<compile_context>
chip_gen: v7x
topology: tpu7x:2x2x1
jax: 0.10.0
libtpu: 0.0.40
codegen_flags: <defaults>
</compile_context>

<pallas_src>
import functools

import jax
import jax.numpy as jnp
from jax.experimental import pallas as pl
from jax.experimental.pallas import tpu as pltpu


def _classify_pool_kernel(x_ref, wf_ref, bias_ref, o_ref, *, block_b):
    """Fused 1x1 conv (+folded BN) -> SiLU -> global average pool.

    x_ref:    (block_b, C1, HW)   per-step image block (streams from HBM)
    wf_ref:   (C_, C1)            folded conv+BN weight (VMEM resident)
    bias_ref: (C_, 1)             folded BN bias        (VMEM resident)
    o_ref:    (block_b, 1, C_)    pooled features, lane-dense store
    """
    wf = wf_ref[...]
    bias = bias_ref[...]

    def body(i, carry):
        x = x_ref[i]                                                    # (C1, HW)
        # 1x1 conv + folded BN as one MXU matmul, f32 accumulate.
        t = jnp.dot(wf, x, preferred_element_type=jnp.float32) + bias   # (C_, HW)
        # SiLU: t * sigmoid(t); exp and approx reciprocal both go to the EUP.
        a = t * pl.reciprocal(1.0 + jnp.exp(-t), approx=True)
        # AdaptiveAvgPool2d(1) + flatten(1): mean over all spatial positions.
        pooled = jnp.mean(a, axis=-1, keepdims=True)                    # (C_, 1)
        o_ref[i] = pooled.T.astype(o_ref.dtype)                         # (1, C_)
        return carry

    jax.lax.fori_loop(0, block_b, body, 0, unroll=True)


def classify_forward(x, conv_w, bn_gamma, bn_beta, bn_mean, bn_var,
                     lin_w, lin_b, eps=1e-5):
    """Classify.forward for the default config (k=1, s=1, g=1, dropout_p=0).

    x: (B, C1, H, W) or a list of NCHW arrays (concatenated along channels).
    conv_w: (C_, C1, 1, 1)  BN params: (C_,)  lin_w: (C2, C_)  lin_b: (C2,)
    Returns (B, C2) float32.
    """
    if isinstance(x, (list, tuple)):
        x = jnp.concatenate(x, axis=1)
    b, c1, h, w = x.shape
    c_ = conv_w.shape[0]
    hw = h * w

    # bf16 inputs stay bf16 on the MXU; anything else computes in f32.
    mm_dtype = jnp.bfloat16 if x.dtype == jnp.bfloat16 else jnp.float32
    if x.dtype != mm_dtype:
        x = x.astype(mm_dtype)

    # Fold eval-mode BatchNorm into the (bias-free) 1x1 conv.
    scale = (bn_gamma / jnp.sqrt(bn_var + eps)).astype(jnp.float32)          # (C_,)
    wf = (conv_w[:, :, 0, 0].astype(jnp.float32) * scale[:, None])           # (C_, C1)
    wf = wf.astype(mm_dtype)
    bias = (bn_beta - bn_mean * scale).astype(jnp.float32)[:, None]          # (C_, 1)

    # NCHW -> (B, C1, HW): free reshape, no transpose / extra HBM pass.
    x3 = x.reshape(b, c1, hw)

    # Images per grid step: amortize ~0.35 us/step grid overhead and get
    # roofline-sized DMAs, keep >= 2 steps for v7x megacore, cap at 8 images
    # so per-step VMEM stays small even on v7x (64 MiB physical).
    block_b = max(1, min(8, b // 2)) if b >= 2 else 1
    num_blocks = pl.cdiv(b, block_b)
    b_pad = num_blocks * block_b
    if b_pad != b:
        x3 = jnp.pad(x3, ((0, b_pad - b), (0, 0), (0, 0)))

    pooled = pl.pallas_call(
        functools.partial(_classify_pool_kernel, block_b=block_b),
        out_shape=jax.ShapeDtypeStruct((b_pad, 1, c_), jnp.float32),
        grid_spec=pltpu.PrefetchScalarGridSpec(
            num_scalar_prefetch=0,
            grid=(num_blocks,),
            in_specs=[
                pl.BlockSpec((block_b, c1, hw), lambda i: (i, 0, 0)),  # streams
                pl.BlockSpec((c_, c1), lambda i: (0, 0)),              # resident
                pl.BlockSpec((c_, 1), lambda i: (0, 0)),               # resident
            ],
            out_specs=pl.BlockSpec((block_b, 1, c_), lambda i: (i, 0, 0)),
        ),
        compiler_params=pltpu.CompilerParams(
            dimension_semantics=("parallel",),
        ),
    )(x3, wf, bias)

    pooled = pooled[:b, 0, :]                                                # (B, C_)

    # Dropout(p=0.0) is identity; the tiny final Linear(1280, c2) runs in XLA
    # (its (1280, c2) operand is lane-thin and would waste MXU columns and
    #  force masked partial stores if kept inside the kernel).
    return pooled @ lin_w.astype(jnp.float32).T + lin_b.astype(jnp.float32)


def _reference_classify(x, conv_w, bn_gamma, bn_beta, bn_mean, bn_var,
                        lin_w, lin_b, eps=1e-5):
    """Pure-JAX reference mirroring the PyTorch math (sanity check)."""
    x32 = x.astype(jnp.float32)
    z = jnp.einsum("bchw,oc->bohw", x32, conv_w[:, :, 0, 0].astype(jnp.float32))
    scale = bn_gamma / jnp.sqrt(bn_var + eps)
    z = z * scale[None, :, None, None] + (bn_beta - bn_mean * scale)[None, :, None, None]
    a = z * jax.nn.sigmoid(z)                      # SiLU
    pooled = a.mean(axis=(2, 3))                   # AdaptiveAvgPool2d(1) + flatten(1)
    return pooled @ lin_w.astype(jnp.float32).T + lin_b.astype(jnp.float32)


if __name__ == "__main__":
    B, C1, H, W = 2, 32, 16, 16
    C_, C2 = 1280, 10

    key = jax.random.PRNGKey(0)
    k_x, k_w, k_g, k_b, k_m, k_v, k_lw, k_lb = jax.random.split(key, 8)

    x = jax.random.normal(k_x, (B, C1, H, W), dtype=jnp.float32)
    conv_w = 0.1 * jax.random.normal(k_w, (C_, C1, 1, 1), dtype=jnp.float32)
    bn_gamma = 1.0 + 0.1 * jax.random.normal(k_g, (C_,), dtype=jnp.float32)
    bn_beta = 0.1 * jax.random.normal(k_b, (C_,), dtype=jnp.float32)
    bn_mean = 0.1 * jax.random.normal(k_m, (C_,), dtype=jnp.float32)
    bn_var = 0.5 + 0.5 * jnp.abs(jax.random.normal(k_v, (C_,), dtype=jnp.float32))
    lin_w = 0.03 * jax.random.normal(k_lw, (C2, C_), dtype=jnp.float32)
    lin_b = 0.01 * jax.random.normal(k_lb, (C2,), dtype=jnp.float32)

    fwd = jax.jit(classify_forward)
    y = fwd(x, conv_w, bn_gamma, bn_beta, bn_mean, bn_var, lin_w, lin_b)
    y = jax.block_until_ready(y)

    y_ref = _reference_classify(x, conv_w, bn_gamma, bn_beta, bn_mean, bn_var, lin_w, lin_b)
    assert y.shape == (B, C2) and y.dtype == jnp.float32
    assert jnp.allclose(y, y_ref, rtol=5e-3, atol=5e-3), "mismatch vs reference"

    print("KERNEL_OK")
</pallas_src>

<mosaic_0001>
module attributes {stable_mosaic.version = 11 : i64} {
  func.func @_classify_pool_kernel(%arg0: i32, %arg1: memref<1x32x256xf32, #tpu.memory_space<vmem>>, %arg2: memref<1280x32xf32, #tpu.memory_space<vmem>>, %arg3: memref<1280x1xf32, #tpu.memory_space<vmem>>, %arg4: memref<1x1x1280xf32, #tpu.memory_space<vmem>>) attributes {dimension_semantics = [#tpu.dimension_semantics<parallel>], iteration_bounds = array<i64: 2>, scalar_prefetch = 0 : i64, scratch_operands = 0 : i64, tpu.core_type = #tpu.core_type<tc>, window_params = [{transform_indices = @transform_0, window_bounds = array<i64: 1, 32, 256>}, {pipeline_mode = #tpu.pipeline_mode<synchronous>, transform_indices = @transform_1, window_bounds = array<i64: 1280, 32>}, {pipeline_mode = #tpu.pipeline_mode<synchronous>, transform_indices = @transform_2, window_bounds = array<i64: 1280, 1>}, {transform_indices = @transform_3, window_bounds = array<i64: 1, 1, 1280>}]} {
    %c0 = arith.constant 0 : index
    %c0_0 = arith.constant 0 : index
    %0 = vector.load %arg2[%c0, %c0_0] : memref<1280x32xf32, #tpu.memory_space<vmem>>, vector<1280x32xf32>
    %c0_1 = arith.constant 0 : index
    %c0_2 = arith.constant 0 : index
    %1 = vector.load %arg3[%c0_1, %c0_2] : memref<1280x1xf32, #tpu.memory_space<vmem>>, vector<1280x1xf32>
    %c0_i32 = arith.constant 0 : i32
    %2 = arith.index_cast %c0_i32 : i32 to index
    %c0_3 = arith.constant 0 : index
    %c0_4 = arith.constant 0 : index
    %3 = vector.load %arg1[%2, %c0_3, %c0_4] : memref<1x32x256xf32, #tpu.memory_space<vmem>>, vector<1x32x256xf32>
    %4 = vector.shape_cast %3 : vector<1x32x256xf32> to vector<32x256xf32>
    %cst = arith.constant dense<0.000000e+00> : vector<1280x256xf32>
    %5 = tpu.matmul %0, %4, %cst {dimension_numbers = #tpu.dot_dimension_numbers<[1], [0], [0], [1], [0, 0, 1, 1], [], []>} : vector<1280x32xf32>, vector<32x256xf32>, vector<1280x256xf32> -> vector<1280x256xf32>
    %6 = vector.broadcast %1 : vector<1280x1xf32> to vector<1280x256xf32>
    %7 = arith.addf %5, %6 : vector<1280x256xf32>
    %cst_5 = arith.constant 0.000000e+00 : f32
    %8 = vector.broadcast %cst_5 : f32 to vector<1280x256xf32>
    %9 = arith.subf %8, %7 : vector<1280x256xf32>
    %10 = math.exp %9 : vector<1280x256xf32>
    %cst_6 = arith.constant 1.000000e+00 : f32
    %11 = vector.broadcast %cst_6 : f32 to vector<1280x256xf32>
    %12 = arith.addf %11, %10 : vector<1280x256xf32>
    %13 = tpu.reciprocal %12 {approx = true} : vector<1280x256xf32> -> vector<1280x256xf32>
    %14 = arith.mulf %7, %13 : vector<1280x256xf32>
    %cst_7 = arith.constant dense<0.000000e+00> : vector<1280xf32>
    %15 = vector.multi_reduction <add>, %14, %cst_7 [1] : vector<1280x256xf32> to vector<1280xf32>
    %16 = vector.shape_cast %15 : vector<1280xf32> to vector<1280x1xf32>
    %cst_8 = arith.constant 2.560000e+02 : f32
    %17 = vector.broadcast %cst_8 : f32 to vector<1280x1xf32>
    %18 = arith.divf %16, %17 : vector<1280x1xf32>
    %19 = tpu.transpose %18, [1, 0] : vector<1280x1xf32> -> vector<1x1280xf32>
    %20 = arith.index_cast %c0_i32 : i32 to index
    %c0_9 = arith.constant 0 : index
    %c0_10 = arith.constant 0 : index
    %21 = vector.load %arg4[%20, %c0_9, %c0_10] : memref<1x1x1280xf32, #tpu.memory_space<vmem>>, vector<1x1x1280xf32>
    %22 = vector.shape_cast %21 : vector<1x1x1280xf32> to vector<1x1280xf32>
    %23 = vector.shape_cast %19 : vector<1x1280xf32> to vector<1x1x1280xf32>
    tpu.vector_store %arg4[%20, %c0_9, %c0_10], %23 {strides = array<i32>} : memref<1x1x1280xf32, #tpu.memory_space<vmem>>, vector<1x1x1280xf32>,
    %c1_i32 = arith.constant 1 : i32
    return
  }
  func.func @transform_0(%arg0: i32) -> (i32, i32, i32) {
    %c0_i32 = arith.constant 0 : i32
    %c0_i32_0 = arith.constant 0 : i32
    %c0_i32_1 = arith.constant 0 : i32
    return %arg0, %c0_i32, %c0_i32_0 : i32, i32, i32
  }
  func.func @transform_1(%arg0: i32) -> (i32, i32) {
    %c0_i32 = arith.constant 0 : i32
    %c0_i32_0 = arith.constant 0 : i32
    %c0_i32_1 = arith.constant 0 : i32
    return %c0_i32, %c0_i32_0 : i32, i32
  }
  func.func @transform_2(%arg0: i32) -> (i32, i32) {
    %c0_i32 = arith.constant 0 : i32
    %c0_i32_0 = arith.constant 0 : i32
    %c0_i32_1 = arith.constant 0 : i32
    return %c0_i32, %c0_i32_0 : i32, i32
  }
  func.func @transform_3(%arg0: i32) -> (i32, i32, i32) {
    %c0_i32 = arith.constant 0 : i32
    %c0_i32_0 = arith.constant 0 : i32
    %c0_i32_1 = arith.constant 0 : i32
    return %arg0, %c0_i32, %c0_i32_0 : i32, i32, i32
  }
}

</mosaic_0001>

<bundles_post_ra>
// kernel: classify_forward.1
= control target key start
LH: loop header
LB: loop body
LE: loop exit
PB: predicated region body
PF: predicated region fallthrough
CT: control target
= control target key end

     0   :  { %s7326_s12 = smov 0   ;;  %s13075_s0 = inlined_call_operand.vmem [shape: f32[2,32,256], index: 0, kind: input, shape index: {}]   ;;  %s13076_s1 = inlined_call_operand.vmem [shape: f32[1280,32], index: 1, kind: input, shape index: {}]   ;;  %s13077_s2 = inlined_call_operand.vmem [shape: f32[1280,1], index: 2, kind: input, shape index: {}]   ;;  %s13078_s3 = inlined_call_operand.vmem [shape: f32[2,1,1280], index: 3, kind: output, shape index: {}]  }
   0x1 LB: > { %s5819_s13 = sadd.s32 4294967295, %s7301_s12   ;;  %p5823_p0 = scmp.ge.s32.totalorder %s7301_s12, 1  ;;  %s7301_s12 = sphi %s7326_s12, %s13_s12  }
   0x2   : > { %p137_p1 = scmp.lt.s32.totalorder %s7301_s12, 3 }
   0x4   : > { %p138_p2 = pnand %p5823_p0, %p137_p1 }
   0x6   : > { %141 = sbr.rel (%p138_p2) target bundleno = 1469 (0x5bd), region = 32 }
   0xd   : > { %v331_v0 = vld [vmem:[%s13077_s2 + $0x10] sm:$0xff]  ;;  %v329_v1 = vld [vmem:[%s13077_s2] sm:$0xff]  ;;  %p160_p3 = scmp.lt.s32.totalorder %s5819_s13, 1  ;;  %v7303_v2 = vmov 0   ;;  %v332_v3 = vld [vmem:[%s13077_s2 + $0x18] sm:$0xff]  ;;  %v13079_v5 = vmov 0.0  }
   0xe   : > { %6014 = vset.pattern.permute.xlu1 %v7303_v2  ;;  %6013 = vset.pattern.permute.xlu0 %v7303_v2  ;;  %v330_v4 = vld [vmem:[%s13077_s2 + $0x8] sm:$0xff]  ;;  %v333_v7 = vld [vmem:[%s13077_s2 + $0x20] sm:$0xff]  ;;  %v336_v19 = vld [vmem:[%s13077_s2 + $0x38] sm:$0xff]  ;;  %vm1297_vm0 = vcmask 261120  }
   0xf   : > { %509 = vperm.xlu1 %6014, %v331_v0   ;;  %499 = vperm.xlu0 %6013, %v329_v1   ;;  %s14800_s13 = smov (!%p160_p3, %s5819_s13), 1  ;;  %v334_v6 = vld [vmem:[%s13077_s2 + $0x28] sm:$0xff]  ;;  %v335_v20 = vld [vmem:[%s13077_s2 + $0x30] sm:$0xff]  ;;  %v169_v22 = vld [vmem:[%s13076_s1] sm:$0xff] }
  0x10   : > { %1842 = vmatprep.mubr.f32.mxu0 %v13079_v5  ;;  %2322 = vmatprep.mubr.f32.mxu1 %v13079_v5  ;;  %s5988_s22 = sshll.u32 %s14800_s13, 6  ;;  %v249_v23 = vld [vmem:[%s13076_s1 + $0x280] sm:$0xff]  ;;  %v338_v24 = vld [vmem:[%s13077_s2 + $0x48] sm:$0xff]  ;;  %v340_v28 = vld [vmem:[%s13077_s2 + $0x58] sm:$0xff]  ;;  %s6001_s6 = smul.u32 10, %s14800_s13 }
  0x11   : > { %s164_s25 = scalar_lea.vmem %s13075_s0, %s5988_s22  ;;  %v337_v25 = vld [vmem:[%s13077_s2 + $0x40] sm:$0xff]  ;;  %v170_v26 = vld [vmem:[%s13076_s1 + $0x8] sm:$0xff]  ;;  %v339_v29 = vld [vmem:[%s13077_s2 + $0x50] sm:$0xff] }
  0x12   : > { %v490_v8 = vld [vmem:[%s164_s25 + $0x8] sm:$0xff]  ;;  %v492_v9 = vld [vmem:[%s164_s25 + $0x18] sm:$0xff]  ;;  %v489_v10 = vld [vmem:[%s164_s25] sm:$0xff]  ;;  %s168_s9 = scalar_lea.vmem %s13078_s3, %s6001_s6 }
  0x13   : > { %514 = vperm.xlu1 %6014, %v332_v3   ;;  %504 = vperm.xlu0 %6013, %v330_v4   ;;  %v5989_v11 = vpack.c.bf16 %v492_v9, %v490_v8  ;;  %v491_v12 = vld [vmem:[%s164_s25 + $0x10] sm:$0xff]  ;;  %v494_v13 = vld [vmem:[%s164_s25 + $0x28] sm:$0xff]  ;;  %v496_v14 = vld [vmem:[%s164_s25 + $0x38] sm:$0xff] }
  0x14   : > { %v5991_v15 = vpack.c.bf16 %v491_v12, %v489_v10  ;;  %v5993_v16 = vpack.c.bf16 %v496_v14, %v494_v13  ;;  %v493_v17 = vld [vmem:[%s164_s25 + $0x20] sm:$0xff]  ;;  %v495_v18 = vld [vmem:[%s164_s25 + $0x30] sm:$0xff]  ;;  %v250_v27 = vld [vmem:[%s13076_s1 + $0x288] sm:$0xff] }
  0x15   : > { %5990 = vmatprep.subr.bf16.mxu0 %v5989_v11  ;;  %5997 = vmatprep.subr.bf16.mxu1 %v5989_v11  ;;  %v5995_v21 = vpack.c.bf16 %v495_v18, %v493_v17  ;;  %v171_v30 = vld [vmem:[%s13076_s1 + $0x10] sm:$0xff]  ;;  %v342_v32 = vld [vmem:[%s13077_s2 + $0x68] sm:$0xff]  ;;  %v341_v33 = vld [vmem:[%s13077_s2 + $0x60] sm:$0xff] }
  0x16   : > { %5992 = vmatpush1.bf16.msra.mxu0 %v5991_v15  ;;  %5999 = vmatpush1.bf16.msra.mxu1 %v5991_v15  ;;  %v251_v31 = vld [vmem:[%s13076_s1 + $0x290] sm:$0xff]  ;;  %v172_v34 = vld [vmem:[%s13076_s1 + $0x18] sm:$0xff]  ;;  %v173_v38 = vld [vmem:[%s13076_s1 + $0x20] sm:$0xff] }
  0x17   : > { %524 = vperm.xlu1 %6014, %v334_v6   ;;  %519 = vperm.xlu0 %6013, %v333_v7   ;;  %v252_v35 = vld [vmem:[%s13076_s1 + $0x298] sm:$0xff]  ;;  %v343_v37 = vld [vmem:[%s13077_s2 + $0x70] sm:$0xff]  ;;  %v253_v39 = vld [vmem:[%s13076_s1 + $0x2a0] sm:$0xff] }
  0x18   : > { %5994 = vmatprep.subr.bf16.mxu0 %v5993_v16  ;;  %5998 = vmatprep.subr.bf16.mxu1 %v5993_v16  ;;  %v344_v36 = vld [vmem:[%s13077_s2 + $0x78] sm:$0xff]  ;;  %v346_v40 = vld [vmem:[%s13077_s2 + $0x88] sm:$0xff]  ;;  %v345_v41 = vld [vmem:[%s13077_s2 + $0x80] sm:$0xff] }
  0x19   : > { %v174_v42 = vld [vmem:[%s13076_s1 + $0x28] sm:$0xff]  ;;  %v348_v44 = vld [vmem:[%s13077_s2 + $0x98] sm:$0xff]  ;;  %v347_v45 = vld [vmem:[%s13077_s2 + $0x90] sm:$0xff] }
  0x1a   : > { %5996 = vmatpush1.bf16.msra.mxu0 %v5995_v21  ;;  %6000 = vmatpush1.bf16.msra.mxu1 %v5995_v21  ;;  %v254_v43 = vld [vmem:[%s13076_s1 + $0x2a8] sm:$0xff]  ;;  %v175_v46 = vld [vmem:[%s13076_s1 + $0x30] sm:$0xff]  ;;  %v349_v49 = vld [vmem:[%s13077_s2 + $0xa0] sm:$0xff] }
  0x1b   : > { %534 = vperm.xlu1 %6014, %v336_v19   ;;  %529 = vperm.xlu0 %6013, %v335_v20   ;;  %v255_v47 = vld [vmem:[%s13076_s1 + $0x2b0] sm:$0xff]  ;;  %v350_v48 = vld [vmem:[%s13077_s2 + $0xa8] sm:$0xff]  ;;  %v176_v50 = vld [vmem:[%s13076_s1 + $0x38] sm:$0xff] }
  0x1c   : > { %v256_v51 = vld [vmem:[%s13076_s1 + $0x2b8] sm:$0xff]  ;;  %v351_v53 = vld [vmem:[%s13077_s2 + $0xb0] sm:$0xff]  ;;  %v177_v54 = vld [vmem:[%s13076_s1 + $0x40] sm:$0xff] }
  0x1d   : > { %5826 = vmatmul.mubr.msk.f32.vlgmr.msra.gmra.mrb[0].mxu0 %vm1297_vm0, %v169_v22  ;;  %5906 = vmatmul.mubr.msk.f32.vlgmr.msra.gmra.mrb[0].mxu1 %vm1297_vm0, %v249_v23  ;;  %v352_v52 = vld [vmem:[%s13077_s2 + $0xb8] sm:$0xff]  ;;  %v257_v55 = vld [vmem:[%s13076_s1 + $0x2c0] sm:$0xff]  ;;  %v354_v56 = vld [vmem:[%s13077_s2 + $0xc8] sm:$0xff] }
  0x1e   : > { %1848 = vmatprep.mubr.f32.mxu0 %v13079_v5  ;;  %2328 = vmatprep.mubr.f32.mxu1 %v13079_v5  ;;  %v353_v57 = vld [vmem:[%s13077_s2 + $0xc0] sm:$0xff]  ;;  %v178_v58 = vld [vmem:[%s13076_s1 + $0x48] sm:$0xff]  ;;  %v356_v60 = vld [vmem:[%s13077_s2 + $0xd8] sm:$0xff] }
  0x1f   : > { %544 = vperm.xlu1 %6014, %v338_v24   ;;  %539 = vperm.xlu0 %6013, %v337_v25   ;;  %v258_v59 = vld [vmem:[%s13076_s1 + $0x2c8] sm:$0xff]  ;;  %v355_v61 = vld [vmem:[%s13077_s2 + $0xd0] sm:$0xff]  ;;  %v357_v1 = vld [vmem:[%s13077_s2 + $0xe0] sm:$0xff] }
  0x20   : > { %v179_v62 = vld [vmem:[%s13076_s1 + $0x50] sm:$0xff]  ;;  %v358_v0 = vld [vmem:[%s13077_s2 + $0xe8] sm:$0xff]  ;;  %v180_v2 = vld [vmem:[%s13076_s1 + $0x58] sm:$0xff] }
  0x21   : > { %5827 = vmatmul.mubr.msk.f32.gmra.mrb[2].mxu0 %vm1297_vm0, %v170_v26  ;;  %5907 = vmatmul.mubr.msk.f32.gmra.mrb[2].mxu1 %vm1297_vm0, %v250_v27  ;;  %v259_v63 = vld [vmem:[%s13076_s1 + $0x2d0] sm:$0xff]  ;;  %v260_v3 = vld [vmem:[%s13076_s1 + $0x2d8] sm:$0xff]  ;;  %v181_v7 = vld [vmem:[%s13076_s1 + $0x60] sm:$0xff] }
  0x22   : > { %1854 = vmatprep.mubr.f32.mxu0 %v13079_v5  ;;  %2334 = vmatprep.mubr.f32.mxu1 %v13079_v5  ;;  %v360_v4 = vld [vmem:[%s13077_s2 + $0xf8] sm:$0xff]  ;;  %v359_v6 = vld [vmem:[%s13077_s2 + $0xf0] sm:$0xff]  ;;  %v261_v8 = vld [vmem:[%s13076_s1 + $0x2e0] sm:$0xff] }
  0x23   : > { %554 = vperm.xlu1 %6014, %v340_v28   ;;  %549 = vperm.xlu0 %6013, %v339_v29   ;;  %v362_v9 = vld [vmem:[%s13077_s2 + $0x108] sm:$0xff]  ;;  %v361_v10 = vld [vmem:[%s13077_s2 + $0x100] sm:$0xff]  ;;  %v364_v13 = vld [vmem:[%s13077_s2 + $0x118] sm:$0xff] }
  0x24   : > { %v182_v11 = vld [vmem:[%s13076_s1 + $0x68] sm:$0xff]  ;;  %v363_v14 = vld [vmem:[%s13077_s2 + $0x110] sm:$0xff]  ;;  %v365_v18 = vld [vmem:[%s13077_s2 + $0x120] sm:$0xff] }
  0x25   : > { %5828 = vmatmul.mubr.msk.f32.gmra.mrb[4].mxu0 %vm1297_vm0, %v171_v30  ;;  %5908 = vmatmul.mubr.msk.f32.gmra.mrb[4].mxu1 %vm1297_vm0, %v251_v31  ;;  %v262_v12 = vld [vmem:[%s13076_s1 + $0x2e8] sm:$0xff]  ;;  %v183_v15 = vld [vmem:[%s13076_s1 + $0x70] sm:$0xff]  ;;  %v184_v19 = vld [vmem:[%s13076_s1 + $0x78] sm:$0xff] }
  0x26   : > { %1860 = vmatprep.mubr.f32.mxu0 %v13079_v5  ;;  %2340 = vmatprep.mubr.f32.mxu1 %v13079_v5  ;;  %v263_v16 = vld [vmem:[%s13076_s1 + $0x2f0] sm:$0xff]  ;;  %v366_v17 = vld [vmem:[%s13077_s2 + $0x128] sm:$0xff]  ;;  %v264_v20 = vld [vmem:[%s13076_s1 + $0x2f8] sm:$0xff] }
  0x27   : > { %564 = vperm.xlu1 %6014, %v342_v32   ;;  %559 = vperm.xlu0 %6013, %v341_v33   ;;  %v368_v21 = vld [vmem:[%s13077_s2 + $0x138] sm:$0xff]  ;;  %v367_v22 = vld [vmem:[%s13077_s2 + $0x130] sm:$0xff]  ;;  %v185_v23 = vld [vmem:[%s13076_s1 + $0x80] sm:$0xff] }
  0x28   : > { %v265_v24 = vld [vmem:[%s13076_s1 + $0x300] sm:$0xff]  ;;  %v370_v25 = vld [vmem:[%s13077_s2 + $0x148] sm:$0xff]  ;;  %v372_v29 = vld [vmem:[%s13077_s2 + $0x158] sm:$0xff] }
  0x29   : > { %5829 = vmatmul.mubr.msk.f32.gmra.mrb[6].mxu0 %vm1297_vm0, %v172_v34  ;;  %5909 = vmatmul.mubr.msk.f32.gmra.mrb[6].mxu1 %vm1297_vm0, %v252_v35  ;;  %v369_v26 = vld [vmem:[%s13077_s2 + $0x140] sm:$0xff]  ;;  %v186_v27 = vld [vmem:[%s13076_s1 + $0x88] sm:$0xff]  ;;  %v371_v30 = vld [vmem:[%s13077_s2 + $0x150] sm:$0xff] }
  0x2a   : > { %1866 = vmatprep.mubr.f32.mxu0 %v13079_v5  ;;  %2346 = vmatprep.mubr.f32.mxu1 %v13079_v5  ;;  %v266_v28 = vld [vmem:[%s13076_s1 + $0x308] sm:$0xff]  ;;  %v187_v31 = vld [vmem:[%s13076_s1 + $0x90] sm:$0xff]  ;;  %v373_v34 = vld [vmem:[%s13077_s2 + $0x160] sm:$0xff] }
  0x2b   : > { %574 = vperm.xlu1 %6014, %v344_v36   ;;  %569 = vperm.xlu0 %6013, %v343_v37   ;;  %v267_v32 = vld [vmem:[%s13076_s1 + $0x310] sm:$0xff]  ;;  %v374_v33 = vld [vmem:[%s13077_s2 + $0x168] sm:$0xff]  ;;  %v188_v35 = vld [vmem:[%s13076_s1 + $0x98] sm:$0xff] }
  0x2c   : > { %v268_v36 = vld [vmem:[%s13076_s1 + $0x318] sm:$0xff] }
  0x2d   : > { %5830 = vmatmul.mubr.msk.f32.gmra.mrb[8].mxu0 %vm1297_vm0, %v173_v38  ;;  %5910 = vmatmul.mubr.msk.f32.gmra.mrb[8].mxu1 %vm1297_vm0, %v253_v39  ;;  %v376_v37 = vld [vmem:[%s13077_s2 + $0x178] sm:$0xff]  ;;  %v375_v38 = vld [vmem:[%s13077_s2 + $0x170] sm:$0xff]  ;;  %v189_v39 = vld [vmem:[%s13076_s1 + $0xa0] sm:$0xff] }
  0x2e   : > { %1872 = vmatprep.mubr.f32.mxu0 %v13079_v5  ;;  %2352 = vmatprep.mubr.f32.mxu1 %v13079_v5 }
  0x2f   : > { %584 = vperm.xlu1 %6014, %v346_v40   ;;  %579 = vperm.xlu0 %6013, %v345_v41   ;;  %v269_v40 = vld [vmem:[%s13076_s1 + $0x320] sm:$0xff]  ;;  %v378_v41 = vld [vmem:[%s13077_s2 + $0x188] sm:$0xff] }
  0x31   : > { %5831 = vmatmul.mubr.msk.f32.gmra.mrb[10].mxu0 %vm1297_vm0, %v174_v42  ;;  %5911 = vmatmul.mubr.msk.f32.gmra.mrb[10].mxu1 %vm1297_vm0, %v254_v43  ;;  %v377_v42 = vld [vmem:[%s13077_s2 + $0x180] sm:$0xff]  ;;  %v190_v43 = vld [vmem:[%s13076_s1 + $0xa8] sm:$0xff] }
  0x32   : > { %1878 = vmatprep.mubr.f32.mxu0 %v13079_v5  ;;  %2358 = vmatprep.mubr.f32.mxu1 %v13079_v5 }
  0x33   : > { %594 = vperm.xlu1 %6014, %v348_v44   ;;  %589 = vperm.xlu0 %6013, %v347_v45   ;;  %v270_v44 = vld [vmem:[%s13076_s1 + $0x328] sm:$0xff]  ;;  %v380_v45 = vld [vmem:[%s13077_s2 + $0x198] sm:$0xff] }
  0x35   : > { %5832 = vmatmul.mubr.msk.f32.gmra.mrb[12].mxu0 %vm1297_vm0, %v175_v46  ;;  %5912 = vmatmul.mubr.msk.f32.gmra.mrb[12].mxu1 %vm1297_vm0, %v255_v47  ;;  %v379_v46 = vld [vmem:[%s13077_s2 + $0x190] sm:$0xff] }
  0x36   : > { %1884 = vmatprep.mubr.f32.mxu0 %v13079_v5  ;;  %2364 = vmatprep.mubr.f32.mxu1 %v13079_v5  ;;  %v191_v47 = vld [vmem:[%s13076_s1 + $0xb0] sm:$0xff] }
  0x37   : > { %604 = vperm.xlu1 %6014, %v350_v48   ;;  %599 = vperm.xlu0 %6013, %v349_v49   ;;  %v271_v48 = vld [vmem:[%s13076_s1 + $0x330] sm:$0xff]  ;;  %v382_v49 = vld [vmem:[%s13077_s2 + $0x1a8] sm:$0xff] }
  0x39   : > { %5833 = vmatmul.mubr.msk.f32.gmra.mrb[14].mxu0 %vm1297_vm0, %v176_v50  ;;  %5913 = vmatmul.mubr.msk.f32.gmra.mrb[14].mxu1 %vm1297_vm0, %v256_v51  ;;  %v381_v50 = vld [vmem:[%s13077_s2 + $0x1a0] sm:$0xff]  ;;  %v192_v51 = vld [vmem:[%s13076_s1 + $0xb8] sm:$0xff] }
  0x3a   : > { %1890 = vmatprep.mubr.f32.mxu0 %v13079_v5  ;;  %2370 = vmatprep.mubr.f32.mxu1 %v13079_v5 }
  0x3b   : > { %614 = vperm.xlu1 %6014, %v352_v52   ;;  %609 = vperm.xlu0 %6013, %v351_v53   ;;  %v272_v52 = vld [vmem:[%s13076_s1 + $0x338] sm:$0xff] }
  0x3c   : > { %v384_v53 = vld [vmem:[%s13077_s2 + $0x1b8] sm:$0xff] }
  0x3d   : > { %5834 = vmatmul.mubr.msk.f32.gmra.mrb[16].mxu0 %vm1297_vm0, %v177_v54  ;;  %5914 = vmatmul.mubr.msk.f32.gmra.mrb[16].mxu1 %vm1297_vm0, %v257_v55  ;;  %v383_v54 = vld [vmem:[%s13077_s2 + $0x1b0] sm:$0xff]  ;;  %v193_v55 = vld [vmem:[%s13076_s1 + $0xc0] sm:$0xff] }
  0x3e   : > { %1896 = vmatprep.mubr.f32.mxu0 %v13079_v5  ;;  %2376 = vmatprep.mubr.f32.mxu1 %v13079_v5 }
  0x3f   : > { %624 = vperm.xlu1 %6014, %v354_v56   ;;  %619 = vperm.xlu0 %6013, %v353_v57   ;;  %v273_v56 = vld [vmem:[%s13076_s1 + $0x340] sm:$0xff]  ;;  %v386_v57 = vld [vmem:[%s13077_s2 + $0x1c8] sm:$0xff] }
  0x41   : > { %5835 = vmatmul.mubr.msk.f32.gmra.mrb[18].mxu0 %vm1297_vm0, %v178_v58  ;;  %5915 = vmatmul.mubr.msk.f32.gmra.mrb[18].mxu1 %vm1297_vm0, %v258_v59  ;;  %v385_v58 = vld [vmem:[%s13077_s2 + $0x1c0] sm:$0xff]  ;;  %v194_v59 = vld [vmem:[%s13076_s1 + $0xc8] sm:$0xff] }
  0x42   : > { %1902 = vmatprep.mubr.f32.mxu0 %v13079_v5  ;;  %2382 = vmatprep.mubr.f32.mxu1 %v13079_v5 }
  0x43   : > { %634 = vperm.xlu1 %6014, %v356_v60   ;;  %629 = vperm.xlu0 %6013, %v355_v61   ;;  %v274_v60 = vld [vmem:[%s13076_s1 + $0x348] sm:$0xff]  ;;  %v388_v61 = vld [vmem:[%s13077_s2 + $0x1d8] sm:$0xff] }
  0x45   : > { %5836 = vmatmul.mubr.msk.f32.gmra.mrb[20].mxu0 %vm1297_vm0, %v179_v62  ;;  %5916 = vmatmul.mubr.msk.f32.gmra.mrb[20].mxu1 %vm1297_vm0, %v259_v63  ;;  %v387_v62 = vld [vmem:[%s13077_s2 + $0x1d0] sm:$0xff] }
  0x46   : > { %1908 = vmatprep.mubr.f32.mxu0 %v13079_v5  ;;  %2388 = vmatprep.mubr.f32.mxu1 %v13079_v5  ;;  %v195_v63 = vld [vmem:[%s13076_s1 + $0xd0] sm:$0xff] }
  0x47   : > { %644 = vperm.xlu1 %6014, %v358_v0   ;;  %639 = vperm.xlu0 %6013, %v357_v1   ;;  %v275_v0 = vld [vmem:[%s13076_s1 + $0x350] sm:$0xff]  ;;  %v390_v1 = vld [vmem:[%s13077_s2 + $0x1e8] sm:$0xff] }
  0x49   : > { %5837 = vmatmul.mubr.msk.f32.gmra.mrb[22].mxu0 %vm1297_vm0, %v180_v2  ;;  %5917 = vmatmul.mubr.msk.f32.gmra.mrb[22].mxu1 %vm1297_vm0, %v260_v3  ;;  %v389_v2 = vld [vmem:[%s13077_s2 + $0x1e0] sm:$0xff]  ;;  %v196_v3 = vld [vmem:[%s13076_s1 + $0xd8] sm:$0xff] }
  0x4a   : > { %1914 = vmatprep.mubr.f32.mxu0 %v13079_v5  ;;  %2394 = vmatprep.mubr.f32.mxu1 %v13079_v5 }
  0x4b   : > { %654 = vperm.xlu1 %6014, %v360_v4   ;;  %649 = vperm.xlu0 %6013, %v359_v6   ;;  %v276_v4 = vld [vmem:[%s13076_s1 + $0x358] sm:$0xff] }
  0x4c   : > { %v392_v6 = vld [vmem:[%s13077_s2 + $0x1f8] sm:$0xff] }
  0x4d   : > { %5838 = vmatmul.mubr.msk.f32.gmra.mrb[24].mxu0 %vm1297_vm0, %v181_v7  ;;  %5918 = vmatmul.mubr.msk.f32.gmra.mrb[24].mxu1 %vm1297_vm0, %v261_v8  ;;  %v391_v7 = vld [vmem:[%s13077_s2 + $0x1f0] sm:$0xff]  ;;  %v197_v8 = vld [vmem:[%s13076_s1 + $0xe0] sm:$0xff] }
  0x4e   : > { %1920 = vmatprep.mubr.f32.mxu0 %v13079_v5  ;;  %2400 = vmatprep.mubr.f32.mxu1 %v13079_v5 }
  0x4f   : > { %664 = vperm.xlu1 %6014, %v362_v9   ;;  %659 = vperm.xlu0 %6013, %v361_v10   ;;  %v277_v9 = vld [vmem:[%s13076_s1 + $0x360] sm:$0xff]  ;;  %v394_v10 = vld [vmem:[%s13077_s2 + $0x208] sm:$0xff] }
  0x51   : > { %5839 = vmatmul.mubr.msk.f32.gmra.mrb[26].mxu0 %vm1297_vm0, %v182_v11  ;;  %5919 = vmatmul.mubr.msk.f32.gmra.mrb[26].mxu1 %vm1297_vm0, %v262_v12  ;;  %v393_v11 = vld [vmem:[%s13077_s2 + $0x200] sm:$0xff] }
  0x52   : > { %1926 = vmatprep.mubr.f32.mxu0 %v13079_v5  ;;  %2406 = vmatprep.mubr.f32.mxu1 %v13079_v5 }
  0x53   : > { %674 = vperm.xlu1 %6014, %v364_v13   ;;  %669 = vperm.xlu0 %6013, %v363_v14   ;;  %v198_v14 = vld [vmem:[%s13076_s1 + $0xe8] sm:$0xff] }
  0x55   : > { %5840 = vmatmul.mubr.msk.f32.gmra.mrb[28].mxu0 %vm1297_vm0, %v183_v15  ;;  %5920 = vmatmul.mubr.msk.f32.gmra.mrb[28].mxu1 %vm1297_vm0, %v263_v16  ;;  %v278_v15 = vld [vmem:[%s13076_s1 + $0x368] sm:$0xff]  ;;  %v396_v16 = vld [vmem:[%s13077_s2 + $0x218] sm:$0xff] }
  0x56   : > { %1932 = vmatprep.mubr.f32.mxu0 %v13079_v5  ;;  %2412 = vmatprep.mubr.f32.mxu1 %v13079_v5 }
  0x57   : > { %684 = vperm.xlu1 %6014, %v366_v17   ;;  %679 = vperm.xlu0 %6013, %v365_v18   ;;  %v395_v17 = vld [vmem:[%s13077_s2 + $0x210] sm:$0xff] }
  0x59   : > { %5841 = vmatmul.mubr.msk.f32.gmra.mrb[30].mxu0 %vm1297_vm0, %v184_v19  ;;  %5921 = vmatmul.mubr.msk.f32.gmra.mrb[30].mxu1 %vm1297_vm0, %v264_v20  ;;  %v199_v20 = vld [vmem:[%s13076_s1 + $0xf0] sm:$0xff] }
  0x5a   : > { %1938 = vmatprep.mubr.f32.mxu0 %v13079_v5  ;;  %2418 = vmatprep.mubr.f32.mxu1 %v13079_v5 }
  0x5b   : > { %694 = vperm.xlu1 %6014, %v368_v21   ;;  %689 = vperm.xlu0 %6013, %v367_v22   ;;  %v279_v21 = vld [vmem:[%s13076_s1 + $0x370] sm:$0xff]  ;;  %v398_v22 = vld [vmem:[%s13077_s2 + $0x228] sm:$0xff] }
  0x5d   : > { %5842 = vmatmul.mubr.msk.f32.gmra.mrb[32].mxu0 %vm1297_vm0, %v185_v23  ;;  %5922 = vmatmul.mubr.msk.f32.gmra.mrb[32].mxu1 %vm1297_vm0, %v265_v24  ;;  %v397_v23 = vld [vmem:[%s13077_s2 + $0x220] sm:$0xff] }
  0x5e   : > { %1944 = vmatprep.mubr.f32.mxu0 %v13079_v5  ;;  %2424 = vmatprep.mubr.f32.mxu1 %v13079_v5 }
  0x5f   : > { %704 = vperm.xlu1 %6014, %v370_v25   ;;  %699 = vperm.xlu0 %6013, %v369_v26   ;;  %v200_v26 = vld [vmem:[%s13076_s1 + $0xf8] sm:$0xff] }
  0x61   : > { %5843 = vmatmul.mubr.msk.f32.gmra.mrb[34].mxu0 %vm1297_vm0, %v186_v27  ;;  %5923 = vmatmul.mubr.msk.f32.gmra.mrb[34].mxu1 %vm1297_vm0, %v266_v28  ;;  %v280_v27 = vld [vmem:[%s13076_s1 + $0x378] sm:$0xff] }
  0x62   : > { %1950 = vmatprep.mubr.f32.mxu0 %v13079_v5  ;;  %2430 = vmatprep.mubr.f32.mxu1 %v13079_v5  ;;  %v400_v28 = vld [vmem:[%s13077_s2 + $0x238] sm:$0xff] }
  0x63   : > { %714 = vperm.xlu1 %6014, %v372_v29   ;;  %709 = vperm.xlu0 %6013, %v371_v30   ;;  %v399_v29 = vld [vmem:[%s13077_s2 + $0x230] sm:$0xff] }
  0x65   : > { %5844 = vmatmul.mubr.msk.f32.gmra.mrb[36].mxu0 %vm1297_vm0, %v187_v31  ;;  %5924 = vmatmul.mubr.msk.f32.gmra.mrb[36].mxu1 %vm1297_vm0, %v267_v32  ;;  %v201_v32 = vld [vmem:[%s13076_s1 + $0x100] sm:$0xff] }
  0x66   : > { %1956 = vmatprep.mubr.f32.mxu0 %v13079_v5  ;;  %2436 = vmatprep.mubr.f32.mxu1 %v13079_v5 }
  0x67   : > { %724 = vperm.xlu1 %6014, %v374_v33   ;;  %719 = vperm.xlu0 %6013, %v373_v34   ;;  %v281_v33 = vld [vmem:[%s13076_s1 + $0x380] sm:$0xff]  ;;  %v402_v34 = vld [vmem:[%s13077_s2 + $0x248] sm:$0xff] }
  0x69   : > { %5845 = vmatmul.mubr.msk.f32.gmra.mrb[38].mxu0 %vm1297_vm0, %v188_v35  ;;  %5925 = vmatmul.mubr.msk.f32.gmra.mrb[38].mxu1 %vm1297_vm0, %v268_v36  ;;  %v401_v35 = vld [vmem:[%s13077_s2 + $0x240] sm:$0xff] }
  0x6a   : > { %1962 = vmatprep.mubr.f32.mxu0 %v13079_v5  ;;  %2442 = vmatprep.mubr.f32.mxu1 %v13079_v5 }
  0x6b   : > { %734 = vperm.xlu1 %6014, %v376_v37   ;;  %729 = vperm.xlu0 %6013, %v375_v38   ;;  %v202_v38 = vld [vmem:[%s13076_s1 + $0x108] sm:$0xff] }
  0x6d   : > { %5846 = vmatmul.mubr.msk.f32.gmra.mrb[40].mxu0 %vm1297_vm0, %v189_v39  ;;  %5926 = vmatmul.mubr.msk.f32.gmra.mrb[40].mxu1 %vm1297_vm0, %v269_v40  ;;  %v282_v39 = vld [vmem:[%s13076_s1 + $0x388] sm:$0xff]  ;;  %v404_v40 = vld [vmem:[%s13077_s2 + $0x258] sm:$0xff] }
  0x6e   : > { %1968 = vmatprep.mubr.f32.mxu0 %v13079_v5  ;;  %2448 = vmatprep.mubr.f32.mxu1 %v13079_v5 }
  0x6f   : > { %744 = vperm.xlu1 %6014, %v378_v41   ;;  %739 = vperm.xlu0 %6013, %v377_v42   ;;  %v403_v41 = vld [vmem:[%s13077_s2 + $0x250] sm:$0xff] }
  0x71   : > { %5847 = vmatmul.mubr.msk.f32.gmra.mrb[42].mxu0 %vm1297_vm0, %v190_v43  ;;  %5927 = vmatmul.mubr.msk.f32.gmra.mrb[42].mxu1 %vm1297_vm0, %v270_v44  ;;  %v203_v44 = vld [vmem:[%s13076_s1 + $0x110] sm:$0xff] }
  0x72   : > { %1974 = vmatprep.mubr.f32.mxu0 %v13079_v5  ;;  %2454 = vmatprep.mubr.f32.mxu1 %v13079_v5 }
  0x73   : > { %754 = vperm.xlu1 %6014, %v380_v45   ;;  %749 = vperm.xlu0 %6013, %v379_v46   ;;  %v283_v45 = vld [vmem:[%s13076_s1 + $0x390] sm:$0xff]  ;;  %v406_v46 = vld [vmem:[%s13077_s2 + $0x268] sm:$0xff] }
  0x75   : > { %5848 = vmatmul.mubr.msk.f32.gmra.mrb[44].mxu0 %vm1297_vm0, %v191_v47  ;;  %5928 = vmatmul.mubr.msk.f32.gmra.mrb[44].mxu1 %vm1297_vm0, %v271_v48  ;;  %v405_v47 = vld [vmem:[%s13077_s2 + $0x260] sm:$0xff] }
  0x76   : > { %1980 = vmatprep.mubr.f32.mxu0 %v13079_v5  ;;  %2460 = vmatprep.mubr.f32.mxu1 %v13079_v5 }
  0x77   : > { %764 = vperm.xlu1 %6014, %v382_v49   ;;  %759 = vperm.xlu0 %6013, %v381_v50   ;;  %v204_v50 = vld [vmem:[%s13076_s1 + $0x118] sm:$0xff] }
  0x79   : > { %5849 = vmatmul.mubr.msk.f32.gmra.mrb[46].mxu0 %vm1297_vm0, %v192_v51  ;;  %5929 = vmatmul.mubr.msk.f32.gmra.mrb[46].mxu1 %vm1297_vm0, %v272_v52  ;;  %v284_v51 = vld [vmem:[%s13076_s1 + $0x398] sm:$0xff] }
  0x7a   : > { %1986 = vmatprep.mubr.f32.mxu0 %v13079_v5  ;;  %2466 = vmatprep.mubr.f32.mxu1 %v13079_v5  ;;  %v408_v52 = vld [vmem:[%s13077_s2 + $0x278] sm:$0xff] }
  0x7b   : > { %774 = vperm.xlu1 %6014, %v384_v53   ;;  %769 = vperm.xlu0 %6013, %v383_v54   ;;  %v407_v53 = vld [vmem:[%s13077_s2 + $0x270] sm:$0xff] }
  0x7d   : > { %5850 = vmatmul.mubr.msk.f32.gmra.mrb[48].mxu0 %vm1297_vm0, %v193_v55  ;;  %5930 = vmatmul.mubr.msk.f32.gmra.mrb[48].mxu1 %vm1297_vm0, %v273_v56  ;;  %v205_v56 = vld [vmem:[%s13076_s1 + $0x120] sm:$0xff] }
  0x7e   : > { %1992 = vmatprep.mubr.f32.mxu0 %v13079_v5  ;;  %2472 = vmatprep.mubr.f32.mxu1 %v13079_v5 }
  0x7f   : > { %784 = vperm.xlu1 %6014, %v386_v57   ;;  %779 = vperm.xlu0 %6013, %v385_v58   ;;  %v285_v57 = vld [vmem:[%s13076_s1 + $0x3a0] sm:$0xff]  ;;  %v410_v58 = vld [vmem:[%s13077_s2 + $0x288] sm:$0xff] }
  0x81   : > { %5851 = vmatmul.mubr.msk.f32.gmra.mrb[50].mxu0 %vm1297_vm0, %v194_v59  ;;  %5931 = vmatmul.mubr.msk.f32.gmra.mrb[50].mxu1 %vm1297_vm0, %v274_v60  ;;  %v409_v59 = vld [vmem:[%s13077_s2 + $0x280] sm:$0xff] }
  0x82   : > { %1998 = vmatprep.mubr.f32.mxu0 %v13079_v5  ;;  %2478 = vmatprep.mubr.f32.mxu1 %v13079_v5 }
  0x83   : > { %794 = vperm.xlu1 %6014, %v388_v61   ;;  %789 = vperm.xlu0 %6013, %v387_v62   ;;  %v206_v62 = vld [vmem:[%s13076_s1 + $0x128] sm:$0xff] }
  0x85   : > { %5852 = vmatmul.mubr.msk.f32.gmra.mrb[52].mxu0 %vm1297_vm0, %v195_v63  ;;  %5932 = vmatmul.mubr.msk.f32.gmra.mrb[52].mxu1 %vm1297_vm0, %v275_v0  ;;  %v286_v63 = vld [vmem:[%s13076_s1 + $0x3a8] sm:$0xff]  ;;  %v412_v0 = vld [vmem:[%s13077_s2 + $0x298] sm:$0xff] }
  0x86   : > { %2004 = vmatprep.mubr.f32.mxu0 %v13079_v5  ;;  %2484 = vmatprep.mubr.f32.mxu1 %v13079_v5 }
  0x87   : > { %804 = vperm.xlu1 %6014, %v390_v1   ;;  %799 = vperm.xlu0 %6013, %v389_v2   ;;  %v411_v1 = vld [vmem:[%s13077_s2 + $0x290] sm:$0xff] }
  0x89   : > { %5853 = vmatmul.mubr.msk.f32.gmra.mrb[54].mxu0 %vm1297_vm0, %v196_v3  ;;  %5933 = vmatmul.mubr.msk.f32.gmra.mrb[54].mxu1 %vm1297_vm0, %v276_v4  ;;  %v207_v4 = vld [vmem:[%s13076_s1 + $0x130] sm:$0xff] }
  0x8a   : > { %2010 = vmatprep.mubr.f32.mxu0 %v13079_v5  ;;  %2490 = vmatprep.mubr.f32.mxu1 %v13079_v5 }
  0x8b   : > { %814 = vperm.xlu1 %6014, %v392_v6   ;;  %809 = vperm.xlu0 %6013, %v391_v7   ;;  %v287_v6 = vld [vmem:[%s13076_s1 + $0x3b0] sm:$0xff]  ;;  %v414_v7 = vld [vmem:[%s13077_s2 + $0x2a8] sm:$0xff] }
  0x8d   : > { %5854 = vmatmul.mubr.msk.f32.gmra.mrb[56].mxu0 %vm1297_vm0, %v197_v8  ;;  %5934 = vmatmul.mubr.msk.f32.gmra.mrb[56].mxu1 %vm1297_vm0, %v277_v9  ;;  %v413_v8 = vld [vmem:[%s13077_s2 + $0x2a0] sm:$0xff] }
  0x8e   : > { %v7826_v12 = vpop.permute.xlu1 %509  ;;  %v7828_v13 = vpop.permute.xlu0 %499  ;;  %2016 = vmatprep.mubr.f32.mxu0 %v13079_v5  ;;  %2496 = vmatprep.mubr.f32.mxu1 %v13079_v5 }
  0x8f   : > { %824 = vperm.xlu1 %6014, %v394_v10   ;;  %819 = vperm.xlu0 %6013, %v393_v11   ;;  %v208_v11 = vld [vmem:[%s13076_s1 + $0x138] sm:$0xff] }
  0x91   : > { %5855 = vmatmul.mubr.msk.f32.gmra.mrb[58].mxu0 %vm1297_vm0, %v198_v14  ;;  %5935 = vmatmul.mubr.msk.f32.gmra.mrb[58].mxu1 %vm1297_vm0, %v278_v15  ;;  %v288_v14 = vld [vmem:[%s13076_s1 + $0x3b8] sm:$0xff] }
  0x92   : > { %v7846_v18 = vpop.permute.xlu1 %514  ;;  %v7848_v19 = vpop.permute.xlu0 %504  ;;  %2022 = vmatprep.mubr.f32.mxu0 %v13079_v5  ;;  %2502 = vmatprep.mubr.f32.mxu1 %v13079_v5  ;;  %v416_v15 = vld [vmem:[%s13077_s2 + $0x2b8] sm:$0xff] }
  0x93   : > { %834 = vperm.xlu1 %6014, %v396_v16   ;;  %829 = vperm.xlu0 %6013, %v395_v17   ;;  %v415_v16 = vld [vmem:[%s13077_s2 + $0x2b0] sm:$0xff] }
  0x95   : > { %5856 = vmatmul.mubr.msk.f32.gmra.mrb[60].mxu0 %vm1297_vm0, %v199_v20  ;;  %5936 = vmatmul.mubr.msk.f32.gmra.mrb[60].mxu1 %vm1297_vm0, %v279_v21  ;;  %v209_v21 = vld [vmem:[%s13076_s1 + $0x140] sm:$0xff] }
  0x96   : > { %v7866_v24 = vpop.permute.xlu1 %524  ;;  %v7868_v25 = vpop.permute.xlu0 %519  ;;  %2028 = vmatprep.mubr.f32.mxu0 %v13079_v5  ;;  %2508 = vmatprep.mubr.f32.mxu1 %v13079_v5 }
  0x97   : > { %844 = vperm.xlu1 %6014, %v398_v22   ;;  %839 = vperm.xlu0 %6013, %v397_v23   ;;  %v289_v22 = vld [vmem:[%s13076_s1 + $0x3c0] sm:$0xff]  ;;  %v418_v23 = vld [vmem:[%s13077_s2 + $0x2c8] sm:$0xff] }
  0x99   : > { %5857 = vmatmul.mubr.msk.f32.gmra.mrb[62].mxu0 %vm1297_vm0, %v200_v26  ;;  %5937 = vmatmul.mubr.msk.f32.gmra.mrb[62].mxu1 %vm1297_vm0, %v280_v27  ;;  %v417_v26 = vld [vmem:[%s13077_s2 + $0x2c0] sm:$0xff] }
  0x9a   : > { %v7886_v30 = vpop.permute.xlu1 %534  ;;  %v7888_v31 = vpop.permute.xlu0 %529  ;;  %2034 = vmatprep.mubr.f32.mxu0 %v13079_v5  ;;  %2514 = vmatprep.mubr.f32.mxu1 %v13079_v5 }
  0x9b   : > { %854 = vperm.xlu1 %6014, %v400_v28   ;;  %849 = vperm.xlu0 %6013, %v399_v29   ;;  %v210_v29 = vld [vmem:[%s13076_s1 + $0x148] sm:$0xff] }
  0x9d   : > { %5858 = vmatmul.mubr.msk.f32.gmra.mrb[64].mxu0 %vm1297_vm0, %v201_v32  ;;  %5938 = vmatmul.mubr.msk.f32.gmra.mrb[64].mxu1 %vm1297_vm0, %v281_v33  ;;  %v290_v32 = vld [vmem:[%s13076_s1 + $0x3c8] sm:$0xff]  ;;  %v420_v33 = vld [vmem:[%s13077_s2 + $0x2d8] sm:$0xff] }
  0x9e   : > { %v7906_v36 = vpop.permute.xlu1 %544  ;;  %v7908_v37 = vpop.permute.xlu0 %539  ;;  %2040 = vmatprep.mubr.f32.mxu0 %v13079_v5  ;;  %2520 = vmatprep.mubr.f32.mxu1 %v13079_v5 }
  0x9f   : > { %864 = vperm.xlu1 %6014, %v402_v34   ;;  %859 = vperm.xlu0 %6013, %v401_v35   ;;  %v419_v34 = vld [vmem:[%s13077_s2 + $0x2d0] sm:$0xff] }
  0xa1   : > { %5859 = vmatmul.mubr.msk.f32.gmra.mrb[66].mxu0 %vm1297_vm0, %v202_v38  ;;  %5939 = vmatmul.mubr.msk.f32.gmra.mrb[66].mxu1 %vm1297_vm0, %v282_v39  ;;  %v211_v39 = vld [vmem:[%s13076_s1 + $0x150] sm:$0xff] }
  0xa2   : > { %v7926_v42 = vpop.permute.xlu1 %554  ;;  %v7928_v43 = vpop.permute.xlu0 %549  ;;  %2046 = vmatprep.mubr.f32.mxu0 %v13079_v5  ;;  %2526 = vmatprep.mubr.f32.mxu1 %v13079_v5 }
  0xa3   : > { %874 = vperm.xlu1 %6014, %v404_v40   ;;  %869 = vperm.xlu0 %6013, %v403_v41   ;;  %v291_v40 = vld [vmem:[%s13076_s1 + $0x3d0] sm:$0xff]  ;;  %v422_v41 = vld [vmem:[%s13077_s2 + $0x2e8] sm:$0xff] }
  0xa5   : > { %5860 = vmatmul.mubr.msk.f32.gmra.mrb[68].mxu0 %vm1297_vm0, %v203_v44  ;;  %5940 = vmatmul.mubr.msk.f32.gmra.mrb[68].mxu1 %vm1297_vm0, %v283_v45  ;;  %v421_v44 = vld [vmem:[%s13077_s2 + $0x2e0] sm:$0xff] }
  0xa6   : > { %v7946_v48 = vpop.permute.xlu1 %564  ;;  %v7948_v49 = vpop.permute.xlu0 %559  ;;  %2052 = vmatprep.mubr.f32.mxu0 %v13079_v5  ;;  %2532 = vmatprep.mubr.f32.mxu1 %v13079_v5 }
  0xa7   : > { %884 = vperm.xlu1 %6014, %v406_v46   ;;  %879 = vperm.xlu0 %6013, %v405_v47   ;;  %v212_v47 = vld [vmem:[%s13076_s1 + $0x158] sm:$0xff] }
  0xa9   : > { %5861 = vmatmul.mubr.msk.f32.gmra.mrb[70].mxu0 %vm1297_vm0, %v204_v50  ;;  %5941 = vmatmul.mubr.msk.f32.gmra.mrb[70].mxu1 %vm1297_vm0, %v284_v51  ;;  %v292_v50 = vld [vmem:[%s13076_s1 + $0x3d8] sm:$0xff] }
  0xaa   : > { %v7966_v54 = vpop.permute.xlu1 %574  ;;  %v7968_v55 = vpop.permute.xlu0 %569  ;;  %2058 = vmatprep.mubr.f32.mxu0 %v13079_v5  ;;  %2538 = vmatprep.mubr.f32.mxu1 %v13079_v5  ;;  %v424_v51 = vld [vmem:[%s13077_s2 + $0x2f8] sm:$0xff] }
  0xab   : > { %894 = vperm.xlu1 %6014, %v408_v52   ;;  %889 = vperm.xlu0 %6013, %v407_v53   ;;  %v423_v52 = vld [vmem:[%s13077_s2 + $0x2f0] sm:$0xff] }
  0xad   : > { %5862 = vmatmul.mubr.msk.f32.gmra.mrb[72].mxu0 %vm1297_vm0, %v205_v56  ;;  %5942 = vmatmul.mubr.msk.f32.gmra.mrb[72].mxu1 %vm1297_vm0, %v285_v57  ;;  %v213_v57 = vld [vmem:[%s13076_s1 + $0x160] sm:$0xff] }
  0xae   : > { %v7986_v60 = vpop.permute.xlu1 %584  ;;  %v7988_v61 = vpop.permute.xlu0 %579  ;;  %2064 = vmatprep.mubr.f32.mxu0 %v13079_v5  ;;  %2544 = vmatprep.mubr.f32.mxu1 %v13079_v5 }
  0xaf   : > { %904 = vperm.xlu1 %6014, %v410_v58   ;;  %899 = vperm.xlu0 %6013, %v409_v59   ;;  %v293_v58 = vld [vmem:[%s13076_s1 + $0x3e0] sm:$0xff]  ;;  %v426_v59 = vld [vmem:[%s13077_s2 + $0x308] sm:$0xff] }
  0xb1   : > { %5863 = vmatmul.mubr.msk.f32.gmra.mrb[74].mxu0 %vm1297_vm0, %v206_v62  ;;  %5943 = vmatmul.mubr.msk.f32.gmra.mrb[74].mxu1 %vm1297_vm0, %v286_v63  ;;  %v425_v62 = vld [vmem:[%s13077_s2 + $0x300] sm:$0xff] }
  0xb2   : > { %v8006_v2 = vpop.permute.xlu1 %594  ;;  %v8008_v3 = vpop.permute.xlu0 %589  ;;  %2070 = vmatprep.mubr.f32.mxu0 %v13079_v5  ;;  %2550 = vmatprep.mubr.f32.mxu1 %v13079_v5 }
  0xb3   : > { %914 = vperm.xlu1 %6014, %v412_v0   ;;  %909 = vperm.xlu0 %6013, %v411_v1   ;;  %v214_v1 = vld [vmem:[%s13076_s1 + $0x168] sm:$0xff] }
  0xb5   : > { %5864 = vmatmul.mubr.msk.f32.gmra.mrb[76].mxu0 %vm1297_vm0, %v207_v4  ;;  %5944 = vmatmul.mubr.msk.f32.gmra.mrb[76].mxu1 %vm1297_vm0, %v287_v6  ;;  %v294_v4 = vld [vmem:[%s13076_s1 + $0x3e8] sm:$0xff]  ;;  %v428_v6 = vld [vmem:[%s13077_s2 + $0x318] sm:$0xff] }
  0xb6   : > { %v8026_v9 = vpop.permute.xlu1 %604  ;;  %v8028_v10 = vpop.permute.xlu0 %599  ;;  %2076 = vmatprep.mubr.f32.mxu0 %v13079_v5  ;;  %2556 = vmatprep.mubr.f32.mxu1 %v13079_v5 }
  0xb7   : > { %13341 = vst [vmem:[#allocation2_spill] sm:$0xff] %v8026_v9  ;;  %924 = vperm.xlu1 %6014, %v414_v7   ;;  %919 = vperm.xlu0 %6013, %v413_v8   ;;  %v427_v7 = vld [vmem:[%s13077_s2 + $0x310] sm:$0xff] }
  0xb9   : > { %5865 = vmatmul.mubr.msk.f32.gmra.mrb[78].mxu0 %vm1297_vm0, %v208_v11  ;;  %5945 = vmatmul.mubr.msk.f32.gmra.mrb[78].mxu1 %vm1297_vm0, %v288_v14  ;;  %v215_v14 = vld [vmem:[%s13076_s1 + $0x170] sm:$0xff] }
  0xba   : > { %v8046_v17 = vpop.permute.xlu1 %614  ;;  %v8048_v20 = vpop.permute.xlu0 %609  ;;  %2082 = vmatprep.mubr.f32.mxu0 %v13079_v5  ;;  %2562 = vmatprep.mubr.f32.mxu1 %v13079_v5 }
  0xbb   : > { %13342 = vst [vmem:[#allocation3_spill] sm:$0xff] %v8046_v17  ;;  %13343 = vst [vmem:[#allocation4_spill] sm:$0xff] %v8048_v20  ;;  %934 = vperm.xlu1 %6014, %v416_v15   ;;  %929 = vperm.xlu0 %6013, %v415_v16   ;;  %v295_v15 = vld [vmem:[%s13076_s1 + $0x3f0] sm:$0xff]  ;;  %v430_v16 = vld [vmem:[%s13077_s2 + $0x328] sm:$0xff] }
  0xbd   : > { %5866 = vmatmul.mubr.msk.f32.gmra.mrb[80].mxu0 %vm1297_vm0, %v209_v21  ;;  %5946 = vmatmul.mubr.msk.f32.gmra.mrb[80].mxu1 %vm1297_vm0, %v289_v22  ;;  %v429_v21 = vld [vmem:[%s13077_s2 + $0x320] sm:$0xff] }
  0xbe   : > { %v8066_v27 = vpop.permute.xlu1 %624  ;;  %v8068_v28 = vpop.permute.xlu0 %619  ;;  %2088 = vmatprep.mubr.f32.mxu0 %v13079_v5  ;;  %2568 = vmatprep.mubr.f32.mxu1 %v13079_v5 }
  0xbf   : > { %13344 = vst [vmem:[#allocation5_spill] sm:$0xff] %v8066_v27  ;;  %13345 = vst [vmem:[#allocation6_spill] sm:$0xff] %v8068_v28  ;;  %944 = vperm.xlu1 %6014, %v418_v23   ;;  %939 = vperm.xlu0 %6013, %v417_v26   ;;  %v216_v26 = vld [vmem:[%s13076_s1 + $0x178] sm:$0xff] }
  0xc1   : > { %5867 = vmatmul.mubr.msk.f32.gmra.mrb[82].mxu0 %vm1297_vm0, %v210_v29  ;;  %5947 = vmatmul.mubr.msk.f32.gmra.mrb[82].mxu1 %vm1297_vm0, %v290_v32  ;;  %v296_v29 = vld [vmem:[%s13076_s1 + $0x3f8] sm:$0xff] }
  0xc2   : > { %v8086_v35 = vpop.permute.xlu1 %634  ;;  %v8088_v38 = vpop.permute.xlu0 %629  ;;  %2094 = vmatprep.mubr.f32.mxu0 %v13079_v5  ;;  %2574 = vmatprep.mubr.f32.mxu1 %v13079_v5  ;;  %v432_v32 = vld [vmem:[%s13077_s2 + $0x338] sm:$0xff] }
  0xc3   : > { %13346 = vst [vmem:[#allocation7_spill] sm:$0xff] %v8086_v35  ;;  %13347 = vst [vmem:[#allocation8_spill] sm:$0xff] %v8088_v38  ;;  %954 = vperm.xlu1 %6014, %v420_v33   ;;  %949 = vperm.xlu0 %6013, %v419_v34   ;;  %v431_v33 = vld [vmem:[%s13077_s2 + $0x330] sm:$0xff] }
  0xc5   : > { %5868 = vmatmul.mubr.msk.f32.gmra.mrb[84].mxu0 %vm1297_vm0, %v211_v39  ;;  %5948 = vmatmul.mubr.msk.f32.gmra.mrb[84].mxu1 %vm1297_vm0, %v291_v40  ;;  %v217_v40 = vld [vmem:[%s13076_s1 + $0x180] sm:$0xff] }
  0xc6   : > { %v8106_v45 = vpop.permute.xlu1 %644  ;;  %v8108_v46 = vpop.permute.xlu0 %639  ;;  %2100 = vmatprep.mubr.f32.mxu0 %v13079_v5  ;;  %2580 = vmatprep.mubr.f32.mxu1 %v13079_v5 }
  0xc7   : > { %13348 = vst [vmem:[#allocation9_spill] sm:$0xff] %v8106_v45  ;;  %13349 = vst [vmem:[#allocation10_spill] sm:$0xff] %v8108_v46  ;;  %964 = vperm.xlu1 %6014, %v422_v41   ;;  %959 = vperm.xlu0 %6013, %v421_v44   ;;  %v297_v41 = vld [vmem:[%s13076_s1 + $0x400] sm:$0xff]  ;;  %v434_v44 = vld [vmem:[%s13077_s2 + $0x348] sm:$0xff] }
  0xc9   : > { %5869 = vmatmul.mubr.msk.f32.gmra.mrb[86].mxu0 %vm1297_vm0, %v212_v47  ;;  %5949 = vmatmul.mubr.msk.f32.gmra.mrb[86].mxu1 %vm1297_vm0, %v292_v50  ;;  %v433_v47 = vld [vmem:[%s13077_s2 + $0x340] sm:$0xff] }
  0xca   : > { %v8126_v53 = vpop.permute.xlu1 %654  ;;  %v8128_v56 = vpop.permute.xlu0 %649  ;;  %2106 = vmatprep.mubr.f32.mxu0 %v13079_v5  ;;  %2586 = vmatprep.mubr.f32.mxu1 %v13079_v5 }
  0xcb   : > { %13350 = vst [vmem:[#allocation11_spill] sm:$0xff] %v8126_v53  ;;  %13351 = vst [vmem:[#allocation12_spill] sm:$0xff] %v8128_v56  ;;  %974 = vperm.xlu1 %6014, %v424_v51   ;;  %969 = vperm.xlu0 %6013, %v423_v52   ;;  %v218_v52 = vld [vmem:[%s13076_s1 + $0x188] sm:$0xff] }
  0xcd   : > { %5870 = vmatmul.mubr.msk.f32.gmra.mrb[88].mxu0 %vm1297_vm0, %v213_v57  ;;  %5950 = vmatmul.mubr.msk.f32.gmra.mrb[88].mxu1 %vm1297_vm0, %v293_v58  ;;  %v298_v57 = vld [vmem:[%s13076_s1 + $0x408] sm:$0xff]  ;;  %v436_v58 = vld [vmem:[%s13077_s2 + $0x358] sm:$0xff] }
  0xce   : > { %v8146_v63 = vpop.permute.xlu1 %664  ;;  %v8148_v0 = vpop.permute.xlu0 %659  ;;  %2112 = vmatprep.mubr.f32.mxu0 %v13079_v5  ;;  %2592 = vmatprep.mubr.f32.mxu1 %v13079_v5 }
  0xcf   : > { %13352 = vst [vmem:[#allocation13_spill] sm:$0xff] %v8146_v63  ;;  %13353 = vst [vmem:[#allocation14_spill] sm:$0xff] %v8148_v0  ;;  %984 = vperm.xlu1 %6014, %v426_v59   ;;  %979 = vperm.xlu0 %6013, %v425_v62   ;;  %v435_v59 = vld [vmem:[%s13077_s2 + $0x350] sm:$0xff] }
  0xd1   : > { %5871 = vmatmul.mubr.msk.f32.gmra.mrb[90].mxu0 %vm1297_vm0, %v214_v1  ;;  %5951 = vmatmul.mubr.msk.f32.gmra.mrb[90].mxu1 %vm1297_vm0, %v294_v4  ;;  %v219_v4 = vld [vmem:[%s13076_s1 + $0x190] sm:$0xff] }
  0xd2   : > { %v8166_v8 = vpop.permute.xlu1 %674  ;;  %v8168_v11 = vpop.permute.xlu0 %669  ;;  %2118 = vmatprep.mubr.f32.mxu0 %v13079_v5  ;;  %2598 = vmatprep.mubr.f32.mxu1 %v13079_v5 }
  0xd3   : > { %13354 = vst [vmem:[#allocation15_spill] sm:$0xff] %v8166_v8  ;;  %13355 = vst [vmem:[#allocation16_spill] sm:$0xff] %v8168_v11  ;;  %994 = vperm.xlu1 %6014, %v428_v6   ;;  %989 = vperm.xlu0 %6013, %v427_v7   ;;  %v299_v6 = vld [vmem:[%s13076_s1 + $0x410] sm:$0xff]  ;;  %v438_v7 = vld [vmem:[%s13077_s2 + $0x368] sm:$0xff] }
  0xd5   : > { %5872 = vmatmul.mubr.msk.f32.gmra.mrb[92].mxu0 %vm1297_vm0, %v215_v14  ;;  %5952 = vmatmul.mubr.msk.f32.gmra.mrb[92].mxu1 %vm1297_vm0, %v295_v15  ;;  %v437_v14 = vld [vmem:[%s13077_s2 + $0x360] sm:$0xff] }
  0xd6   : > { %v8186_v22 = vpop.permute.xlu1 %684  ;;  %v8188_v23 = vpop.permute.xlu0 %679  ;;  %2124 = vmatprep.mubr.f32.mxu0 %v13079_v5  ;;  %2604 = vmatprep.mubr.f32.mxu1 %v13079_v5 }
  0xd7   : > { %13356 = vst [vmem:[#allocation17_spill] sm:$0xff] %v8186_v22  ;;  %13357 = vst [vmem:[#allocation18_spill] sm:$0xff] %v8188_v23  ;;  %1004 = vperm.xlu1 %6014, %v430_v16   ;;  %999 = vperm.xlu0 %6013, %v429_v21   ;;  %v220_v21 = vld [vmem:[%s13076_s1 + $0x198] sm:$0xff] }
  0xd9   : > { %5873 = vmatmul.mubr.msk.f32.gmra.mrb[94].mxu0 %vm1297_vm0, %v216_v26  ;;  %5953 = vmatmul.mubr.msk.f32.gmra.mrb[94].mxu1 %vm1297_vm0, %v296_v29  ;;  %v300_v26 = vld [vmem:[%s13076_s1 + $0x418] sm:$0xff] }
  0xda   : > { %v8206_v34 = vpop.permute.xlu1 %694  ;;  %v8208_v39 = vpop.permute.xlu0 %689  ;;  %2130 = vmatprep.mubr.f32.mxu0 %v13079_v5  ;;  %2610 = vmatprep.mubr.f32.mxu1 %v13079_v5  ;;  %v440_v29 = vld [vmem:[%s13077_s2 + $0x378] sm:$0xff] }
  0xdb   : > { %13358 = vst [vmem:[#allocation19_spill] sm:$0xff] %v8206_v34  ;;  %13359 = vst [vmem:[#allocation20_spill] sm:$0xff] %v8208_v39  ;;  %1014 = vperm.xlu1 %6014, %v432_v32   ;;  %1009 = vperm.xlu0 %6013, %v431_v33   ;;  %v439_v32 = vld [vmem:[%s13077_s2 + $0x370] sm:$0xff] }
  0xdd   : > { %5874 = vmatmul.mubr.msk.f32.gmra.mrb[96].mxu0 %vm1297_vm0, %v217_v40  ;;  %5954 = vmatmul.mubr.msk.f32.gmra.mrb[96].mxu1 %vm1297_vm0, %v297_v41  ;;  %v221_v41 = vld [vmem:[%s13076_s1 + $0x1a0] sm:$0xff] }
  0xde   : > { %v8226_v50 = vpop.permute.xlu1 %704  ;;  %v8228_v51 = vpop.permute.xlu0 %699  ;;  %2136 = vmatprep.mubr.f32.mxu0 %v13079_v5  ;;  %2616 = vmatprep.mubr.f32.mxu1 %v13079_v5 }
  0xdf   : > { %13360 = vst [vmem:[#allocation21_spill] sm:$0xff] %v8226_v50  ;;  %13361 = vst [vmem:[#allocation22_spill] sm:$0xff] %v8228_v51  ;;  %1024 = vperm.xlu1 %6014, %v434_v44   ;;  %1019 = vperm.xlu0 %6013, %v433_v47   ;;  %v301_v44 = vld [vmem:[%s13076_s1 + $0x420] sm:$0xff]  ;;  %v442_v47 = vld [vmem:[%s13077_s2 + $0x388] sm:$0xff] }
  0xe1   : > { %5875 = vmatmul.mubr.msk.f32.gmra.mrb[98].mxu0 %vm1297_vm0, %v218_v52  ;;  %5955 = vmatmul.mubr.msk.f32.gmra.mrb[98].mxu1 %vm1297_vm0, %v298_v57  ;;  %v441_v52 = vld [vmem:[%s13077_s2 + $0x380] sm:$0xff] }
  0xe2   : > { %v8246_v62 = vpop.permute.xlu1 %714  ;;  %v8248_v1 = vpop.permute.xlu0 %709  ;;  %2142 = vmatprep.mubr.f32.mxu0 %v13079_v5  ;;  %2622 = vmatprep.mubr.f32.mxu1 %v13079_v5 }
  0xe3   : > { %13362 = vst [vmem:[#allocation23_spill] sm:$0xff] %v8246_v62  ;;  %13363 = vst [vmem:[#allocation24_spill] sm:$0xff] %v8248_v1  ;;  %1034 = vperm.xlu1 %6014, %v436_v58   ;;  %1029 = vperm.xlu0 %6013, %v435_v59   ;;  %v222_v59 = vld [vmem:[%s13076_s1 + $0x1a8] sm:$0xff] }
  0xe5   : > { %5876 = vmatmul.mubr.msk.f32.gmra.mrb[100].mxu0 %vm1297_vm0, %v219_v4  ;;  %5956 = vmatmul.mubr.msk.f32.gmra.mrb[100].mxu1 %vm1297_vm0, %v299_v6  ;;  %v302_v4 = vld [vmem:[%s13076_s1 + $0x428] sm:$0xff]  ;;  %v444_v6 = vld [vmem:[%s13077_s2 + $0x398] sm:$0xff] }
  0xe6   : > { %v8266_v15 = vpop.permute.xlu1 %724  ;;  %v8268_v16 = vpop.permute.xlu0 %719  ;;  %2148 = vmatprep.mubr.f32.mxu0 %v13079_v5  ;;  %2628 = vmatprep.mubr.f32.mxu1 %v13079_v5 }
  0xe7   : > { %13364 = vst [vmem:[#allocation25_spill] sm:$0xff] %v8266_v15  ;;  %13365 = vst [vmem:[#allocation26_spill] sm:$0xff] %v8268_v16  ;;  %1044 = vperm.xlu1 %6014, %v438_v7   ;;  %1039 = vperm.xlu0 %6013, %v437_v14   ;;  %v443_v7 = vld [vmem:[%s13077_s2 + $0x390] sm:$0xff] }
  0xe9   : > { %5877 = vmatmul.mubr.msk.f32.gmra.mrb[102].mxu0 %vm1297_vm0, %v220_v21  ;;  %5957 = vmatmul.mubr.msk.f32.gmra.mrb[102].mxu1 %vm1297_vm0, %v300_v26 }
  0xea   : > { %v8286_v33 = vpop.permute.xlu1 %734  ;;  %v8288_v40 = vpop.permute.xlu0 %729  ;;  %2154 = vmatprep.mubr.f32.mxu0 %v13079_v5  ;;  %2634 = vmatprep.mubr.f32.mxu1 %v13079_v5 }
  0xeb   : > { %13366 = vst [vmem:[#allocation27_spill] sm:$0xff] %v8286_v33  ;;  %13367 = vst [vmem:[#allocation28_spill] sm:$0xff] %v8288_v40  ;;  %1054 = vperm.xlu1 %6014, %v440_v29   ;;  %1049 = vperm.xlu0 %6013, %v439_v32  }
  0xed   : > { %5878 = vmatmul.mubr.msk.f32.gmra.mrb[104].mxu0 %vm1297_vm0, %v221_v41  ;;  %5958 = vmatmul.mubr.msk.f32.gmra.mrb[104].mxu1 %vm1297_vm0, %v301_v44  ;;  %v223_v44 = vld [vmem:[%s13076_s1 + $0x1b0] sm:$0xff] }
  0xee   : > { %v8306_v57 = vpop.permute.xlu1 %744  ;;  %v8308_v58 = vpop.permute.xlu0 %739  ;;  %2160 = vmatprep.mubr.f32.mxu0 %v13079_v5  ;;  %2640 = vmatprep.mubr.f32.mxu1 %v13079_v5 }
  0xef   : > { %13368 = vst [vmem:[#allocation29_spill] sm:$0xff] %v8306_v57  ;;  %13369 = vst [vmem:[#allocation30_spill] sm:$0xff] %v8308_v58  ;;  %1064 = vperm.xlu1 %6014, %v442_v47   ;;  %1059 = vperm.xlu0 %6013, %v441_v52   ;;  %v303_v47 = vld [vmem:[%s13076_s1 + $0x430] sm:$0xff] }
  0xf0   : > { %v1844_v14 = vpop.f32.mrb[0].mxu0  ;;  %v8326_v21 = vpop.f32.mrb[0].mxu1 }
  0xf1   : > { %v8329_v26 = vadd.f32 %v1844_v14, %v7828_v13  ;;  %5879 = vmatmul.mubr.msk.f32.gmra.mrb[106].mxu0 %vm1297_vm0, %v222_v59  ;;  %5959 = vmatmul.mubr.msk.f32.gmra.mrb[106].mxu1 %vm1297_vm0, %v302_v4  ;;  %v1846_v41 = vpop.f32.mrb[1].mxu0  ;;  %v8343_v52 = vpop.f32.mrb[1].mxu1  ;;  %v13372_v59 = vmov 0.0   ;;  %v446_v4 = vld [vmem:[%s13077_s2 + $0x3a8] sm:$0xff] }
  0xf2   : > { %v8331_v29 = vpop.permute.xlu1 %754  ;;  %v8333_v32 = vpop.permute.xlu0 %749  ;;  %v8347_v5 = vadd.f32 %v1846_v41, %v7828_v13  ;;  %2166 = vmatprep.mubr.f32.mxu0 %v13372_v59  ;;  %2646 = vmatprep.mubr.f32.mxu1 %v13372_v59 }
  0xf3   : > { %13370 = vst [vmem:[#allocation31_spill] sm:$0xff] %v8331_v29  ;;  %13371 = vst [vmem:[#allocation32_spill] sm:$0xff] %v8333_v32  ;;  %1074 = vperm.xlu1 %6014, %v444_v6   ;;  %1069 = vperm.xlu0 %6013, %v443_v7   ;;  %v2803_v14 = vsub.f32 0.0, %v8329_v26  ;;  %v445_v6 = vld [vmem:[%s13077_s2 + $0x3a0] sm:$0xff] }
  0xf4   : > { %v1850_v7 = vpop.f32.mrb[2].mxu0  ;;  %v8357_v29 = vpop.f32.mrb[2].mxu1  ;;  %v2804_v57 = vsub.f32 0.0, %v8347_v5 }
  0xf5   : > { %v3123_v32 = vmul.f32 1.442695, %v2803_v14  ;;  %v8361_v13 = vadd.f32 %v1850_v7, %v7848_v19  ;;  %5880 = vmatmul.mubr.msk.f32.gmra.mrb[108].mxu0 %vm1297_vm0, %v223_v44  ;;  %5960 = vmatmul.mubr.msk.f32.gmra.mrb[108].mxu1 %vm1297_vm0, %v303_v47  ;;  %v1852_v33 = vpop.f32.mrb[3].mxu0  ;;  %v224_v14 = vld [vmem:[%s13076_s1 + $0x1b8] sm:$0xff]  ;;  %v8375_v40 = vpop.f32.mrb[3].mxu1 }
  0xf6   : > { %v8363_v41 = vpop.permute.xlu1 %764  ;;  %v8365_v58 = vpop.permute.xlu0 %759  ;;  %v304_v7 = vld [vmem:[%s13076_s1 + $0x438] sm:$0xff]  ;;  %v8379_v44 = vadd.f32 %v1852_v33, %v7848_v19  ;;  %2172 = vmatprep.mubr.f32.mxu0 %v13372_v59  ;;  %2652 = vmatprep.mubr.f32.mxu1 %v13372_v59 }
  0xf7   : > { %13373 = vst [vmem:[#allocation33_spill] sm:$0xff] %v8363_v41  ;;  %13374 = vst [vmem:[#allocation34_spill] sm:$0xff] %v8365_v58  ;;  %1084 = vperm.xlu1 %6014, %v446_v4   ;;  %1079 = vperm.xlu0 %6013, %v445_v6   ;;  %6015 = vpow2.f32 %v3123_v32  ;;  %v3125_v41 = vmul.f32 1.442695, %v2804_v57  ;;  %v2805_v58 = vsub.f32 0.0, %v8361_v13  ;;  %v448_v47 = vld [vmem:[%s13077_s2 + $0x3b8] sm:$0xff] }
  0xf8   : > { %v447_v4 = vld [vmem:[%s13077_s2 + $0x3b0] sm:$0xff]  ;;  %v1856_v6 = vpop.f32.mrb[4].mxu0  ;;  %v8389_v32 = vpop.f32.mrb[4].mxu1  ;;  %v2806_v19 = vsub.f32 0.0, %v8379_v44 }
  0xf9   : > { %6017 = vpow2.f32 %v3125_v41  ;;  %v3127_v57 = vmul.f32 1.442695, %v2805_v58  ;;  %v8393_v33 = vadd.f32 %v1856_v6, %v7826_v12  ;;  %5881 = vmatmul.mubr.msk.f32.gmra.mrb[110].mxu0 %vm1297_vm0, %v224_v14  ;;  %5961 = vmatmul.mubr.msk.f32.gmra.mrb[110].mxu1 %vm1297_vm0, %v304_v7  ;;  %v1858_v62 = vpop.f32.mrb[5].mxu0  ;;  %v225_v58 = vld [vmem:[%s13076_s1 + $0x1c0] sm:$0xff]  ;;  %v8407_v6 = vpop.f32.mrb[5].mxu1  ;;  %v450_v7 = vld [vmem:[%s13077_s2 + $0x3c8] sm:$0xff] }
  0xfa   : > { %v8395_v15 = vpop.permute.xlu1 %774  ;;  %v8397_v16 = vpop.permute.xlu0 %769  ;;  %v305_v41 = vld [vmem:[%s13076_s1 + $0x440] sm:$0xff]  ;;  %v8411_v14 = vadd.f32 %v1858_v62, %v7826_v12  ;;  %2178 = vmatprep.mubr.f32.mxu0 %v13372_v59  ;;  %2658 = vmatprep.mubr.f32.mxu1 %v13372_v59 }
  0xfb   : > { %13375 = vst [vmem:[#allocation35_spill] sm:$0xff] %v8395_v15  ;;  %13376 = vst [vmem:[#allocation36_spill] sm:$0xff] %v8397_v16  ;;  %1094 = vperm.xlu1 %6014, %v448_v47   ;;  %1089 = vperm.xlu0 %6013, %v447_v4   ;;  %6019 = vpow2.f32 %v3127_v57  ;;  %v3129_v15 = vmul.f32 1.442695, %v2806_v19  ;;  %v2807_v16 = vsub.f32 0.0, %v8393_v33  ;;  %v449_v47 = vld [vmem:[%s13077_s2 + $0x3c0] sm:$0xff] }
  0xfc   : > { %v1862_v4 = vpop.f32.mrb[6].mxu0  ;;  %v8421_v57 = vpop.f32.mrb[6].mxu1  ;;  %v2808_v12 = vsub.f32 0.0, %v8411_v14 }
  0xfd   : > { %6021 = vpow2.f32 %v3129_v15  ;;  %v3131_v19 = vmul.f32 1.442695, %v2807_v16  ;;  %v8425_v62 = vadd.f32 %v1862_v4, %v7846_v18  ;;  %5882 = vmatmul.mubr.msk.f32.gmra.mrb[112].mxu0 %vm1297_vm0, %v225_v58  ;;  %5962 = vmatmul.mubr.msk.f32.gmra.mrb[112].mxu1 %vm1297_vm0, %v305_v41  ;;  %v1864_v51 = vpop.f32.mrb[7].mxu0  ;;  %v226_v15 = vld [vmem:[%s13076_s1 + $0x1c8] sm:$0xff]  ;;  %v8439_v4 = vpop.f32.mrb[7].mxu1  ;;  %v452_v41 = vld [vmem:[%s13077_s2 + $0x3d8] sm:$0xff] }
  0xfe   : > { %v8427_v1 = vpop.permute.xlu1 %784  ;;  %v8429_v50 = vpop.permute.xlu0 %779  ;;  %v306_v16 = vld [vmem:[%s13076_s1 + $0x448] sm:$0xff]  ;;  %v8443_v58 = vadd.f32 %v1864_v51, %v7846_v18  ;;  %2184 = vmatprep.mubr.f32.mxu0 %v13372_v59  ;;  %2664 = vmatprep.mubr.f32.mxu1 %v13372_v59 }
  0xff   : > { %13377 = vst [vmem:[#allocation37_spill] sm:$0xff] %v8427_v1  ;;  %13378 = vst [vmem:[#allocation38_spill] sm:$0xff] %v8429_v50  ;;  %1104 = vperm.xlu1 %6014, %v450_v7   ;;  %1099 = vperm.xlu0 %6013, %v449_v47   ;;  %6023 = vpow2.f32 %v3131_v19  ;;  %v3133_v1 = vmul.f32 1.442695, %v2808_v12  ;;  %v2809_v50 = vsub.f32 0.0, %v8425_v62  ;;  %v451_v7 = vld [vmem:[%s13077_s2 + $0x3d0] sm:$0xff] }
 0x100   : > { %v1868_v47 = vpop.f32.mrb[8].mxu0  ;;  %v8453_v19 = vpop.f32.mrb[8].mxu1  ;;  %v2810_v18 = vsub.f32 0.0, %v8443_v58 }
 0x101   : > { %v6016_v12 = vpop.eup %6015  ;;  %6025 = vpow2.f32 %v3133_v1  ;;  %v3135_v34 = vmul.f32 1.442695, %v2809_v50  ;;  %v8457_v51 = vadd.f32 %v1868_v47, %v7868_v25  ;;  %5883 = vmatmul.mubr.msk.f32.gmra.mrb[114].mxu0 %vm1297_vm0, %v226_v15  ;;  %5963 = vmatmul.mubr.msk.f32.gmra.mrb[114].mxu1 %vm1297_vm0, %v306_v16  ;;  %v1870_v8 = vpop.f32.mrb[9].mxu0  ;;  %v227_v50 = vld [vmem:[%s13076_s1 + $0x1d0] sm:$0xff] }
 0x102   : > { %v8459_v39 = vpop.permute.xlu1 %794  ;;  %v8461_v22 = vpop.permute.xlu0 %789  ;;  %v3763_v23 = vadd.f32 1.0, %v6016_v12  ;;  %v307_v1 = vld [vmem:[%s13076_s1 + $0x450] sm:$0xff]  ;;  %v8475_v16 = vadd.f32 %v1870_v8, %v7868_v25  ;;  %2190 = vmatprep.mubr.f32.mxu0 %v13372_v59  ;;  %2670 = vmatprep.mubr.f32.mxu1 %v13372_v59 }
 0x103   : > { %13379 = vst [vmem:[#allocation39_spill] sm:$0xff] %v8459_v39  ;;  %13380 = vst [vmem:[#allocation40_spill] sm:$0xff] %v8461_v22  ;;  %1114 = vperm.xlu1 %6014, %v452_v41   ;;  %1109 = vperm.xlu0 %6013, %v451_v7   ;;  %v8471_v47 = vpop.f32.mrb[9].mxu1  ;;  %v6018_v39 = vpop.eup %6017  ;;  %6027 = vpow2.f32 %v3135_v34  ;;  %v3137_v22 = vmul.f32 1.442695, %v2810_v18  ;;  %v2811_v15 = vsub.f32 0.0, %v8457_v51 }
 0x104   : > { %v454_v41 = vld [vmem:[%s13077_s2 + $0x3e8] sm:$0xff]  ;;  %v453_v7 = vld [vmem:[%s13077_s2 + $0x3e0] sm:$0xff]  ;;  %6029 = vrcp.f32 %v3763_v23  ;;  %v3764_v34 = vadd.f32 1.0, %v6018_v39  ;;  %v1874_v12 = vpop.f32.mrb[10].mxu0  ;;  %v8485_v18 = vpop.f32.mrb[10].mxu1  ;;  %v2812_v8 = vsub.f32 0.0, %v8475_v16 }
 0x105   : > { %v6020_v11 = vpop.eup %6019  ;;  %6031 = vpow2.f32 %v3137_v22  ;;  %v3139_v25 = vmul.f32 1.442695, %v2811_v15  ;;  %v8489_v63 = vadd.f32 %v1874_v12, %v7866_v24  ;;  %5884 = vmatmul.mubr.msk.f32.gmra.mrb[116].mxu0 %vm1297_vm0, %v227_v50  ;;  %5964 = vmatmul.mubr.msk.f32.gmra.mrb[116].mxu1 %vm1297_vm0, %v307_v1  ;;  %v1876_v39 = vpop.f32.mrb[11].mxu0  ;;  %v228_v22 = vld [vmem:[%s13076_s1 + $0x1d8] sm:$0xff] }
 0x106   : > { %v8491_v0 = vpop.permute.xlu1 %804  ;;  %v8493_v53 = vpop.permute.xlu0 %799  ;;  %6033 = vrcp.f32 %v3764_v34  ;;  %v3765_v23 = vadd.f32 1.0, %v6020_v11  ;;  %v308_v15 = vld [vmem:[%s13076_s1 + $0x458] sm:$0xff]  ;;  %v3141_v50 = vmul.f32 1.442695, %v2812_v8  ;;  %v8507_v11 = vadd.f32 %v1876_v39, %v7866_v24  ;;  %2196 = vmatprep.mubr.f32.mxu0 %v13372_v59  ;;  %2676 = vmatprep.mubr.f32.mxu1 %v13372_v59 }
 0x107   : > { %13381 = vst [vmem:[#allocation41_spill] sm:$0xff] %v8489_v63  ;;  %13382 = vst [vmem:[#allocation42_spill] sm:$0xff] %v8491_v0  ;;  %1124 = vperm.xlu1 %6014, %v454_v41   ;;  %1119 = vperm.xlu0 %6013, %v453_v7   ;;  %v8503_v12 = vpop.f32.mrb[11].mxu1  ;;  %v6022_v0 = vpop.eup %6021  ;;  %6035 = vpow2.f32 %v3139_v25  ;;  %v2813_v1 = vsub.f32 0.0, %v8489_v63  ;;  %v456_v41 = vld [vmem:[%s13077_s2 + $0x3f8] sm:$0xff]  ;;  %v455_v7 = vld [vmem:[%s13077_s2 + $0x3f0] sm:$0xff] }
 0x108   : > { %13383 = vst [vmem:[#allocation43_spill] sm:$0xff] %v8493_v53  ;;  %13384 = vst [vmem:[#allocation44_spill] sm:$0xff] %v8507_v11  ;;  %6037 = vrcp.f32 %v3765_v23  ;;  %v3766_v34 = vadd.f32 1.0, %v6022_v0  ;;  %v1880_v25 = vpop.f32.mrb[12].mxu0  ;;  %v8517_v8 = vpop.f32.mrb[12].mxu1  ;;  %v2814_v39 = vsub.f32 0.0, %v8507_v11 }
 0x109   : > { %v6024_v53 = vpop.eup %6023  ;;  %6039 = vpow2.f32 %v3141_v50  ;;  %v3143_v24 = vmul.f32 1.442695, %v2813_v1  ;;  %v8521_v56 = vadd.f32 %v1880_v25, %v7888_v31  ;;  %5885 = vmatmul.mubr.msk.f32.gmra.mrb[118].mxu0 %vm1297_vm0, %v228_v22  ;;  %5965 = vmatmul.mubr.msk.f32.gmra.mrb[118].mxu1 %vm1297_vm0, %v308_v15  ;;  %v1882_v23 = vpop.f32.mrb[13].mxu0  ;;  %v229_v50 = vld [vmem:[%s13076_s1 + $0x1e0] sm:$0xff] }
 0x10a   : > { %v8523_v45 = vpop.permute.xlu1 %814  ;;  %v8525_v46 = vpop.permute.xlu0 %809  ;;  %6041 = vrcp.f32 %v3766_v34  ;;  %v3767_v0 = vadd.f32 1.0, %v6024_v53  ;;  %v309_v1 = vld [vmem:[%s13076_s1 + $0x460] sm:$0xff]  ;;  %v3145_v22 = vmul.f32 1.442695, %v2814_v39  ;;  %v8539_v53 = vadd.f32 %v1882_v23, %v7888_v31  ;;  %2202 = vmatprep.mubr.f32.mxu0 %v13372_v59  ;;  %2682 = vmatprep.mubr.f32.mxu1 %v13372_v59 }
 0x10b   : > { %13385 = vst [vmem:[#allocation45_spill] sm:$0xff] %v8521_v56  ;;  %13386 = vst [vmem:[#allocation46_spill] sm:$0xff] %v8523_v45  ;;  %1134 = vperm.xlu1 %6014, %v456_v41   ;;  %1129 = vperm.xlu0 %6013, %v455_v7   ;;  %v8535_v25 = vpop.f32.mrb[13].mxu1  ;;  %v6026_v45 = vpop.eup %6025  ;;  %6043 = vpow2.f32 %v3143_v24  ;;  %v2815_v15 = vsub.f32 0.0, %v8521_v56  ;;  %v458_v41 = vld [vmem:[%s13077_s2 + $0x408] sm:$0xff]  ;;  %v457_v7 = vld [vmem:[%s13077_s2 + $0x400] sm:$0xff] }
 0x10c   : > { %13387 = vst [vmem:[#allocation47_spill] sm:$0xff] %v8525_v46  ;;  %13388 = vst [vmem:[#allocation48_spill] sm:$0xff] %v8539_v53  ;;  %6045 = vrcp.f32 %v3767_v0  ;;  %v3768_v34 = vadd.f32 1.0, %v6026_v45  ;;  %v1886_v24 = vpop.f32.mrb[14].mxu0  ;;  %v8549_v39 = vpop.f32.mrb[14].mxu1  ;;  %v2816_v23 = vsub.f32 0.0, %v8539_v53 }
 0x10d   : > { %v6028_v46 = vpop.eup %6027  ;;  %6047 = vpow2.f32 %v3145_v22  ;;  %v3147_v31 = vmul.f32 1.442695, %v2815_v15  ;;  %v8553_v35 = vadd.f32 %v1886_v24, %v7886_v30  ;;  %5886 = vmatmul.mubr.msk.f32.gmra.mrb[120].mxu0 %vm1297_vm0, %v229_v50  ;;  %5966 = vmatmul.mubr.msk.f32.gmra.mrb[120].mxu1 %vm1297_vm0, %v309_v1  ;;  %v1888_v11 = vpop.f32.mrb[15].mxu0  ;;  %v230_v22 = vld [vmem:[%s13076_s1 + $0x1e8] sm:$0xff] }
 0x10e   : > { %v8555_v38 = vpop.permute.xlu1 %824  ;;  %v8557_v56 = vpop.permute.xlu0 %819  ;;  %6049 = vrcp.f32 %v3768_v34  ;;  %v3769_v0 = vadd.f32 1.0, %v6028_v46  ;;  %v310_v15 = vld [vmem:[%s13076_s1 + $0x468] sm:$0xff]  ;;  %v3149_v50 = vmul.f32 1.442695, %v2816_v23  ;;  %2208 = vmatprep.mubr.f32.mxu0 %v13372_v59  ;;  %2688 = vmatprep.mubr.f32.mxu1 %v13372_v59  ;;  %v460_v46 = vld [vmem:[%s13077_s2 + $0x418] sm:$0xff] }
 0x10f   : > { %13389 = vst [vmem:[#allocation49_spill] sm:$0xff] %v8553_v35  ;;  %13390 = vst [vmem:[#allocation50_spill] sm:$0xff] %v8555_v38  ;;  %v6030_v45 = vpop.eup %6029  ;;  %1144 = vperm.xlu1 %6014, %v458_v41   ;;  %1139 = vperm.xlu0 %6013, %v457_v7   ;;  %v8567_v24 = vpop.f32.mrb[15].mxu1  ;;  %6051 = vpow2.f32 %v3147_v31  ;;  %v2817_v1 = vsub.f32 0.0, %v8553_v35  ;;  %v459_v41 = vld [vmem:[%s13077_s2 + $0x410] sm:$0xff]  ;;  %v8580_v31 = vadd.f32 %v1888_v11, %v7886_v30 }
 0x110   : > { %13391 = vst [vmem:[#allocation51_spill] sm:$0xff] %v8557_v56  ;;  %v6032_v38 = vpop.eup %6031  ;;  %v4403_v34 = vmul.f32 %v6030_v45, %v8329_v26  ;;  %v1892_v23 = vpop.f32.mrb[16].mxu0  ;;  %6053 = vpow2.f32 %v3149_v50  ;;  %v311_v45 = vld [vmem:[%s13076_s1 + $0x470] sm:$0xff] }
 0x111   : > { %v6034_v7 = vpop.eup %6033  ;;  %v3770_v56 = vadd.f32 1.0, %v6032_v38  ;;  %13392 = vst [vmem:[#allocation52_spill] sm:$0xff] %v8580_v31  ;;  %v8582_v35 = vpop.f32.mrb[16].mxu1  ;;  %v3151_v27 = vmul.f32 1.442695, %v2817_v1  ;;  %v8586_v28 = vadd.f32 %v1892_v23, %v7908_v37  ;;  %5887 = vmatmul.mubr.msk.f32.gmra.mrb[122].mxu0 %vm1297_vm0, %v230_v22  ;;  %5967 = vmatmul.mubr.msk.f32.gmra.mrb[122].mxu1 %vm1297_vm0, %v310_v15  ;;  %6055 = vrcp.f32 %v3769_v0  ;;  %v462_v15 = vld [vmem:[%s13077_s2 + $0x428] sm:$0xff] }
 0x112   : > { %v6036_v53 = vpop.eup %6035  ;;  %v4404_v63 = vmul.f32 %v6034_v7, %v8347_v5  ;;  %v8588_v17 = vpop.permute.xlu1 %834  ;;  %v2818_v26 = vsub.f32 0.0, %v8580_v31  ;;  %v231_v5 = vld [vmem:[%s13076_s1 + $0x1f0] sm:$0xff]  ;;  %2214 = vmatprep.mubr.f32.mxu0 %v13372_v59  ;;  %2694 = vmatprep.mubr.f32.mxu1 %v13372_v59  ;;  %v461_v1 = vld [vmem:[%s13077_s2 + $0x420] sm:$0xff] }
 0x113   : > { %13393 = vst [vmem:[#allocation53_spill] sm:$0xff] %v8586_v28  ;;  %13394 = vst [vmem:[#allocation54_spill] sm:$0xff] %v8588_v17  ;;  %v8590_v20 = vpop.permute.xlu0 %829  ;;  %v6038_v30 = vpop.eup %6037  ;;  %v3771_v38 = vadd.f32 1.0, %v6036_v53  ;;  %1154 = vperm.xlu1 %6014, %v460_v46   ;;  %1149 = vperm.xlu0 %6013, %v459_v41   ;;  %6057 = vpow2.f32 %v3151_v27  ;;  %v2819_v0 = vsub.f32 0.0, %v8586_v28 }
 0x114   : > { %13395 = vst [vmem:[#allocation55_spill] sm:$0xff] %v8590_v20  ;;  %v1894_v11 = vpop.f32.mrb[17].mxu0  ;;  %v8601_v50 = vpop.f32.mrb[17].mxu1  ;;  %6059 = vrcp.f32 %v3770_v56  ;;  %v3153_v41 = vmul.f32 1.442695, %v2818_v26 }
 0x115   : > { %v6040_v22 = vpop.eup %6039  ;;  %v8605_v53 = vadd.f32 %v1894_v11, %v7908_v37  ;;  %v1898_v7 = vpop.f32.mrb[18].mxu0  ;;  %v8617_v37 = vadd.f32 %v4404_v63, %v4403_v34  ;;  %6061 = vrcp.f32 %v3771_v38  ;;  %v3155_v17 = vmul.f32 1.442695, %v2819_v0  ;;  %5888 = vmatmul.mubr.msk.f32.gmra.mrb[124].mxu0 %vm1297_vm0, %v231_v5  ;;  %5968 = vmatmul.mubr.msk.f32.gmra.mrb[124].mxu1 %vm1297_vm0, %v311_v45  ;;  %v312_v5 = vld [vmem:[%s13076_s1 + $0x478] sm:$0xff] }
 0x116   : > { %v6042_v46 = vpop.eup %6041  ;;  %v3772_v27 = vadd.f32 1.0, %v6040_v22  ;;  %v8615_v23 = vpop.f32.mrb[18].mxu1  ;;  %v8621_v28 = vadd.f32 %v1898_v7, %v7906_v36  ;;  %v4405_v63 = vmul.f32 %v6038_v30, %v8361_v13  ;;  %v232_v22 = vld [vmem:[%s13076_s1 + $0x1f8] sm:$0xff]  ;;  %2220 = vmatprep.mubr.f32.mxu0 %v13372_v59  ;;  %2700 = vmatprep.mubr.f32.mxu1 %v13372_v59 }
 0x117   : > { %13396 = vst [vmem:[#allocation56_spill] sm:$0xff] %v8605_v53  ;;  %v6044_v11 = vpop.eup %6043  ;;  %v2820_v20 = vsub.f32 0.0, %v8605_v53  ;;  %v8623_v31 = vpop.permute.xlu1 %844  ;;  %v4406_v34 = vmul.f32 %v6042_v46, %v8379_v44  ;;  %1164 = vperm.xlu1 %6014, %v462_v15   ;;  %1159 = vperm.xlu0 %6013, %v461_v1   ;;  %v464_v30 = vld [vmem:[%s13077_s2 + $0x438] sm:$0xff]  ;;  %v463_v15 = vld [vmem:[%s13077_s2 + $0x430] sm:$0xff] }
 0x118   : > { %13397 = vst [vmem:[#allocation57_spill] sm:$0xff] %v8621_v28  ;;  %13398 = vst [vmem:[#allocation58_spill] sm:$0xff] %v8623_v31  ;;  %v8625_v9 = vpop.permute.xlu0 %839  ;;  %v6046_v56 = vpop.eup %6045  ;;  %6063 = vrcp.f32 %v3772_v27  ;;  %v3773_v38 = vadd.f32 1.0, %v6044_v11  ;;  %v2821_v44 = vsub.f32 0.0, %v8621_v28 }
 0x119   : > { %13399 = vst [vmem:[#allocation59_spill] sm:$0xff] %v8625_v9  ;;  %v1900_v26 = vpop.f32.mrb[19].mxu0  ;;  %v8637_v0 = vpop.f32.mrb[19].mxu1  ;;  %6065 = vpow2.f32 %v3153_v41  ;;  %v3157_v13 = vmul.f32 1.442695, %v2820_v20  ;;  %v4407_v11 = vmul.f32 %v6046_v56, %v8393_v33  ;;  %5889 = vmatmul.mubr.msk.f32.gmra.mrb[126].mxu0 %vm1297_vm0, %v232_v22  ;;  %5969 = vmatmul.mubr.msk.f32.gmra.mrb[126].mxu1 %vm1297_vm0, %v312_v5  ;;  %v313_v33 = vld [vmem:[%s13076_s1 + $0x480] sm:$0xff]  ;;  %v8673_v22 = vadd.f32 %v4406_v34, %v4405_v63 }
 0x11a   : > { %v6048_v45 = vpop.eup %6047  ;;  %6067 = vrcp.f32 %v3773_v38  ;;  %v8649_v27 = vadd.f32 %v1900_v26, %v7906_v36  ;;  %v1904_v20 = vpop.f32.mrb[20].mxu0  ;;  %v3159_v31 = vmul.f32 1.442695, %v2821_v44  ;;  %2226 = vmatprep.mubr.f32.mxu0 %v13372_v59  ;;  %2706 = vmatprep.mubr.f32.mxu1 %v13372_v59  ;;  %v465_v63 = vld [vmem:[%s13077_s2 + $0x440] sm:$0xff] }
 0x11b   : > { %v6050_v1 = vpop.eup %6049  ;;  %v3774_v46 = vadd.f32 1.0, %v6048_v45  ;;  %v8651_v41 = vpop.f32.mrb[20].mxu1  ;;  %6069 = vpow2.f32 %v3155_v17  ;;  %v8655_v9 = vadd.f32 %v1904_v20, %v7928_v43  ;;  %1174 = vperm.xlu1 %6014, %v464_v30   ;;  %1169 = vperm.xlu0 %6013, %v463_v15   ;;  %v233_v17 = vld [vmem:[%s13076_s1 + $0x200] sm:$0xff]  ;;  %v466_v30 = vld [vmem:[%s13077_s2 + $0x448] sm:$0xff] }
 0x11c   : > { %13400 = vst [vmem:[#allocation60_spill] sm:$0xff] %v8649_v27  ;;  %v6052_v7 = vpop.eup %6051  ;;  %v8657_v28 = vpop.permute.xlu1 %854  ;;  %v4408_v36 = vmul.f32 %v6050_v1, %v8411_v14  ;;  %v2822_v26 = vsub.f32 0.0, %v8649_v27  ;;  %6071 = vpow2.f32 %v3157_v13 }
 0x11d   : > { %13401 = vst [vmem:[#allocation61_spill] sm:$0xff] %v8655_v9  ;;  %13402 = vst [vmem:[#allocation62_spill] sm:$0xff] %v8657_v28  ;;  %v8659_v53 = vpop.permute.xlu0 %849  ;;  %v3775_v38 = vadd.f32 1.0, %v6052_v7  ;;  %v1906_v45 = vpop.f32.mrb[21].mxu0  ;;  %v2823_v14 = vsub.f32 0.0, %v8655_v9  ;;  %6073 = vrcp.f32 %v3774_v46  ;;  %5890 = vmatmul.mubr.msk.f32.gmra.mrb[128].mxu0 %vm1297_vm0, %v233_v17  ;;  %5970 = vmatmul.mubr.msk.f32.gmra.mrb[128].mxu1 %vm1297_vm0, %v313_v33 }
 0x11e   : > { %13403 = vst [vmem:[#allocation63_spill] sm:$0xff] %v8659_v53  ;;  %v8671_v56 = vpop.f32.mrb[21].mxu1  ;;  %v6054_v5 = vpop.eup %6053  ;;  %v8677_v44 = vadd.f32 %v1906_v45, %v7928_v43  ;;  %v3161_v15 = vmul.f32 1.442695, %v2822_v26  ;;  %6075 = vpow2.f32 %v3159_v31  ;;  %v234_v31 = vld [vmem:[%s13076_s1 + $0x208] sm:$0xff]  ;;  %v8707_v17 = vadd.f32 %v4408_v36, %v4407_v11  ;;  %2232 = vmatprep.mubr.f32.mxu0 %v13372_v59  ;;  %2712 = vmatprep.mubr.f32.mxu1 %v13372_v59  ;;  %v467_v11 = vld [vmem:[%s13077_s2 + $0x450] sm:$0xff] }
 0x11f   : > { %v6056_v34 = vpop.eup %6055  ;;  %v3776_v13 = vadd.f32 1.0, %v6054_v5  ;;  %v1910_v1 = vpop.f32.mrb[22].mxu0  ;;  %v3163_v7 = vmul.f32 1.442695, %v2823_v14  ;;  %6077 = vrcp.f32 %v3775_v38  ;;  %1184 = vperm.xlu1 %6014, %v466_v30   ;;  %1179 = vperm.xlu0 %6013, %v465_v63   ;;  %v314_v5 = vld [vmem:[%s13076_s1 + $0x488] sm:$0xff]  ;;  %v468_v30 = vld [vmem:[%s13077_s2 + $0x458] sm:$0xff] }
 0x120   : > { %13404 = vst [vmem:[#allocation64_spill] sm:$0xff] %v8677_v44  ;;  %v8687_v20 = vpop.f32.mrb[22].mxu1  ;;  %v6058_v43 = vpop.eup %6057  ;;  %v2824_v45 = vsub.f32 0.0, %v8677_v44  ;;  %v8697_v46 = vadd.f32 %v1910_v1, %v7926_v42  ;;  %6079 = vpow2.f32 %v3161_v15 }
 0x121   : > { %v8690_v28 = vpop.permute.xlu1 %864  ;;  %v8692_v53 = vpop.permute.xlu0 %859  ;;  %v3777_v38 = vadd.f32 1.0, %v6058_v43  ;;  %6081 = vrcp.f32 %v3776_v13  ;;  %5891 = vmatmul.mubr.msk.f32.gmra.mrb[130].mxu0 %vm1297_vm0, %v234_v31  ;;  %5971 = vmatmul.mubr.msk.f32.gmra.mrb[130].mxu1 %vm1297_vm0, %v314_v5  ;;  %v235_v13 = vld [vmem:[%s13076_s1 + $0x210] sm:$0xff] }
 0x122   : > { %13405 = vst [vmem:[#allocation65_spill] sm:$0xff] %v8690_v28  ;;  %13406 = vst [vmem:[#allocation66_spill] sm:$0xff] %v8692_v53  ;;  %v6060_v9 = vpop.eup %6059  ;;  %v1912_v26 = vpop.f32.mrb[23].mxu0  ;;  %v3165_v1 = vmul.f32 1.442695, %v2824_v45  ;;  %v2825_v63 = vsub.f32 0.0, %v8697_v46  ;;  %v4409_v45 = vmul.f32 %v6056_v34, %v8425_v62  ;;  %6083 = vpow2.f32 %v3163_v7  ;;  %2238 = vmatprep.mubr.f32.mxu0 %v13372_v59  ;;  %2718 = vmatprep.mubr.f32.mxu1 %v13372_v59 }
 0x123   : > { %13407 = vst [vmem:[#allocation67_spill] sm:$0xff] %v8697_v46  ;;  %v8705_v14 = vpop.f32.mrb[23].mxu1  ;;  %v6062_v33 = vpop.eup %6061  ;;  %v8710_v28 = vadd.f32 %v1912_v26, %v7926_v42  ;;  %v4410_v62 = vmul.f32 %v6060_v9, %v8443_v58  ;;  %1194 = vperm.xlu1 %6014, %v468_v30   ;;  %1189 = vperm.xlu0 %6013, %v467_v11   ;;  %v315_v31 = vld [vmem:[%s13076_s1 + $0x490] sm:$0xff]  ;;  %v470_v9 = vld [vmem:[%s13077_s2 + $0x468] sm:$0xff]  ;;  %v469_v58 = vld [vmem:[%s13077_s2 + $0x460] sm:$0xff] }
 0x124   : > { %v6064_v36 = vpop.eup %6063  ;;  %v1916_v15 = vpop.f32.mrb[24].mxu0  ;;  %6085 = vpow2.f32 %v3165_v1  ;;  %v3167_v7 = vmul.f32 1.442695, %v2825_v63 }
 0x125   : > { %13408 = vst [vmem:[#allocation68_spill] sm:$0xff] %v8710_v28  ;;  %v8721_v43 = vpop.f32.mrb[24].mxu1  ;;  %v6066_v42 = vpop.eup %6065  ;;  %v2826_v26 = vsub.f32 0.0, %v8710_v28  ;;  %v8726_v53 = vadd.f32 %v1916_v15, %v7948_v49  ;;  %6087 = vrcp.f32 %v3777_v38  ;;  %v4411_v38 = vmul.f32 %v6062_v33, %v8457_v51  ;;  %5892 = vmatmul.mubr.msk.f32.gmra.mrb[132].mxu0 %vm1297_vm0, %v235_v13  ;;  %5972 = vmatmul.mubr.msk.f32.gmra.mrb[132].mxu1 %vm1297_vm0, %v315_v31 }
 0x126   : > { %v8728_v44 = vpop.permute.xlu1 %874  ;;  %v8730_v27 = vpop.permute.xlu0 %869  ;;  %v3778_v34 = vadd.f32 1.0, %v6066_v42  ;;  %v4412_v63 = vmul.f32 %v6064_v36, %v8475_v16  ;;  %v316_v36 = vld [vmem:[%s13076_s1 + $0x498] sm:$0xff]  ;;  %2244 = vmatprep.mubr.f32.mxu0 %v13372_v59  ;;  %2724 = vmatprep.mubr.f32.mxu1 %v13372_v59 }
 0x127   : > { %13409 = vst [vmem:[#allocation69_spill] sm:$0xff] %v8726_v53  ;;  %13410 = vst [vmem:[#allocation70_spill] sm:$0xff] %v8728_v44  ;;  %v8737_v46 = vpop.eup %6067  ;;  %v1918_v15 = vpop.f32.mrb[25].mxu0  ;;  %v2827_v28 = vsub.f32 0.0, %v8726_v53  ;;  %1204 = vperm.xlu1 %6014, %v470_v9   ;;  %1199 = vperm.xlu0 %6013, %v469_v58   ;;  %v472_v9 = vld [vmem:[%s13077_s2 + $0x478] sm:$0xff]  ;;  %v471_v58 = vld [vmem:[%s13077_s2 + $0x470] sm:$0xff] }
 0x128   : > { %13411 = vst [vmem:[#allocation71_spill] sm:$0xff] %v8730_v27  ;;  %13412 = vst [vmem:[#allocation72_spill] sm:$0xff] %v8737_v46  ;;  %v8743_v44 = vpop.f32.mrb[25].mxu1  ;;  %v6070_v5 = vpop.eup %6069  ;;  %v3169_v27 = vmul.f32 1.442695, %v2826_v26  ;;  %v8747_v46 = vadd.f32 %v1918_v15, %v7948_v49  ;;  %6089 = vrcp.f32 %v3778_v34 }
 0x129   : > { %v3779_v1 = vadd.f32 1.0, %v6070_v5  ;;  %v1922_v30 = vpop.f32.mrb[26].mxu0  ;;  %v8758_v11 = vpop.f32.mrb[26].mxu1  ;;  %6091 = vpow2.f32 %v3167_v7  ;;  %v3171_v42 = vmul.f32 1.442695, %v2827_v28  ;;  %v236_v28 = vld [vmem:[%s13076_s1 + $0x218] sm:$0xff]  ;;  %v8781_v7 = vadd.f32 %v4410_v62, %v4409_v45  ;;  %5973 = vmatmul.mubr.msk.f32.gmra.mrb[134].mxu1 %vm1297_vm0, %v316_v36 }
 0x12a   : > { %13413 = vst [vmem:[#allocation73_spill] sm:$0xff] %v8747_v46  ;;  %v6072_v49 = vpop.eup %6071  ;;  %v2828_v26 = vsub.f32 0.0, %v8747_v46  ;;  %v8762_v15 = vpop.permute.xlu1 %884  ;;  %v8771_v34 = vadd.f32 %v1922_v30, %v7946_v48  ;;  %5893 = vmatmul.mubr.msk.f32.gmra.mrb[134].mxu0 %vm1297_vm0, %v236_v28  ;;  %v8819_v28 = vadd.f32 %v4412_v63, %v4411_v38  ;;  %2730 = vmatprep.mubr.f32.mxu1 %v13372_v59 }
 0x12b   : > { %13414 = vst [vmem:[#allocation74_spill] sm:$0xff] %v8762_v15  ;;  %v8764_v53 = vpop.permute.xlu0 %879  ;;  %v8768_v51 = vpop.eup %6073  ;;  %6093 = vrcp.f32 %v3779_v1  ;;  %v3780_v33 = vadd.f32 1.0, %v6072_v49  ;;  %1214 = vperm.xlu1 %6014, %v472_v9   ;;  %1209 = vperm.xlu0 %6013, %v471_v58   ;;  %v474_v9 = vld [vmem:[%s13077_s2 + $0x488] sm:$0xff]  ;;  %v473_v58 = vld [vmem:[%s13077_s2 + $0x480] sm:$0xff] }
 0x12c   : > { %13415 = vst [vmem:[#allocation75_spill] sm:$0xff] %v8764_v53  ;;  %13416 = vst [vmem:[#allocation76_spill] sm:$0xff] %v8768_v51  ;;  %v1924_v16 = vpop.f32.mrb[27].mxu0  ;;  %v8779_v13 = vpop.f32.mrb[27].mxu1  ;;  %6095 = vpow2.f32 %v3169_v27  ;;  %v3173_v5 = vmul.f32 1.442695, %v2828_v26  ;;  %2250 = vmatprep.mubr.f32.mxu0 %v13372_v59 }
 0x12d   : > { %13417 = vst [vmem:[#allocation77_spill] sm:$0xff] %v8771_v34  ;;  %v6076_v31 = vpop.eup %6075  ;;  %v8784_v1 = vadd.f32 %v1924_v16, %v7946_v48  ;;  %6097 = vrcp.f32 %v3780_v33  ;;  %v2829_v62 = vsub.f32 0.0, %v8771_v34  ;;  %v1928_v48 = vpop.f32.mrb[28].mxu0  ;;  %v237_v33 = vld [vmem:[%s13076_s1 + $0x220] sm:$0xff] }
 0x12e   : > { %v8794_v45 = vpop.eup %6077  ;;  %v3781_v27 = vadd.f32 1.0, %v6076_v31  ;;  %v8797_v30 = vpop.f32.mrb[28].mxu1  ;;  %6099 = vpow2.f32 %v3171_v42  ;;  %v8801_v16 = vadd.f32 %v1928_v48, %v7968_v55  ;;  %v317_v48 = vld [vmem:[%s13076_s1 + $0x4a0] sm:$0xff]  ;;  %5894 = vmatmul.mubr.msk.f32.gmra.mrb[136].mxu0 %vm1297_vm0, %v237_v33  ;;  %v238_v33 = vld [vmem:[%s13076_s1 + $0x228] sm:$0xff] }
 0x12f   : > { %13418 = vst [vmem:[#allocation78_spill] sm:$0xff] %v8784_v1  ;;  %13419 = vst [vmem:[#allocation79_spill] sm:$0xff] %v8794_v45  ;;  %v6080_v49 = vpop.eup %6079  ;;  %v2830_v26 = vsub.f32 0.0, %v8784_v1  ;;  %v8803_v15 = vpop.permute.xlu1 %894  ;;  %v3175_v1 = vmul.f32 1.442695, %v2829_v62  ;;  %5974 = vmatmul.mubr.msk.f32.gmra.mrb[136].mxu1 %vm1297_vm0, %v317_v48  ;;  %1224 = vperm.xlu1 %6014, %v474_v9   ;;  %v476_v9 = vld [vmem:[%s13077_s2 + $0x498] sm:$0xff] }
 0x130   : > { %13420 = vst [vmem:[#allocation80_spill] sm:$0xff] %v8801_v16  ;;  %13421 = vst [vmem:[#allocation81_spill] sm:$0xff] %v8803_v15  ;;  %v8805_v53 = vpop.permute.xlu0 %889  ;;  %v8812_v31 = vpop.eup %6081  ;;  %6101 = vrcp.f32 %v3781_v27  ;;  %v3782_v42 = vadd.f32 1.0, %v6080_v49  ;;  %1219 = vperm.xlu0 %6013, %v473_v58   ;;  %2256 = vmatprep.mubr.f32.mxu0 %v13372_v59  ;;  %v475_v58 = vld [vmem:[%s13077_s2 + $0x490] sm:$0xff] }
 0x131   : > { %13422 = vst [vmem:[#allocation82_spill] sm:$0xff] %v8805_v53  ;;  %13423 = vst [vmem:[#allocation83_spill] sm:$0xff] %v8812_v31  ;;  %v1930_v34 = vpop.f32.mrb[29].mxu0  ;;  %v8817_v15 = vpop.f32.mrb[29].mxu1  ;;  %6103 = vpow2.f32 %v3173_v5  ;;  %v2831_v53 = vsub.f32 0.0, %v8801_v16  ;;  %2736 = vmatprep.mubr.f32.mxu1 %v13372_v59 }
 0x132   : > { %13424 = vst [vmem:[#allocation84_spill] sm:$0xff] %v8817_v15  ;;  %v6084_v36 = vpop.eup %6083  ;;  %6105 = vrcp.f32 %v3782_v42  ;;  %v3177_v63 = vmul.f32 1.442695, %v2830_v26  ;;  %v8831_v5 = vadd.f32 %v1930_v34, %v7968_v55  ;;  %v1934_v62 = vpop.f32.mrb[30].mxu0  ;;  %v318_v42 = vld [vmem:[%s13076_s1 + $0x4a8] sm:$0xff]  ;;  %5895 = vmatmul.mubr.msk.f32.gmra.mrb[138].mxu0 %vm1297_vm0, %v238_v33 }
 0x133   : > { %v6086_v27 = vpop.eup %6085  ;;  %v3783_v38 = vadd.f32 1.0, %v6084_v36  ;;  %v8833_v49 = vpop.f32.mrb[30].mxu1  ;;  %6107 = vpow2.f32 %v3175_v1  ;;  %v3179_v31 = vmul.f32 1.442695, %v2831_v53  ;;  %v8838_v45 = vadd.f32 %v1934_v62, %v7966_v54  ;;  %5975 = vmatmul.mubr.msk.f32.gmra.mrb[138].mxu1 %vm1297_vm0, %v318_v42  ;;  %1234 = vperm.xlu1 %6014, %v476_v9  }
 0x134   : > { %13425 = vst [vmem:[#allocation85_spill] sm:$0xff] %v8831_v5  ;;  %v8835_v16 = vpop.eup %6087  ;;  %v3784_v46 = vadd.f32 1.0, %v6086_v27  ;;  %v905_v51 = vpop.permute.xlu1 %904  ;;  %v2832_v55 = vsub.f32 0.0, %v8831_v5  ;;  %1229 = vperm.xlu0 %6013, %v475_v58   ;;  %2262 = vmatprep.mubr.f32.mxu0 %v13372_v59  ;;  %v478_v58 = vld [vmem:[%s13077_s2 + $0x4a8] sm:$0xff] }
 0x135   : > { %13426 = vst [vmem:[#allocation86_spill] sm:$0xff] %v8835_v16  ;;  %13427 = vst [vmem:[#allocation87_spill] sm:$0xff] %v8838_v45  ;;  %v900_v15 = vpop.permute.xlu0 %899  ;;  %v8842_v26 = vpop.eup %6089  ;;  %6109 = vrcp.f32 %v3783_v38  ;;  %v8846_v34 = vadd.f32 %v8357_v29, %v905_v51  ;;  %v2833_v29 = vsub.f32 0.0, %v8838_v45  ;;  %2742 = vmatprep.mubr.f32.mxu1 %v13372_v59 }
 0x136   : > { %13428 = vst [vmem:[#allocation88_spill] sm:$0xff] %v8842_v26  ;;  %v8849_v1 = vadd.f32 %v8326_v21, %v900_v15  ;;  %v1936_v53 = vpop.f32.mrb[31].mxu0  ;;  %v8857_v48 = vpop.f32.mrb[31].mxu1  ;;  %6111 = vrcp.f32 %v3784_v46  ;;  %v8861_v21 = vadd.f32 %v8343_v52, %v900_v15  ;;  %v3181_v38 = vmul.f32 1.442695, %v2832_v55  ;;  %v239_v55 = vld [vmem:[%s13076_s1 + $0x230] sm:$0xff] }
 0x137   : > { %13429 = vst [vmem:[#allocation89_spill] sm:$0xff] %v8846_v34  ;;  %v6092_v36 = vpop.eup %6091  ;;  %6113 = vpow2.f32 %v3177_v63  ;;  %v2965_v52 = vsub.f32 0.0, %v8846_v34  ;;  %v1940_v15 = vpop.f32.mrb[32].mxu0  ;;  %v3183_v5 = vmul.f32 1.442695, %v2833_v29  ;;  %5896 = vmatmul.mubr.msk.f32.gmra.mrb[140].mxu0 %vm1297_vm0, %v239_v55  ;;  %1244 = vperm.xlu1 %6014, %v478_v58   ;;  %v479_v58 = vld [vmem:[%s13077_s2 + $0x4b0] sm:$0xff] }
 0x138   : > { %13430 = vst [vmem:[#allocation90_spill] sm:$0xff] %v8849_v1  ;;  %13431 = vst [vmem:[#allocation91_spill] sm:$0xff] %v8861_v21  ;;  %v8871_v27 = vpop.eup %6093  ;;  %v3785_v46 = vadd.f32 1.0, %v6092_v36  ;;  %v8874_v62 = vpop.f32.mrb[32].mxu1  ;;  %6115 = vpow2.f32 %v3179_v31  ;;  %v2963_v26 = vsub.f32 0.0, %v8849_v1  ;;  %v319_v31 = vld [vmem:[%s13076_s1 + $0x4b0] sm:$0xff]  ;;  %2268 = vmatprep.mubr.f32.mxu0 %v13372_v59 }
 0x139   : > { %13432 = vst [vmem:[#allocation92_spill] sm:$0xff] %v8871_v27  ;;  %13433 = vst [vmem:[#allocation93_spill] sm:$0xff] %v8874_v62  ;;  %v6096_v45 = vpop.eup %6095  ;;  %v8881_v63 = vpop.f32.mrb[33].mxu0  ;;  %v3447_v42 = vmul.f32 1.442695, %v2965_v52  ;;  %5976 = vmatmul.mubr.msk.f32.gmra.mrb[140].mxu1 %vm1297_vm0, %v319_v31  ;;  %v480_v31 = vld [vmem:[%s13077_s2 + $0x4b8] sm:$0xff] }
 0x13a   : > { %v8879_v16 = vpop.eup %6097  ;;  %6117 = vrcp.f32 %v3785_v46  ;;  %v3786_v36 = vadd.f32 1.0, %v6096_v45  ;;  %v8889_v29 = vpop.f32.mrb[33].mxu1  ;;  %v2964_v46 = vsub.f32 0.0, %v8861_v21  ;;  %v8893_v45 = vadd.f32 %v1936_v53, %v7966_v54  ;;  %2748 = vmatprep.mubr.f32.mxu1 %v13372_v59 }
 0x13b   : > { %13434 = vst [vmem:[#allocation94_spill] sm:$0xff] %v8879_v16  ;;  %13435 = vst [vmem:[#allocation95_spill] sm:$0xff] %v8889_v29  ;;  %v6100_v33 = vpop.eup %6099  ;;  %6119 = vpow2.f32 %v3181_v38  ;;  %v8895_v9 = vpop.permute.xlu1 %914  ;;  %v477_v38 = vld [vmem:[%s13077_s2 + $0x4a0] sm:$0xff]  ;;  %v8908_v54 = vadd.f32 %v8375_v40, %v905_v51  ;;  %v3443_v16 = vmul.f32 1.442695, %v2963_v26  ;;  %v8916_v29 = vadd.f32 %v1940_v15, %v7988_v61  ;;  %v320_v26 = vld [vmem:[%s13076_s1 + $0x4b8] sm:$0xff]  ;;  %1254 = vperm.xlu1 %6014, %v480_v31  }
 0x13c   : > { %13436 = vst [vmem:[#allocation96_spill] sm:$0xff] %v8893_v45  ;;  %v8905_v52 = vpop.eup %6101  ;;  %6121 = vrcp.f32 %v3786_v36  ;;  %v3787_v21 = vadd.f32 1.0, %v6100_v33  ;;  %v8910_v53 = vpop.f32.mrb[34].mxu0  ;;  %v2834_v27 = vsub.f32 0.0, %v8893_v45  ;;  %1239 = vperm.xlu0 %6013, %v477_v38   ;;  %v482_v31 = vld [vmem:[%s13077_s2 + $0x4c8] sm:$0xff] }
 0x13d   : > { %13437 = vst [vmem:[#allocation97_spill] sm:$0xff] %v8905_v52  ;;  %13438 = vst [vmem:[#allocation98_spill] sm:$0xff] %v8908_v54  ;;  %v8912_v1 = vpop.f32.mrb[34].mxu1  ;;  %v6104_v34 = vpop.eup %6103  ;;  %6123 = vpow2.f32 %v3183_v5  ;;  %v2966_v51 = vsub.f32 0.0, %v8908_v54  ;;  %v240_v5 = vld [vmem:[%s13076_s1 + $0x238] sm:$0xff]  ;;  %5977 = vmatmul.mubr.msk.f32.gmra.mrb[142].mxu1 %vm1297_vm0, %v320_v26 }
 0x13e   : > { %13439 = vst [vmem:[#allocation99_spill] sm:$0xff] %v8916_v29  ;;  %v910_v62 = vpop.permute.xlu0 %909  ;;  %v8920_v36 = vpop.eup %6105  ;;  %6125 = vrcp.f32 %v3787_v21  ;;  %v3788_v40 = vadd.f32 1.0, %v6104_v34  ;;  %v3445_v21 = vmul.f32 1.442695, %v2964_v46  ;;  %v8935_v34 = vadd.f32 %v8421_v57, %v8895_v9  ;;  %5897 = vmatmul.mubr.msk.f32.gmra.mrb[142].mxu0 %vm1297_vm0, %v240_v5  ;;  %2754 = vmatprep.mubr.f32.mxu1 %v13372_v59 }
 0x13f   : > { %13440 = vst [vmem:[#allocation100_spill] sm:$0xff] %v8920_v36  ;;  %v8923_v33 = vpop.f32.mrb[35].mxu0  ;;  %v8931_v15 = vpop.f32.mrb[35].mxu1  ;;  %6127 = vpow2.f32 %v3447_v42  ;;  %v3185_v46 = vmul.f32 1.442695, %v2834_v27  ;;  %v2835_v36 = vsub.f32 0.0, %v8916_v29  ;;  %v8955_v52 = vadd.f32 %v8389_v32, %v910_v62  ;;  %2274 = vmatprep.mubr.f32.mxu0 %v13372_v59  ;;  %1264 = vperm.xlu1 %6014, %v482_v31  }
 0x140   : > { %v6108_v55 = vpop.eup %6107  ;;  %13441 = vst [vmem:[#allocation101_spill] sm:$0xff] %v8935_v34  ;;  %6129 = vrcp.f32 %v3788_v40  ;;  %v8947_v54 = vpop.f32.mrb[36].mxu0  ;;  %v3449_v40 = vmul.f32 1.442695, %v2966_v51  ;;  %1249 = vperm.xlu0 %6013, %v479_v58   ;;  %v321_v32 = vld [vmem:[%s13076_s1 + $0x4c0] sm:$0xff]  ;;  %v2969_v26 = vsub.f32 0.0, %v8935_v34  ;;  %v8971_v51 = vadd.f32 %v8407_v6, %v910_v62 }
 0x141   : > { %v8945_v38 = vpop.eup %6109  ;;  %v3789_v42 = vadd.f32 1.0, %v6108_v55  ;;  %v8949_v57 = vpop.f32.mrb[36].mxu1  ;;  %6131 = vpow2.f32 %v3443_v16  ;;  %13445 = vst [vmem:[#allocation105_spill] sm:$0xff] %v8955_v52  ;;  %v241_v16 = vld [vmem:[%s13076_s1 + $0x240] sm:$0xff]  ;;  %v3187_v34 = vmul.f32 1.442695, %v2835_v36  ;;  %5978 = vmatmul.mubr.msk.f32.gmra.mrb[144].mxu1 %vm1297_vm0, %v321_v32 }
 0x142   : > { %13442 = vst [vmem:[#allocation102_spill] sm:$0xff] %v8945_v38  ;;  %13443 = vst [vmem:[#allocation103_spill] sm:$0xff] %v8949_v57  ;;  %v8951_v45 = vpop.eup %6111  ;;  %v8959_v27 = vpop.f32.mrb[37].mxu0  ;;  %v481_v58 = vld [vmem:[%s13077_s2 + $0x4c0] sm:$0xff]  ;;  %5898 = vmatmul.mubr.msk.f32.gmra.mrb[144].mxu0 %vm1297_vm0, %v241_v16  ;;  %v3455_v32 = vmul.f32 1.442695, %v2969_v26  ;;  %2760 = vmatprep.mubr.f32.mxu1 %v13372_v59 }
 0x143   : > { %13444 = vst [vmem:[#allocation104_spill] sm:$0xff] %v8951_v45  ;;  %v6114_v38 = vpop.eup %6113  ;;  %6133 = vrcp.f32 %v3789_v42  ;;  %v8967_v55 = vpop.f32.mrb[37].mxu1  ;;  %13447 = vst [vmem:[#allocation107_spill] sm:$0xff] %v8971_v51  ;;  %v2967_v45 = vsub.f32 0.0, %v8955_v52  ;;  %2280 = vmatprep.mubr.f32.mxu0 %v13372_v59  ;;  %v484_v31 = vld [vmem:[%s13077_s2 + $0x4d8] sm:$0xff] }
 0x144   : > { %13446 = vst [vmem:[#allocation106_spill] sm:$0xff] %v8967_v55  ;;  %v6116_v5 = vpop.eup %6115  ;;  %v3790_v29 = vadd.f32 1.0, %v6114_v38  ;;  %6135 = vpow2.f32 %v3445_v21  ;;  %v8983_v38 = vpop.f32.mrb[38].mxu0  ;;  %v8990_v55 = vadd.f32 %v8881_v63, %v7988_v61  ;;  %1259 = vperm.xlu0 %6013, %v481_v58   ;;  %v242_v61 = vld [vmem:[%s13076_s1 + $0x248] sm:$0xff]  ;;  %v483_v58 = vld [vmem:[%s13077_s2 + $0x4d0] sm:$0xff]  ;;  %1274 = vperm.xlu1 %6014, %v484_v31  }
 0x145   : > { %v8981_v42 = vpop.eup %6117  ;;  %v3791_v21 = vadd.f32 1.0, %v6116_v5  ;;  %6137 = vpow2.f32 %v3185_v46  ;;  %v8985_v6 = vpop.f32.mrb[38].mxu1  ;;  %v8998_v5 = vadd.f32 %v8439_v4, %v8895_v9  ;;  %v322_v63 = vld [vmem:[%s13076_s1 + $0x4c8] sm:$0xff]  ;;  %v2968_v4 = vsub.f32 0.0, %v8971_v51 }
 0x146   : > { %13448 = vst [vmem:[#allocation108_spill] sm:$0xff] %v8981_v42  ;;  %13449 = vst [vmem:[#allocation109_spill] sm:$0xff] %v8985_v6  ;;  %v6120_v62 = vpop.eup %6119  ;;  %6139 = vrcp.f32 %v3790_v29  ;;  %v9000_v29 = vpop.f32.mrb[39].mxu0  ;;  %v3451_v52 = vmul.f32 1.442695, %v2967_v45  ;;  %5899 = vmatmul.mubr.msk.f32.gmra.mrb[146].mxu0 %vm1297_vm0, %v242_v61  ;;  %5979 = vmatmul.mubr.msk.f32.gmra.mrb[146].mxu1 %vm1297_vm0, %v322_v63  ;;  %v243_v45 = vld [vmem:[%s13076_s1 + $0x250] sm:$0xff] }
 0x147   : > { %13450 = vst [vmem:[#allocation110_spill] sm:$0xff] %v8990_v55  ;;  %v8994_v42 = vpop.eup %6121  ;;  %6141 = vrcp.f32 %v3791_v21  ;;  %v3792_v46 = vadd.f32 1.0, %v6120_v62  ;;  %13452 = vst [vmem:[#allocation112_spill] sm:$0xff] %v8998_v5  ;;  %v9008_v36 = vpop.f32.mrb[39].mxu1  ;;  %v3453_v63 = vmul.f32 1.442695, %v2968_v4  ;;  %2286 = vmatprep.mubr.f32.mxu0 %v13372_v59  ;;  %2766 = vmatprep.mubr.f32.mxu1 %v13372_v59 }
 0x148   : > { %13451 = vst [vmem:[#allocation111_spill] sm:$0xff] %v8994_v42  ;;  %13453 = vst [vmem:[#allocation113_spill] sm:$0xff] %v9008_v36  ;;  %v6124_v16 = vpop.eup %6123  ;;  %6143 = vpow2.f32 %v3449_v40  ;;  %v9011_v9 = vpop.permute.xlu1 %924  ;;  %v2836_v42 = vsub.f32 0.0, %v8990_v55  ;;  %v9030_v36 = vadd.f32 %v8910_v53, %v7986_v60  ;;  %1269 = vperm.xlu0 %6013, %v483_v58   ;;  %v323_v53 = vld [vmem:[%s13076_s1 + $0x4d0] sm:$0xff]  ;;  %v486_v31 = vld [vmem:[%s13077_s2 + $0x4e8] sm:$0xff] }
 0x149   : > { %v9021_v21 = vpop.eup %6125  ;;  %6145 = vrcp.f32 %v3792_v46  ;;  %v3793_v40 = vadd.f32 1.0, %v6124_v16  ;;  %v9023_v26 = vpop.f32.mrb[40].mxu0  ;;  %v485_v58 = vld [vmem:[%s13077_s2 + $0x4e0] sm:$0xff]  ;;  %1284 = vperm.xlu1 %6014, %v486_v31   ;;  %v487_v31 = vld [vmem:[%s13077_s2 + $0x4f0] sm:$0xff] }
 0x14a   : > { %13454 = vst [vmem:[#allocation114_spill] sm:$0xff] %v9021_v21  ;;  %v9025_v62 = vpop.f32.mrb[40].mxu1  ;;  %v6128_v51 = vpop.eup %6127  ;;  %6147 = vpow2.f32 %v3187_v34  ;;  %13456 = vst [vmem:[#allocation116_spill] sm:$0xff] %v9030_v36  ;;  %v2970_v21 = vsub.f32 0.0, %v8998_v5  ;;  %v3189_v55 = vmul.f32 1.442695, %v2836_v42  ;;  %5900 = vmatmul.mubr.msk.f32.gmra.mrb[148].mxu0 %vm1297_vm0, %v243_v45  ;;  %5980 = vmatmul.mubr.msk.f32.gmra.mrb[148].mxu1 %vm1297_vm0, %v323_v53 }
 0x14b   : > { %13455 = vst [vmem:[#allocation115_spill] sm:$0xff] %v9025_v62  ;;  %v920_v57 = vpop.permute.xlu0 %919  ;;  %v9034_v46 = vpop.eup %6129  ;;  %6149 = vrcp.f32 %v3793_v40  ;;  %v3925_v16 = vadd.f32 1.0, %v6128_v51  ;;  %v9049_v51 = vadd.f32 %v8485_v18, %v9011_v9  ;;  %2292 = vmatprep.mubr.f32.mxu0 %v13372_v59  ;;  %2772 = vmatprep.mubr.f32.mxu1 %v13372_v59 }
 0x14c   : > { %13457 = vst [vmem:[#allocation117_spill] sm:$0xff] %v9034_v46  ;;  %v9037_v62 = vpop.f32.mrb[41].mxu0  ;;  %v9045_v34 = vpop.f32.mrb[41].mxu1  ;;  %6151 = vpow2.f32 %v3455_v32  ;;  %v2837_v46 = vsub.f32 0.0, %v9030_v36  ;;  %1279 = vperm.xlu0 %6013, %v485_v58  }
 0x14d   : > { %13458 = vst [vmem:[#allocation118_spill] sm:$0xff] %v9045_v34  ;;  %v6132_v61 = vpop.eup %6131  ;;  %13459 = vst [vmem:[#allocation119_spill] sm:$0xff] %v9049_v51  ;;  %6153 = vrcp.f32 %v3925_v16  ;;  %v9061_v4 = vpop.f32.mrb[42].mxu0  ;;  %v9067_v34 = vadd.f32 %v8453_v19, %v920_v57  ;;  %v244_v16 = vld [vmem:[%s13076_s1 + $0x258] sm:$0xff]  ;;  %v2973_v53 = vsub.f32 0.0, %v9049_v51  ;;  %v9104_v51 = vadd.f32 %v8923_v33, %v7986_v60  ;;  %v245_v60 = vld [vmem:[%s13076_s1 + $0x260] sm:$0xff] }
 0x14e   : > { %v9059_v40 = vpop.eup %6133  ;;  %v3923_v32 = vadd.f32 1.0, %v6132_v61  ;;  %v9063_v18 = vpop.f32.mrb[42].mxu1  ;;  %6155 = vpow2.f32 %v3451_v52  ;;  %v324_v19 = vld [vmem:[%s13076_s1 + $0x4d8] sm:$0xff]  ;;  %5901 = vmatmul.mubr.msk.f32.gmra.mrb[150].mxu0 %vm1297_vm0, %v244_v16  ;;  %v325_v33 = vld [vmem:[%s13076_s1 + $0x4e0] sm:$0xff] }
 0x14f   : > { %13460 = vst [vmem:[#allocation120_spill] sm:$0xff] %v9059_v40  ;;  %13461 = vst [vmem:[#allocation121_spill] sm:$0xff] %v9063_v18  ;;  %v6136_v5 = vpop.eup %6135  ;;  %v3457_v18 = vmul.f32 1.442695, %v2970_v21  ;;  %v9074_v6 = vpop.f32.mrb[43].mxu0  ;;  %v488_v21 = vld [vmem:[%s13077_s2 + $0x4f8] sm:$0xff]  ;;  %5981 = vmatmul.mubr.msk.f32.gmra.mrb[150].mxu1 %vm1297_vm0, %v324_v19  ;;  %2298 = vmatprep.mubr.f32.mxu0 %v13372_v59 }
 0x150   : > { %13462 = vst [vmem:[#allocation122_spill] sm:$0xff] %v9067_v34  ;;  %v6138_v61 = vpop.eup %6137  ;;  %v3924_v40 = vadd.f32 1.0, %v6136_v5  ;;  %6157 = vrcp.f32 %v3923_v32  ;;  %v9079_v52 = vpop.f32.mrb[43].mxu1  ;;  %v9085_v5 = vadd.f32 %v8471_v47, %v920_v57  ;;  %v3191_v57 = vmul.f32 1.442695, %v2837_v46  ;;  %13467 = vst [vmem:[#allocation127_spill] sm:$0xff] %v9104_v51  ;;  %1294 = vperm.xlu1 %6014, %v488_v21   ;;  %1289 = vperm.xlu0 %6013, %v487_v31  }
 0x151   : > { %v9081_v42 = vpop.eup %6139  ;;  %v3794_v45 = vadd.f32 1.0, %v6138_v61  ;;  %6159 = vpow2.f32 %v3453_v63  ;;  %v9097_v63 = vpop.f32.mrb[44].mxu0  ;;  %v2971_v61 = vsub.f32 0.0, %v9067_v34  ;;  %2778 = vmatprep.mubr.f32.mxu1 %v13372_v59  ;;  %v9133_v31 = vadd.f32 %v8947_v54, %v8008_v3 }
 0x152   : > { %13463 = vst [vmem:[#allocation123_spill] sm:$0xff] %v9081_v42  ;;  %13464 = vst [vmem:[#allocation124_spill] sm:$0xff] %v9085_v5  ;;  %v9095_v58 = vpop.eup %6141  ;;  %6161 = vrcp.f32 %v3924_v40  ;;  %v9099_v32 = vpop.f32.mrb[44].mxu1  ;;  %v2838_v34 = vsub.f32 0.0, %v9104_v51  ;;  %5902 = vmatmul.mubr.msk.f32.gmra.mrb[152].mxu0 %vm1297_vm0, %v245_v60 }
 0x153   : > { %13465 = vst [vmem:[#allocation125_spill] sm:$0xff] %v9095_v58  ;;  %13466 = vst [vmem:[#allocation126_spill] sm:$0xff] %v9099_v32  ;;  %v6144_v47 = vpop.eup %6143  ;;  %6163 = vrcp.f32 %v3794_v45  ;;  %v9112_v58 = vadd.f32 %v8503_v12, %v9011_v9  ;;  %v9114_v45 = vpop.f32.mrb[45].mxu0  ;;  %v2972_v12 = vsub.f32 0.0, %v9085_v5  ;;  %v3459_v5 = vmul.f32 1.442695, %v2971_v61  ;;  %5982 = vmatmul.mubr.msk.f32.gmra.mrb[152].mxu1 %vm1297_vm0, %v325_v33  ;;  %2304 = vmatprep.mubr.f32.mxu0 %v13372_v59 }
 0x154   : > { %v9108_v36 = vpop.eup %6145  ;;  %v3926_v40 = vadd.f32 1.0, %v6144_v47  ;;  %6165 = vpow2.f32 %v3189_v55  ;;  %v9122_v46 = vpop.f32.mrb[45].mxu1  ;;  %v3463_v55 = vmul.f32 1.442695, %v2973_v53  ;;  %13472 = vst [vmem:[#allocation132_spill] sm:$0xff] %v9133_v31  ;;  %2784 = vmatprep.mubr.f32.mxu1 %v13372_v59  ;;  %v326_v61 = vld [vmem:[%s13076_s1 + $0x4e8] sm:$0xff] }
 0x155   : > { %13468 = vst [vmem:[#allocation128_spill] sm:$0xff] %v9108_v36  ;;  %13469 = vst [vmem:[#allocation129_spill] sm:$0xff] %v9112_v58  ;;  %v6148_v16 = vpop.eup %6147  ;;  %6167 = vpow2.f32 %v3457_v18  ;;  %v9125_v9 = vpop.permute.xlu1 %934  ;;  %v2974_v54 = vsub.f32 0.0, %v9112_v58 }
 0x156   : > { %13470 = vst [vmem:[#allocation130_spill] sm:$0xff] %v9122_v46  ;;  %v9129_v19 = vpop.eup %6149  ;;  %6169 = vrcp.f32 %v3926_v40  ;;  %v3795_v21 = vadd.f32 1.0, %v6148_v16  ;;  %v9135_v47 = vpop.f32.mrb[46].mxu0 }
 0x157   : > { %13471 = vst [vmem:[#allocation131_spill] sm:$0xff] %v9129_v19  ;;  %v9137_v18 = vpop.f32.mrb[46].mxu1  ;;  %v6152_v53 = vpop.eup %6151  ;;  %6171 = vpow2.f32 %v3191_v57  ;;  %v246_v57 = vld [vmem:[%s13076_s1 + $0x268] sm:$0xff]  ;;  %5983 = vmatmul.mubr.msk.f32.gmra.mrb[154].mxu1 %vm1297_vm0, %v326_v61 }
 0x158   : > { %v930_v36 = vpop.permute.xlu0 %929  ;;  %v9142_v40 = vpop.eup %6153  ;;  %6173 = vrcp.f32 %v3795_v21  ;;  %v3929_v16 = vadd.f32 1.0, %v6152_v53  ;;  %v3461_v21 = vmul.f32 1.442695, %v2972_v12  ;;  %v9159_v53 = vadd.f32 %v8549_v39, %v9125_v9  ;;  %5903 = vmatmul.mubr.msk.f32.gmra.mrb[154].mxu0 %vm1297_vm0, %v246_v57  ;;  %v247_v39 = vld [vmem:[%s13076_s1 + $0x270] sm:$0xff]  ;;  %2790 = vmatprep.mubr.f32.mxu1 %v13372_v59 }
 0x159   : > { %13473 = vst [vmem:[#allocation133_spill] sm:$0xff] %v9142_v40  ;;  %v9145_v19 = vpop.f32.mrb[47].mxu0  ;;  %v9155_v60 = vpop.f32.mrb[47].mxu1  ;;  %6175 = vpow2.f32 %v3463_v55  ;;  %v2839_v40 = vsub.f32 0.0, %v9133_v31  ;;  %v9169_v55 = vadd.f32 %v8517_v8, %v930_v36  ;;  %2310 = vmatprep.mubr.f32.mxu0 %v13372_v59  ;;  %v327_v8 = vld [vmem:[%s13076_s1 + $0x4f0] sm:$0xff] }
 0x15a   : > { %13474 = vst [vmem:[#allocation134_spill] sm:$0xff] %v9155_v60  ;;  %v6156_v33 = vpop.eup %6155  ;;  %13475 = vst [vmem:[#allocation135_spill] sm:$0xff] %v9159_v53  ;;  %6177 = vrcp.f32 %v3929_v16  ;;  %v9164_v42 = vpop.f32.mrb[48].mxu0  ;;  %v3193_v60 = vmul.f32 1.442695, %v2838_v34  ;;  %v2977_v57 = vsub.f32 0.0, %v9159_v53 }
 0x15b   : > { %v9161_v58 = vpop.eup %6157  ;;  %v3927_v51 = vadd.f32 1.0, %v6156_v33  ;;  %v9166_v46 = vpop.f32.mrb[48].mxu1  ;;  %6179 = vpow2.f32 %v3459_v5  ;;  %13478 = vst [vmem:[#allocation138_spill] sm:$0xff] %v9169_v55  ;;  %v3465_v33 = vmul.f32 1.442695, %v2974_v54  ;;  %5984 = vmatmul.mubr.msk.f32.gmra.mrb[156].mxu1 %vm1297_vm0, %v327_v8 }
 0x15c   : > { %13476 = vst [vmem:[#allocation136_spill] sm:$0xff] %v9161_v58  ;;  %13477 = vst [vmem:[#allocation137_spill] sm:$0xff] %v9166_v46  ;;  %v6160_v32 = vpop.eup %6159  ;;  %v9178_v31 = vpop.f32.mrb[49].mxu0  ;;  %v3195_v54 = vmul.f32 1.442695, %v2839_v40  ;;  %5904 = vmatmul.mubr.msk.f32.gmra.mrb[156].mxu0 %vm1297_vm0, %v247_v39  ;;  %2796 = vmatprep.mubr.f32.mxu1 %v13372_v59 }
 0x15d   : > { %v9176_v12 = vpop.eup %6161  ;;  %v3928_v16 = vadd.f32 1.0, %v6160_v32  ;;  %6181 = vrcp.f32 %v3927_v51  ;;  %v9185_v34 = vpop.f32.mrb[49].mxu1  ;;  %v9191_v51 = vadd.f32 %v8535_v25, %v930_v36  ;;  %2316 = vmatprep.mubr.f32.mxu0 %v13372_v59 }
 0x15e   : > { %13479 = vst [vmem:[#allocation139_spill] sm:$0xff] %v9176_v12  ;;  %13480 = vst [vmem:[#allocation140_spill] sm:$0xff] %v9185_v34  ;;  %v9187_v5 = vpop.eup %6163  ;;  %6183 = vpow2.f32 %v3461_v21  ;;  %v9193_v61 = vpop.f32.mrb[50].mxu0  ;;  %v2975_v34 = vsub.f32 0.0, %v9169_v55  ;;  %v9200_v21 = vadd.f32 %v8959_v27, %v8008_v3  ;;  %v328_v3 = vld [vmem:[%s13076_s1 + $0x4f8] sm:$0xff]  ;;  %v9229_v55 = vadd.f32 %v8983_v38, %v8006_v2 }
 0x15f   : > { %13481 = vst [vmem:[#allocation141_spill] sm:$0xff] %v9187_v5  ;;  %13482 = vst [vmem:[#allocation142_spill] sm:$0xff] %v9191_v51  ;;  %v6166_v32 = vpop.eup %6165  ;;  %6185 = vrcp.f32 %v3928_v16  ;;  %v9195_v12 = vpop.f32.mrb[50].mxu1  ;;  %v2976_v16 = vsub.f32 0.0, %v9191_v51  ;;  %5985 = vmatmul.mubr.msk.f32.gmra.mrb[158].mxu1 %vm1297_vm0, %v328_v3 }
 0x160   : > { %v6168_v58 = vpop.eup %6167  ;;  %v3796_v46 = vadd.f32 1.0, %v6166_v32  ;;  %6187 = vpow2.f32 %v3193_v60  ;;  %13483 = vst [vmem:[#allocation143_spill] sm:$0xff] %v9200_v21  ;;  %v9206_v40 = vpop.f32.mrb[51].mxu0  ;;  %v248_v60 = vld [vmem:[%s13076_s1 + $0x278] sm:$0xff]  ;;  %13487 = vst [vmem:[#allocation147_spill] sm:$0xff] %v9229_v55 }
 0x161   : > { %v9204_v25 = vpop.eup %6169  ;;  %v3930_v36 = vadd.f32 1.0, %v6168_v58  ;;  %6189 = vpow2.f32 %v3465_v33  ;;  %v9216_v27 = vpop.f32.mrb[51].mxu1  ;;  %v3471_v58 = vmul.f32 1.442695, %v2977_v57  ;;  %v9221_v33 = vadd.f32 %v8567_v24, %v9125_v9  ;;  %5905 = vmatmul.mubr.msk.f32.gmra.mrb[158].mxu0 %vm1297_vm0, %v248_v60 }
 0x162   : > { %13484 = vst [vmem:[#allocation144_spill] sm:$0xff] %v9204_v25  ;;  %v6172_v39 = vpop.eup %6171  ;;  %6191 = vrcp.f32 %v3796_v46  ;;  %v9223_v59 = vpop.permute.xlu1 %944  ;;  %v3467_v51 = vmul.f32 1.442695, %v2975_v34  ;;  %v2840_v24 = vsub.f32 0.0, %v9200_v21 }
 0x163   : > { %13485 = vst [vmem:[#allocation145_spill] sm:$0xff] %v9221_v33  ;;  %v9225_v8 = vpop.eup %6173  ;;  %6193 = vrcp.f32 %v3930_v36  ;;  %v3797_v32 = vadd.f32 1.0, %v6172_v39  ;;  %v9231_v53 = vpop.f32.mrb[52].mxu0  ;;  %v2978_v34 = vsub.f32 0.0, %v9221_v33 }
 0x164   : > { %13486 = vst [vmem:[#allocation146_spill] sm:$0xff] %v9225_v8  ;;  %v9233_v46 = vpop.f32.mrb[52].mxu1  ;;  %v6176_v57 = vpop.eup %6175  ;;  %6195 = vpow2.f32 %v3195_v54  ;;  %v9247_v54 = vadd.f32 %v8615_v23, %v9223_v59 }
 0x165   : > { %13488 = vst [vmem:[#allocation148_spill] sm:$0xff] %v9233_v46  ;;  %v940_v9 = vpop.permute.xlu0 %939  ;;  %v9238_v36 = vpop.eup %6177  ;;  %6197 = vrcp.f32 %v3797_v32  ;;  %v3933_v39 = vadd.f32 1.0, %v6176_v57  ;;  %v3469_v46 = vmul.f32 1.442695, %v2976_v16  ;;  %v2841_v32 = vsub.f32 0.0, %v9229_v55 }
 0x166   : > { %13489 = vst [vmem:[#allocation149_spill] sm:$0xff] %v9238_v36  ;;  %v9240_v38 = vpop.f32.mrb[53].mxu0  ;;  %v9242_v8 = vpop.f32.mrb[53].mxu1  ;;  %6199 = vpow2.f32 %v3471_v58  ;;  %13491 = vst [vmem:[#allocation151_spill] sm:$0xff] %v9247_v54  ;;  %v3197_v58 = vmul.f32 1.442695, %v2840_v24  ;;  %v9257_v16 = vadd.f32 %v8582_v35, %v940_v9 }
 0x167   : > { %13490 = vst [vmem:[#allocation150_spill] sm:$0xff] %v9242_v8  ;;  %v6180_v25 = vpop.eup %6179  ;;  %6201 = vrcp.f32 %v3933_v39  ;;  %v9252_v57 = vpop.f32.mrb[54].mxu0  ;;  %v3473_v55 = vmul.f32 1.442695, %v2978_v34  ;;  %v3199_v24 = vmul.f32 1.442695, %v2841_v32  ;;  %v9278_v34 = vadd.f32 %v9000_v29, %v8006_v2 }
 0x168   : > { %v9249_v60 = vpop.eup %6181  ;;  %v3931_v3 = vadd.f32 1.0, %v6180_v25  ;;  %v9254_v21 = vpop.f32.mrb[54].mxu1  ;;  %6203 = vpow2.f32 %v3467_v51  ;;  %13494 = vst [vmem:[#allocation154_spill] sm:$0xff] %v9257_v16 }
 0x169   : > { %13492 = vst [vmem:[#allocation152_spill] sm:$0xff] %v9249_v60  ;;  %13493 = vst [vmem:[#allocation153_spill] sm:$0xff] %v9254_v21  ;;  %v6184_v8 = vpop.eup %6183  ;;  %v9261_v36 = vpop.f32.mrb[55].mxu0  ;;  %v2981_v60 = vsub.f32 0.0, %v9247_v54  ;;  %v9267_v21 = vadd.f32 %v8601_v50, %v940_v9 }
 0x16a   : > { %v9259_v33 = vpop.eup %6185  ;;  %v3932_v23 = vadd.f32 1.0, %v6184_v8  ;;  %6205 = vrcp.f32 %v3931_v3  ;;  %v9263_v39 = vpop.f32.mrb[55].mxu1  ;;  %13499 = vst [vmem:[#allocation159_spill] sm:$0xff] %v9278_v34 }
 0x16b   : > { %13495 = vst [vmem:[#allocation155_spill] sm:$0xff] %v9259_v33  ;;  %13496 = vst [vmem:[#allocation156_spill] sm:$0xff] %v9263_v39  ;;  %v6188_v25 = vpop.eup %6187  ;;  %6207 = vpow2.f32 %v3469_v46  ;;  %v9269_v5 = vpop.f32.mrb[56].mxu0  ;;  %v2979_v46 = vsub.f32 0.0, %v9257_v16  ;;  %v2980_v54 = vsub.f32 0.0, %v9267_v21 }
 0x16c   : > { %13497 = vst [vmem:[#allocation157_spill] sm:$0xff] %v9267_v21  ;;  %v6190_v51 = vpop.eup %6189  ;;  %6209 = vrcp.f32 %v3932_v23  ;;  %v3798_v35 = vadd.f32 1.0, %v6188_v25  ;;  %v9271_v8 = vpop.f32.mrb[56].mxu1  ;;  %v3479_v25 = vmul.f32 1.442695, %v2981_v60 }
 0x16d   : > { %13498 = vst [vmem:[#allocation158_spill] sm:$0xff] %v9271_v8  ;;  %v9273_v3 = vpop.eup %6191  ;;  %v3934_v33 = vadd.f32 1.0, %v6190_v51  ;;  %6211 = vpow2.f32 %v3197_v58  ;;  %v9282_v9 = vpop.f32.mrb[57].mxu0  ;;  %v9289_v58 = vadd.f32 %v8637_v0, %v9223_v59  ;;  %v3475_v21 = vmul.f32 1.442695, %v2979_v46 }
 0x16e   : > { %v9280_v50 = vpop.eup %6193  ;;  %6213 = vrcp.f32 %v3798_v35  ;;  %v9284_v32 = vpop.f32.mrb[57].mxu1  ;;  %v9297_v35 = vadd.f32 %v9023_v26, %v8028_v10  ;;  %v2842_v0 = vsub.f32 0.0, %v9278_v34 }
 0x16f   : > { %13500 = vst [vmem:[#allocation160_spill] sm:$0xff] %v9284_v32  ;;  %v6196_v23 = vpop.eup %6195  ;;  %6215 = vrcp.f32 %v3934_v33  ;;  %13501 = vst [vmem:[#allocation161_spill] sm:$0xff] %v9289_v58  ;;  %v9291_v51 = vpop.permute.xlu1 %954  ;;  %4724 = vadd.xlane.f32.xlu0 %v8617_v37 }
 0x170   : > { %v9293_v2 = vpop.eup %6197  ;;  %v3799_v29 = vadd.f32 1.0, %v6196_v23  ;;  %6217 = vpow2.f32 %v3473_v55  ;;  %13502 = vst [vmem:[#allocation162_spill] sm:$0xff] %v9297_v35  ;;  %v9299_v16 = vpop.f32.mrb[58].mxu0  ;;  %v9308_v55 = vadd.f32 %v8687_v20, %v9291_v51 }
 0x171   : > { %13503 = vst [vmem:[#allocation163_spill] sm:$0xff] %v9299_v16  ;;  %v9301_v33 = vpop.f32.mrb[58].mxu1  ;;  %v6200_v60 = vpop.eup %6199  ;;  %6219 = vpow2.f32 %v3199_v24  ;;  %v2982_v24 = vsub.f32 0.0, %v9289_v58 }
 0x172   : > { %13504 = vst [vmem:[#allocation164_spill] sm:$0xff] %v9301_v33  ;;  %v950_v59 = vpop.permute.xlu0 %949  ;;  %v9304_v32 = vpop.eup %6201  ;;  %6221 = vrcp.f32 %v3799_v29  ;;  %v3937_v8 = vadd.f32 1.0, %v6200_v60  ;;  %13505 = vst [vmem:[#allocation165_spill] sm:$0xff] %v9308_v55  ;;  %v3477_v33 = vmul.f32 1.442695, %v2980_v54  ;;  %v2843_v29 = vsub.f32 0.0, %v9297_v35 }
 0x173   : > { %v9310_v26 = vpop.f32.mrb[59].mxu0  ;;  %v9312_v23 = vpop.f32.mrb[59].mxu1  ;;  %6223 = vpow2.f32 %v3479_v25  ;;  %4730 = vadd.xlane.f32.xlu0 %v8707_v17 }
 0x174   : > { %13506 = vst [vmem:[#allocation166_spill] sm:$0xff] %v9310_v26  ;;  %13507 = vst [vmem:[#allocation167_spill] sm:$0xff] %v9312_v23  ;;  %v6204_v16 = vpop.eup %6203  ;;  %6225 = vrcp.f32 %v3937_v8  ;;  %v9318_v60 = vpop.f32.mrb[60].mxu0  ;;  %v3201_v26 = vmul.f32 1.442695, %v2842_v0  ;;  %v9323_v23 = vadd.f32 %v8651_v41, %v950_v59  ;;  %4727 = vadd.xlane.f32.xlu1 %v8673_v22 }
 0x175   : > { %v9315_v46 = vpop.eup %6205  ;;  %v3935_v34 = vadd.f32 1.0, %v6204_v16  ;;  %13508 = vst [vmem:[#allocation168_spill] sm:$0xff] %v9318_v60  ;;  %v9320_v39 = vpop.f32.mrb[60].mxu1  ;;  %6227 = vpow2.f32 %v3475_v21  ;;  %v2985_v16 = vsub.f32 0.0, %v9308_v55  ;;  %v9334_v21 = vadd.f32 %v8671_v56, %v950_v59 }
 0x176   : > { %13509 = vst [vmem:[#allocation169_spill] sm:$0xff] %v9320_v39  ;;  %v6208_v20 = vpop.eup %6207  ;;  %13510 = vst [vmem:[#allocation170_spill] sm:$0xff] %v9323_v23  ;;  %v9329_v8 = vpop.f32.mrb[61].mxu0  ;;  %v3481_v39 = vmul.f32 1.442695, %v2982_v24  ;;  %v2983_v55 = vsub.f32 0.0, %v9323_v23 }
 0x177   : > { %v9326_v54 = vpop.eup %6209  ;;  %v3936_v25 = vadd.f32 1.0, %v6208_v20  ;;  %6229 = vrcp.f32 %v3935_v34  ;;  %v9331_v35 = vpop.f32.mrb[61].mxu1  ;;  %13512 = vst [vmem:[#allocation172_spill] sm:$0xff] %v9334_v21  ;;  %v3203_v0 = vmul.f32 1.442695, %v2843_v29  ;;  %4733 = vadd.xlane.f32.xlu0 %v8781_v7  ;;  %v13538_v23 = vld [vmem:[#allocation84_spill] sm:$0xff] }
 0x178   : > { %13511 = vst [vmem:[#allocation171_spill] sm:$0xff] %v9331_v35  ;;  %v6212_v58 = vpop.eup %6211  ;;  %6231 = vpow2.f32 %v3477_v33  ;;  %v9338_v60 = vpop.f32.mrb[62].mxu0  ;;  %v9347_v33 = vadd.f32 %v9037_v62, %v8028_v10  ;;  %v3487_v59 = vmul.f32 1.442695, %v2985_v16  ;;  %v9358_v10 = vadd.f32 %v8705_v14, %v9291_v51  ;;  %4736 = vadd.xlane.f32.xlu1 %v8819_v28 }
 0x179   : > { %v9336_v41 = vpop.eup %6213  ;;  %6233 = vrcp.f32 %v3936_v25  ;;  %v3800_v37 = vadd.f32 1.0, %v6212_v58  ;;  %13513 = vst [vmem:[#allocation173_spill] sm:$0xff] %v9338_v60  ;;  %v9340_v34 = vpop.f32.mrb[62].mxu1  ;;  %v13666_v60 = vld [vmem:[#allocation114_spill] sm:$0xff] }
 0x17a   : > { %13514 = vst [vmem:[#allocation174_spill] sm:$0xff] %v9340_v34  ;;  %v9342_v20 = vpop.eup %6215  ;;  %6235 = vpow2.f32 %v3201_v26  ;;  %13515 = vst [vmem:[#allocation175_spill] sm:$0xff] %v9347_v33  ;;  %v9350_v58 = vpop.f32.mrb[63].mxu0  ;;  %v2984_v26 = vsub.f32 0.0, %v9334_v21 }
 0x17b   : > { %v6218_v56 = vpop.eup %6217  ;;  %6237 = vrcp.f32 %v3800_v37  ;;  %13516 = vst [vmem:[#allocation176_spill] sm:$0xff] %v9350_v58  ;;  %v9352_v24 = vpop.f32.mrb[63].mxu1  ;;  %13518 = vst [vmem:[#allocation178_spill] sm:$0xff] %v9358_v10  ;;  %v3483_v58 = vmul.f32 1.442695, %v2983_v55 }
 0x17c   : > { %13517 = vst [vmem:[#allocation177_spill] sm:$0xff] %v9352_v24  ;;  %v6220_v29 = vpop.eup %6219  ;;  %v3938_v25 = vadd.f32 1.0, %v6218_v56  ;;  %6239 = vpow2.f32 %v3481_v39  ;;  %v965_v62 = vpop.permute.xlu1 %964  ;;  %v2844_v24 = vsub.f32 0.0, %v9347_v33  ;;  %v13519_v56 = vld [vmem:[#allocation2_spill] sm:$0xff]  ;;  %v3485_v55 = vmul.f32 1.442695, %v2984_v26 }
 0x17d   : > { %v9360_v17 = vpop.eup %6221  ;;  %v3801_v37 = vadd.f32 1.0, %v6220_v29  ;;  %6241 = vpow2.f32 %v3203_v0  ;;  %v9368_v14 = vadd.f32 %v9061_v4, %v13519_v56  ;;  %v9371_v51 = vadd.f32 %v8758_v11, %v965_v62  ;;  %v960_v29 = vpop.permute.xlu0 %959 }
 0x17e   : > { %v6224_v16 = vpop.eup %6223  ;;  %6243 = vrcp.f32 %v3938_v25  ;;  %v2986_v25 = vsub.f32 0.0, %v9358_v10  ;;  %v9375_v7 = vpop.f32.mrb[64].mxu0  ;;  %v3205_v11 = vmul.f32 1.442695, %v2844_v24  ;;  %v9382_v21 = vadd.f32 %v8721_v43, %v960_v29 }
 0x17f   : > { %v9364_v22 = vpop.eup %6225  ;;  %6245 = vrcp.f32 %v3801_v37  ;;  %v3941_v39 = vadd.f32 1.0, %v6224_v16  ;;  %13520 = vst [vmem:[#allocation2_spill] sm:$0xff] %v9368_v14  ;;  %13521 = vst [vmem:[#allocation179_spill] sm:$0xff] %v9371_v51  ;;  %v9377_v33 = vpop.f32.mrb[64].mxu1  ;;  %v2845_v26 = vsub.f32 0.0, %v9368_v14 }
 0x180   : > { %v6228_v0 = vpop.eup %6227  ;;  %6247 = vpow2.f32 %v3487_v59  ;;  %13522 = vst [vmem:[#allocation180_spill] sm:$0xff] %v9375_v7  ;;  %13523 = vst [vmem:[#allocation181_spill] sm:$0xff] %v9377_v33  ;;  %v2989_v7 = vsub.f32 0.0, %v9371_v51  ;;  %v9388_v10 = vpop.f32.mrb[65].mxu0  ;;  %v9400_v51 = vadd.f32 %v9074_v6, %v13519_v56 }
 0x181   : > { %v9379_v37 = vpop.eup %6229  ;;  %6249 = vrcp.f32 %v3941_v39  ;;  %v3939_v4 = vadd.f32 1.0, %v6228_v0  ;;  %13524 = vst [vmem:[#allocation182_spill] sm:$0xff] %v9382_v21  ;;  %13525 = vst [vmem:[#allocation183_spill] sm:$0xff] %v9388_v10  ;;  %v9390_v33 = vpop.f32.mrb[65].mxu1  ;;  %v3489_v0 = vmul.f32 1.442695, %v2986_v25 }
 0x182   : > { %v6232_v16 = vpop.eup %6231  ;;  %6251 = vpow2.f32 %v3483_v58  ;;  %13526 = vst [vmem:[#allocation184_spill] sm:$0xff] %v9390_v33  ;;  %v9393_v58 = vadd.f32 %v8743_v44, %v960_v29  ;;  %13528 = vst [vmem:[#allocation186_spill] sm:$0xff] %v9400_v51  ;;  %v3495_v25 = vmul.f32 1.442695, %v2989_v7  ;;  %v9410_v6 = vpop.f32.mrb[66].mxu0 }
 0x183   : > { %v9384_v28 = vpop.eup %6233  ;;  %v3940_v59 = vadd.f32 1.0, %v6232_v16  ;;  %6253 = vrcp.f32 %v3939_v4  ;;  %v2987_v4 = vsub.f32 0.0, %v9382_v21  ;;  %13530 = vst [vmem:[#allocation188_spill] sm:$0xff] %v9410_v6  ;;  %v9412_v56 = vpop.f32.mrb[66].mxu1 }
 0x184   : > { %v6236_v39 = vpop.eup %6235  ;;  %6255 = vpow2.f32 %v3485_v55  ;;  %13527 = vst [vmem:[#allocation185_spill] sm:$0xff] %v9393_v58  ;;  %v3207_v55 = vmul.f32 1.442695, %v2845_v26  ;;  %v2988_v29 = vsub.f32 0.0, %v9393_v58  ;;  %13531 = vst [vmem:[#allocation189_spill] sm:$0xff] %v9412_v56  ;;  %v2846_v26 = vsub.f32 0.0, %v9400_v51 }
 0x185   : > { %v9395_v43 = vpop.eup %6237  ;;  %6257 = vrcp.f32 %v3940_v59  ;;  %v3802_v24 = vadd.f32 1.0, %v6236_v39  ;;  %v9406_v59 = vadd.f32 %v8779_v13, %v965_v62  ;;  %v3491_v7 = vmul.f32 1.442695, %v2987_v4  ;;  %v9424_v6 = vpop.f32.mrb[67].mxu0 }
 0x186   : > { %v6240_v16 = vpop.eup %6239  ;;  %6259 = vpow2.f32 %v3205_v11  ;;  %v975_v11 = vpop.permute.xlu1 %974  ;;  %13535 = vst [vmem:[#allocation191_spill] sm:$0xff] %v9424_v6  ;;  %v3493_v4 = vmul.f32 1.442695, %v2988_v29 }
 0x187   : > { %v6242_v10 = vpop.eup %6241  ;;  %6261 = vrcp.f32 %v3802_v24  ;;  %v3942_v33 = vadd.f32 1.0, %v6240_v16  ;;  %13529 = vst [vmem:[#allocation187_spill] sm:$0xff] %v9406_v59  ;;  %v970_v16 = vpop.permute.xlu0 %969  ;;  %v2990_v51 = vsub.f32 0.0, %v9406_v59 }
 0x188   : > { %v9402_v14 = vpop.eup %6243  ;;  %v3803_v44 = vadd.f32 1.0, %v6242_v10  ;;  %6263 = vpow2.f32 %v3489_v0  ;;  %v13532_v10 = vld [vmem:[#allocation4_spill] sm:$0xff]  ;;  %v9426_v56 = vpop.f32.mrb[67].mxu1  ;;  %v9432_v21 = vadd.f32 %v8797_v30, %v970_v16 }
 0x189   : > { %v9408_v39 = vpop.eup %6245  ;;  %6265 = vrcp.f32 %v3942_v33  ;;  %v9417_v0 = vadd.f32 %v9097_v63, %v13532_v10  ;;  %v9422_v33 = vadd.f32 %v8833_v49, %v975_v11  ;;  %13536 = vst [vmem:[#allocation192_spill] sm:$0xff] %v9426_v56  ;;  %v3209_v49 = vmul.f32 1.442695, %v2846_v26 }
 0x18a   : > { %v6248_v24 = vpop.eup %6247  ;;  %6267 = vrcp.f32 %v3803_v44  ;;  %13537 = vst [vmem:[#allocation193_spill] sm:$0xff] %v9432_v21  ;;  %v3497_v59 = vmul.f32 1.442695, %v2990_v51 }
 0x18b   : > { %13533 = vst [vmem:[#allocation4_spill] sm:$0xff] %v9417_v0  ;;  %v9419_v13 = vpop.eup %6249  ;;  %v3945_v62 = vadd.f32 1.0, %v6248_v24  ;;  %6269 = vpow2.f32 %v3207_v55  ;;  %13534 = vst [vmem:[#allocation190_spill] sm:$0xff] %v9422_v33  ;;  %v2847_v24 = vsub.f32 0.0, %v9417_v0 }
 0x18c   : > { %v6252_v44 = vpop.eup %6251  ;;  %6271 = vpow2.f32 %v3495_v25  ;;  %v2993_v25 = vsub.f32 0.0, %v9422_v33 }
 0x18d   : > { %v9429_v58 = vpop.eup %6253  ;;  %6273 = vrcp.f32 %v3945_v62  ;;  %v3943_v63 = vadd.f32 1.0, %v6252_v44  ;;  %v9439_v62 = vadd.f32 %v13538_v23, %v970_v16  ;;  %v3211_v0 = vmul.f32 1.442695, %v2847_v24 }
 0x18e   : > { %v6256_v55 = vpop.eup %6255  ;;  %6275 = vpow2.f32 %v3491_v7  ;;  %v2991_v7 = vsub.f32 0.0, %v9432_v21  ;;  %v9454_v16 = vadd.f32 %v8857_v48, %v975_v11 }
 0x18f   : > { %v9435_v6 = vpop.eup %6257  ;;  %v3944_v56 = vadd.f32 1.0, %v6256_v55  ;;  %6277 = vrcp.f32 %v3943_v63  ;;  %13539 = vst [vmem:[#allocation84_spill] sm:$0xff] %v9439_v62  ;;  %v9446_v63 = vadd.f32 %v9114_v45, %v13532_v10  ;;  %v13545_v10 = vld [vmem:[#allocation3_spill] sm:$0xff] }
 0x190   : > { %v6260_v29 = vpop.eup %6259  ;;  %6279 = vpow2.f32 %v3493_v4  ;;  %v3503_v4 = vmul.f32 1.442695, %v2993_v25  ;;  %13544 = vst [vmem:[#allocation198_spill] sm:$0xff] %v9454_v16  ;;  %v985_v25 = vpop.permute.xlu1 %984 }
 0x191   : > { %v9441_v44 = vpop.eup %6261  ;;  %6281 = vrcp.f32 %v3944_v56  ;;  %v3804_v30 = vadd.f32 1.0, %v6260_v29  ;;  %13541 = vst [vmem:[#allocation195_spill] sm:$0xff] %v9446_v63  ;;  %v2992_v56 = vsub.f32 0.0, %v9439_v62  ;;  %v2848_v45 = vsub.f32 0.0, %v9446_v63 }
 0x192   : > { %13540 = vst [vmem:[#allocation194_spill] sm:$0xff] %v9441_v44  ;;  %v6264_v26 = vpop.eup %6263  ;;  %6283 = vpow2.f32 %v3209_v49  ;;  %v3499_v49 = vmul.f32 1.442695, %v2991_v7  ;;  %v2994_v7 = vsub.f32 0.0, %v9454_v16  ;;  %v13684_v44 = vld [vmem:[#allocation125_spill] sm:$0xff] }
 0x193   : > { %v9448_v55 = vpop.eup %6265  ;;  %6285 = vrcp.f32 %v3804_v30  ;;  %v3946_v51 = vadd.f32 1.0, %v6264_v26  ;;  %v9459_v30 = vadd.f32 %v9135_v47, %v13545_v10  ;;  %v980_v26 = vpop.permute.xlu0 %979  ;;  %v3501_v11 = vmul.f32 1.442695, %v2992_v56  ;;  %v13550_v47 = vld [vmem:[#allocation93_spill] sm:$0xff] }
 0x194   : > { %13542 = vst [vmem:[#allocation196_spill] sm:$0xff] %v9448_v55  ;;  %v9450_v23 = vpop.eup %6267  ;;  %6287 = vpow2.f32 %v3497_v59  ;;  %v9470_v63 = vadd.f32 %v13550_v47, %v980_v26  ;;  %v3213_v34 = vmul.f32 1.442695, %v2848_v45  ;;  %v3505_v16 = vmul.f32 1.442695, %v2994_v7 }
 0x195   : > { %13543 = vst [vmem:[#allocation197_spill] sm:$0xff] %v9450_v23  ;;  %v6270_v29 = vpop.eup %6269  ;;  %6289 = vrcp.f32 %v3946_v51  ;;  %13546 = vst [vmem:[#allocation3_spill] sm:$0xff] %v9459_v30 }
 0x196   : > { %v6272_v24 = vpop.eup %6271  ;;  %v3805_v21 = vadd.f32 1.0, %v6270_v29  ;;  %6291 = vpow2.f32 %v3211_v0  ;;  %v9467_v29 = vadd.f32 %v8912_v1, %v985_v25  ;;  %13551 = vst [vmem:[#allocation93_spill] sm:$0xff] %v9470_v63 }
 0x197   : > { %v9461_v59 = vpop.eup %6273  ;;  %v3949_v62 = vadd.f32 1.0, %v6272_v24  ;;  %6293 = vpow2.f32 %v3503_v4  ;;  %v2849_v4 = vsub.f32 0.0, %v9459_v30 }
 0x198   : > { %13547 = vst [vmem:[#allocation199_spill] sm:$0xff] %v9461_v59  ;;  %v6276_v48 = vpop.eup %6275  ;;  %6295 = vrcp.f32 %v3805_v21  ;;  %13549 = vst [vmem:[#allocation201_spill] sm:$0xff] %v9467_v29 }
 0x199   : > { %v9464_v51 = vpop.eup %6277  ;;  %6297 = vrcp.f32 %v3949_v62  ;;  %v3947_v0 = vadd.f32 1.0, %v6276_v48  ;;  %v13553_v62 = vld [vmem:[#allocation95_spill] sm:$0xff]  ;;  %v3215_v30 = vmul.f32 1.442695, %v2849_v4 }
 0x19a   : > { %13548 = vst [vmem:[#allocation200_spill] sm:$0xff] %v9464_v51  ;;  %v6280_v33 = vpop.eup %6279  ;;  %6299 = vpow2.f32 %v3499_v49  ;;  %v9476_v48 = vadd.f32 %v13553_v62, %v980_v26  ;;  %v2997_v51 = vsub.f32 0.0, %v9467_v29  ;;  %v2995_v49 = vsub.f32 0.0, %v9470_v63  ;;  %v995_v63 = vpop.permute.xlu1 %994 }
 0x19b   : > { %v9473_v24 = vpop.eup %6281  ;;  %v3948_v21 = vadd.f32 1.0, %v6280_v33  ;;  %6301 = vrcp.f32 %v3947_v0  ;;  %v9484_v33 = vadd.f32 %v9145_v19, %v13545_v10 }
 0x19c   : > { %13552 = vst [vmem:[#allocation202_spill] sm:$0xff] %v9473_v24  ;;  %v6284_v56 = vpop.eup %6283  ;;  %6303 = vpow2.f32 %v3501_v11  ;;  %13554 = vst [vmem:[#allocation95_spill] sm:$0xff] %v9476_v48  ;;  %v2996_v0 = vsub.f32 0.0, %v9476_v48  ;;  %v3507_v4 = vmul.f32 1.442695, %v2995_v49  ;;  %v13563_v49 = vld [vmem:[#allocation109_spill] sm:$0xff] }
 0x19d   : > { %v9478_v1 = vpop.eup %6285  ;;  %6305 = vrcp.f32 %v3948_v21  ;;  %v3806_v47 = vadd.f32 1.0, %v6284_v56  ;;  %13556 = vst [vmem:[#allocation204_spill] sm:$0xff] %v9484_v33  ;;  %v9490_v21 = vadd.f32 %v8931_v15, %v985_v25  ;;  %v2850_v10 = vsub.f32 0.0, %v9484_v33 }
 0x19e   : > { %13555 = vst [vmem:[#allocation203_spill] sm:$0xff] %v9478_v1  ;;  %v6288_v45 = vpop.eup %6287  ;;  %6307 = vpow2.f32 %v3213_v34  ;;  %v3511_v34 = vmul.f32 1.442695, %v2997_v51  ;;  %v3509_v25 = vmul.f32 1.442695, %v2996_v0 }
 0x19f   : > { %v9486_v11 = vpop.eup %6289  ;;  %6309 = vrcp.f32 %v3806_v47  ;;  %v3950_v26 = vadd.f32 1.0, %v6288_v45  ;;  %13558 = vst [vmem:[#allocation206_spill] sm:$0xff] %v9490_v21  ;;  %v13560_v47 = vld [vmem:[#allocation6_spill] sm:$0xff]  ;;  %v990_v45 = vpop.permute.xlu0 %989  ;;  %v2998_v51 = vsub.f32 0.0, %v9490_v21 }
 0x1a0   : > { %13557 = vst [vmem:[#allocation205_spill] sm:$0xff] %v9486_v11  ;;  %v6292_v7 = vpop.eup %6291  ;;  %6311 = vpow2.f32 %v3505_v16  ;;  %v9497_v16 = vadd.f32 %v9164_v42, %v13560_v47 }
 0x1a1   : > { %v6294_v56 = vpop.eup %6293  ;;  %6313 = vrcp.f32 %v3950_v26  ;;  %v3807_v62 = vadd.f32 1.0, %v6292_v7  ;;  %v9503_v26 = vadd.f32 %v13563_v49, %v995_v63 }
 0x1a2   : > { %v9492_v29 = vpop.eup %6295  ;;  %v3953_v19 = vadd.f32 1.0, %v6294_v56  ;;  %6315 = vpow2.f32 %v3215_v30  ;;  %13561 = vst [vmem:[#allocation6_spill] sm:$0xff] %v9497_v16  ;;  %v13566_v56 = vld [vmem:[#allocation103_spill] sm:$0xff] }
 0x1a3   : > { %13559 = vst [vmem:[#allocation207_spill] sm:$0xff] %v9492_v29  ;;  %v9499_v48 = vpop.eup %6297  ;;  %6317 = vrcp.f32 %v3807_v62  ;;  %13564 = vst [vmem:[#allocation109_spill] sm:$0xff] %v9503_v26  ;;  %v9508_v33 = vadd.f32 %v13566_v56, %v990_v45  ;;  %v3217_v29 = vmul.f32 1.442695, %v2850_v10  ;;  %v2851_v62 = vsub.f32 0.0, %v9497_v16 }
 0x1a4   : > { %13562 = vst [vmem:[#allocation208_spill] sm:$0xff] %v9499_v48  ;;  %v6300_v15 = vpop.eup %6299  ;;  %6319 = vrcp.f32 %v3953_v19  ;;  %v13569_v19 = vld [vmem:[#allocation106_spill] sm:$0xff] }
 0x1a5   : > { %v9505_v7 = vpop.eup %6301  ;;  %v3951_v30 = vadd.f32 1.0, %v6300_v15  ;;  %6321 = vpow2.f32 %v3511_v34  ;;  %13567 = vst [vmem:[#allocation103_spill] sm:$0xff] %v9508_v33  ;;  %v9514_v21 = vadd.f32 %v13569_v19, %v990_v45  ;;  %v3001_v34 = vsub.f32 0.0, %v9503_v26  ;;  %v9524_v45 = vpop.f32.mrb[68].mxu0 }
 0x1a6   : > { %13565 = vst [vmem:[#allocation209_spill] sm:$0xff] %v9505_v7  ;;  %v6304_v42 = vpop.eup %6303  ;;  %6323 = vpow2.f32 %v3507_v4  ;;  %v3513_v7 = vmul.f32 1.442695, %v2998_v51  ;;  %v2999_v4 = vsub.f32 0.0, %v9508_v33  ;;  %v3219_v16 = vmul.f32 1.442695, %v2851_v62 }
 0x1a7   : > { %v9511_v48 = vpop.eup %6305  ;;  %v3952_v0 = vadd.f32 1.0, %v6304_v42  ;;  %6325 = vrcp.f32 %v3951_v30  ;;  %13570 = vst [vmem:[#allocation106_spill] sm:$0xff] %v9514_v21  ;;  %v9522_v30 = vadd.f32 %v9178_v31, %v13560_v47  ;;  %13573 = vst [vmem:[#allocation213_spill] sm:$0xff] %v9524_v45  ;;  %v9526_v42 = vpop.f32.mrb[68].mxu1  ;;  %v13576_v33 = vld [vmem:[#allocation113_spill] sm:$0xff] }
 0x1a8   : > { %13568 = vst [vmem:[#allocation210_spill] sm:$0xff] %v9511_v48  ;;  %v6308_v49 = vpop.eup %6307  ;;  %6327 = vpow2.f32 %v3509_v25  ;;  %13574 = vst [vmem:[#allocation214_spill] sm:$0xff] %v9526_v42  ;;  %v9534_v62 = vpop.f32.mrb[69].mxu0  ;;  %v3515_v42 = vmul.f32 1.442695, %v2999_v4  ;;  %v13632_v48 = vld [vmem:[#allocation126_spill] sm:$0xff] }
 0x1a9   : > { %v9517_v15 = vpop.eup %6309  ;;  %6329 = vrcp.f32 %v3952_v0  ;;  %v3808_v56 = vadd.f32 1.0, %v6308_v49  ;;  %13572 = vst [vmem:[#allocation212_spill] sm:$0xff] %v9522_v30  ;;  %v3000_v0 = vsub.f32 0.0, %v9514_v21  ;;  %v3519_v49 = vmul.f32 1.442695, %v3001_v34  ;;  %13578 = vst [vmem:[#allocation216_spill] sm:$0xff] %v9534_v62  ;;  %v1005_v45 = vpop.permute.xlu1 %1004 }
 0x1aa   : > { %13571 = vst [vmem:[#allocation211_spill] sm:$0xff] %v9517_v15  ;;  %v6312_v10 = vpop.eup %6311  ;;  %6331 = vpow2.f32 %v3217_v29  ;;  %v9532_v29 = vadd.f32 %v13576_v33, %v995_v63  ;;  %v9536_v31 = vpop.f32.mrb[69].mxu1 }
 0x1ab   : > { %v9528_v25 = vpop.eup %6313  ;;  %6333 = vrcp.f32 %v3808_v56  ;;  %v3954_v51 = vadd.f32 1.0, %v6312_v10  ;;  %13579 = vst [vmem:[#allocation217_spill] sm:$0xff] %v9536_v31  ;;  %v2852_v10 = vsub.f32 0.0, %v9522_v30  ;;  %v9547_v63 = vpop.f32.mrb[70].mxu0  ;;  %v3517_v31 = vmul.f32 1.442695, %v3000_v0 }
 0x1ac   : > { %13575 = vst [vmem:[#allocation215_spill] sm:$0xff] %v9528_v25  ;;  %v6316_v19 = vpop.eup %6315  ;;  %6335 = vpow2.f32 %v3513_v7  ;;  %13577 = vst [vmem:[#allocation113_spill] sm:$0xff] %v9532_v29  ;;  %v13582_v7 = vld [vmem:[#allocation5_spill] sm:$0xff]  ;;  %v9549_v33 = vpop.f32.mrb[70].mxu1  ;;  %v3002_v62 = vsub.f32 0.0, %v9532_v29 }
 0x1ad   : > { %v9538_v47 = vpop.eup %6317  ;;  %6337 = vrcp.f32 %v3954_v51  ;;  %v3809_v26 = vadd.f32 1.0, %v6316_v19  ;;  %v9545_v34 = vadd.f32 %v9193_v61, %v13582_v7  ;;  %13584 = vst [vmem:[#allocation220_spill] sm:$0xff] %v9547_v63  ;;  %13585 = vst [vmem:[#allocation221_spill] sm:$0xff] %v9549_v33  ;;  %v1000_v51 = vpop.permute.xlu0 %999 }
 0x1ae   : > { %13580 = vst [vmem:[#allocation218_spill] sm:$0xff] %v9538_v47  ;;  %v9540_v56 = vpop.eup %6319  ;;  %6339 = vpow2.f32 %v3219_v16  ;;  %v13586_v16 = vld [vmem:[#allocation121_spill] sm:$0xff]  ;;  %v9555_v30 = vpop.f32.mrb[71].mxu0 }
 0x1af   : > { %13581 = vst [vmem:[#allocation219_spill] sm:$0xff] %v9540_v56  ;;  %13583 = vst [vmem:[#allocation5_spill] sm:$0xff] %v9545_v34  ;;  %v6322_v21 = vpop.eup %6321  ;;  %6341 = vrcp.f32 %v3809_v26  ;;  %v9553_v56 = vadd.f32 %v13586_v16, %v1005_v45  ;;  %v9557_v61 = vpop.f32.mrb[71].mxu1  ;;  %v3221_v26 = vmul.f32 1.442695, %v2852_v10  ;;  %v2853_v0 = vsub.f32 0.0, %v9545_v34 }
 0x1b0   : > { %v6324_v19 = vpop.eup %6323  ;;  %v3957_v4 = vadd.f32 1.0, %v6322_v21  ;;  %6343 = vpow2.f32 %v3519_v49  ;;  %13588 = vst [vmem:[#allocation222_spill] sm:$0xff] %v9555_v30  ;;  %13589 = vst [vmem:[#allocation223_spill] sm:$0xff] %v9557_v61  ;;  %v9562_v21 = vpop.f32.mrb[72].mxu0  ;;  %v13594_v30 = vld [vmem:[#allocation115_spill] sm:$0xff]  ;;  %v13596_v61 = vld [vmem:[#allocation118_spill] sm:$0xff] }
 0x1b1   : > { %13587 = vst [vmem:[#allocation121_spill] sm:$0xff] %v9553_v56  ;;  %v9559_v47 = vpop.eup %6325  ;;  %v3955_v63 = vadd.f32 1.0, %v6324_v19  ;;  %6345 = vpow2.f32 %v3515_v42  ;;  %13591 = vst [vmem:[#allocation225_spill] sm:$0xff] %v9562_v21  ;;  %v9564_v49 = vpop.f32.mrb[72].mxu1  ;;  %v9569_v25 = vadd.f32 %v13594_v30, %v1000_v51  ;;  %v3521_v19 = vmul.f32 1.442695, %v3002_v62 }
 0x1b2   : > { %13590 = vst [vmem:[#allocation224_spill] sm:$0xff] %v9559_v47  ;;  %v6328_v33 = vpop.eup %6327  ;;  %6347 = vrcp.f32 %v3957_v4  ;;  %13592 = vst [vmem:[#allocation226_spill] sm:$0xff] %v9564_v49  ;;  %v9572_v47 = vadd.f32 %v13596_v61, %v1000_v51  ;;  %v3005_v10 = vsub.f32 0.0, %v9553_v56  ;;  %v9575_v4 = vpop.f32.mrb[73].mxu0  ;;  %v3223_v30 = vmul.f32 1.442695, %v2853_v0 }
 0x1b3   : > { %v9566_v29 = vpop.eup %6329  ;;  %v3956_v16 = vadd.f32 1.0, %v6328_v33  ;;  %6349 = vrcp.f32 %v3955_v63  ;;  %13595 = vst [vmem:[#allocation115_spill] sm:$0xff] %v9569_v25  ;;  %13598 = vst [vmem:[#allocation228_spill] sm:$0xff] %v9575_v4  ;;  %v9577_v21 = vpop.f32.mrb[73].mxu1  ;;  %v9583_v51 = vadd.f32 %v9206_v40, %v13582_v7  ;;  %v13605_v4 = vld [vmem:[#allocation41_spill] sm:$0xff]  ;;  %v9598_v7 = vadd.f32 %v9079_v52, %v1005_v45  ;;  %v13615_v45 = vld [vmem:[#allocation48_spill] sm:$0xff] }
 0x1b4   : > { %13593 = vst [vmem:[#allocation227_spill] sm:$0xff] %v9566_v29  ;;  %13597 = vst [vmem:[#allocation118_spill] sm:$0xff] %v9572_v47  ;;  %v6332_v42 = vpop.eup %6331  ;;  %6351 = vpow2.f32 %v3517_v31  ;;  %v9585_v61 = vpop.f32.mrb[74].mxu0  ;;  %v3527_v40 = vmul.f32 1.442695, %v3005_v10 }
 0x1b5   : > { %13599 = vst [vmem:[#allocation229_spill] sm:$0xff] %v9577_v21  ;;  %v9579_v49 = vpop.eup %6333  ;;  %6353 = vrcp.f32 %v3956_v16  ;;  %v3810_v33 = vadd.f32 1.0, %v6332_v42  ;;  %13601 = vst [vmem:[#allocation231_spill] sm:$0xff] %v9583_v51  ;;  %v9587_v62 = vpop.f32.mrb[74].mxu1  ;;  %v3003_v21 = vsub.f32 0.0, %v9569_v25  ;;  %v3004_v16 = vsub.f32 0.0, %v9572_v47 }
 0x1b6   : > { %13600 = vst [vmem:[#allocation230_spill] sm:$0xff] %v9579_v49  ;;  %v6336_v63 = vpop.eup %6335  ;;  %6355 = vpow2.f32 %v3221_v26  ;;  %13602 = vst [vmem:[#allocation232_spill] sm:$0xff] %v9585_v61  ;;  %v13606_v26 = vld [vmem:[#allocation72_spill] sm:$0xff]  ;;  %v9600_v61 = vpop.f32.mrb[75].mxu0  ;;  %v13613_v47 = vld [vmem:[#allocation45_spill] sm:$0xff] }
 0x1b7   : > { %13603 = vst [vmem:[#allocation233_spill] sm:$0xff] %v9587_v62  ;;  %v9589_v31 = vpop.eup %6337  ;;  %6357 = vrcp.f32 %v3810_v33  ;;  %v3958_v56 = vadd.f32 1.0, %v6336_v63  ;;  %v9595_v0 = vmul.f32 %v13606_v26, %v13605_v4  ;;  %13607 = vst [vmem:[#allocation41_spill] sm:$0xff] %v9598_v7  ;;  %v9602_v62 = vpop.f32.mrb[75].mxu1  ;;  %v13611_v63 = vld [vmem:[#allocation44_spill] sm:$0xff]  ;;  %v13616_v4 = vld [vmem:[#allocation83_spill] sm:$0xff] }
 0x1b8   : > { %13604 = vst [vmem:[#allocation234_spill] sm:$0xff] %v9589_v31  ;;  %v6340_v42 = vpop.eup %6339  ;;  %6359 = vpow2.f32 %v3521_v19  ;;  %13608 = vst [vmem:[#allocation72_spill] sm:$0xff] %v9600_v61  ;;  %v13612_v25 = vld [vmem:[#allocation76_spill] sm:$0xff]  ;;  %v13614_v31 = vld [vmem:[#allocation79_spill] sm:$0xff]  ;;  %v9614_v10 = vpop.permute.xlu1 %1014  ;;  %v9618_v26 = vmul.f32 %v13616_v4, %v13615_v45 }
 0x1b9   : > { %13609 = vst [vmem:[#allocation235_spill] sm:$0xff] %v9602_v62  ;;  %v9604_v33 = vpop.eup %6341  ;;  %v9608_v34 = vmul.f32 %v13612_v25, %v13611_v63  ;;  %v9612_v49 = vmul.f32 %v13614_v31, %v13613_v47  ;;  %6361 = vrcp.f32 %v3958_v56  ;;  %v3811_v19 = vadd.f32 1.0, %v6340_v42  ;;  %v13617_v61 = vld [vmem:[#allocation8_spill] sm:$0xff]  ;;  %v9625_v63 = vpop.f32.mrb[76].mxu0 }
 0x1ba   : > { %13610 = vst [vmem:[#allocation236_spill] sm:$0xff] %v9604_v33  ;;  %v6344_v52 = vpop.eup %6343  ;;  %6363 = vpow2.f32 %v3223_v30  ;;  %v2854_v62 = vsub.f32 0.0, %v9583_v51  ;;  %v9623_v25 = vadd.f32 %v9231_v53, %v13617_v61  ;;  %13619 = vst [vmem:[#allocation76_spill] sm:$0xff] %v9625_v63  ;;  %v9627_v47 = vpop.f32.mrb[76].mxu1  ;;  %v3523_v42 = vmul.f32 1.442695, %v3003_v21 }
 0x1bb   : > { %13620 = vst [vmem:[#allocation45_spill] sm:$0xff] %v9627_v47  ;;  %v6346_v56 = vpop.eup %6345  ;;  %6365 = vrcp.f32 %v3811_v19  ;;  %v3961_v31 = vadd.f32 1.0, %v6344_v52  ;;  %v3525_v33 = vmul.f32 1.442695, %v3004_v16  ;;  %v1010_v29 = vpop.permute.xlu0 %1009  ;;  %v3006_v30 = vsub.f32 0.0, %v9598_v7  ;;  %v13626_v19 = vld [vmem:[#allocation49_spill] sm:$0xff] }
 0x1bc   : > { %13618 = vst [vmem:[#allocation44_spill] sm:$0xff] %v9623_v25  ;;  %v9629_v15 = vpop.eup %6347  ;;  %v3959_v45 = vadd.f32 1.0, %v6346_v56  ;;  %6367 = vpow2.f32 %v3527_v40  ;;  %v9634_v53 = vadd.f32 %v9137_v18, %v9614_v10  ;;  %v9636_v4 = vpop.f32.mrb[77].mxu0  ;;  %v13627_v21 = vld [vmem:[#allocation86_spill] sm:$0xff]  ;;  %v13628_v52 = vld [vmem:[#allocation52_spill] sm:$0xff]  ;;  %v13630_v40 = vld [vmem:[#allocation53_spill] sm:$0xff] }
 0x1bd   : > { %13621 = vst [vmem:[#allocation79_spill] sm:$0xff] %v9629_v15  ;;  %13623 = vst [vmem:[#allocation83_spill] sm:$0xff] %v9636_v4  ;;  %v9638_v63 = vpop.f32.mrb[77].mxu1  ;;  %v9640_v47 = vpop.eup %6349  ;;  %v9644_v16 = vmul.f32 %v13627_v21, %v13626_v19  ;;  %v13629_v51 = vld [vmem:[#allocation88_spill] sm:$0xff]  ;;  %6369 = vrcp.f32 %v3961_v31  ;;  %v3225_v4 = vmul.f32 1.442695, %v2854_v62 }
 0x1be   : > { %13622 = vst [vmem:[#allocation48_spill] sm:$0xff] %v9634_v53  ;;  %13624 = vst [vmem:[#allocation8_spill] sm:$0xff] %v9638_v63  ;;  %v9648_v56 = vmul.f32 %v13629_v51, %v13628_v52  ;;  %v13631_v7 = vld [vmem:[#allocation92_spill] sm:$0xff]  ;;  %v6352_v18 = vpop.eup %6351  ;;  %6371 = vrcp.f32 %v3959_v45  ;;  %v2855_v63 = vsub.f32 0.0, %v9623_v25  ;;  %v9658_v11 = vpop.f32.mrb[78].mxu0  ;;  %v13638_v52 = vld [vmem:[#allocation94_spill] sm:$0xff] }
 0x1bf   : > { %13625 = vst [vmem:[#allocation237_spill] sm:$0xff] %v9640_v47  ;;  %v9652_v15 = vmul.f32 %v13631_v7, %v13630_v40  ;;  %v9656_v47 = vadd.f32 %v13632_v48, %v1010_v29  ;;  %13634 = vst [vmem:[#allocation86_spill] sm:$0xff] %v9658_v11  ;;  %v9660_v19 = vpop.f32.mrb[78].mxu1  ;;  %v9662_v21 = vpop.eup %6353  ;;  %v13637_v51 = vld [vmem:[#allocation56_spill] sm:$0xff]  ;;  %v3960_v7 = vadd.f32 1.0, %v6352_v18  ;;  %6373 = vpow2.f32 %v3523_v42  ;;  %v13639_v31 = vld [vmem:[#allocation130_spill] sm:$0xff] }
 0x1c0   : > { %13635 = vst [vmem:[#allocation52_spill] sm:$0xff] %v9660_v19  ;;  %13636 = vst [vmem:[#allocation88_spill] sm:$0xff] %v9662_v21  ;;  %v9666_v1 = vmul.f32 %v13638_v52, %v13637_v51  ;;  %v9669_v45 = vadd.f32 %v13639_v31, %v1010_v29  ;;  %v6356_v62 = vpop.eup %6355  ;;  %v13641_v40 = vld [vmem:[#allocation57_spill] sm:$0xff]  ;;  %6375 = vpow2.f32 %v3525_v33  ;;  %v3529_v11 = vmul.f32 1.442695, %v3006_v30  ;;  %v9676_v24 = vpop.f32.mrb[79].mxu0 }
 0x1c1   : > { %13633 = vst [vmem:[#allocation49_spill] sm:$0xff] %v9656_v47  ;;  %v13642_v25 = vld [vmem:[#allocation97_spill] sm:$0xff]  ;;  %v3009_v19 = vsub.f32 0.0, %v9634_v53  ;;  %13643 = vst [vmem:[#allocation92_spill] sm:$0xff] %v9676_v24  ;;  %v9678_v21 = vpop.f32.mrb[79].mxu1  ;;  %v9680_v51 = vpop.eup %6357  ;;  %v13646_v18 = vld [vmem:[#allocation60_spill] sm:$0xff]  ;;  %6377 = vrcp.f32 %v3960_v7 }
 0x1c2   : > { %13640 = vst [vmem:[#allocation53_spill] sm:$0xff] %v9669_v45  ;;  %v9673_v48 = vmul.f32 %v13642_v25, %v13641_v40  ;;  %13644 = vst [vmem:[#allocation126_spill] sm:$0xff] %v9678_v21  ;;  %v13647_v42 = vld [vmem:[#allocation100_spill] sm:$0xff]  ;;  %v3812_v29 = vadd.f32 1.0, %v6356_v62  ;;  %v9688_v25 = vadd.f32 %v9240_v38, %v13617_v61  ;;  %v6360_v33 = vpop.eup %6359  ;;  %v13649_v30 = vld [vmem:[#allocation61_spill] sm:$0xff]  ;;  %6379 = vpow2.f32 %v3225_v4  ;;  %v9695_v24 = vpop.f32.mrb[80].mxu0 }
 0x1c3   : > { %13645 = vst [vmem:[#allocation56_spill] sm:$0xff] %v9680_v51  ;;  %v9684_v52 = vmul.f32 %v13647_v42, %v13646_v18  ;;  %v13650_v31 = vld [vmem:[#allocation102_spill] sm:$0xff]  ;;  %v3227_v53 = vmul.f32 1.442695, %v2855_v63  ;;  %v3007_v21 = vsub.f32 0.0, %v9656_v47  ;;  %13651 = vst [vmem:[#allocation130_spill] sm:$0xff] %v9695_v24  ;;  %v9699_v18 = vpop.eup %6361  ;;  %v1020_v23 = vpop.permute.xlu0 %1019 }
 0x1c4   : > { %13648 = vst [vmem:[#allocation94_spill] sm:$0xff] %v9688_v25  ;;  %v9692_v40 = vmul.f32 %v13650_v31, %v13649_v30  ;;  %v9697_v51 = vpop.f32.mrb[80].mxu1  ;;  %13653 = vst [vmem:[#allocation97_spill] sm:$0xff] %v9699_v18  ;;  %v13654_v7 = vld [vmem:[#allocation64_spill] sm:$0xff]  ;;  %6381 = vrcp.f32 %v3812_v29  ;;  %v3962_v38 = vadd.f32 1.0, %v6360_v33  ;;  %v3008_v61 = vsub.f32 0.0, %v9669_v45  ;;  %v6364_v30 = vpop.eup %6363 }
 0x1c5   : > { %13652 = vst [vmem:[#allocation57_spill] sm:$0xff] %v9697_v51  ;;  %v13655_v62 = vld [vmem:[#allocation104_spill] sm:$0xff]  ;;  %v13656_v31 = vld [vmem:[#allocation67_spill] sm:$0xff]  ;;  %6383 = vpow2.f32 %v3529_v11  ;;  %v3535_v47 = vmul.f32 1.442695, %v3009_v19  ;;  %v13658_v24 = vld [vmem:[#allocation134_spill] sm:$0xff]  ;;  %v1025_v11 = vpop.permute.xlu1 %1024 }
 0x1c6   : > { %v9703_v42 = vmul.f32 %v13655_v62, %v13654_v7  ;;  %v13657_v4 = vld [vmem:[#allocation108_spill] sm:$0xff]  ;;  %v9712_v51 = vadd.f32 %v13658_v24, %v9614_v10  ;;  %v9714_v18 = vpop.f32.mrb[81].mxu0  ;;  %v9716_v59 = vpop.f32.mrb[81].mxu1  ;;  %v13664_v33 = vld [vmem:[#allocation111_spill] sm:$0xff]  ;;  %6385 = vrcp.f32 %v3962_v38  ;;  %v3813_v45 = vadd.f32 1.0, %v6364_v30 }
 0x1c7   : > { %v9708_v63 = vmul.f32 %v13657_v4, %v13656_v31  ;;  %13660 = vst [vmem:[#allocation100_spill] sm:$0xff] %v9714_v18  ;;  %13661 = vst [vmem:[#allocation61_spill] sm:$0xff] %v9716_v59  ;;  %v9718_v7 = vpop.eup %6365  ;;  %v13663_v29 = vld [vmem:[#allocation68_spill] sm:$0xff]  ;;  %v2856_v31 = vsub.f32 0.0, %v9688_v25  ;;  %v13665_v4 = vld [vmem:[#allocation69_spill] sm:$0xff]  ;;  %6387 = vpow2.f32 %v3227_v53 }
 0x1c8   : > { %13659 = vst [vmem:[#allocation60_spill] sm:$0xff] %v9712_v51  ;;  %13662 = vst [vmem:[#allocation102_spill] sm:$0xff] %v9718_v7  ;;  %v9722_v62 = vmul.f32 %v13664_v33, %v13663_v29  ;;  %v6368_v19 = vpop.eup %6367  ;;  %v9727_v24 = vmul.f32 %v13666_v60, %v13665_v4  ;;  %v3531_v10 = vmul.f32 1.442695, %v3007_v21  ;;  %v13667_v18 = vld [vmem:[#allocation7_spill] sm:$0xff]  ;;  %v13670_v29 = vld [vmem:[#allocation73_spill] sm:$0xff]  ;;  %6389 = vrcp.f32 %v3813_v45 }
 0x1c9   : > { %v9731_v59 = vadd.f32 %v9252_v57, %v13667_v18  ;;  %v9733_v7 = vpop.eup %6369  ;;  %v13671_v33 = vld [vmem:[#allocation117_spill] sm:$0xff]  ;;  %v3965_v30 = vadd.f32 1.0, %v6368_v19  ;;  %v3533_v25 = vmul.f32 1.442695, %v3008_v61  ;;  %v13675_v4 = vld [vmem:[#allocation120_spill] sm:$0xff]  ;;  %6391 = vpow2.f32 %v3535_v47  ;;  %v13680_v19 = vld [vmem:[#allocation78_spill] sm:$0xff] }
 0x1ca   : > { %13669 = vst [vmem:[#allocation104_spill] sm:$0xff] %v9733_v7  ;;  %v9737_v38 = vmul.f32 %v13671_v33, %v13670_v29  ;;  %v9739_v55 = vpop.eup %6371  ;;  %v13674_v60 = vld [vmem:[#allocation77_spill] sm:$0xff]  ;;  %v3010_v57 = vsub.f32 0.0, %v9712_v51  ;;  %v9747_v21 = vadd.f32 %v9195_v12, %v1025_v11  ;;  %v9749_v7 = vpop.f32.mrb[82].mxu0  ;;  %v13681_v61 = vld [vmem:[#allocation123_spill] sm:$0xff] }
 0x1cb   : > { %13668 = vst [vmem:[#allocation64_spill] sm:$0xff] %v9731_v59  ;;  %13673 = vst [vmem:[#allocation108_spill] sm:$0xff] %v9739_v55  ;;  %v9743_v53 = vmul.f32 %v13675_v4, %v13674_v60  ;;  %v9751_v29 = vpop.f32.mrb[82].mxu1  ;;  %v6374_v45 = vpop.eup %6373  ;;  %v9755_v33 = vmul.f32 %v13681_v61, %v13680_v19  ;;  %v13683_v55 = vld [vmem:[#allocation80_spill] sm:$0xff]  ;;  %6393 = vrcp.f32 %v3965_v30  ;;  %v3229_v47 = vmul.f32 1.442695, %v2856_v31 }
 0x1cc   : > { %13672 = vst [vmem:[#allocation67_spill] sm:$0xff] %v9737_v38  ;;  %13677 = vst [vmem:[#allocation68_spill] sm:$0xff] %v9747_v21  ;;  %v9759_v35 = vmul.f32 %v13684_v44, %v13683_v55  ;;  %v6376_v60 = vpop.eup %6375  ;;  %v3963_v4 = vadd.f32 1.0, %v6374_v45  ;;  %6395 = vpow2.f32 %v3531_v10  ;;  %v2857_v12 = vsub.f32 0.0, %v9731_v59  ;;  %v13685_v51 = vld [vmem:[#allocation137_spill] sm:$0xff]  ;;  %v13689_v38 = vld [vmem:[#allocation128_spill] sm:$0xff] }
 0x1cd   : > { %13676 = vst [vmem:[#allocation134_spill] sm:$0xff] %v9743_v53  ;;  %13678 = vst [vmem:[#allocation111_spill] sm:$0xff] %v9749_v7  ;;  %v9763_v7 = vadd.f32 %v13685_v51, %v1020_v23  ;;  %v13688_v53 = vld [vmem:[#allocation85_spill] sm:$0xff]  ;;  %v13690_v61 = vld [vmem:[#allocation87_spill] sm:$0xff]  ;;  %v3964_v55 = vadd.f32 1.0, %v6376_v60  ;;  %6397 = vpow2.f32 %v3533_v25  ;;  %v9775_v31 = vpop.f32.mrb[83].mxu0  ;;  %v9791_v25 = vadd.f32 %v9261_v36, %v13667_v18 }
 0x1ce   : > { %13679 = vst [vmem:[#allocation69_spill] sm:$0xff] %v9751_v29  ;;  %13682 = vst [vmem:[#allocation114_spill] sm:$0xff] %v9755_v33  ;;  %v9765_v29 = vpop.eup %6377  ;;  %v9769_v19 = vmul.f32 %v13689_v38, %v13688_v53  ;;  %v13691_v33 = vld [vmem:[#allocation131_spill] sm:$0xff]  ;;  %v9777_v10 = vpop.f32.mrb[83].mxu1  ;;  %v13695_v45 = vld [vmem:[#allocation89_spill] sm:$0xff]  ;;  %6399 = vrcp.f32 %v3963_v4  ;;  %v3013_v38 = vsub.f32 0.0, %v9747_v21  ;;  %v9805_v36 = vadd.f32 %v9216_v27, %v1025_v11 }
 0x1cf   : > { %13686 = vst [vmem:[#allocation7_spill] sm:$0xff] %v9763_v7  ;;  %13687 = vst [vmem:[#allocation73_spill] sm:$0xff] %v9765_v29  ;;  %v9773_v44 = vmul.f32 %v13691_v33, %v13690_v61  ;;  %v6380_v30 = vpop.eup %6379  ;;  %v13696_v51 = vld [vmem:[#allocation133_spill] sm:$0xff]  ;;  %v3537_v29 = vmul.f32 1.442695, %v3010_v57  ;;  %6401 = vrcp.f32 %v3964_v55  ;;  %v13699_v61 = vld [vmem:[#allocation140_spill] sm:$0xff] }
 0x1d0   : > { %13693 = vst [vmem:[#allocation77_spill] sm:$0xff] %v9775_v31  ;;  %13694 = vst [vmem:[#allocation120_spill] sm:$0xff] %v9777_v10  ;;  %v9781_v59 = vmul.f32 %v13696_v51, %v13695_v45  ;;  %v9784_v53 = vpop.eup %6381  ;;  %v3814_v33 = vadd.f32 1.0, %v6380_v30  ;;  %v9787_v60 = vadd.f32 %v13699_v61, %v1020_v23  ;;  %v13702_v31 = vld [vmem:[#allocation90_spill] sm:$0xff]  ;;  %6403 = vpow2.f32 %v3229_v47  ;;  %v13706_v55 = vld [vmem:[#allocation91_spill] sm:$0xff] }
 0x1d1   : > { %13692 = vst [vmem:[#allocation117_spill] sm:$0xff] %v9773_v44  ;;  %13698 = vst [vmem:[#allocation123_spill] sm:$0xff] %v9784_v53  ;;  %v6384_v10 = vpop.eup %6383  ;;  %v13703_v44 = vld [vmem:[#allocation136_spill] sm:$0xff]  ;;  %v3231_v57 = vmul.f32 1.442695, %v2857_v12  ;;  %v3011_v4 = vsub.f32 0.0, %v9763_v7 }
 0x1d2   : > { %13697 = vst [vmem:[#allocation78_spill] sm:$0xff] %v9781_v59  ;;  %13700 = vst [vmem:[#allocation80_spill] sm:$0xff] %v9787_v60  ;;  %v9795_v45 = vmul.f32 %v13703_v44, %v13702_v31  ;;  %v9798_v51 = vpop.eup %6385  ;;  %v13707_v30 = vld [vmem:[#allocation139_spill] sm:$0xff]  ;;  %6405 = vrcp.f32 %v3814_v33  ;;  %v3966_v23 = vadd.f32 1.0, %v6384_v10  ;;  %v13710_v61 = vld [vmem:[#allocation96_spill] sm:$0xff]  ;;  %v9815_v7 = vpop.f32.mrb[84].mxu0 }
 0x1d3   : > { %13701 = vst [vmem:[#allocation125_spill] sm:$0xff] %v9791_v25  ;;  %13705 = vst [vmem:[#allocation85_spill] sm:$0xff] %v9798_v51  ;;  %v9802_v59 = vmul.f32 %v13707_v30, %v13706_v55  ;;  %v6388_v18 = vpop.eup %6387  ;;  %v13711_v21 = vld [vmem:[#allocation141_spill] sm:$0xff]  ;;  %v13712_v47 = vld [vmem:[#allocation98_spill] sm:$0xff]  ;;  %6407 = vpow2.f32 %v3537_v29  ;;  %v9817_v55 = vpop.f32.mrb[84].mxu1  ;;  %v3012_v11 = vsub.f32 0.0, %v9787_v60 }
 0x1d4   : > { %13704 = vst [vmem:[#allocation137_spill] sm:$0xff] %v9795_v45  ;;  %13709 = vst [vmem:[#allocation87_spill] sm:$0xff] %v9805_v36  ;;  %v9809_v44 = vmul.f32 %v13711_v21, %v13710_v61  ;;  %v13713_v12 = vld [vmem:[#allocation144_spill] sm:$0xff]  ;;  %v3543_v45 = vmul.f32 1.442695, %v3013_v38  ;;  %v9819_v33 = vpop.eup %6389  ;;  %6409 = vrcp.f32 %v3966_v23  ;;  %v3815_v27 = vadd.f32 1.0, %v6388_v18  ;;  %v9823_v21 = vpop.permute.xlu1 %1034 }
 0x1d5   : > { %13708 = vst [vmem:[#allocation128_spill] sm:$0xff] %v9802_v59  ;;  %v9813_v31 = vmul.f32 %v13713_v12, %v13712_v47  ;;  %13715 = vst [vmem:[#allocation89_spill] sm:$0xff] %v9815_v7  ;;  %v2858_v10 = vsub.f32 0.0, %v9791_v25  ;;  %v6392_v30 = vpop.eup %6391  ;;  %v13718_v61 = vld [vmem:[#allocation99_spill] sm:$0xff]  ;;  %v13719_v47 = vld [vmem:[#allocation146_spill] sm:$0xff]  ;;  %6411 = vpow2.f32 %v3231_v57  ;;  %v3014_v7 = vsub.f32 0.0, %v9805_v36  ;;  %v1030_v51 = vpop.permute.xlu0 %1029 }
 0x1d6   : > { %13716 = vst [vmem:[#allocation133_spill] sm:$0xff] %v9817_v55  ;;  %13717 = vst [vmem:[#allocation140_spill] sm:$0xff] %v9819_v33  ;;  %v9827_v12 = vmul.f32 %v13719_v47, %v13718_v61  ;;  %v3539_v29 = vmul.f32 1.442695, %v3011_v4  ;;  %v13720_v38 = vld [vmem:[#allocation10_spill] sm:$0xff]  ;;  %v9833_v59 = vpop.eup %6393  ;;  %v13722_v23 = vld [vmem:[#allocation101_spill] sm:$0xff]  ;;  %6413 = vrcp.f32 %v3815_v27 }
 0x1d7   : > { %13714 = vst [vmem:[#allocation131_spill] sm:$0xff] %v9813_v31  ;;  %v9831_v31 = vadd.f32 %v9269_v5, %v13720_v38  ;;  %13721 = vst [vmem:[#allocation90_spill] sm:$0xff] %v9833_v59  ;;  %v13723_v18 = vld [vmem:[#allocation149_spill] sm:$0xff]  ;;  %v3969_v55 = vadd.f32 1.0, %v6392_v30  ;;  %v9840_v25 = vpop.f32.mrb[85].mxu0  ;;  %v6396_v61 = vpop.eup %6395  ;;  %v13727_v4 = vld [vmem:[#allocation152_spill] sm:$0xff]  ;;  %6415 = vpow2.f32 %v3543_v45 }
 0x1d8   : > { %v9837_v60 = vmul.f32 %v13723_v18, %v13722_v23  ;;  %13725 = vst [vmem:[#allocation91_spill] sm:$0xff] %v9840_v25  ;;  %v13726_v57 = vld [vmem:[#allocation105_spill] sm:$0xff]  ;;  %v13729_v5 = vld [vmem:[#allocation107_spill] sm:$0xff]  ;;  %v9854_v27 = vpop.f32.mrb[85].mxu1  ;;  %v6398_v30 = vpop.eup %6397  ;;  %v3541_v25 = vmul.f32 1.442695, %v3012_v11 }
 0x1d9   : > { %v9844_v47 = vmul.f32 %v13727_v4, %v13726_v57  ;;  %v13730_v33 = vld [vmem:[#allocation155_spill] sm:$0xff]  ;;  %v13732_v23 = vld [vmem:[#allocation153_spill] sm:$0xff]  ;;  %13734 = vst [vmem:[#allocation98_spill] sm:$0xff] %v9854_v27  ;;  %6417 = vrcp.f32 %v3969_v55  ;;  %v3233_v36 = vmul.f32 1.442695, %v2858_v10  ;;  %v9856_v59 = vpop.eup %6399  ;;  %v3968_v57 = vadd.f32 1.0, %v6398_v30 }
 0x1da   : > { %13724 = vst [vmem:[#allocation136_spill] sm:$0xff] %v9837_v60  ;;  %v9848_v53 = vmul.f32 %v13730_v33, %v13729_v5  ;;  %v9852_v18 = vadd.f32 %v13732_v23, %v9823_v21  ;;  %v3967_v60 = vadd.f32 1.0, %v6396_v61  ;;  %6419 = vpow2.f32 %v3539_v29  ;;  %v13735_v33 = vld [vmem:[#allocation148_spill] sm:$0xff]  ;;  %v9862_v45 = vpop.eup %6401  ;;  %v13737_v23 = vld [vmem:[#allocation110_spill] sm:$0xff] }
 0x1db   : > { %13728 = vst [vmem:[#allocation139_spill] sm:$0xff] %v9844_v47  ;;  %v2859_v4 = vsub.f32 0.0, %v9831_v31  ;;  %v9860_v5 = vadd.f32 %v13735_v33, %v1030_v51  ;;  %v3545_v55 = vmul.f32 1.442695, %v3014_v7  ;;  %v13738_v61 = vld [vmem:[#allocation150_spill] sm:$0xff]  ;;  %v6404_v10 = vpop.eup %6403  ;;  %v9874_v30 = vadd.f32 %v9282_v9, %v13720_v38  ;;  %v9878_v47 = vpop.f32.mrb[86].mxu0 }
 0x1dc   : > { %13731 = vst [vmem:[#allocation96_spill] sm:$0xff] %v9848_v53  ;;  %13733 = vst [vmem:[#allocation141_spill] sm:$0xff] %v9852_v18  ;;  %v9866_v53 = vmul.f32 %v9273_v3, %v13737_v23  ;;  %6421 = vrcp.f32 %v3967_v60  ;;  %v9869_v11 = vadd.f32 %v13738_v61, %v1030_v51  ;;  %v3017_v29 = vsub.f32 0.0, %v9852_v18  ;;  %v9880_v3 = vpop.f32.mrb[86].mxu1  ;;  %v9882_v60 = vpop.eup %6405  ;;  %v13742_v7 = vld [vmem:[#allocation112_spill] sm:$0xff] }
 0x1dd   : > { %13736 = vst [vmem:[#allocation144_spill] sm:$0xff] %v9860_v5  ;;  %6423 = vrcp.f32 %v3968_v57  ;;  %v4738_v33 = vadd.f32 %v9608_v34, %v9595_v0  ;;  %13740 = vst [vmem:[#allocation146_spill] sm:$0xff] %v9878_v47  ;;  %v9886_v51 = vmul.f32 %v9280_v50, %v13742_v7  ;;  %v3816_v57 = vadd.f32 1.0, %v6404_v10  ;;  %v6408_v9 = vpop.eup %6407  ;;  %v13744_v38 = vld [vmem:[#allocation116_spill] sm:$0xff]  ;;  %v13745_v47 = vld [vmem:[#allocation119_spill] sm:$0xff] }
 0x1de   : > { %13739 = vst [vmem:[#allocation99_spill] sm:$0xff] %v9869_v11  ;;  %13741 = vst [vmem:[#allocation10_spill] sm:$0xff] %v9880_v3  ;;  %6425 = vpow2.f32 %v3541_v25  ;;  %v4741_v23 = vadd.f32 %v9618_v26, %v9612_v49  ;;  %v9892_v61 = vmul.f32 %v9293_v2, %v13744_v38  ;;  %v3235_v34 = vmul.f32 1.442695, %v2859_v4  ;;  %v9895_v3 = vpop.eup %6409  ;;  %v9902_v26 = vpop.f32.mrb[87].mxu0 }
 0x1df   : > { %13743 = vst [vmem:[#allocation101_spill] sm:$0xff] %v9886_v51  ;;  %6427 = vpow2.f32 %v3233_v36  ;;  %v3015_v0 = vsub.f32 0.0, %v9860_v5  ;;  %4739 = vadd.xlane.f32.xlu0 %v4738_v33  ;;  %v9899_v50 = vmul.f32 %v9304_v32, %v13745_v47  ;;  %v3970_v25 = vadd.f32 1.0, %v6408_v9  ;;  %13747 = vst [vmem:[#allocation105_spill] sm:$0xff] %v9902_v26  ;;  %v9904_v2 = vpop.f32.mrb[87].mxu1  ;;  %v6412_v36 = vpop.eup %6411  ;;  %v13749_v33 = vld [vmem:[#allocation156_spill] sm:$0xff] }
 0x1e0   : > { %6429 = vrcp.f32 %v3816_v57  ;;  %v3016_v49 = vsub.f32 0.0, %v9869_v11  ;;  %4742 = vadd.xlane.f32.xlu1 %v4741_v23  ;;  %13748 = vst [vmem:[#allocation152_spill] sm:$0xff] %v9904_v2  ;;  %v3551_v4 = vmul.f32 1.442695, %v3017_v29  ;;  %v2860_v10 = vsub.f32 0.0, %v9874_v30  ;;  %v1045_v32 = vpop.permute.xlu1 %1044  ;;  %v9911_v47 = vpop.eup %6413  ;;  %v13751_v57 = vld [vmem:[#allocation122_spill] sm:$0xff] }
 0x1e1   : > { %13746 = vst [vmem:[#allocation149_spill] sm:$0xff] %v9899_v50  ;;  %6431 = vpow2.f32 %v3545_v55  ;;  %v9909_v7 = vadd.f32 %v13749_v33, %v9823_v21  ;;  %v9915_v9 = vmul.f32 %v9315_v46, %v13751_v57  ;;  %v13753_v23 = vld [vmem:[#allocation124_spill] sm:$0xff]  ;;  %v3817_v55 = vadd.f32 1.0, %v6412_v36  ;;  %v6416_v29 = vpop.eup %6415  ;;  %v13755_v50 = vld [vmem:[#allocation127_spill] sm:$0xff]  ;;  %v13756_v33 = vld [vmem:[#allocation9_spill] sm:$0xff]  ;;  %v1040_v11 = vpop.permute.xlu0 %1039 }
 0x1e2   : > { %v9919_v38 = vmul.f32 %v9326_v54, %v13753_v23  ;;  %6433 = vrcp.f32 %v3970_v25  ;;  %v9923_v51 = vmul.f32 %v9336_v41, %v13755_v50  ;;  %v3547_v21 = vmul.f32 1.442695, %v3015_v0  ;;  %v13757_v2 = vld [vmem:[#allocation163_spill] sm:$0xff]  ;;  %v13758_v23 = vld [vmem:[#allocation164_spill] sm:$0xff]  ;;  %v9937_v0 = vpop.f32.mrb[88].mxu0  ;;  %v9939_v50 = vpop.f32.mrb[88].mxu1 }
 0x1e3   : > { %13750 = vst [vmem:[#allocation107_spill] sm:$0xff] %v9909_v7  ;;  %13752 = vst [vmem:[#allocation155_spill] sm:$0xff] %v9915_v9  ;;  %6435 = vpow2.f32 %v3235_v34  ;;  %v9927_v26 = vadd.f32 %v13757_v2, %v13756_v33  ;;  %v9929_v46 = vpop.eup %6417  ;;  %v3973_v57 = vadd.f32 1.0, %v6416_v29  ;;  %v3549_v54 = vmul.f32 1.442695, %v3016_v49  ;;  %v13762_v49 = vld [vmem:[#allocation158_spill] sm:$0xff] }
 0x1e4   : > { %13754 = vst [vmem:[#allocation153_spill] sm:$0xff] %v9919_v38  ;;  %6437 = vrcp.f32 %v3817_v55  ;;  %v9932_v25 = vadd.f32 %v13758_v23, %v1045_v32  ;;  %v6420_v36 = vpop.eup %6419  ;;  %v3237_v38 = vmul.f32 1.442695, %v2860_v10  ;;  %v3018_v41 = vsub.f32 0.0, %v9909_v7  ;;  %13760 = vst [vmem:[#allocation110_spill] sm:$0xff] %v9937_v0  ;;  %v13764_v23 = vld [vmem:[#allocation129_spill] sm:$0xff] }
 0x1e5   : > { %6439 = vpow2.f32 %v3551_v4  ;;  %v4744_v34 = vadd.f32 %v9648_v56, %v9644_v16  ;;  %13761 = vst [vmem:[#allocation150_spill] sm:$0xff] %v9939_v50  ;;  %v3971_v55 = vadd.f32 1.0, %v6420_v36  ;;  %v9944_v29 = vadd.f32 %v13762_v49, %v1040_v11  ;;  %v13766_v16 = vld [vmem:[#allocation132_spill] sm:$0xff]  ;;  %v9959_v36 = vpop.f32.mrb[89].mxu0  ;;  %v13768_v50 = vld [vmem:[#allocation135_spill] sm:$0xff] }
 0x1e6   : > { %13759 = vst [vmem:[#allocation148_spill] sm:$0xff] %v9932_v25  ;;  %v9941_v2 = vpop.eup %6421  ;;  %6441 = vrcp.f32 %v3973_v57  ;;  %v4747_v4 = vadd.f32 %v9666_v1, %v9652_v15  ;;  %v9952_v9 = vmul.f32 %v9342_v20, %v13764_v23  ;;  %v9956_v56 = vmul.f32 %v9360_v17, %v13766_v16  ;;  %13767 = vst [vmem:[#allocation119_spill] sm:$0xff] %v9959_v36  ;;  %v13770_v15 = vld [vmem:[#allocation138_spill] sm:$0xff]  ;;  %v9970_v17 = vpop.f32.mrb[89].mxu1  ;;  %v13773_v16 = vld [vmem:[#allocation160_spill] sm:$0xff] }
 0x1e7   : > { %13763 = vst [vmem:[#allocation112_spill] sm:$0xff] %v9944_v29  ;;  %v9948_v10 = vpop.eup %6423  ;;  %6443 = vpow2.f32 %v3547_v21  ;;  %v2861_v57 = vsub.f32 0.0, %v9927_v26  ;;  %4745 = vadd.xlane.f32.xlu0 %v4744_v34  ;;  %v9963_v1 = vmul.f32 %v9364_v22, %v13768_v50  ;;  %v9967_v0 = vmul.f32 %v9379_v37, %v13770_v15  ;;  %13772 = vst [vmem:[#allocation124_spill] sm:$0xff] %v9970_v17  ;;  %v13775_v22 = vld [vmem:[#allocation142_spill] sm:$0xff] }
 0x1e8   : > { %13765 = vst [vmem:[#allocation116_spill] sm:$0xff] %v9952_v9  ;;  %v6426_v49 = vpop.eup %6425  ;;  %6445 = vrcp.f32 %v3971_v55  ;;  %v3021_v20 = vsub.f32 0.0, %v9932_v25  ;;  %4748 = vadd.xlane.f32.xlu1 %v4747_v4  ;;  %v3553_v34 = vmul.f32 1.442695, %v3018_v41  ;;  %v9973_v9 = vadd.f32 %v13773_v16, %v1040_v11  ;;  %v13778_v41 = vld [vmem:[#allocation167_spill] sm:$0xff] }
 0x1e9   : > { %13769 = vst [vmem:[#allocation156_spill] sm:$0xff] %v9963_v1  ;;  %13771 = vst [vmem:[#allocation122_spill] sm:$0xff] %v9967_v0  ;;  %v6428_v21 = vpop.eup %6427  ;;  %v3972_v23 = vadd.f32 1.0, %v6426_v49  ;;  %6447 = vpow2.f32 %v3549_v54  ;;  %v9979_v50 = vmul.f32 %v9384_v28, %v13775_v22  ;;  %v3019_v55 = vsub.f32 0.0, %v9944_v29  ;;  %v13777_v49 = vld [vmem:[#allocation166_spill] sm:$0xff]  ;;  %v13780_v1 = vld [vmem:[#allocation143_spill] sm:$0xff] }
 0x1ea   : > { %13774 = vst [vmem:[#allocation127_spill] sm:$0xff] %v9973_v9  ;;  %v9975_v36 = vpop.eup %6429  ;;  %v3818_v37 = vadd.f32 1.0, %v6428_v21  ;;  %6449 = vpow2.f32 %v3237_v38  ;;  %v3239_v15 = vmul.f32 1.442695, %v2861_v57  ;;  %v9984_v54 = vadd.f32 %v13777_v49, %v13756_v33  ;;  %v10002_v49 = vpop.f32.mrb[90].mxu1 }
 0x1eb   : > { %13776 = vst [vmem:[#allocation9_spill] sm:$0xff] %v9979_v50  ;;  %v6432_v4 = vpop.eup %6431  ;;  %6451 = vrcp.f32 %v3972_v23  ;;  %v9987_v11 = vadd.f32 %v13778_v41, %v1045_v32  ;;  %v9993_v28 = vmul.f32 %v9395_v43, %v13780_v1  ;;  %v3559_v21 = vmul.f32 1.442695, %v3021_v20  ;;  %v10000_v23 = vpop.f32.mrb[90].mxu0  ;;  %13782 = vst [vmem:[#allocation158_spill] sm:$0xff] %v10002_v49  ;;  %v13783_v43 = vld [vmem:[#allocation145_spill] sm:$0xff] }
 0x1ec   : > { %v9989_v16 = vpop.eup %6433  ;;  %6453 = vrcp.f32 %v3818_v37  ;;  %v3974_v38 = vadd.f32 1.0, %v6432_v4  ;;  %v3020_v57 = vsub.f32 0.0, %v9973_v9  ;;  %v4750_v33 = vadd.f32 %v9684_v52, %v9673_v48  ;;  %13781 = vst [vmem:[#allocation164_spill] sm:$0xff] %v10000_v23  ;;  %v1050_v37 = vpop.permute.xlu0 %1049  ;;  %v13793_v49 = vld [vmem:[#allocation154_spill] sm:$0xff]  ;;  %v13795_v23 = vld [vmem:[#allocation169_spill] sm:$0xff] }
 0x1ed   : > { %13779 = vst [vmem:[#allocation163_spill] sm:$0xff] %v9987_v11  ;;  %v6436_v22 = vpop.eup %6435  ;;  %6455 = vpow2.f32 %v3553_v34  ;;  %v4753_v32 = vadd.f32 %v9703_v42, %v9692_v40  ;;  %v10008_v1 = vmul.f32 %v9402_v14, %v13783_v43  ;;  %v3555_v34 = vmul.f32 1.442695, %v3019_v55  ;;  %v13785_v40 = vld [vmem:[#allocation12_spill] sm:$0xff]  ;;  %v13788_v14 = vld [vmem:[#allocation147_spill] sm:$0xff]  ;;  %v10026_v43 = vpop.f32.mrb[91].mxu0 }
 0x1ee   : > { %v10004_v41 = vpop.eup %6437  ;;  %6457 = vrcp.f32 %v3974_v38  ;;  %v3819_v20 = vadd.f32 1.0, %v6436_v22  ;;  %v2862_v48 = vsub.f32 0.0, %v9984_v54  ;;  %v3022_v52 = vsub.f32 0.0, %v9987_v11  ;;  %v13786_v42 = vld [vmem:[#allocation168_spill] sm:$0xff]  ;;  %4751 = vadd.xlane.f32.xlu0 %v4750_v33  ;;  %v13789_v55 = vld [vmem:[#allocation151_spill] sm:$0xff]  ;;  %13791 = vst [vmem:[#allocation138_spill] sm:$0xff] %v10026_v43 }
 0x1ef   : > { %13784 = vst [vmem:[#allocation129_spill] sm:$0xff] %v10008_v1  ;;  %v6440_v4 = vpop.eup %6439  ;;  %6459 = vpow2.f32 %v3239_v15  ;;  %v10014_v50 = vadd.f32 %v13786_v42, %v13785_v40  ;;  %4754 = vadd.xlane.f32.xlu1 %v4753_v32  ;;  %v10020_v38 = vmul.f32 %v9408_v39, %v13788_v14  ;;  %v10024_v22 = vmul.f32 %v9419_v13, %v13789_v55  ;;  %v10028_v1 = vpop.f32.mrb[91].mxu1  ;;  %v13798_v13 = vld [vmem:[#allocation157_spill] sm:$0xff]  ;;  %v13813_v43 = vld [vmem:[#allocation11_spill] sm:$0xff] }
 0x1f0   : > { %v10016_v0 = vpop.eup %6441  ;;  %6461 = vrcp.f32 %v3819_v20  ;;  %v3977_v15 = vadd.f32 1.0, %v6440_v4  ;;  %13792 = vst [vmem:[#allocation160_spill] sm:$0xff] %v10028_v1  ;;  %v10032_v33 = vmul.f32 %v9429_v58, %v13793_v49  ;;  %v3557_v32 = vmul.f32 1.442695, %v3020_v57 }
 0x1f1   : > { %13787 = vst [vmem:[#allocation132_spill] sm:$0xff] %v10016_v0  ;;  %13790 = vst [vmem:[#allocation135_spill] sm:$0xff] %v10024_v22  ;;  %v6444_v42 = vpop.eup %6443  ;;  %6463 = vpow2.f32 %v3559_v21  ;;  %v10035_v39 = vadd.f32 %v13795_v23, %v1050_v37  ;;  %v10041_v20 = vmul.f32 %v9435_v6, %v13798_v13  ;;  %v10045_v55 = vadd.f32 %v9329_v8, %v13785_v40  ;;  %v13800_v6 = vld [vmem:[#allocation67_spill] sm:$0xff] }
 0x1f2   : > { %13794 = vst [vmem:[#allocation142_spill] sm:$0xff] %v10032_v33  ;;  %v10037_v14 = vpop.eup %6445  ;;  %6465 = vrcp.f32 %v3977_v15  ;;  %v3975_v4 = vadd.f32 1.0, %v6444_v42  ;;  %v3241_v58 = vmul.f32 1.442695, %v2862_v48  ;;  %v3561_v21 = vmul.f32 1.442695, %v3022_v52 }
 0x1f3   : > { %13796 = vst [vmem:[#allocation166_spill] sm:$0xff] %v10035_v39  ;;  %13797 = vst [vmem:[#allocation167_spill] sm:$0xff] %v10037_v14  ;;  %v6448_v22 = vpop.eup %6447  ;;  %6467 = vpow2.f32 %v3555_v34  ;;  %v2863_v57 = vsub.f32 0.0, %v10014_v50  ;;  %v4756_v33 = vadd.f32 %v9722_v62, %v9708_v63  ;;  %v4759_v15 = vadd.f32 %v13800_v6, %v9727_v24  ;;  %v13802_v34 = vld [vmem:[#allocation171_spill] sm:$0xff]  ;;  %v13807_v63 = vld [vmem:[#allocation196_spill] sm:$0xff] }
 0x1f4   : > { %13799 = vst [vmem:[#allocation143_spill] sm:$0xff] %v10041_v20  ;;  %v6450_v23 = vpop.eup %6449  ;;  %v3976_v49 = vadd.f32 1.0, %v6448_v22  ;;  %6469 = vrcp.f32 %v3975_v4  ;;  %v3023_v8 = vsub.f32 0.0, %v10035_v39  ;;  %v10056_v48 = vadd.f32 %v13802_v34, %v1050_v37  ;;  %v13804_v40 = vld [vmem:[#allocation159_spill] sm:$0xff]  ;;  %v13805_v22 = vld [vmem:[#allocation194_spill] sm:$0xff]  ;;  %v13806_v20 = vld [vmem:[#allocation161_spill] sm:$0xff] }
 0x1f5   : > { %v10052_v42 = vpop.eup %6451  ;;  %v3820_v13 = vadd.f32 1.0, %v6450_v23  ;;  %6471 = vpow2.f32 %v3557_v32  ;;  %v10062_v4 = vmul.f32 %v13805_v22, %v13804_v40  ;;  %v10066_v62 = vmul.f32 %v13807_v63, %v13806_v20  ;;  %4757 = vadd.xlane.f32.xlu0 %v4756_v33  ;;  %4760 = vadd.xlane.f32.xlu1 %v4759_v15  ;;  %v10069_v32 = vpop.f32.mrb[92].mxu0  ;;  %v13811_v6 = vld [vmem:[#allocation162_spill] sm:$0xff]  ;;  %v13812_v34 = vld [vmem:[#allocation197_spill] sm:$0xff]  ;;  %v13817_v15 = vld [vmem:[#allocation199_spill] sm:$0xff] }
 0x1f6   : > { %13801 = vst [vmem:[#allocation145_spill] sm:$0xff] %v10052_v42  ;;  %13803 = vst [vmem:[#allocation12_spill] sm:$0xff] %v10056_v48  ;;  %v10058_v52 = vpop.eup %6453  ;;  %6473 = vrcp.f32 %v3976_v49  ;;  %v2864_v24 = vsub.f32 0.0, %v10045_v55  ;;  %v10071_v23 = vpop.f32.mrb[92].mxu1  ;;  %v10075_v1 = vmul.f32 %v13812_v34, %v13811_v6  ;;  %v3243_v40 = vmul.f32 1.442695, %v2863_v57 }
 0x1f7   : > { %13808 = vst [vmem:[#allocation168_spill] sm:$0xff] %v10066_v62  ;;  %13809 = vst [vmem:[#allocation147_spill] sm:$0xff] %v10069_v32  ;;  %v6456_v37 = vpop.eup %6455  ;;  %6475 = vrcp.f32 %v3820_v13  ;;  %v1055_v22 = vpop.permute.xlu1 %1054  ;;  %v13814_v20 = vld [vmem:[#allocation173_spill] sm:$0xff]  ;;  %v13823_v34 = vld [vmem:[#allocation170_spill] sm:$0xff]  ;;  %v3563_v11 = vmul.f32 1.442695, %v3023_v8  ;;  %v4771_v5 = vadd.f32 %v9866_v53, %v9827_v12 }
 0x1f8   : > { %13810 = vst [vmem:[#allocation151_spill] sm:$0xff] %v10071_v23  ;;  %v10079_v63 = vadd.f32 %v13814_v20, %v13813_v43  ;;  %v10081_v49 = vpop.eup %6457  ;;  %v13816_v33 = vld [vmem:[#allocation165_spill] sm:$0xff]  ;;  %v3978_v32 = vadd.f32 1.0, %v6456_v37  ;;  %6477 = vpow2.f32 %v3241_v58  ;;  %v13819_v23 = vld [vmem:[#allocation174_spill] sm:$0xff]  ;;  %v10090_v6 = vpop.f32.mrb[93].mxu0  ;;  %v13824_v39 = vld [vmem:[#allocation200_spill] sm:$0xff] }
 0x1f9   : > { %13815 = vst [vmem:[#allocation154_spill] sm:$0xff] %v10081_v49  ;;  %v10085_v62 = vmul.f32 %v13817_v15, %v13816_v33  ;;  %v10088_v17 = vadd.f32 %v13819_v23, %v1055_v22  ;;  %13821 = vst [vmem:[#allocation67_spill] sm:$0xff] %v10090_v6  ;;  %v10092_v13 = vpop.f32.mrb[93].mxu1  ;;  %v6460_v57 = vpop.eup %6459  ;;  %v10096_v20 = vmul.f32 %v13824_v39, %v13823_v34  ;;  %6479 = vpow2.f32 %v3561_v21  ;;  %v13826_v23 = vld [vmem:[#allocation176_spill] sm:$0xff]  ;;  %v13827_v6 = vld [vmem:[#allocation134_spill] sm:$0xff] }
 0x1fa   : > { %13822 = vst [vmem:[#allocation171_spill] sm:$0xff] %v10092_v13  ;;  %v3024_v9 = vsub.f32 0.0, %v10056_v48  ;;  %v10099_v33 = vpop.eup %6461  ;;  %6481 = vrcp.f32 %v3978_v32  ;;  %v3821_v58 = vadd.f32 1.0, %v6460_v57  ;;  %v3245_v37 = vmul.f32 1.442695, %v2864_v24  ;;  %v13828_v39 = vld [vmem:[#allocation114_spill] sm:$0xff] }
 0x1fb   : > { %13818 = vst [vmem:[#allocation169_spill] sm:$0xff] %v10085_v62  ;;  %13820 = vst [vmem:[#allocation157_spill] sm:$0xff] %v10088_v17  ;;  %v10103_v15 = vadd.f32 %v13826_v23, %v13813_v43  ;;  %v6464_v62 = vpop.eup %6463  ;;  %6483 = vpow2.f32 %v3243_v40  ;;  %v2865_v13 = vsub.f32 0.0, %v10079_v63  ;;  %v4762_v34 = vadd.f32 %v13828_v39, %v13827_v6  ;;  %v13831_v32 = vld [vmem:[#allocation202_spill] sm:$0xff]  ;;  %v13833_v40 = vld [vmem:[#allocation175_spill] sm:$0xff] }
 0x1fc   : > { %13825 = vst [vmem:[#allocation159_spill] sm:$0xff] %v10096_v20  ;;  %v4765_v21 = vadd.f32 %v9769_v19, %v9759_v35  ;;  %v10110_v8 = vpop.eup %6465  ;;  %v13830_v20 = vld [vmem:[#allocation172_spill] sm:$0xff]  ;;  %6485 = vrcp.f32 %v3821_v58  ;;  %v3981_v24 = vadd.f32 1.0, %v6464_v62  ;;  %v3025_v43 = vsub.f32 0.0, %v10088_v17  ;;  %v13834_v48 = vld [vmem:[#allocation203_spill] sm:$0xff]  ;;  %v13835_v39 = vld [vmem:[#allocation177_spill] sm:$0xff] }
 0x1fd   : > { %13829 = vst [vmem:[#allocation194_spill] sm:$0xff] %v10110_v8  ;;  %v10114_v57 = vmul.f32 %v13831_v32, %v13830_v20  ;;  %v6468_v23 = vpop.eup %6467  ;;  %v10119_v29 = vmul.f32 %v13834_v48, %v13833_v40  ;;  %6487 = vpow2.f32 %v3563_v11  ;;  %v3565_v6 = vmul.f32 1.442695, %v3024_v9  ;;  %4763 = vadd.xlane.f32.xlu0 %v4762_v34  ;;  %v10124_v35 = vpop.f32.mrb[94].mxu0  ;;  %v13840_v62 = vld [vmem:[#allocation178_spill] sm:$0xff]  ;;  %v13841_v58 = vld [vmem:[#allocation205_spill] sm:$0xff] }
 0x1fe   : > { %v10122_v25 = vadd.f32 %v13835_v39, %v1055_v22  ;;  %4766 = vadd.xlane.f32.xlu1 %v4765_v21  ;;  %13837 = vst [vmem:[#allocation162_spill] sm:$0xff] %v10124_v35  ;;  %v10126_v19 = vpop.f32.mrb[94].mxu1  ;;  %v10128_v20 = vpop.eup %6469  ;;  %v10132_v32 = vmul.f32 %v13841_v58, %v13840_v62  ;;  %6489 = vrcp.f32 %v3981_v24  ;;  %v3979_v48 = vadd.f32 1.0, %v6468_v23  ;;  %v13843_v40 = vld [vmem:[#allocation2_spill] sm:$0xff]  ;;  %v13844_v22 = vld [vmem:[#allocation207_spill] sm:$0xff]  ;;  %v13848_v23 = vld [vmem:[#allocation181_spill] sm:$0xff] }
 0x1ff   : > { %13832 = vst [vmem:[#allocation161_spill] sm:$0xff] %v10114_v57  ;;  %13838 = vst [vmem:[#allocation197_spill] sm:$0xff] %v10126_v19  ;;  %v2866_v11 = vsub.f32 0.0, %v10103_v15  ;;  %v6472_v9 = vpop.eup %6471  ;;  %v10137_v39 = vmul.f32 %v13844_v22, %v13843_v40  ;;  %6491 = vpow2.f32 %v3245_v37  ;;  %v3247_v34 = vmul.f32 1.442695, %v2865_v13  ;;  %v1060_v21 = vpop.permute.xlu0 %1059  ;;  %v13845_v57 = vld [vmem:[#allocation14_spill] sm:$0xff] }
 0x200   : > { %13836 = vst [vmem:[#allocation196_spill] sm:$0xff] %v10122_v25  ;;  %13839 = vst [vmem:[#allocation11_spill] sm:$0xff] %v10128_v20  ;;  %v13846_v19 = vld [vmem:[#allocation180_spill] sm:$0xff]  ;;  %v10143_v17 = vpop.eup %6473  ;;  %v3980_v62 = vadd.f32 1.0, %v6472_v9  ;;  %6493 = vrcp.f32 %v3979_v48  ;;  %v3567_v24 = vmul.f32 1.442695, %v3025_v43  ;;  %v10146_v58 = vadd.f32 %v13848_v23, %v1060_v21 }
 0x201   : > { %13842 = vst [vmem:[#allocation173_spill] sm:$0xff] %v10132_v32  ;;  %v10141_v35 = vadd.f32 %v13846_v19, %v13845_v57  ;;  %13847 = vst [vmem:[#allocation165_spill] sm:$0xff] %v10143_v17  ;;  %v10148_v32 = vpop.f32.mrb[95].mxu0  ;;  %v10150_v7 = vpop.eup %6475  ;;  %v13851_v40 = vld [vmem:[#allocation179_spill] sm:$0xff]  ;;  %v13852_v37 = vld [vmem:[#allocation208_spill] sm:$0xff]  ;;  %6495 = vpow2.f32 %v3565_v6  ;;  %v3026_v9 = vsub.f32 0.0, %v10122_v25 }
 0x202   : > { %13849 = vst [vmem:[#allocation199_spill] sm:$0xff] %v10146_v58  ;;  %13850 = vst [vmem:[#allocation174_spill] sm:$0xff] %v10148_v32  ;;  %v10154_v13 = vmul.f32 %v13852_v37, %v13851_v40  ;;  %v13854_v22 = vld [vmem:[#allocation182_spill] sm:$0xff]  ;;  %v13855_v20 = vld [vmem:[#allocation209_spill] sm:$0xff]  ;;  %v10161_v48 = vpop.f32.mrb[95].mxu1  ;;  %v6478_v43 = vpop.eup %6477  ;;  %6497 = vrcp.f32 %v3980_v62  ;;  %4772 = vadd.xlane.f32.xlu1 %v4771_v5 }
 0x203   : > { %v10158_v19 = vmul.f32 %v13855_v20, %v13854_v22  ;;  %13857 = vst [vmem:[#allocation176_spill] sm:$0xff] %v10161_v48  ;;  %v3249_v23 = vmul.f32 1.442695, %v2866_v11  ;;  %v13858_v17 = vld [vmem:[#allocation117_spill] sm:$0xff]  ;;  %v6480_v40 = vpop.eup %6479  ;;  %v3822_v37 = vadd.f32 1.0, %v6478_v43  ;;  %6499 = vpow2.f32 %v3247_v34  ;;  %v13859_v6 = vld [vmem:[#allocation183_spill] sm:$0xff] }
 0x204   : > { %13853 = vst [vmem:[#allocation170_spill] sm:$0xff] %v10154_v13  ;;  %v4768_v32 = vadd.f32 %v9809_v44, %v13858_v17  ;;  %v2867_v20 = vsub.f32 0.0, %v10141_v35  ;;  %v10170_v22 = vadd.f32 %v13859_v6, %v13845_v57  ;;  %v10172_v13 = vpop.eup %6481  ;;  %v13862_v62 = vld [vmem:[#allocation210_spill] sm:$0xff]  ;;  %v3982_v48 = vadd.f32 1.0, %v6480_v40  ;;  %v13865_v17 = vld [vmem:[#allocation211_spill] sm:$0xff]  ;;  %v13871_v40 = vld [vmem:[#allocation4_spill] sm:$0xff] }
 0x205   : > { %13856 = vst [vmem:[#allocation200_spill] sm:$0xff] %v10158_v19  ;;  %13860 = vst [vmem:[#allocation134_spill] sm:$0xff] %v10172_v13  ;;  %v13861_v19 = vld [vmem:[#allocation185_spill] sm:$0xff]  ;;  %6501 = vpow2.f32 %v3567_v24  ;;  %v3027_v44 = vsub.f32 0.0, %v10146_v58  ;;  %v6484_v53 = vpop.eup %6483  ;;  %v13864_v12 = vld [vmem:[#allocation186_spill] sm:$0xff]  ;;  %v10187_v13 = vpop.f32.mrb[96].mxu0 }
 0x206   : > { %v10176_v11 = vmul.f32 %v13862_v62, %v13861_v19  ;;  %4769 = vadd.xlane.f32.xlu0 %v4768_v32  ;;  %v10181_v34 = vmul.f32 %v13865_v17, %v13864_v12  ;;  %v13866_v43 = vld [vmem:[#allocation187_spill] sm:$0xff]  ;;  %6503 = vrcp.f32 %v3822_v37  ;;  %v3569_v25 = vmul.f32 1.442695, %v3026_v9  ;;  %13869 = vst [vmem:[#allocation202_spill] sm:$0xff] %v10187_v13  ;;  %v10189_v19 = vpop.f32.mrb[96].mxu1  ;;  %v10191_v24 = vpop.eup %6485  ;;  %v13872_v32 = vld [vmem:[#allocation218_spill] sm:$0xff] }
 0x207   : > { %v13867_v57 = vld [vmem:[#allocation215_spill] sm:$0xff]  ;;  %13870 = vst [vmem:[#allocation175_spill] sm:$0xff] %v10189_v19  ;;  %v10195_v5 = vmul.f32 %v13872_v32, %v13871_v40  ;;  %6505 = vrcp.f32 %v3982_v48  ;;  %v3823_v62 = vadd.f32 1.0, %v6484_v53  ;;  %v13873_v12 = vld [vmem:[#allocation184_spill] sm:$0xff]  ;;  %v2868_v9 = vsub.f32 0.0, %v10170_v22  ;;  %v13875_v37 = vld [vmem:[#allocation13_spill] sm:$0xff]  ;;  %v1065_v53 = vpop.permute.xlu1 %1064 }
 0x208   : > { %13863 = vst [vmem:[#allocation114_spill] sm:$0xff] %v10176_v11  ;;  %v10185_v6 = vmul.f32 %v13867_v57, %v13866_v43  ;;  %v10198_v17 = vadd.f32 %v13873_v12, %v1060_v21  ;;  %v6488_v11 = vpop.eup %6487  ;;  %6507 = vpow2.f32 %v3249_v23  ;;  %v3251_v43 = vmul.f32 1.442695, %v2867_v20  ;;  %v13876_v57 = vld [vmem:[#allocation188_spill] sm:$0xff]  ;;  %v13878_v13 = vld [vmem:[#allocation190_spill] sm:$0xff]  ;;  %v13879_v58 = vld [vmem:[#allocation219_spill] sm:$0xff] }
 0x209   : > { %v10205_v19 = vpop.eup %6489  ;;  %v10209_v40 = vmul.f32 %v13879_v58, %v13878_v13  ;;  %6509 = vrcp.f32 %v3823_v62  ;;  %v3983_v48 = vadd.f32 1.0, %v6488_v11  ;;  %v3571_v21 = vmul.f32 1.442695, %v3027_v44  ;;  %v10211_v32 = vpop.f32.mrb[97].mxu0  ;;  %v13882_v20 = vld [vmem:[#allocation189_spill] sm:$0xff]  ;;  %v13887_v11 = vld [vmem:[#allocation224_spill] sm:$0xff] }
 0x20a   : > { %13868 = vst [vmem:[#allocation172_spill] sm:$0xff] %v10185_v6  ;;  %13874 = vst [vmem:[#allocation203_spill] sm:$0xff] %v10198_v17  ;;  %v10203_v6 = vadd.f32 %v13876_v57, %v13875_v37  ;;  %v6492_v23 = vpop.eup %6491  ;;  %6511 = vpow2.f32 %v3569_v25  ;;  %v10214_v12 = vadd.f32 %v13882_v20, %v1065_v53  ;;  %v4774_v57 = vadd.f32 %v9923_v51, %v9892_v61  ;;  %v10220_v27 = vpop.f32.mrb[97].mxu1  ;;  %v13886_v13 = vld [vmem:[#allocation193_spill] sm:$0xff]  ;;  %v13889_v61 = vld [vmem:[#allocation191_spill] sm:$0xff] }
 0x20b   : > { %13877 = vst [vmem:[#allocation177_spill] sm:$0xff] %v10205_v19  ;;  %13880 = vst [vmem:[#allocation178_spill] sm:$0xff] %v10209_v40  ;;  %v4777_v19 = vadd.f32 %v9993_v28, %v9956_v56  ;;  %v10222_v58 = vpop.eup %6493  ;;  %v10226_v44 = vmul.f32 %v13887_v11, %v13886_v13  ;;  %6513 = vrcp.f32 %v3983_v48  ;;  %v3824_v62 = vadd.f32 1.0, %v6492_v23  ;;  %v13892_v13 = vld [vmem:[#allocation227_spill] sm:$0xff]  ;;  %v13895_v23 = vld [vmem:[#allocation230_spill] sm:$0xff] }
 0x20c   : > { %13881 = vst [vmem:[#allocation205_spill] sm:$0xff] %v10211_v32  ;;  %13883 = vst [vmem:[#allocation2_spill] sm:$0xff] %v10214_v12  ;;  %v3028_v25 = vsub.f32 0.0, %v10198_v17  ;;  %v6496_v20 = vpop.eup %6495  ;;  %6515 = vpow2.f32 %v3251_v43  ;;  %v3253_v40 = vmul.f32 1.442695, %v2868_v9  ;;  %v2869_v51 = vsub.f32 0.0, %v10203_v6  ;;  %4775 = vadd.xlane.f32.xlu0 %v4774_v57 }
 0x20d   : > { %13884 = vst [vmem:[#allocation207_spill] sm:$0xff] %v10220_v27  ;;  %13885 = vst [vmem:[#allocation14_spill] sm:$0xff] %v10222_v58  ;;  %v10232_v56 = vadd.f32 %v13889_v61, %v13875_v37  ;;  %4778 = vadd.xlane.f32.xlu1 %v4777_v19  ;;  %v10234_v28 = vpop.eup %6497  ;;  %v13891_v27 = vld [vmem:[#allocation84_spill] sm:$0xff]  ;;  %v13894_v48 = vld [vmem:[#allocation195_spill] sm:$0xff]  ;;  %6517 = vrcp.f32 %v3824_v62  ;;  %v3984_v43 = vadd.f32 1.0, %v6496_v20  ;;  %v3029_v19 = vsub.f32 0.0, %v10214_v12 }
 0x20e   : > { %13888 = vst [vmem:[#allocation180_spill] sm:$0xff] %v10226_v44  ;;  %13890 = vst [vmem:[#allocation181_spill] sm:$0xff] %v10234_v28  ;;  %v10238_v11 = vmul.f32 %v13892_v13, %v13891_v27  ;;  %v10242_v44 = vmul.f32 %v13895_v23, %v13894_v48  ;;  %v6500_v9 = vpop.eup %6499  ;;  %v13896_v32 = vld [vmem:[#allocation198_spill] sm:$0xff]  ;;  %6519 = vpow2.f32 %v3571_v21  ;;  %v13899_v37 = vld [vmem:[#allocation192_spill] sm:$0xff]  ;;  %v10252_v61 = vpop.f32.mrb[98].mxu0 }
 0x20f   : > { %v13897_v17 = vld [vmem:[#allocation234_spill] sm:$0xff]  ;;  %v10250_v57 = vadd.f32 %v13899_v37, %v1065_v53  ;;  %13901 = vst [vmem:[#allocation209_spill] sm:$0xff] %v10252_v61  ;;  %v10254_v27 = vpop.f32.mrb[98].mxu1  ;;  %v6502_v13 = vpop.eup %6501  ;;  %6521 = vrcp.f32 %v3984_v43  ;;  %v3825_v48 = vadd.f32 1.0, %v6500_v9  ;;  %v3573_v62 = vmul.f32 1.442695, %v3028_v25 }
 0x210   : > { %13893 = vst [vmem:[#allocation179_spill] sm:$0xff] %v10238_v11  ;;  %v10246_v58 = vmul.f32 %v13897_v17, %v13896_v32  ;;  %13902 = vst [vmem:[#allocation117_spill] sm:$0xff] %v10254_v27  ;;  %v13903_v20 = vld [vmem:[#allocation16_spill] sm:$0xff]  ;;  %v13904_v23 = vld [vmem:[#allocation213_spill] sm:$0xff]  ;;  %v10260_v17 = vpop.eup %6503  ;;  %v3985_v21 = vadd.f32 1.0, %v6502_v13  ;;  %v1070_v32 = vpop.permute.xlu0 %1069  ;;  %6523 = vpow2.f32 %v3253_v40  ;;  %v2870_v53 = vsub.f32 0.0, %v10232_v56 }
 0x211   : > { %13900 = vst [vmem:[#allocation182_spill] sm:$0xff] %v10250_v57  ;;  %v10258_v11 = vadd.f32 %v13904_v23, %v13903_v20  ;;  %v10263_v37 = vpop.eup %6505  ;;  %v13906_v61 = vld [vmem:[#allocation3_spill] sm:$0xff]  ;;  %v13907_v27 = vld [vmem:[#allocation236_spill] sm:$0xff]  ;;  %6525 = vrcp.f32 %v3825_v48  ;;  %v4780_v25 = vadd.f32 %v10062_v4, %v10020_v38  ;;  %v4783_v43 = vadd.f32 %v10119_v29, %v10075_v1  ;;  %v10273_v9 = vpop.f32.mrb[99].mxu0  ;;  %v13913_v48 = vld [vmem:[#allocation201_spill] sm:$0xff] }
 0x212   : > { %13898 = vst [vmem:[#allocation208_spill] sm:$0xff] %v10246_v58  ;;  %v3255_v58 = vmul.f32 1.442695, %v2869_v51  ;;  %13905 = vst [vmem:[#allocation183_spill] sm:$0xff] %v10263_v37  ;;  %v10267_v12 = vmul.f32 %v13907_v27, %v13906_v61  ;;  %v10275_v13 = vpop.f32.mrb[99].mxu1  ;;  %v6508_v40 = vpop.eup %6507  ;;  %6527 = vrcp.f32 %v3985_v21  ;;  %v3030_v23 = vsub.f32 0.0, %v10250_v57 }
 0x213   : > { %13908 = vst [vmem:[#allocation185_spill] sm:$0xff] %v10273_v9  ;;  %13909 = vst [vmem:[#allocation210_spill] sm:$0xff] %v10275_v13  ;;  %v3575_v51 = vmul.f32 1.442695, %v3029_v19  ;;  %v13910_v37 = vld [vmem:[#allocation214_spill] sm:$0xff]  ;;  %v10281_v61 = vpop.eup %6509  ;;  %v3826_v27 = vadd.f32 1.0, %v6508_v40  ;;  %6529 = vpow2.f32 %v3573_v62  ;;  %4781 = vadd.xlane.f32.xlu0 %v4780_v25  ;;  %4784 = vadd.xlane.f32.xlu1 %v4783_v43 }
 0x214   : > { %v10279_v28 = vadd.f32 %v13910_v37, %v1070_v32  ;;  %v2871_v38 = vsub.f32 0.0, %v10258_v11  ;;  %v13912_v29 = vld [vmem:[#allocation216_spill] sm:$0xff]  ;;  %v6512_v4 = vpop.eup %6511  ;;  %v13914_v19 = vld [vmem:[#allocation79_spill] sm:$0xff]  ;;  %v13916_v13 = vld [vmem:[#allocation93_spill] sm:$0xff]  ;;  %6531 = vpow2.f32 %v3255_v58  ;;  %v3257_v40 = vmul.f32 1.442695, %v2870_v53 }
 0x215   : > { %v10286_v1 = vadd.f32 %v13912_v29, %v13903_v20  ;;  %v10290_v21 = vmul.f32 %v13914_v19, %v13913_v48  ;;  %v13917_v37 = vld [vmem:[#allocation237_spill] sm:$0xff]  ;;  %v10296_v62 = vpop.eup %6513  ;;  %v13920_v57 = vld [vmem:[#allocation95_spill] sm:$0xff]  ;;  %v13921_v8 = vld [vmem:[#allocation88_spill] sm:$0xff]  ;;  %6533 = vrcp.f32 %v3826_v27  ;;  %v3986_v20 = vadd.f32 1.0, %v6512_v4  ;;  %v10308_v53 = vpop.f32.mrb[100].mxu0 }
 0x216   : > { %13911 = vst [vmem:[#allocation186_spill] sm:$0xff] %v10279_v28  ;;  %v10294_v9 = vmul.f32 %v13917_v37, %v13916_v13  ;;  %13919 = vst [vmem:[#allocation215_spill] sm:$0xff] %v10296_v62  ;;  %v10300_v18 = vmul.f32 %v13921_v8, %v13920_v57  ;;  %v13923_v25 = vld [vmem:[#allocation217_spill] sm:$0xff]  ;;  %v6516_v29 = vpop.eup %6515  ;;  %v13925_v48 = vld [vmem:[#allocation204_spill] sm:$0xff]  ;;  %6535 = vpow2.f32 %v3575_v51  ;;  %v3577_v13 = vmul.f32 1.442695, %v3030_v23  ;;  %v1075_v4 = vpop.permute.xlu1 %1074 }
 0x217   : > { %13915 = vst [vmem:[#allocation211_spill] sm:$0xff] %v10290_v21  ;;  %v10303_v43 = vadd.f32 %v13923_v25, %v1070_v32  ;;  %v13926_v19 = vld [vmem:[#allocation56_spill] sm:$0xff]  ;;  %v3031_v58 = vsub.f32 0.0, %v10279_v28  ;;  %13927 = vst [vmem:[#allocation184_spill] sm:$0xff] %v10308_v53  ;;  %v10310_v37 = vpop.f32.mrb[100].mxu1  ;;  %6537 = vrcp.f32 %v3986_v20  ;;  %v3827_v8 = vadd.f32 1.0, %v6516_v29 }
 0x218   : > { %13918 = vst [vmem:[#allocation187_spill] sm:$0xff] %v10294_v9  ;;  %13922 = vst [vmem:[#allocation4_spill] sm:$0xff] %v10300_v18  ;;  %v4450_v21 = vmul.f32 %v13926_v19, %v13925_v48  ;;  %v10312_v9 = vpop.eup %6517  ;;  %v3259_v57 = vmul.f32 1.442695, %v2871_v38  ;;  %v2872_v32 = vsub.f32 0.0, %v10286_v1  ;;  %6539 = vpow2.f32 %v3257_v40  ;;  %v13929_v25 = vld [vmem:[#allocation15_spill] sm:$0xff] }
 0x219   : > { %13924 = vst [vmem:[#allocation218_spill] sm:$0xff] %v10303_v43  ;;  %13928 = vst [vmem:[#allocation13_spill] sm:$0xff] %v10310_v37  ;;  %v6520_v27 = vpop.eup %6519  ;;  %v13930_v48 = vld [vmem:[#allocation220_spill] sm:$0xff]  ;;  %v4786_v23 = vadd.f32 %v10181_v34, %v10137_v39  ;;  %v4789_v19 = vadd.f32 %v10242_v44, %v10195_v5  ;;  %6541 = vrcp.f32 %v3827_v8  ;;  %v3032_v38 = vsub.f32 0.0, %v10303_v43  ;;  %v13932_v29 = vld [vmem:[#allocation221_spill] sm:$0xff]  ;;  %v10329_v40 = vpop.f32.mrb[101].mxu0 }
 0x21a   : > { %v10317_v51 = vadd.f32 %v13930_v48, %v13929_v25  ;;  %v10323_v18 = vpop.eup %6521  ;;  %v3987_v20 = vadd.f32 1.0, %v6520_v27  ;;  %v10327_v37 = vadd.f32 %v13932_v29, %v1075_v4  ;;  %13934 = vst [vmem:[#allocation219_spill] sm:$0xff] %v10329_v40  ;;  %v10331_v53 = vpop.f32.mrb[101].mxu1  ;;  %v13936_v28 = vld [vmem:[#allocation6_spill] sm:$0xff]  ;;  %6543 = vpow2.f32 %v3577_v13  ;;  %v13939_v27 = vld [vmem:[#allocation212_spill] sm:$0xff]  ;;  %v13940_v29 = vld [vmem:[#allocation123_spill] sm:$0xff] }
 0x21b   : > { %13931 = vst [vmem:[#allocation188_spill] sm:$0xff] %v10323_v18  ;;  %13935 = vst [vmem:[#allocation189_spill] sm:$0xff] %v10331_v53  ;;  %v6524_v48 = vpop.eup %6523  ;;  %v13937_v62 = vld [vmem:[#allocation102_spill] sm:$0xff]  ;;  %v3579_v34 = vmul.f32 1.442695, %v3031_v58  ;;  %4787 = vadd.xlane.f32.xlu0 %v4786_v23  ;;  %4790 = vadd.xlane.f32.xlu1 %v4789_v19  ;;  %v4452_v43 = vmul.f32 %v13940_v29, %v13939_v27  ;;  %v13945_v58 = vld [vmem:[#allocation223_spill] sm:$0xff] }
 0x21c   : > { %13933 = vst [vmem:[#allocation190_spill] sm:$0xff] %v10327_v37  ;;  %v4451_v39 = vmul.f32 %v13937_v62, %v13936_v28  ;;  %v13938_v5 = vld [vmem:[#allocation222_spill] sm:$0xff]  ;;  %v10339_v8 = vpop.eup %6525  ;;  %6545 = vrcp.f32 %v3987_v20  ;;  %v3828_v40 = vadd.f32 1.0, %v6524_v48  ;;  %v3261_v53 = vmul.f32 1.442695, %v2872_v32  ;;  %v13943_v28 = vld [vmem:[#allocation97_spill] sm:$0xff] }
 0x21d   : > { %v10337_v44 = vadd.f32 %v13938_v5, %v13929_v25  ;;  %v10343_v18 = vpop.eup %6527  ;;  %v13942_v49 = vld [vmem:[#allocation206_spill] sm:$0xff]  ;;  %6547 = vpow2.f32 %v3259_v57  ;;  %v2873_v13 = vsub.f32 0.0, %v10317_v51  ;;  %v10351_v25 = vadd.f32 %v13945_v58, %v1075_v4  ;;  %v13947_v19 = vld [vmem:[#allocation5_spill] sm:$0xff]  ;;  %v13948_v5 = vld [vmem:[#allocation140_spill] sm:$0xff]  ;;  %v10356_v48 = vpop.f32.mrb[102].mxu0 }
 0x21e   : > { %13941 = vst [vmem:[#allocation193_spill] sm:$0xff] %v10343_v18  ;;  %v10347_v62 = vmul.f32 %v13943_v28, %v13942_v49  ;;  %v6530_v23 = vpop.eup %6529  ;;  %v4453_v42 = vmul.f32 %v13948_v5, %v13947_v19  ;;  %6549 = vrcp.f32 %v3828_v40  ;;  %v3581_v20 = vmul.f32 1.442695, %v3032_v38  ;;  %13949 = vst [vmem:[#allocation84_spill] sm:$0xff] %v10356_v48  ;;  %v10358_v27 = vpop.f32.mrb[102].mxu1  ;;  %v13951_v28 = vld [vmem:[#allocation18_spill] sm:$0xff] }
 0x21f   : > { %13946 = vst [vmem:[#allocation191_spill] sm:$0xff] %v10351_v25  ;;  %v3033_v32 = vsub.f32 0.0, %v10327_v37  ;;  %13950 = vst [vmem:[#allocation227_spill] sm:$0xff] %v10358_v27  ;;  %v6532_v49 = vpop.eup %6531  ;;  %v3988_v29 = vadd.f32 1.0, %v6530_v23  ;;  %6551 = vpow2.f32 %v3579_v34  ;;  %v2874_v57 = vsub.f32 0.0, %v10337_v44  ;;  %v13952_v4 = vld [vmem:[#allocation225_spill] sm:$0xff]  ;;  %v1080_v40 = vpop.permute.xlu0 %1079 }
 0x220   : > { %13944 = vst [vmem:[#allocation224_spill] sm:$0xff] %v10347_v62  ;;  %v10363_v58 = vadd.f32 %v13952_v4, %v13951_v28  ;;  %v10365_v62 = vpop.eup %6533  ;;  %v3829_v19 = vadd.f32 1.0, %v6532_v49  ;;  %6553 = vpow2.f32 %v3261_v53  ;;  %v4792_v38 = vadd.f32 %v4450_v21, %v10267_v12  ;;  %v13953_v34 = vld [vmem:[#allocation226_spill] sm:$0xff]  ;;  %v13955_v4 = vld [vmem:[#allocation231_spill] sm:$0xff]  ;;  %v13956_v53 = vld [vmem:[#allocation228_spill] sm:$0xff]  ;;  %v10380_v12 = vpop.f32.mrb[103].mxu0 }
 0x221   : > { %v4795_v5 = vadd.f32 %v4452_v43, %v4451_v39  ;;  %v6536_v48 = vpop.eup %6535  ;;  %6555 = vrcp.f32 %v3988_v29  ;;  %v3263_v27 = vmul.f32 1.442695, %v2873_v13  ;;  %v3034_v23 = vsub.f32 0.0, %v10351_v25  ;;  %13957 = vst [vmem:[#allocation230_spill] sm:$0xff] %v10380_v12  ;;  %v10382_v21 = vpop.f32.mrb[103].mxu1  ;;  %v13959_v39 = vld [vmem:[#allocation44_spill] sm:$0xff] }
 0x222   : > { %v10370_v37 = vadd.f32 %v13953_v34, %v1080_v40  ;;  %v10372_v18 = vpop.eup %6537  ;;  %v4454_v14 = vmul.f32 %v9882_v60, %v13955_v4  ;;  %6557 = vrcp.f32 %v3829_v19  ;;  %v3989_v49 = vadd.f32 1.0, %v6536_v48  ;;  %4793 = vadd.xlane.f32.xlu0 %v4792_v38  ;;  %13958 = vst [vmem:[#allocation198_spill] sm:$0xff] %v10382_v21  ;;  %v13960_v29 = vld [vmem:[#allocation94_spill] sm:$0xff]  ;;  %v13961_v38 = vld [vmem:[#allocation229_spill] sm:$0xff]  ;;  %v10406_v12 = vpop.f32.mrb[104].mxu1 }
 0x223   : > { %v10378_v0 = vadd.f32 %v13956_v53, %v13951_v28  ;;  %4796 = vadd.xlane.f32.xlu1 %v4795_v5  ;;  %v6540_v43 = vpop.eup %6539  ;;  %v4455_v13 = vmul.f32 %v9911_v47, %v13959_v39  ;;  %v4456_v34 = vmul.f32 %v9975_v36, %v13960_v29  ;;  %6559 = vpow2.f32 %v3581_v20  ;;  %v13964_v36 = vld [vmem:[#allocation64_spill] sm:$0xff]  ;;  %v13965_v29 = vld [vmem:[#allocation17_spill] sm:$0xff]  ;;  %13968 = vst [vmem:[#allocation213_spill] sm:$0xff] %v10406_v12  ;;  %v1085_v25 = vpop.permute.xlu1 %1084 }
 0x224   : > { %13954 = vst [vmem:[#allocation195_spill] sm:$0xff] %v10370_v37  ;;  %v3583_v60 = vmul.f32 1.442695, %v3033_v32  ;;  %v10388_v48 = vpop.eup %6541  ;;  %6561 = vrcp.f32 %v3989_v49  ;;  %v3830_v28 = vadd.f32 1.0, %v6540_v43  ;;  %v2875_v19 = vsub.f32 0.0, %v10363_v58 }
 0x225   : > { %v10392_v5 = vadd.f32 %v13961_v38, %v1080_v40  ;;  %v6544_v4 = vpop.eup %6543  ;;  %6563 = vpow2.f32 %v3263_v27  ;;  %v3265_v53 = vmul.f32 1.442695, %v2874_v57  ;;  %v3585_v21 = vmul.f32 1.442695, %v3034_v23  ;;  %v13966_v40 = vld [vmem:[#allocation232_spill] sm:$0xff]  ;;  %v10404_v23 = vpop.f32.mrb[104].mxu0 }
 0x226   : > { %v3035_v47 = vsub.f32 0.0, %v10370_v37  ;;  %v10395_v39 = vpop.eup %6545  ;;  %v4457_v20 = vmul.f32 %v10004_v41, %v13964_v36  ;;  %6565 = vrcp.f32 %v3830_v28  ;;  %v3990_v32 = vadd.f32 1.0, %v6544_v4  ;;  %13967 = vst [vmem:[#allocation16_spill] sm:$0xff] %v10404_v23 }
 0x227   : > { %13962 = vst [vmem:[#allocation234_spill] sm:$0xff] %v10392_v5  ;;  %13963 = vst [vmem:[#allocation192_spill] sm:$0xff] %v10395_v39  ;;  %v2876_v49 = vsub.f32 0.0, %v10378_v0  ;;  %v6548_v43 = vpop.eup %6547  ;;  %6567 = vpow2.f32 %v3583_v60  ;;  %v10402_v38 = vadd.f32 %v13966_v40, %v13965_v29  ;;  %v4798_v27 = vadd.f32 %v4454_v14, %v4453_v42  ;;  %v13969_v60 = vld [vmem:[#allocation125_spill] sm:$0xff] }
 0x228   : > { %v4801_v57 = vadd.f32 %v4456_v34, %v4455_v13  ;;  %v10408_v37 = vpop.eup %6549  ;;  %6569 = vrcp.f32 %v3990_v32  ;;  %v3831_v41 = vadd.f32 1.0, %v6548_v43  ;;  %v3267_v28 = vmul.f32 1.442695, %v2875_v19  ;;  %v13970_v14 = vld [vmem:[#allocation233_spill] sm:$0xff] }
 0x229   : > { %v3036_v4 = vsub.f32 0.0, %v10392_v5  ;;  %v6552_v36 = vpop.eup %6551  ;;  %v4458_v39 = vmul.f32 %v10058_v52, %v13969_v60  ;;  %6571 = vpow2.f32 %v3265_v53  ;;  %v3587_v40 = vmul.f32 1.442695, %v3035_v47  ;;  %4799 = vadd.xlane.f32.xlu0 %v4798_v27  ;;  %v13971_v53 = vld [vmem:[#allocation72_spill] sm:$0xff]  ;;  %v10427_v27 = vpop.f32.mrb[105].mxu0 }
 0x22a   : > { %v10414_v42 = vadd.f32 %v13970_v14, %v1085_v25  ;;  %4802 = vadd.xlane.f32.xlu1 %v4801_v57  ;;  %v6554_v13 = vpop.eup %6553  ;;  %v4459_v34 = vmul.f32 %v10099_v33, %v9831_v31  ;;  %v4460_v19 = vmul.f32 %v10150_v7, %v9874_v30  ;;  %6573 = vrcp.f32 %v3831_v41  ;;  %13972 = vst [vmem:[#allocation3_spill] sm:$0xff] %v10427_v27  ;;  %v10429_v57 = vpop.f32.mrb[105].mxu1  ;;  %v13974_v33 = vld [vmem:[#allocation109_spill] sm:$0xff]  ;;  %v13975_v30 = vld [vmem:[#allocation104_spill] sm:$0xff]  ;;  %v13977_v41 = vld [vmem:[#allocation103_spill] sm:$0xff] }
 0x22b   : > { %v3991_v32 = vadd.f32 1.0, %v6552_v36  ;;  %v10420_v43 = vpop.eup %6555  ;;  %v3832_v12 = vadd.f32 1.0, %v6554_v13  ;;  %6575 = vpow2.f32 %v3585_v21  ;;  %v2877_v52 = vsub.f32 0.0, %v10402_v38  ;;  %13973 = vst [vmem:[#allocation236_spill] sm:$0xff] %v10429_v57  ;;  %v13978_v36 = vld [vmem:[#allocation108_spill] sm:$0xff]  ;;  %v13980_v21 = vld [vmem:[#allocation106_spill] sm:$0xff] }
 0x22c   : > { %v10425_v47 = vadd.f32 %v13971_v53, %v13965_v29  ;;  %v10431_v31 = vpop.eup %6557  ;;  %v10435_v7 = vmul.f32 %v13975_v30, %v13974_v33  ;;  %v10439_v60 = vmul.f32 %v13978_v36, %v13977_v41  ;;  %v13981_v14 = vld [vmem:[#allocation73_spill] sm:$0xff]  ;;  %v3269_v53 = vmul.f32 1.442695, %v2876_v49  ;;  %v13983_v57 = vld [vmem:[#allocation235_spill] sm:$0xff]  ;;  %v13984_v49 = vld [vmem:[#allocation20_spill] sm:$0xff] }
 0x22d   : > { %v10443_v13 = vmul.f32 %v13981_v14, %v13980_v21  ;;  %6577 = vrcp.f32 %v3991_v32  ;;  %v6560_v29 = vpop.eup %6559  ;;  %v3589_v27 = vmul.f32 1.442695, %v3036_v4  ;;  %v10446_v23 = vadd.f32 %v13983_v57, %v1085_v25  ;;  %v13985_v4 = vld [vmem:[#allocation76_spill] sm:$0xff] }
 0x22e   : > { %13976 = vst [vmem:[#allocation214_spill] sm:$0xff] %v10435_v7  ;;  %13979 = vst [vmem:[#allocation216_spill] sm:$0xff] %v10439_v60  ;;  %6579 = vrcp.f32 %v3832_v12  ;;  %v10448_v5 = vpop.eup %6561  ;;  %v3992_v33 = vadd.f32 1.0, %v6560_v29  ;;  %v4804_v30 = vadd.f32 %v4458_v39, %v4457_v20  ;;  %v4807_v7 = vadd.f32 %v4460_v19, %v4459_v34  ;;  %v1090_v34 = vpop.permute.xlu0 %1089 }
 0x22f   : > { %13982 = vst [vmem:[#allocation201_spill] sm:$0xff] %v10443_v13  ;;  %6581 = vpow2.f32 %v3267_v28  ;;  %v6564_v41 = vpop.eup %6563  ;;  %v3271_v36 = vmul.f32 1.442695, %v2877_v52  ;;  %v3037_v21 = vsub.f32 0.0, %v10414_v42  ;;  %v2878_v32 = vsub.f32 0.0, %v10425_v47  ;;  %v13986_v52 = vld [vmem:[#allocation45_spill] sm:$0xff] }
 0x230   : > { %6583 = vpow2.f32 %v3587_v40  ;;  %v10452_v14 = vpop.eup %6565  ;;  %v4461_v12 = vmul.f32 %v10191_v24, %v9927_v26  ;;  %v3833_v25 = vadd.f32 1.0, %v6564_v41  ;;  %v10458_v57 = vadd.f32 %v13985_v4, %v13984_v49  ;;  %4805 = vadd.xlane.f32.xlu0 %v4804_v30  ;;  %4808 = vadd.xlane.f32.xlu1 %v4807_v7 }
 0x231   : > { %6585 = vrcp.f32 %v3992_v33  ;;  %v6568_v39 = vpop.eup %6567  ;;  %v4462_v20 = vmul.f32 %v10260_v17, %v9984_v54  ;;  %v4463_v28 = vmul.f32 %v10281_v61, %v10014_v50  ;;  %v4464_v40 = vmul.f32 %v10312_v9, %v10045_v55  ;;  %v13987_v17 = vld [vmem:[#allocation83_spill] sm:$0xff]  ;;  %v13988_v61 = vld [vmem:[#allocation8_spill] sm:$0xff]  ;;  %v13990_v33 = vld [vmem:[#allocation85_spill] sm:$0xff] }
 0x232   : > { %6587 = vpow2.f32 %v3269_v53  ;;  %v10466_v26 = vpop.eup %6569  ;;  %v3993_v24 = vadd.f32 1.0, %v6568_v39  ;;  %v3038_v19 = vsub.f32 0.0, %v10446_v23  ;;  %v10470_v7 = vadd.f32 %v13986_v52, %v1090_v34  ;;  %v13989_v53 = vld [vmem:[#allocation113_spill] sm:$0xff] }
 0x233   : > { %6589 = vrcp.f32 %v3833_v25  ;;  %v6572_v29 = vpop.eup %6571  ;;  %v3591_v54 = vmul.f32 1.442695, %v3037_v21  ;;  %v10474_v50 = vadd.f32 %v13987_v17, %v13984_v49  ;;  %v10477_v55 = vadd.f32 %v13988_v61, %v1090_v34 }
 0x234   : > { %6591 = vpow2.f32 %v3589_v27  ;;  %v6574_v9 = vpop.eup %6573  ;;  %v10481_v30 = vmul.f32 %v13990_v33, %v13989_v53  ;;  %v3834_v41 = vadd.f32 1.0, %v6572_v29  ;;  %v3273_v25 = vmul.f32 1.442695, %v2878_v32  ;;  %v13993_v29 = vld [vmem:[#allocation86_spill] sm:$0xff] }
 0x235   : > { %6593 = vrcp.f32 %v3993_v24  ;;  %v6576_v4 = vpop.eup %6575  ;;  %v2879_v27 = vsub.f32 0.0, %v10458_v57  ;;  %v4810_v21 = vadd.f32 %v4462_v20, %v4461_v12  ;;  %v4813_v39 = vadd.f32 %v4464_v40, %v4463_v28 }
 0x236   : > { %13991 = vst [vmem:[#allocation79_spill] sm:$0xff] %v10481_v30  ;;  %6595 = vpow2.f32 %v3271_v36  ;;  %v3994_v49 = vadd.f32 1.0, %v6576_v4  ;;  %v3593_v34 = vmul.f32 1.442695, %v3038_v19  ;;  %v3039_v17 = vsub.f32 0.0, %v10470_v7  ;;  %v13992_v19 = vld [vmem:[#allocation19_spill] sm:$0xff] }
 0x237   : > { %v10484_v52 = vpop.eup %6577  ;;  %6597 = vrcp.f32 %v3834_v41  ;;  %v4465_v53 = vmul.f32 %v10339_v8, %v10079_v63  ;;  %v2880_v32 = vsub.f32 0.0, %v10474_v50  ;;  %v3040_v36 = vsub.f32 0.0, %v10477_v55  ;;  %4811 = vadd.xlane.f32.xlu0 %v4810_v21  ;;  %4814 = vadd.xlane.f32.xlu1 %v4813_v39  ;;  %v13994_v41 = vld [vmem:[#allocation121_spill] sm:$0xff]  ;;  %v13995_v4 = vld [vmem:[#allocation90_spill] sm:$0xff]  ;;  %v14000_v39 = vld [vmem:[#allocation92_spill] sm:$0xff] }
 0x238   : > { %v6580_v61 = vpop.eup %6579  ;;  %6599 = vpow2.f32 %v3591_v54  ;;  %v4466_v20 = vmul.f32 %v10365_v62, %v10103_v15  ;;  %v4467_v28 = vmul.f32 %v10388_v48, %v10141_v35  ;;  %v4468_v40 = vmul.f32 %v10408_v37, %v10170_v22  ;;  %v13997_v62 = vld [vmem:[#allocation115_spill] sm:$0xff]  ;;  %v1095_v22 = vpop.permute.xlu1 %1094 }
 0x239   : > { %v6582_v12 = vpop.eup %6581  ;;  %6601 = vrcp.f32 %v3994_v49  ;;  %v3275_v8 = vmul.f32 1.442695, %v2879_v27  ;;  %v10499_v54 = vadd.f32 %v13993_v29, %v13992_v19  ;;  %v10505_v15 = vmul.f32 %v13995_v4, %v13994_v41  ;;  %v13999_v27 = vld [vmem:[#allocation52_spill] sm:$0xff] }
 0x23a   : > { %v6584_v24 = vpop.eup %6583  ;;  %v3835_v63 = vadd.f32 1.0, %v6582_v12  ;;  %6603 = vpow2.f32 %v3273_v25  ;;  %v10509_v35 = vmul.f32 %v9856_v59, %v13997_v62  ;;  %v3595_v25 = vmul.f32 1.442695, %v3039_v17 }
 0x23b   : > { %v10501_v33 = vpop.eup %6585  ;;  %13996 = vst [vmem:[#allocation93_spill] sm:$0xff] %v10505_v15  ;;  %v3995_v37 = vadd.f32 1.0, %v6584_v24  ;;  %6605 = vpow2.f32 %v3593_v34  ;;  %v10512_v21 = vadd.f32 %v13999_v27, %v1095_v22  ;;  %v10516_v49 = vadd.f32 %v14000_v39, %v13992_v19  ;;  %v14001_v19 = vld [vmem:[#allocation126_spill] sm:$0xff]  ;;  %v14039_v15 = vld [vmem:[#allocation145_spill] sm:$0xff] }
 0x23c   : > { %13998 = vst [vmem:[#allocation237_spill] sm:$0xff] %v10509_v35  ;;  %v6588_v48 = vpop.eup %6587  ;;  %6607 = vrcp.f32 %v3835_v63  ;;  %v4816_v41 = vadd.f32 %v4466_v20, %v4465_v53  ;;  %v4819_v4 = vadd.f32 %v4468_v40, %v4467_v28  ;;  %v3277_v62 = vmul.f32 1.442695, %v2880_v32  ;;  %v14052_v35 = vld [vmem:[#allocation11_spill] sm:$0xff] }
 0x23d   : > { %v6590_v12 = vpop.eup %6589  ;;  %6609 = vrcp.f32 %v3995_v37  ;;  %v3836_v29 = vadd.f32 1.0, %v6588_v48  ;;  %v3597_v24 = vmul.f32 1.442695, %v3040_v36  ;;  %v2881_v34 = vsub.f32 0.0, %v10499_v54 }
 0x23e   : > { %v6592_v59 = vpop.eup %6591  ;;  %6611 = vpow2.f32 %v3275_v8  ;;  %v4469_v17 = vmul.f32 %v10431_v31, %v10203_v6  ;;  %v10524_v39 = vadd.f32 %v14001_v19, %v1095_v22  ;;  %4817 = vadd.xlane.f32.xlu0 %v4816_v41  ;;  %4820 = vadd.xlane.f32.xlu1 %v4819_v4  ;;  %v4470_v20 = vmul.f32 %v10452_v14, %v10232_v56  ;;  %v14002_v22 = vld [vmem:[#allocation118_spill] sm:$0xff] }
 0x23f   : > { %v10519_v63 = vpop.eup %6593  ;;  %6613 = vrcp.f32 %v3836_v29  ;;  %v3996_v27 = vadd.f32 1.0, %v6592_v59  ;;  %v4471_v32 = vmul.f32 %v6574_v9, %v10258_v11  ;;  %v4472_v36 = vmul.f32 %v6580_v61, %v10286_v1  ;;  %v14004_v56 = vld [vmem:[#allocation22_spill] sm:$0xff]  ;;  %v14006_v9 = vld [vmem:[#allocation41_spill] sm:$0xff] }
 0x240   : > { %v6596_v53 = vpop.eup %6595  ;;  %6615 = vpow2.f32 %v3595_v25  ;;  %v3041_v6 = vsub.f32 0.0, %v10512_v21  ;;  %v2882_v31 = vsub.f32 0.0, %v10516_v49  ;;  %v10534_v37 = vmul.f32 %v9862_v45, %v14002_v22  ;;  %v14005_v14 = vld [vmem:[#allocation130_spill] sm:$0xff]  ;;  %v1100_v25 = vpop.permute.xlu0 %1099  ;;  %v14008_v45 = vld [vmem:[#allocation57_spill] sm:$0xff] }
 0x241   : > { %v6598_v28 = vpop.eup %6597  ;;  %6617 = vrcp.f32 %v3996_v27  ;;  %v3837_v40 = vadd.f32 1.0, %v6596_v53  ;;  %v3279_v48 = vmul.f32 1.442695, %v2881_v34  ;;  %v10538_v11 = vadd.f32 %v14005_v14, %v14004_v56 }
 0x242   : > { %v6600_v8 = vpop.eup %6599  ;;  %14003 = vst [vmem:[#allocation95_spill] sm:$0xff] %v10534_v37  ;;  %6619 = vpow2.f32 %v3277_v62  ;;  %v10544_v61 = vmul.f32 %v9895_v3, %v14006_v9  ;;  %v3042_v41 = vsub.f32 0.0, %v10524_v39  ;;  %v10548_v59 = vadd.f32 %v14008_v45, %v1100_v25 }
 0x243   : > { %v10540_v1 = vpop.eup %6601  ;;  %6621 = vrcp.f32 %v3837_v40  ;;  %v3997_v29 = vadd.f32 1.0, %v6600_v8  ;;  %v4822_v62 = vadd.f32 %v4470_v20, %v4469_v17  ;;  %v4825_v34 = vadd.f32 %v4472_v36, %v4471_v32  ;;  %v14009_v8 = vld [vmem:[#allocation100_spill] sm:$0xff] }
 0x244   : > { %14007 = vst [vmem:[#allocation88_spill] sm:$0xff] %v10544_v61  ;;  %v6604_v4 = vpop.eup %6603  ;;  %6623 = vpow2.f32 %v3597_v24  ;;  %v3599_v53 = vmul.f32 1.442695, %v3041_v6  ;;  %v3281_v22 = vmul.f32 1.442695, %v2882_v31  ;;  %v2883_v40 = vsub.f32 0.0, %v10538_v11 }
 0x245   : > { %v6606_v27 = vpop.eup %6605  ;;  %6625 = vrcp.f32 %v3997_v29  ;;  %v3838_v19 = vadd.f32 1.0, %v6604_v4  ;;  %v10553_v9 = vadd.f32 %v14009_v8, %v14004_v56  ;;  %4823 = vadd.xlane.f32.xlu0 %v4822_v62  ;;  %4826 = vadd.xlane.f32.xlu1 %v4825_v34  ;;  %v4473_v17 = vmul.f32 %v6590_v12, %v10317_v51  ;;  %v14012_v4 = vld [vmem:[#allocation48_spill] sm:$0xff]  ;;  %v14014_v51 = vld [vmem:[#allocation21_spill] sm:$0xff] }
 0x246   : > { %v6608_v14 = vpop.eup %6607  ;;  %v3998_v3 = vadd.f32 1.0, %v6606_v27  ;;  %6627 = vpow2.f32 %v3279_v48  ;;  %v4474_v20 = vmul.f32 %v6598_v28, %v10337_v44  ;;  %v3601_v32 = vmul.f32 1.442695, %v3042_v41  ;;  %v14010_v48 = vld [vmem:[#allocation61_spill] sm:$0xff]  ;;  %v14015_v44 = vld [vmem:[#allocation111_spill] sm:$0xff]  ;;  %v1105_v41 = vpop.permute.xlu1 %1104  ;;  %v14038_v61 = vld [vmem:[#allocation80_spill] sm:$0xff] }
 0x247   : > { %v10555_v24 = vpop.eup %6609  ;;  %6629 = vrcp.f32 %v3838_v19  ;;  %v4475_v6 = vmul.f32 %v6608_v14, %v10363_v58  ;;  %v3043_v31 = vsub.f32 0.0, %v10548_v59  ;;  %v10562_v29 = vadd.f32 %v14010_v48, %v1100_v25 }
 0x248   : > { %v6612_v36 = vpop.eup %6611  ;;  %6631 = vrcp.f32 %v3998_v3  ;;  %v10566_v45 = vmul.f32 %v9929_v46, %v14012_v4  ;;  %v10570_v12 = vadd.f32 %v14015_v44, %v14014_v51  ;;  %v3283_v34 = vmul.f32 1.442695, %v2883_v40  ;;  %v14016_v46 = vld [vmem:[#allocation69_spill] sm:$0xff]  ;;  %v10580_v4 = vpop.f32.mrb[106].mxu0 }
 0x249   : > { %14011 = vst [vmem:[#allocation217_spill] sm:$0xff] %v10562_v29  ;;  %v6614_v56 = vpop.eup %6613  ;;  %v3839_v62 = vadd.f32 1.0, %v6612_v36  ;;  %6633 = vpow2.f32 %v3599_v53  ;;  %v2884_v25 = vsub.f32 0.0, %v10553_v9  ;;  %v10577_v14 = vadd.f32 %v14016_v46, %v1105_v41  ;;  %v14023_v46 = vld [vmem:[#allocation120_spill] sm:$0xff] }
 0x24a   : > { %14013 = vst [vmem:[#allocation204_spill] sm:$0xff] %v10566_v45  ;;  %v6616_v28 = vpop.eup %6615  ;;  %v4476_v58 = vmul.f32 %v6614_v56, %v10378_v0  ;;  %6635 = vpow2.f32 %v3281_v22  ;;  %v4828_v53 = vadd.f32 %v4474_v20, %v4473_v17  ;;  %v3603_v8 = vmul.f32 1.442695, %v3043_v31  ;;  %v14018_v22 = vld [vmem:[#allocation49_spill] sm:$0xff]  ;;  %v10612_v45 = vpop.f32.mrb[107].mxu0 }
 0x24b   : > { %v10574_v27 = vpop.eup %6617  ;;  %6637 = vrcp.f32 %v3839_v62  ;;  %v3999_v19 = vadd.f32 1.0, %v6616_v28  ;;  %14017 = vst [vmem:[#allocation56_spill] sm:$0xff] %v10577_v14  ;;  %v3044_v36 = vsub.f32 0.0, %v10562_v29  ;;  %v10584_v40 = vmul.f32 %v9941_v2, %v14018_v22  ;;  %v14020_v17 = vld [vmem:[#allocation53_spill] sm:$0xff]  ;;  %v10595_v28 = vpop.f32.mrb[106].mxu1  ;;  %v14027_v22 = vld [vmem:[#allocation68_spill] sm:$0xff] }
 0x24c   : > { %v6620_v3 = vpop.eup %6619  ;;  %6639 = vpow2.f32 %v3601_v32  ;;  %v4831_v48 = vadd.f32 %v4476_v58, %v4475_v6  ;;  %v2885_v62 = vsub.f32 0.0, %v10570_v12  ;;  %4829 = vadd.xlane.f32.xlu0 %v4828_v53  ;;  %v10589_v20 = vmul.f32 %v9948_v10, %v14020_v17  ;;  %v14022_v6 = vld [vmem:[#allocation77_spill] sm:$0xff]  ;;  %v14028_v17 = vld [vmem:[#allocation132_spill] sm:$0xff] }
 0x24d   : > { %v6622_v0 = vpop.eup %6621  ;;  %14019 = vst [vmem:[#allocation15_spill] sm:$0xff] %v10584_v40  ;;  %6641 = vrcp.f32 %v3999_v19  ;;  %v3840_v56 = vadd.f32 1.0, %v6620_v3  ;;  %v3285_v32 = vmul.f32 1.442695, %v2884_v25  ;;  %v10593_v31 = vadd.f32 %v14022_v6, %v14014_v51  ;;  %v14025_v3 = vld [vmem:[#allocation60_spill] sm:$0xff] }
 0x24e   : > { %v6624_v44 = vpop.eup %6623  ;;  %14021 = vst [vmem:[#allocation220_spill] sm:$0xff] %v10589_v20  ;;  %6643 = vpow2.f32 %v3283_v34  ;;  %4832 = vadd.xlane.f32.xlu1 %v4831_v48  ;;  %v3045_v19 = vsub.f32 0.0, %v10577_v14  ;;  %v10601_v53 = vadd.f32 %v14023_v46, %v1105_v41  ;;  %v10605_v34 = vmul.f32 %v9989_v16, %v14025_v3  ;;  %v10632_v20 = vpop.f32.mrb[108].mxu0 }
 0x24f   : > { %v10597_v2 = vpop.eup %6625  ;;  %6645 = vrcp.f32 %v3840_v56  ;;  %v4000_v58 = vadd.f32 1.0, %v6624_v44  ;;  %v4477_v51 = vmul.f32 %v6622_v0, %v10402_v38  ;;  %v3605_v25 = vmul.f32 1.442695, %v3044_v36  ;;  %v14030_v38 = vld [vmem:[#allocation24_spill] sm:$0xff]  ;;  %v10622_v0 = vpop.f32.mrb[107].mxu1  ;;  %14037 = vst [vmem:[#allocation123_spill] sm:$0xff] %v10632_v20 }
 0x250   : > { %14024 = vst [vmem:[#allocation221_spill] sm:$0xff] %v10601_v53  ;;  %v6628_v10 = vpop.eup %6627  ;;  %14026 = vst [vmem:[#allocation6_spill] sm:$0xff] %v10605_v34  ;;  %6647 = vpow2.f32 %v3603_v8  ;;  %v10610_v6 = vmul.f32 %v14028_v17, %v14027_v22  ;;  %v3287_v44 = vmul.f32 1.442695, %v2885_v62  ;;  %v2886_v16 = vsub.f32 0.0, %v10593_v31  ;;  %v14031_v8 = vld [vmem:[#allocation89_spill] sm:$0xff]  ;;  %v1110_v62 = vpop.permute.xlu0 %1109 }
 0x251   : > { %v6630_v48 = vpop.eup %6629  ;;  %6649 = vrcp.f32 %v4000_v58  ;;  %v3841_v56 = vadd.f32 1.0, %v6628_v10  ;;  %v10620_v36 = vadd.f32 %v14031_v8, %v14030_v38  ;;  %v14032_v22 = vld [vmem:[#allocation7_spill] sm:$0xff]  ;;  %v3607_v17 = vmul.f32 1.442695, %v3045_v19 }
 0x252   : > { %14029 = vst [vmem:[#allocation102_spill] sm:$0xff] %v10610_v6  ;;  %v10614_v41 = vpop.eup %6631  ;;  %v4478_v46 = vmul.f32 %v6630_v48, %v10425_v47  ;;  %6651 = vpow2.f32 %v3285_v32  ;;  %v14033_v58 = vld [vmem:[#allocation167_spill] sm:$0xff]  ;;  %v3046_v6 = vsub.f32 0.0, %v10601_v53  ;;  %v14035_v48 = vld [vmem:[#allocation133_spill] sm:$0xff]  ;;  %v10636_v37 = vmul.f32 %v14039_v15, %v14038_v61 }
 0x253   : > { %v6634_v3 = vpop.eup %6633  ;;  %v10626_v10 = vmul.f32 %v14033_v58, %v14032_v22  ;;  %6653 = vrcp.f32 %v3841_v56  ;;  %v10630_v34 = vadd.f32 %v14035_v48, %v1110_v62  ;;  %v14041_v22 = vld [vmem:[#allocation87_spill] sm:$0xff]  ;;  %v14042_v58 = vld [vmem:[#allocation154_spill] sm:$0xff]  ;;  %v14046_v61 = vld [vmem:[#allocation141_spill] sm:$0xff] }
 0x254   : > { %v6636_v47 = vpop.eup %6635  ;;  %v4001_v32 = vadd.f32 1.0, %v6634_v3  ;;  %6655 = vpow2.f32 %v3605_v25  ;;  %v4834_v8 = vadd.f32 %v4478_v46, %v4477_v51  ;;  %14040 = vst [vmem:[#allocation206_spill] sm:$0xff] %v10636_v37  ;;  %v10640_v56 = vmul.f32 %v14042_v58, %v14041_v22  ;;  %v14045_v46 = vld [vmem:[#allocation91_spill] sm:$0xff]  ;;  %v14047_v37 = vld [vmem:[#allocation194_spill] sm:$0xff] }
 0x255   : > { %14034 = vst [vmem:[#allocation222_spill] sm:$0xff] %v10626_v10  ;;  %14036 = vst [vmem:[#allocation212_spill] sm:$0xff] %v10630_v34  ;;  %v6638_v40 = vpop.eup %6637  ;;  %v3842_v19 = vadd.f32 1.0, %v6636_v47  ;;  %6657 = vpow2.f32 %v3287_v44  ;;  %v10642_v10 = vpop.f32.mrb[108].mxu1  ;;  %v3289_v3 = vmul.f32 1.442695, %v2886_v16  ;;  %v10647_v48 = vadd.f32 %v14045_v46, %v14030_v38 }
 0x256   : > { %14043 = vst [vmem:[#allocation97_spill] sm:$0xff] %v10640_v56  ;;  %14044 = vst [vmem:[#allocation223_spill] sm:$0xff] %v10642_v10  ;;  %v6640_v25 = vpop.eup %6639  ;;  %6659 = vrcp.f32 %v4001_v32  ;;  %v2887_v51 = vsub.f32 0.0, %v10620_v36  ;;  %4835 = vadd.xlane.f32.xlu0 %v4834_v8  ;;  %v10653_v22 = vmul.f32 %v14047_v37, %v14046_v61  ;;  %v14049_v47 = vld [vmem:[#allocation98_spill] sm:$0xff]  ;;  %v4479_v16 = vmul.f32 %v6638_v40, %v10458_v57  ;;  %v14051_v8 = vld [vmem:[#allocation144_spill] sm:$0xff] }
 0x257   : > { %v10649_v15 = vpop.eup %6641  ;;  %6661 = vrcp.f32 %v3842_v19  ;;  %v4002_v44 = vadd.f32 1.0, %v6640_v25  ;;  %v10656_v58 = vadd.f32 %v14049_v47, %v1110_v62  ;;  %v3609_v56 = vmul.f32 1.442695, %v3046_v6  ;;  %v14054_v61 = vld [vmem:[#allocation23_spill] sm:$0xff]  ;;  %v14055_v19 = vld [vmem:[#allocation146_spill] sm:$0xff]  ;;  %v10668_v62 = vpop.f32.mrb[109].mxu0 }
 0x258   : > { %14048 = vst [vmem:[#allocation5_spill] sm:$0xff] %v10653_v22  ;;  %v6644_v32 = vpop.eup %6643  ;;  %6663 = vpow2.f32 %v3607_v17  ;;  %v3047_v38 = vsub.f32 0.0, %v10630_v34  ;;  %v10662_v30 = vmul.f32 %v14052_v35, %v14051_v8  ;;  %v10666_v25 = vadd.f32 %v14055_v19, %v14054_v61  ;;  %14056 = vst [vmem:[#allocation225_spill] sm:$0xff] %v10668_v62  ;;  %v10672_v17 = vpop.f32.mrb[109].mxu1  ;;  %v14058_v35 = vld [vmem:[#allocation99_spill] sm:$0xff] }
 0x259   : > { %14050 = vst [vmem:[#allocation140_spill] sm:$0xff] %v10656_v58  ;;  %v6646_v46 = vpop.eup %6645  ;;  %6665 = vrcp.f32 %v4002_v44  ;;  %v3843_v37 = vadd.f32 1.0, %v6644_v32  ;;  %v3291_v40 = vmul.f32 1.442695, %v2887_v51  ;;  %v2888_v6 = vsub.f32 0.0, %v10647_v48  ;;  %14057 = vst [vmem:[#allocation226_spill] sm:$0xff] %v10672_v17  ;;  %v1115_v8 = vpop.permute.xlu1 %1114 }
 0x25a   : > { %14053 = vst [vmem:[#allocation18_spill] sm:$0xff] %v10662_v30  ;;  %v6648_v47 = vpop.eup %6647  ;;  %v4480_v57 = vmul.f32 %v6646_v46, %v10474_v50  ;;  %6667 = vpow2.f32 %v3289_v3  ;;  %v14059_v44 = vld [vmem:[#allocation165_spill] sm:$0xff]  ;;  %v3048_v30 = vsub.f32 0.0, %v10656_v58  ;;  %v3611_v50 = vmul.f32 1.442695, %v3047_v38  ;;  %v14061_v3 = vld [vmem:[#allocation10_spill] sm:$0xff] }
 0x25b   : > { %v10674_v22 = vpop.eup %6649  ;;  %v10678_v32 = vmul.f32 %v14059_v44, %v14058_v35  ;;  %6669 = vrcp.f32 %v3843_v37  ;;  %v4003_v19 = vadd.f32 1.0, %v6648_v47  ;;  %v10682_v51 = vadd.f32 %v14061_v3, %v1115_v8  ;;  %v10684_v60 = vpop.f32.mrb[110].mxu0  ;;  %v14064_v44 = vld [vmem:[#allocation105_spill] sm:$0xff]  ;;  %v14066_v58 = vld [vmem:[#allocation134_spill] sm:$0xff]  ;;  %v14068_v38 = vld [vmem:[#allocation148_spill] sm:$0xff] }
 0x25c   : > { %v6652_v13 = vpop.eup %6651  ;;  %6671 = vpow2.f32 %v3609_v56  ;;  %v4837_v46 = vadd.f32 %v4480_v57, %v4479_v16  ;;  %14063 = vst [vmem:[#allocation44_spill] sm:$0xff] %v10684_v60  ;;  %v2889_v35 = vsub.f32 0.0, %v10666_v25  ;;  %v10689_v37 = vadd.f32 %v14064_v44, %v14054_v61  ;;  %v14069_v3 = vld [vmem:[#allocation177_spill] sm:$0xff]  ;;  %v10699_v57 = vpop.f32.mrb[110].mxu1  ;;  %v14072_v61 = vld [vmem:[#allocation152_spill] sm:$0xff]  ;;  %v14089_v10 = vld [vmem:[#allocation163_spill] sm:$0xff] }
 0x25d   : > { %14060 = vst [vmem:[#allocation231_spill] sm:$0xff] %v10678_v32  ;;  %14062 = vst [vmem:[#allocation228_spill] sm:$0xff] %v10682_v51  ;;  %v6654_v34 = vpop.eup %6653  ;;  %6673 = vrcp.f32 %v4003_v19  ;;  %v3844_v53 = vadd.f32 1.0, %v6652_v13  ;;  %v14065_v32 = vld [vmem:[#allocation107_spill] sm:$0xff]  ;;  %v10697_v14 = vmul.f32 %v14069_v3, %v14068_v38  ;;  %v3293_v16 = vmul.f32 1.442695, %v2888_v6 }
 0x25e   : > { %v6656_v47 = vpop.eup %6655  ;;  %v10693_v56 = vmul.f32 %v14066_v58, %v14065_v32  ;;  %6675 = vpow2.f32 %v3291_v40  ;;  %4838 = vadd.xlane.f32.xlu1 %v4837_v46  ;;  %14071 = vst [vmem:[#allocation64_spill] sm:$0xff] %v10699_v57  ;;  %v3613_v60 = vmul.f32 1.442695, %v3048_v30  ;;  %v10702_v44 = vadd.f32 %v14072_v61, %v1115_v8  ;;  %v10708_v40 = vpop.f32.mrb[111].mxu0  ;;  %v14075_v46 = vld [vmem:[#allocation112_spill] sm:$0xff]  ;;  %v14076_v3 = vld [vmem:[#allocation14_spill] sm:$0xff] }
 0x25f   : > { %14070 = vst [vmem:[#allocation229_spill] sm:$0xff] %v10697_v14  ;;  %v6658_v13 = vpop.eup %6657  ;;  %6677 = vrcp.f32 %v3844_v53  ;;  %v4004_v19 = vadd.f32 1.0, %v6656_v47  ;;  %v4481_v58 = vmul.f32 %v6654_v34, %v10499_v54  ;;  %v3049_v38 = vsub.f32 0.0, %v10682_v51  ;;  %14074 = vst [vmem:[#allocation232_spill] sm:$0xff] %v10708_v40  ;;  %v1120_v53 = vpop.permute.xlu0 %1119  ;;  %v14078_v54 = vld [vmem:[#allocation26_spill] sm:$0xff]  ;;  %v14087_v57 = vld [vmem:[#allocation128_spill] sm:$0xff] }
 0x260   : > { %14067 = vst [vmem:[#allocation94_spill] sm:$0xff] %v10693_v56  ;;  %14073 = vst [vmem:[#allocation17_spill] sm:$0xff] %v10702_v44  ;;  %v10704_v29 = vpop.eup %6659  ;;  %v3845_v32 = vadd.f32 1.0, %v6658_v13  ;;  %6679 = vpow2.f32 %v3611_v50  ;;  %v10712_v14 = vmul.f32 %v14076_v3, %v14075_v46  ;;  %v3295_v30 = vmul.f32 1.442695, %v2889_v35  ;;  %v14079_v34 = vld [vmem:[#allocation110_spill] sm:$0xff] }
 0x261   : > { %v6662_v6 = vpop.eup %6661  ;;  %6681 = vrcp.f32 %v4004_v19  ;;  %v2890_v8 = vsub.f32 0.0, %v10689_v37  ;;  %v10718_v50 = vadd.f32 %v14079_v34, %v14078_v54  ;;  %v14080_v13 = vld [vmem:[#allocation150_spill] sm:$0xff]  ;;  %v14082_v46 = vld [vmem:[#allocation127_spill] sm:$0xff]  ;;  %v14083_v3 = vld [vmem:[#allocation181_spill] sm:$0xff]  ;;  %v3050_v19 = vsub.f32 0.0, %v10702_v44  ;;  %v10730_v40 = vpop.f32.mrb[111].mxu1 }
 0x262   : > { %14077 = vst [vmem:[#allocation125_spill] sm:$0xff] %v10712_v14  ;;  %v6664_v47 = vpop.eup %6663  ;;  %v4482_v61 = vmul.f32 %v6662_v6, %v10516_v49  ;;  %6683 = vrcp.f32 %v3845_v32  ;;  %v10721_v56 = vadd.f32 %v14080_v13, %v1120_v53  ;;  %v10727_v14 = vmul.f32 %v14083_v3, %v14082_v46  ;;  %14085 = vst [vmem:[#allocation109_spill] sm:$0xff] %v10730_v40  ;;  %v14086_v34 = vld [vmem:[#allocation137_spill] sm:$0xff]  ;;  %v10736_v17 = vpop.f32.mrb[112].mxu0  ;;  %v14090_v46 = vld [vmem:[#allocation183_spill] sm:$0xff] }
 0x263   : > { %v10723_v51 = vpop.eup %6665  ;;  %v4005_v35 = vadd.f32 1.0, %v6664_v47  ;;  %6685 = vpow2.f32 %v3293_v16  ;;  %v3615_v32 = vmul.f32 1.442695, %v3049_v38  ;;  %v10734_v13 = vadd.f32 %v14087_v57, %v14086_v34  ;;  %14088 = vst [vmem:[#allocation104_spill] sm:$0xff] %v10736_v17  ;;  %v14092_v47 = vld [vmem:[#allocation119_spill] sm:$0xff] }
 0x264   : > { %14081 = vst [vmem:[#allocation233_spill] sm:$0xff] %v10721_v56  ;;  %14084 = vst [vmem:[#allocation72_spill] sm:$0xff] %v10727_v14  ;;  %v6668_v49 = vpop.eup %6667  ;;  %6687 = vpow2.f32 %v3613_v60  ;;  %v4840_v6 = vadd.f32 %v4482_v61, %v4481_v58  ;;  %v10740_v3 = vmul.f32 %v14090_v46, %v14089_v10  ;;  %v10744_v14 = vadd.f32 %v14092_v47, %v14078_v54  ;;  %v10748_v61 = vpop.f32.mrb[112].mxu1  ;;  %v14094_v10 = vld [vmem:[#allocation166_spill] sm:$0xff]  ;;  %v14095_v46 = vld [vmem:[#allocation215_spill] sm:$0xff] }
 0x265   : > { %v6670_v62 = vpop.eup %6669  ;;  %6689 = vrcp.f32 %v4005_v35  ;;  %v3846_v16 = vadd.f32 1.0, %v6668_v49  ;;  %v3297_v58 = vmul.f32 1.442695, %v2890_v8  ;;  %v2891_v38 = vsub.f32 0.0, %v10718_v50  ;;  %14093 = vst [vmem:[#allocation108_spill] sm:$0xff] %v10748_v61  ;;  %v14097_v49 = vld [vmem:[#allocation12_spill] sm:$0xff] }
 0x266   : > { %14091 = vst [vmem:[#allocation103_spill] sm:$0xff] %v10740_v3  ;;  %v6672_v60 = vpop.eup %6671  ;;  %6691 = vpow2.f32 %v3295_v30  ;;  %v3051_v57 = vsub.f32 0.0, %v10721_v56  ;;  %4841 = vadd.xlane.f32.xlu0 %v4840_v6  ;;  %v10754_v35 = vmul.f32 %v14095_v46, %v14094_v10  ;;  %v14098_v3 = vld [vmem:[#allocation188_spill] sm:$0xff]  ;;  %v4483_v47 = vmul.f32 %v6670_v62, %v10538_v11  ;;  %v10764_v61 = vpop.f32.mrb[113].mxu0 }
 0x267   : > { %v10750_v34 = vpop.eup %6673  ;;  %v10758_v54 = vmul.f32 %v14098_v3, %v14097_v49  ;;  %6693 = vrcp.f32 %v3846_v16  ;;  %v4006_v30 = vadd.f32 1.0, %v6672_v60  ;;  %v3617_v56 = vmul.f32 1.442695, %v3050_v19  ;;  %v14100_v6 = vld [vmem:[#allocation124_spill] sm:$0xff]  ;;  %14102 = vst [vmem:[#allocation20_spill] sm:$0xff] %v10764_v61  ;;  %v1125_v60 = vpop.permute.xlu1 %1124  ;;  %v14110_v61 = vld [vmem:[#allocation131_spill] sm:$0xff] }
 0x268   : > { %14096 = vst [vmem:[#allocation106_spill] sm:$0xff] %v10754_v35  ;;  %v6676_v8 = vpop.eup %6675  ;;  %6695 = vpow2.f32 %v3615_v32  ;;  %v10762_v44 = vadd.f32 %v14100_v6, %v1120_v53  ;;  %v2892_v46 = vsub.f32 0.0, %v10744_v14  ;;  %v14103_v35 = vld [vmem:[#allocation25_spill] sm:$0xff]  ;;  %v14104_v3 = vld [vmem:[#allocation164_spill] sm:$0xff]  ;;  %v3299_v62 = vmul.f32 1.442695, %v2891_v38 }
 0x269   : > { %14099 = vst [vmem:[#allocation73_spill] sm:$0xff] %v10758_v54  ;;  %v6678_v17 = vpop.eup %6677  ;;  %6697 = vrcp.f32 %v4006_v30  ;;  %v3847_v10 = vadd.f32 1.0, %v6676_v8  ;;  %v10769_v49 = vadd.f32 %v14104_v3, %v14103_v35  ;;  %v3619_v19 = vmul.f32 1.442695, %v3051_v57  ;;  %v10772_v53 = vpop.f32.mrb[113].mxu1  ;;  %v14107_v8 = vld [vmem:[#allocation158_spill] sm:$0xff] }
 0x26a   : > { %14101 = vst [vmem:[#allocation235_spill] sm:$0xff] %v10762_v44  ;;  %v6680_v16 = vpop.eup %6679  ;;  %v4484_v11 = vmul.f32 %v6678_v17, %v10553_v9  ;;  %6699 = vpow2.f32 %v3297_v58  ;;  %14105 = vst [vmem:[#allocation76_spill] sm:$0xff] %v10772_v53  ;;  %v10777_v6 = vadd.f32 %v14107_v8, %v1125_v60  ;;  %v14109_v54 = vld [vmem:[#allocation78_spill] sm:$0xff]  ;;  %v3052_v9 = vsub.f32 0.0, %v10762_v44  ;;  %v10788_v57 = vpop.f32.mrb[114].mxu0  ;;  %v14114_v53 = vld [vmem:[#allocation193_spill] sm:$0xff] }
 0x26b   : > { %v10774_v32 = vpop.eup %6681  ;;  %6701 = vrcp.f32 %v3847_v10  ;;  %v4007_v30 = vadd.f32 1.0, %v6680_v16  ;;  %v10781_v3 = vadd.f32 %v14110_v61, %v14109_v54  ;;  %v14111_v17 = vld [vmem:[#allocation138_spill] sm:$0xff]  ;;  %14112 = vst [vmem:[#allocation8_spill] sm:$0xff] %v10788_v57  ;;  %v14113_v16 = vld [vmem:[#allocation157_spill] sm:$0xff]  ;;  %v2893_v61 = vsub.f32 0.0, %v10769_v49  ;;  %v14116_v54 = vld [vmem:[#allocation160_spill] sm:$0xff] }
 0x26c   : > { %14106 = vst [vmem:[#allocation45_spill] sm:$0xff] %v10774_v32  ;;  %14108 = vst [vmem:[#allocation83_spill] sm:$0xff] %v10777_v6  ;;  %v6684_v40 = vpop.eup %6683  ;;  %6703 = vpow2.f32 %v3617_v56  ;;  %v10786_v58 = vadd.f32 %v14111_v17, %v14103_v35  ;;  %v4843_v38 = vadd.f32 %v4484_v11, %v4483_v47  ;;  %v10792_v8 = vmul.f32 %v14114_v53, %v14113_v16  ;;  %v14118_v44 = vld [vmem:[#allocation196_spill] sm:$0xff]  ;;  %v10802_v11 = vpop.f32.mrb[114].mxu1  ;;  %v14121_v53 = vld [vmem:[#allocation199_spill] sm:$0xff] }
 0x26d   : > { %v6686_v10 = vpop.eup %6685  ;;  %6705 = vrcp.f32 %v4007_v30  ;;  %v10796_v32 = vadd.f32 %v14116_v54, %v1125_v60  ;;  %v10800_v20 = vmul.f32 %v10372_v18, %v14118_v44  ;;  %v3301_v47 = vmul.f32 1.442695, %v2892_v46  ;;  %14120 = vst [vmem:[#allocation86_spill] sm:$0xff] %v10802_v11  ;;  %v14122_v30 = vld [vmem:[#allocation192_spill] sm:$0xff]  ;;  %v10811_v54 = vpop.f32.mrb[115].mxu0 }
 0x26e   : > { %14115 = vst [vmem:[#allocation113_spill] sm:$0xff] %v10792_v8  ;;  %v6688_v56 = vpop.eup %6687  ;;  %v3848_v35 = vadd.f32 1.0, %v6686_v10  ;;  %6707 = vpow2.f32 %v3299_v62  ;;  %4844 = vadd.xlane.f32.xlu1 %v4843_v38  ;;  %v10808_v16 = vmul.f32 %v14122_v30, %v14121_v53  ;;  %v3053_v60 = vsub.f32 0.0, %v10777_v6  ;;  %14124 = vst [vmem:[#allocation90_spill] sm:$0xff] %v10811_v54  ;;  %v14126_v6 = vld [vmem:[#allocation147_spill] sm:$0xff] }
 0x26f   : > { %14117 = vst [vmem:[#allocation85_spill] sm:$0xff] %v10796_v32  ;;  %14119 = vst [vmem:[#allocation19_spill] sm:$0xff] %v10800_v20  ;;  %v10804_v17 = vpop.eup %6689  ;;  %v4008_v8 = vadd.f32 1.0, %v6688_v56  ;;  %6709 = vpow2.f32 %v3619_v19  ;;  %v4485_v44 = vmul.f32 %v6684_v40, %v10570_v12  ;;  %v3621_v46 = vmul.f32 1.442695, %v3052_v9  ;;  %v1130_v56 = vpop.permute.xlu0 %1129  ;;  %v14127_v12 = vld [vmem:[#allocation139_spill] sm:$0xff] }
 0x270   : > { %14123 = vst [vmem:[#allocation121_spill] sm:$0xff] %v10808_v16  ;;  %v6692_v18 = vpop.eup %6691  ;;  %6711 = vrcp.f32 %v3848_v35  ;;  %v2894_v62 = vsub.f32 0.0, %v10786_v58  ;;  %v3303_v20 = vmul.f32 1.442695, %v2893_v61  ;;  %v3054_v53 = vsub.f32 0.0, %v10796_v32  ;;  %v14125_v16 = vld [vmem:[#allocation28_spill] sm:$0xff] }
 0x271   : > { %v6694_v38 = vpop.eup %6693  ;;  %6713 = vrcp.f32 %v4008_v8  ;;  %v3849_v10 = vadd.f32 1.0, %v6692_v18  ;;  %v10819_v54 = vadd.f32 %v14126_v6, %v14125_v16  ;;  %v14128_v40 = vld [vmem:[#allocation96_spill] sm:$0xff]  ;;  %v10825_v35 = vpop.f32.mrb[115].mxu1  ;;  %v3623_v18 = vmul.f32 1.442695, %v3053_v60  ;;  %v14131_v32 = vld [vmem:[#allocation151_spill] sm:$0xff] }
 0x272   : > { %v6696_v30 = vpop.eup %6695  ;;  %v4486_v19 = vmul.f32 %v6694_v38, %v10593_v31  ;;  %6715 = vpow2.f32 %v3301_v47  ;;  %v10823_v9 = vadd.f32 %v14128_v40, %v14127_v12  ;;  %14129 = vst [vmem:[#allocation115_spill] sm:$0xff] %v10825_v35  ;;  %v10830_v11 = vadd.f32 %v14131_v32, %v1130_v56  ;;  %v14133_v47 = vld [vmem:[#allocation67_spill] sm:$0xff]  ;;  %v10839_v40 = vpop.f32.mrb[116].mxu0  ;;  %v14139_v60 = vld [vmem:[#allocation2_spill] sm:$0xff] }
 0x273   : > { %v10827_v8 = vpop.eup %6697  ;;  %6717 = vrcp.f32 %v3849_v10  ;;  %v4009_v61 = vadd.f32 1.0, %v6696_v30  ;;  %v10834_v6 = vadd.f32 %v14133_v47, %v14125_v16  ;;  %v14134_v38 = vld [vmem:[#allocation171_spill] sm:$0xff]  ;;  %14136 = vst [vmem:[#allocation118_spill] sm:$0xff] %v10839_v40  ;;  %v10847_v32 = vmul.f32 %v10448_v5, %v14139_v60  ;;  %v14141_v16 = vld [vmem:[#allocation182_spill] sm:$0xff] }
 0x274   : > { %14130 = vst [vmem:[#allocation52_spill] sm:$0xff] %v10827_v8  ;;  %14132 = vst [vmem:[#allocation92_spill] sm:$0xff] %v10830_v11  ;;  %v6700_v31 = vpop.eup %6699  ;;  %6719 = vpow2.f32 %v3621_v46  ;;  %v10837_v57 = vadd.f32 %v14134_v38, %v1130_v56  ;;  %v4846_v12 = vadd.f32 %v4486_v19, %v4485_v44  ;;  %v14137_v8 = vld [vmem:[#allocation203_spill] sm:$0xff]  ;;  %v10851_v47 = vmul.f32 %v10466_v26, %v14141_v16  ;;  %v10854_v19 = vpop.f32.mrb[116].mxu1 }
 0x275   : > { %v6702_v35 = vpop.eup %6701  ;;  %v10843_v10 = vmul.f32 %v10420_v43, %v14137_v8  ;;  %14140 = vst [vmem:[#allocation130_spill] sm:$0xff] %v10847_v32  ;;  %6721 = vrcp.f32 %v4009_v61  ;;  %v3850_v46 = vadd.f32 1.0, %v6700_v31  ;;  %v3305_v44 = vmul.f32 1.442695, %v2894_v62  ;;  %14143 = vst [vmem:[#allocation57_spill] sm:$0xff] %v10854_v19  ;;  %v14146_v62 = vld [vmem:[#allocation162_spill] sm:$0xff] }
 0x276   : > { %14135 = vst [vmem:[#allocation126_spill] sm:$0xff] %v10837_v57  ;;  %v6704_v30 = vpop.eup %6703  ;;  %14142 = vst [vmem:[#allocation41_spill] sm:$0xff] %v10851_v47  ;;  %6723 = vpow2.f32 %v3303_v20  ;;  %v2895_v56 = vsub.f32 0.0, %v10819_v54  ;;  %4847 = vadd.xlane.f32.xlu0 %v4846_v12  ;;  %v3625_v5 = vmul.f32 1.442695, %v3054_v53  ;;  %v3055_v61 = vsub.f32 0.0, %v10830_v11  ;;  %v1135_v47 = vpop.permute.xlu1 %1134 }
 0x277   : > { %14138 = vst [vmem:[#allocation22_spill] sm:$0xff] %v10843_v10  ;;  %v10856_v43 = vpop.eup %6705  ;;  %6725 = vrcp.f32 %v3850_v46  ;;  %v4010_v8 = vadd.f32 1.0, %v6704_v30  ;;  %v2896_v38 = vsub.f32 0.0, %v10834_v6  ;;  %v3056_v26 = vsub.f32 0.0, %v10837_v57  ;;  %v14145_v20 = vld [vmem:[#allocation27_spill] sm:$0xff]  ;;  %v10865_v12 = vpop.f32.mrb[117].mxu0 }
 0x278   : > { %14144 = vst [vmem:[#allocation100_spill] sm:$0xff] %v10856_v43  ;;  %v6708_v31 = vpop.eup %6707  ;;  %6727 = vpow2.f32 %v3623_v18  ;;  %v10863_v60 = vadd.f32 %v14146_v62, %v14145_v20  ;;  %14147 = vst [vmem:[#allocation61_spill] sm:$0xff] %v10865_v12  ;;  %v4487_v46 = vmul.f32 %v6702_v35, %v10620_v36  ;;  %v14148_v30 = vld [vmem:[#allocation136_spill] sm:$0xff]  ;;  %v14149_v32 = vld [vmem:[#allocation101_spill] sm:$0xff]  ;;  %v3307_v57 = vmul.f32 1.442695, %v2895_v56 }
 0x279   : > { %v6710_v16 = vpop.eup %6709  ;;  %6729 = vrcp.f32 %v4010_v8  ;;  %v3851_v53 = vadd.f32 1.0, %v6708_v31  ;;  %v10870_v10 = vadd.f32 %v14149_v32, %v14148_v30  ;;  %v14150_v19 = vld [vmem:[#allocation197_spill] sm:$0xff]  ;;  %v10875_v62 = vpop.f32.mrb[117].mxu1  ;;  %v14153_v43 = vld [vmem:[#allocation186_spill] sm:$0xff]  ;;  %v3627_v31 = vmul.f32 1.442695, %v3055_v61 }
 0x27a   : > { %v6712_v18 = vpop.eup %6711  ;;  %v4011_v11 = vadd.f32 1.0, %v6710_v16  ;;  %6731 = vpow2.f32 %v3305_v44  ;;  %v10873_v40 = vadd.f32 %v14150_v19, %v1135_v47  ;;  %14152 = vst [vmem:[#allocation21_spill] sm:$0xff] %v10875_v62  ;;  %v10881_v36 = vmul.f32 %v10484_v52, %v14153_v43  ;;  %v14155_v32 = vld [vmem:[#allocation174_spill] sm:$0xff]  ;;  %v14158_v16 = vld [vmem:[#allocation176_spill] sm:$0xff] }
 0x27b   : > { %v10877_v12 = vpop.eup %6713  ;;  %v4488_v35 = vmul.f32 %v6712_v18, %v10647_v48  ;;  %6733 = vrcp.f32 %v3851_v53  ;;  %v10886_v8 = vadd.f32 %v14155_v32, %v14145_v20  ;;  %v14156_v56 = vld [vmem:[#allocation218_spill] sm:$0xff]  ;;  %v10893_v30 = vadd.f32 %v14158_v16, %v1135_v47  ;;  %v10896_v53 = vpop.f32.mrb[118].mxu0  ;;  %v14166_v16 = vld [vmem:[#allocation155_spill] sm:$0xff] }
 0x27c   : > { %14151 = vst [vmem:[#allocation48_spill] sm:$0xff] %v10873_v40  ;;  %14154 = vst [vmem:[#allocation111_spill] sm:$0xff] %v10881_v36  ;;  %v6716_v44 = vpop.eup %6715  ;;  %v10890_v19 = vmul.f32 %v10501_v33, %v14156_v56  ;;  %6735 = vrcp.f32 %v4011_v11  ;;  %v2897_v48 = vsub.f32 0.0, %v10863_v60  ;;  %v3309_v18 = vmul.f32 1.442695, %v2896_v38  ;;  %v10899_v56 = vpop.f32.mrb[118].mxu1 }
 0x27d   : > { %14159 = vst [vmem:[#allocation49_spill] sm:$0xff] %v10893_v30  ;;  %v6718_v62 = vpop.eup %6717  ;;  %v3852_v52 = vadd.f32 1.0, %v6716_v44  ;;  %6737 = vpow2.f32 %v3625_v5  ;;  %v4849_v43 = vadd.f32 %v4488_v35, %v4487_v46  ;;  %14160 = vst [vmem:[#allocation53_spill] sm:$0xff] %v10896_v53  ;;  %v3629_v32 = vmul.f32 1.442695, %v3056_v26  ;;  %v14162_v47 = vld [vmem:[#allocation190_spill] sm:$0xff] }
 0x27e   : > { %14157 = vst [vmem:[#allocation69_spill] sm:$0xff] %v10890_v19  ;;  %v6720_v20 = vpop.eup %6719  ;;  %6739 = vpow2.f32 %v3307_v57  ;;  %v3057_v33 = vsub.f32 0.0, %v10873_v40  ;;  %14161 = vst [vmem:[#allocation77_spill] sm:$0xff] %v10899_v56  ;;  %v10905_v61 = vmul.f32 %v10519_v63, %v14162_v47  ;;  %v2898_v46 = vsub.f32 0.0, %v10886_v8  ;;  %v14164_v38 = vld [vmem:[#allocation30_spill] sm:$0xff]  ;;  %v14167_v19 = vld [vmem:[#allocation153_spill] sm:$0xff] }
 0x27f   : > { %v10901_v11 = vpop.eup %6721  ;;  %6741 = vrcp.f32 %v3852_v52  ;;  %v4012_v5 = vadd.f32 1.0, %v6720_v20  ;;  %4850 = vadd.xlane.f32.xlu1 %v4849_v43  ;;  %v4489_v57 = vmul.f32 %v6718_v62, %v10666_v25  ;;  %v14165_v26 = vld [vmem:[#allocation202_spill] sm:$0xff]  ;;  %v10915_v36 = vadd.f32 %v14167_v19, %v14166_v16  ;;  %v10917_v40 = vpop.f32.mrb[119].mxu0 }
 0x280   : > { %14163 = vst [vmem:[#allocation120_spill] sm:$0xff] %v10905_v61  ;;  %v6724_v35 = vpop.eup %6723  ;;  %6743 = vpow2.f32 %v3627_v31  ;;  %v10911_v44 = vadd.f32 %v14165_v26, %v14164_v38  ;;  %14168 = vst [vmem:[#allocation60_spill] sm:$0xff] %v10917_v40  ;;  %v1140_v52 = vpop.permute.xlu0 %1139  ;;  %v3311_v47 = vmul.f32 1.442695, %v2897_v48  ;;  %v3058_v43 = vsub.f32 0.0, %v10893_v30  ;;  %v14169_v31 = vld [vmem:[#allocation175_spill] sm:$0xff] }
 0x281   : > { %v6726_v63 = vpop.eup %6725  ;;  %6745 = vrcp.f32 %v4012_v5  ;;  %v3853_v20 = vadd.f32 1.0, %v6724_v35  ;;  %v3631_v62 = vmul.f32 1.442695, %v3057_v33  ;;  %v10922_v26 = vadd.f32 %v14169_v31, %v1140_v52  ;;  %v10924_v56 = vpop.f32.mrb[119].mxu1  ;;  %v14172_v5 = vld [vmem:[#allocation205_spill] sm:$0xff]  ;;  %v14173_v48 = vld [vmem:[#allocation207_spill] sm:$0xff] }
 0x282   : > { %v6728_v61 = vpop.eup %6727  ;;  %v4490_v25 = vmul.f32 %v6726_v63, %v10689_v37  ;;  %6747 = vpow2.f32 %v3309_v18  ;;  %14171 = vst [vmem:[#allocation132_spill] sm:$0xff] %v10924_v56  ;;  %v10930_v35 = vadd.f32 %v14172_v5, %v14164_v38  ;;  %v10933_v30 = vadd.f32 %v14173_v48, %v1140_v52  ;;  %v10937_v31 = vpop.f32.mrb[120].mxu0  ;;  %v14176_v40 = vld [vmem:[#allocation29_spill] sm:$0xff]  ;;  %v14178_v48 = vld [vmem:[#allocation191_spill] sm:$0xff] }
 0x283   : > { %14170 = vst [vmem:[#allocation68_spill] sm:$0xff] %v10922_v26  ;;  %v10926_v19 = vpop.eup %6729  ;;  %6749 = vrcp.f32 %v3853_v20  ;;  %v4013_v16 = vadd.f32 1.0, %v6728_v61  ;;  %4964 = vadd.xlane.f32.xlu1 %v10734_v13  ;;  %v3313_v18 = vmul.f32 1.442695, %v2898_v46  ;;  %v2899_v33 = vsub.f32 0.0, %v10911_v44  ;;  %14175 = vst [vmem:[#allocation89_spill] sm:$0xff] %v10937_v31 }
 0x284   : > { %14174 = vst [vmem:[#allocation24_spill] sm:$0xff] %v10933_v30  ;;  %v6732_v37 = vpop.eup %6731  ;;  %6751 = vpow2.f32 %v3629_v32  ;;  %v4852_v63 = vadd.f32 %v4490_v25, %v4489_v57  ;;  %v3633_v20 = vmul.f32 1.442695, %v3058_v43  ;;  %v14177_v38 = vld [vmem:[#allocation209_spill] sm:$0xff]  ;;  %v10947_v13 = vmul.f32 %v10540_v1, %v14178_v48  ;;  %v14180_v32 = vld [vmem:[#allocation195_spill] sm:$0xff]  ;;  %v10954_v25 = vpop.f32.mrb[120].mxu1 }
 0x285   : > { %v6734_v56 = vpop.eup %6733  ;;  %6753 = vrcp.f32 %v4013_v16  ;;  %v3854_v61 = vadd.f32 1.0, %v6732_v37  ;;  %v10941_v5 = vadd.f32 %v14177_v38, %v14176_v40  ;;  %v10951_v46 = vmul.f32 %v10555_v24, %v14180_v32  ;;  %14182 = vst [vmem:[#allocation133_spill] sm:$0xff] %v10954_v25  ;;  %v14183_v38 = vld [vmem:[#allocation149_spill] sm:$0xff]  ;;  %v14184_v31 = vld [vmem:[#allocation116_spill] sm:$0xff]  ;;  %v10969_v53 = vpop.f32.mrb[121].mxu1 }
 0x286   : > { %v10943_v52 = vpop.eup %6735  ;;  %14179 = vst [vmem:[#allocation7_spill] sm:$0xff] %v10947_v13  ;;  %6755 = vpow2.f32 %v3311_v47  ;;  %v3059_v57 = vsub.f32 0.0, %v10922_v26  ;;  %4853 = vadd.xlane.f32.xlu0 %v4852_v63  ;;  %v2900_v16 = vsub.f32 0.0, %v10930_v35  ;;  %v3060_v37 = vsub.f32 0.0, %v10933_v30  ;;  %v1145_v13 = vpop.permute.xlu1 %1144  ;;  %v14186_v25 = vld [vmem:[#allocation117_spill] sm:$0xff]  ;;  %14188 = vst [vmem:[#allocation87_spill] sm:$0xff] %v10969_v53 }
 0x287   : > { %14181 = vst [vmem:[#allocation167_spill] sm:$0xff] %v10951_v46  ;;  %v6738_v43 = vpop.eup %6737  ;;  %6757 = vrcp.f32 %v3854_v61  ;;  %v10960_v1 = vadd.f32 %v14184_v31, %v14183_v38  ;;  %v4491_v24 = vmul.f32 %v6734_v56, %v10718_v50  ;;  %v3315_v32 = vmul.f32 1.442695, %v2899_v33  ;;  %v10963_v63 = vpop.f32.mrb[121].mxu0  ;;  %v14189_v56 = vld [vmem:[#allocation185_spill] sm:$0xff] }
 0x288   : > { %v6740_v48 = vpop.eup %6739  ;;  %v4014_v47 = vadd.f32 1.0, %v6738_v43  ;;  %6759 = vpow2.f32 %v3631_v62  ;;  %14185 = vst [vmem:[#allocation80_spill] sm:$0xff] %v10963_v63  ;;  %v2901_v61 = vsub.f32 0.0, %v10941_v5  ;;  %v10967_v30 = vadd.f32 %v14186_v25, %v1145_v13  ;;  %v14191_v25 = vld [vmem:[#allocation210_spill] sm:$0xff] }
 0x289   : > { %v6742_v46 = vpop.eup %6741  ;;  %v3855_v26 = vadd.f32 1.0, %v6740_v48  ;;  %6761 = vpow2.f32 %v3313_v18  ;;  %v3635_v50 = vmul.f32 1.442695, %v3059_v57  ;;  %v10974_v62 = vadd.f32 %v14189_v56, %v14176_v40  ;;  %v14193_v63 = vld [vmem:[#allocation234_spill] sm:$0xff]  ;;  %v10986_v40 = vpop.f32.mrb[122].mxu0 }
 0x28a   : > { %14187 = vst [vmem:[#allocation145_spill] sm:$0xff] %v10967_v30  ;;  %v6744_v31 = vpop.eup %6743  ;;  %v4492_v38 = vmul.f32 %v6742_v46, %v10744_v14  ;;  %6763 = vrcp.f32 %v4014_v47  ;;  %4967 = vadd.xlane.f32.xlu0 %v10781_v3  ;;  %v3317_v43 = vmul.f32 1.442695, %v2900_v16  ;;  %v10980_v48 = vadd.f32 %v14191_v25, %v1145_v13  ;;  %14195 = vst [vmem:[#allocation194_spill] sm:$0xff] %v10986_v40  ;;  %v14196_v25 = vld [vmem:[#allocation32_spill] sm:$0xff] }
 0x28b   : > { %v10977_v33 = vpop.eup %6745  ;;  %6765 = vrcp.f32 %v3855_v26  ;;  %v4015_v18 = vadd.f32 1.0, %v6744_v31  ;;  %v10984_v14 = vmul.f32 %v10574_v27, %v14193_v63  ;;  %v3637_v46 = vmul.f32 1.442695, %v3060_v37  ;;  %v1150_v31 = vpop.permute.xlu0 %1149  ;;  %v14199_v37 = vld [vmem:[#allocation9_spill] sm:$0xff] }
 0x28c   : > { %14190 = vst [vmem:[#allocation154_spill] sm:$0xff] %v10977_v33  ;;  %14192 = vst [vmem:[#allocation91_spill] sm:$0xff] %v10980_v48  ;;  %v6748_v53 = vpop.eup %6747  ;;  %6767 = vpow2.f32 %v3633_v20  ;;  %v4855_v57 = vadd.f32 %v4492_v38, %v4491_v24  ;;  %v3319_v56 = vmul.f32 1.442695, %v2901_v61  ;;  %v3061_v26 = vsub.f32 0.0, %v10967_v30  ;;  %v14197_v33 = vld [vmem:[#allocation184_spill] sm:$0xff] }
 0x28d   : > { %14194 = vst [vmem:[#allocation141_spill] sm:$0xff] %v10984_v14  ;;  %v6750_v47 = vpop.eup %6749  ;;  %6769 = vrcp.f32 %v4015_v18  ;;  %v3856_v3 = vadd.f32 1.0, %v6748_v53  ;;  %v2902_v13 = vsub.f32 0.0, %v10974_v62  ;;  %v10992_v27 = vadd.f32 %v14197_v33, %v14196_v25  ;;  %v14198_v20 = vld [vmem:[#allocation122_spill] sm:$0xff]  ;;  %v10998_v63 = vpop.f32.mrb[122].mxu1 }
 0x28e   : > { %v6752_v16 = vpop.eup %6751  ;;  %6771 = vpow2.f32 %v3315_v32  ;;  %4856 = vadd.xlane.f32.xlu1 %v4855_v57  ;;  %v10996_v24 = vadd.f32 %v14199_v37, %v14198_v20  ;;  %14200 = vst [vmem:[#allocation98_spill] sm:$0xff] %v10998_v63  ;;  %v3062_v38 = vsub.f32 0.0, %v10980_v48  ;;  %v14201_v32 = vld [vmem:[#allocation13_spill] sm:$0xff]  ;;  %v11008_v33 = vmul.f32 %v10597_v2, %v10414_v42  ;;  %v14204_v20 = vld [vmem:[#allocation219_spill] sm:$0xff]  ;;  %v11015_v30 = vpop.f32.mrb[123].mxu0 }
 0x28f   : > { %v11000_v53 = vpop.eup %6753  ;;  %6773 = vrcp.f32 %v3856_v3  ;;  %v4016_v61 = vadd.f32 1.0, %v6752_v16  ;;  %v11004_v18 = vadd.f32 %v14201_v32, %v1150_v31  ;;  %v4493_v57 = vmul.f32 %v6750_v47, %v10769_v49  ;;  %14205 = vst [vmem:[#allocation23_spill] sm:$0xff] %v11015_v30  ;;  %v14206_v32 = vld [vmem:[#allocation189_spill] sm:$0xff] }
 0x290   : > { %v6756_v14 = vpop.eup %6755  ;;  %14203 = vst [vmem:[#allocation11_spill] sm:$0xff] %v11008_v33  ;;  %6775 = vpow2.f32 %v3635_v50  ;;  %v11013_v37 = vadd.f32 %v14204_v20, %v14196_v25  ;;  %v3639_v48 = vmul.f32 1.442695, %v3061_v26  ;;  %v11018_v63 = vadd.f32 %v14206_v32, %v1150_v31  ;;  %v11023_v50 = vpop.f32.mrb[123].mxu1  ;;  %v14210_v32 = vld [vmem:[#allocation31_spill] sm:$0xff]  ;;  %v14213_v33 = vld [vmem:[#allocation129_spill] sm:$0xff] }
 0x291   : > { %14202 = vst [vmem:[#allocation144_spill] sm:$0xff] %v11004_v18  ;;  %v6758_v3 = vpop.eup %6757  ;;  %6777 = vrcp.f32 %v4016_v61  ;;  %v3857_v16 = vadd.f32 1.0, %v6756_v14  ;;  %v3321_v2 = vmul.f32 1.442695, %v2902_v13  ;;  %v2903_v49 = vsub.f32 0.0, %v10992_v27  ;;  %14208 = vst [vmem:[#allocation99_spill] sm:$0xff] %v11023_v50 }
 0x292   : > { %14207 = vst [vmem:[#allocation146_spill] sm:$0xff] %v11018_v63  ;;  %v6760_v40 = vpop.eup %6759  ;;  %v4494_v42 = vmul.f32 %v6758_v3, %v10786_v58  ;;  %6779 = vpow2.f32 %v3317_v43  ;;  %4970 = vadd.xlane.f32.xlu1 %v10823_v9  ;;  %v3641_v61 = vmul.f32 1.442695, %v3062_v38  ;;  %v3063_v14 = vsub.f32 0.0, %v11004_v18  ;;  %v11029_v13 = vpop.f32.mrb[124].mxu0  ;;  %v14212_v38 = vld [vmem:[#allocation156_spill] sm:$0xff] }
 0x293   : > { %v6762_v47 = vpop.eup %6761  ;;  %6781 = vrcp.f32 %v3857_v16  ;;  %v4017_v25 = vadd.f32 1.0, %v6760_v40  ;;  %v2904_v58 = vsub.f32 0.0, %v11013_v37  ;;  %14209 = vst [vmem:[#allocation165_spill] sm:$0xff] %v11029_v13  ;;  %v1155_v3 = vpop.permute.xlu1 %1154  ;;  %v3064_v9 = vsub.f32 0.0, %v11018_v63  ;;  %v14211_v16 = vld [vmem:[#allocation84_spill] sm:$0xff]  ;;  %v14217_v50 = vld [vmem:[#allocation230_spill] sm:$0xff] }
 0x294   : > { %v11026_v26 = vpop.eup %6763  ;;  %v3858_v31 = vadd.f32 1.0, %v6762_v47  ;;  %6783 = vpow2.f32 %v3637_v46  ;;  %v4858_v43 = vadd.f32 %v4494_v42, %v4493_v57  ;;  %v11034_v40 = vadd.f32 %v14211_v16, %v14210_v32  ;;  %v14215_v42 = vld [vmem:[#allocation227_spill] sm:$0xff] }
 0x295   : > { %v6766_v20 = vpop.eup %6765  ;;  %6785 = vrcp.f32 %v4017_v25  ;;  %v11038_v18 = vadd.f32 %v14213_v33, %v14212_v38  ;;  %v11042_v46 = vmul.f32 %v10614_v41, %v10446_v23  ;;  %v3323_v57 = vmul.f32 1.442695, %v2903_v49  ;;  %v11053_v38 = vpop.f32.mrb[124].mxu1 }
 0x296   : > { %v6768_v47 = vpop.eup %6767  ;;  %6787 = vrcp.f32 %v3858_v31  ;;  %v11045_v13 = vadd.f32 %v14215_v42, %v1155_v3  ;;  %4859 = vadd.xlane.f32.xlu0 %v4858_v43  ;;  %v3643_v16 = vmul.f32 1.442695, %v3063_v14  ;;  %v11051_v33 = vadd.f32 %v14217_v50, %v14210_v32  ;;  %v11060_v31 = vpop.f32.mrb[125].mxu0 }
 0x297   : > { %14214 = vst [vmem:[#allocation10_spill] sm:$0xff] %v11042_v46  ;;  %v11047_v25 = vpop.eup %6769  ;;  %v4018_v63 = vadd.f32 1.0, %v6768_v47  ;;  %6789 = vpow2.f32 %v3319_v56  ;;  %v11057_v23 = vmul.f32 %v10649_v15, %v10470_v7  ;;  %v4495_v41 = vmul.f32 %v6766_v20, %v10819_v54  ;;  %14219 = vst [vmem:[#allocation134_spill] sm:$0xff] %v11060_v31  ;;  %v14220_v7 = vld [vmem:[#allocation198_spill] sm:$0xff]  ;;  %v11069_v54 = vpop.f32.mrb[125].mxu1 }
 0x298   : > { %14216 = vst [vmem:[#allocation105_spill] sm:$0xff] %v11045_v13  ;;  %v6772_v30 = vpop.eup %6771  ;;  %6791 = vpow2.f32 %v3639_v48  ;;  %v3325_v49 = vmul.f32 1.442695, %v2904_v58  ;;  %v3645_v14 = vmul.f32 1.442695, %v3064_v9  ;;  %v2905_v50 = vsub.f32 0.0, %v11034_v40 }
 0x299   : > { %14218 = vst [vmem:[#allocation107_spill] sm:$0xff] %v11057_v23  ;;  %v6774_v43 = vpop.eup %6773  ;;  %6793 = vrcp.f32 %v4018_v63  ;;  %v3859_v56 = vadd.f32 1.0, %v6772_v30  ;;  %v3065_v42 = vsub.f32 0.0, %v11045_v13  ;;  %v11066_v15 = vadd.f32 %v14220_v7, %v1155_v3  ;;  %14222 = vst [vmem:[#allocation177_spill] sm:$0xff] %v11069_v54  ;;  %v1160_v63 = vpop.permute.xlu0 %1159  ;;  %v14223_v20 = vld [vmem:[#allocation34_spill] sm:$0xff]  ;;  %v14224_v9 = vld [vmem:[#allocation16_spill] sm:$0xff] }
 0x29a   : > { %v6776_v32 = vpop.eup %6775  ;;  %v4496_v47 = vmul.f32 %v6774_v43, %v10834_v6  ;;  %6795 = vpow2.f32 %v3321_v2  ;;  %4973 = vadd.xlane.f32.xlu0 %v10870_v10  ;;  %v2906_v58 = vsub.f32 0.0, %v11051_v33  ;;  %v11076_v6 = vadd.f32 %v14224_v9, %v14223_v20  ;;  %v14225_v43 = vld [vmem:[#allocation213_spill] sm:$0xff]  ;;  %v14227_v10 = vld [vmem:[#allocation142_spill] sm:$0xff]  ;;  %v14228_v23 = vld [vmem:[#allocation143_spill] sm:$0xff]  ;;  %v11085_v13 = vpop.f32.mrb[126].mxu0 }
 0x29b   : > { %14221 = vst [vmem:[#allocation148_spill] sm:$0xff] %v11066_v15  ;;  %v11071_v48 = vpop.eup %6777  ;;  %6797 = vrcp.f32 %v3859_v56  ;;  %v4019_v30 = vadd.f32 1.0, %v6776_v32  ;;  %v11079_v3 = vadd.f32 %v14225_v43, %v1160_v63  ;;  %v11083_v46 = vadd.f32 %v14228_v23, %v14227_v10  ;;  %v11096_v23 = vpop.f32.mrb[126].mxu1 }
 0x29c   : > { %v6780_v2 = vpop.eup %6779  ;;  %6799 = vpow2.f32 %v3641_v61  ;;  %v4861_v7 = vadd.f32 %v4496_v47, %v4495_v41  ;;  %v11089_v32 = vmul.f32 %v10674_v22, %v10477_v55  ;;  %v3327_v54 = vmul.f32 1.442695, %v2905_v50  ;;  %v14230_v41 = vld [vmem:[#allocation3_spill] sm:$0xff] }
 0x29d   : > { %14226 = vst [vmem:[#allocation152_spill] sm:$0xff] %v11079_v3  ;;  %v6782_v56 = vpop.eup %6781  ;;  %6801 = vrcp.f32 %v4019_v30  ;;  %v3860_v9 = vadd.f32 1.0, %v6780_v2  ;;  %v3647_v61 = vmul.f32 1.442695, %v3065_v42  ;;  %v3066_v43 = vsub.f32 0.0, %v11066_v15  ;;  %v14231_v30 = vld [vmem:[#allocation236_spill] sm:$0xff] }
 0x29e   : > { %14229 = vst [vmem:[#allocation112_spill] sm:$0xff] %v11089_v32  ;;  %v6784_v31 = vpop.eup %6783  ;;  %6803 = vpow2.f32 %v3323_v57  ;;  %v11094_v47 = vadd.f32 %v14230_v41, %v14223_v20  ;;  %4862 = vadd.xlane.f32.xlu1 %v4861_v7  ;;  %v4497_v55 = vmul.f32 %v6782_v56, %v10863_v60  ;;  %v11102_v50 = vadd.f32 %v14231_v30, %v1160_v63  ;;  %v11106_v41 = vpop.f32.mrb[127].mxu0 }
 0x29f   : > { %v11098_v10 = vpop.eup %6785  ;;  %6805 = vrcp.f32 %v3860_v9  ;;  %v4020_v22 = vadd.f32 1.0, %v6784_v31  ;;  %v3329_v42 = vmul.f32 1.442695, %v2906_v58  ;;  %v2907_v2 = vsub.f32 0.0, %v11076_v6  ;;  %v14234_v31 = vld [vmem:[#allocation33_spill] sm:$0xff]  ;;  %v11119_v30 = vpop.f32.mrb[127].mxu1 }
 0x2a0   : > { %14232 = vst [vmem:[#allocation14_spill] sm:$0xff] %v11102_v50  ;;  %v6788_v57 = vpop.eup %6787  ;;  %6807 = vpow2.f32 %v3643_v16  ;;  %v3067_v20 = vsub.f32 0.0, %v11079_v3  ;;  %v11110_v32 = vmul.f32 %v10704_v29, %v10512_v21  ;;  %v11115_v63 = vadd.f32 %v10580_v4, %v14234_v31  ;;  %14235 = vst [vmem:[#allocation110_spill] sm:$0xff] %v11119_v30  ;;  %v1165_v21 = vpop.permute.xlu1 %1164 }
 0x2a1   : > { %v6790_v7 = vpop.eup %6789  ;;  %v4498_v60 = vmul.f32 %v6788_v57, %v10886_v8  ;;  %6809 = vrcp.f32 %v4020_v22  ;;  %v3649_v56 = vmul.f32 1.442695, %v3066_v43  ;;  %v2908_v9 = vsub.f32 0.0, %v11094_v47  ;;  %v11124_v4 = vpop.f32.mrb[128].mxu0 }
 0x2a2   : > { %14233 = vst [vmem:[#allocation26_spill] sm:$0xff] %v11110_v32  ;;  %v6792_v16 = vpop.eup %6791  ;;  %v3861_v58 = vadd.f32 1.0, %v6790_v7  ;;  %6811 = vpow2.f32 %v3325_v49  ;;  %4976 = vadd.xlane.f32.xlu1 %v10915_v36  ;;  %v3068_v8 = vsub.f32 0.0, %v11102_v50  ;;  %v3331_v49 = vmul.f32 1.442695, %v2907_v2  ;;  %v14237_v7 = vld [vmem:[#allocation135_spill] sm:$0xff] }
 0x2a3   : > { %v11121_v3 = vpop.eup %6793  ;;  %v4021_v29 = vadd.f32 1.0, %v6792_v16  ;;  %6813 = vpow2.f32 %v3645_v14  ;;  %v4864_v22 = vadd.f32 %v4498_v60, %v4497_v55  ;;  %v11127_v43 = vadd.f32 %v10595_v28, %v1165_v21  ;;  %v14238_v36 = vld [vmem:[#allocation168_spill] sm:$0xff] }
 0x2a4   : > { %v6796_v57 = vpop.eup %6795  ;;  %6815 = vrcp.f32 %v3861_v58  ;;  %v11131_v32 = vadd.f32 %v14238_v36, %v14237_v7  ;;  %v2909_v14 = vsub.f32 0.0, %v11115_v63  ;;  %v11136_v55 = vadd.f32 %v10612_v45, %v14234_v31  ;;  %v11145_v58 = vpop.f32.mrb[128].mxu1 }
 0x2a5   : > { %14236 = vst [vmem:[#allocation150_spill] sm:$0xff] %v11127_v43  ;;  %v6798_v15 = vpop.eup %6797  ;;  %6817 = vrcp.f32 %v4021_v29  ;;  %v3862_v30 = vadd.f32 1.0, %v6796_v57  ;;  %4865 = vadd.xlane.f32.xlu0 %v4864_v22  ;;  %v11138_v2 = vmul.f32 1.442695, %v3067_v20  ;;  %v11140_v28 = vmul.f32 1.442695, %v2908_v9  ;;  %v1170_v7 = vpop.permute.xlu0 %1169 }
 0x2a6   : > { %v6800_v60 = vpop.eup %6799  ;;  %6819 = vpow2.f32 %v3327_v54  ;;  %v11143_v16 = vadd.f32 %v10622_v0, %v1165_v21  ;;  %14240 = vst [vmem:[#allocation181_spill] sm:$0xff] %v11145_v58  ;;  %v11151_v57 = vmul.f32 %v10723_v51, %v10524_v39  ;;  %v11153_v31 = vmul.f32 1.442695, %v3068_v8  ;;  %v11161_v21 = vpop.f32.mrb[129].mxu0 }
 0x2a7   : > { %v11147_v29 = vpop.eup %6801  ;;  %6821 = vrcp.f32 %v3862_v30  ;;  %v4022_v45 = vadd.f32 1.0, %v6800_v60  ;;  %v11157_v20 = vmul.f32 %v10750_v34, %v10548_v59  ;;  %v4499_v0 = vmul.f32 %v6798_v15, %v10911_v44  ;;  %14243 = vst [vmem:[#allocation163_spill] sm:$0xff] %v11161_v21  ;;  %v14244_v44 = vld [vmem:[#allocation159_spill] sm:$0xff]  ;;  %v14245_v15 = vld [vmem:[#allocation161_spill] sm:$0xff]  ;;  %v11173_v36 = vpop.f32.mrb[129].mxu1 }
 0x2a8   : > { %14239 = vst [vmem:[#allocation127_spill] sm:$0xff] %v11143_v16  ;;  %14241 = vst [vmem:[#allocation137_spill] sm:$0xff] %v11151_v57  ;;  %v6804_v54 = vpop.eup %6803  ;;  %6823 = vpow2.f32 %v3647_v61  ;;  %v3069_v9 = vsub.f32 0.0, %v11127_v43  ;;  %v11163_v51 = vmul.f32 1.442695, %v2909_v14  ;;  %v2910_v30 = vsub.f32 0.0, %v11136_v55 }
 0x2a9   : > { %14242 = vst [vmem:[#allocation128_spill] sm:$0xff] %v11157_v20  ;;  %v6806_v22 = vpop.eup %6805  ;;  %6825 = vrcp.f32 %v4022_v45  ;;  %v3863_v39 = vadd.f32 1.0, %v6804_v54  ;;  %4979 = vadd.xlane.f32.xlu0 %v10960_v1  ;;  %v3070_v34 = vsub.f32 0.0, %v11143_v16  ;;  %v11171_v61 = vadd.f32 %v14245_v15, %v14244_v44  ;;  %14246 = vst [vmem:[#allocation183_spill] sm:$0xff] %v11173_v36  ;;  %v14247_v45 = vld [vmem:[#allocation36_spill] sm:$0xff]  ;;  %v14248_v54 = vld [vmem:[#allocation123_spill] sm:$0xff] }
 0x2aa   : > { %v6808_v8 = vpop.eup %6807  ;;  %v4500_v59 = vmul.f32 %v6806_v22, %v10930_v35  ;;  %6827 = vpow2.f32 %v3329_v42  ;;  %v11179_v1 = vadd.f32 %v14248_v54, %v14247_v45  ;;  %v14249_v20 = vld [vmem:[#allocation223_spill] sm:$0xff]  ;;  %v11184_v42 = vmul.f32 1.442695, %v3069_v9  ;;  %v14251_v22 = vld [vmem:[#allocation225_spill] sm:$0xff]  ;;  %v11190_v16 = vpop.f32.mrb[130].mxu0  ;;  %v14253_v54 = vld [vmem:[#allocation226_spill] sm:$0xff] }
 0x2ab   : > { %v11175_v60 = vpop.eup %6809  ;;  %6829 = vrcp.f32 %v3863_v39  ;;  %v4023_v14 = vadd.f32 1.0, %v6808_v8  ;;  %v11182_v57 = vadd.f32 %v14249_v20, %v1170_v7  ;;  %v11188_v44 = vadd.f32 %v14251_v22, %v14247_v45  ;;  %14252 = vst [vmem:[#allocation166_spill] sm:$0xff] %v11190_v16  ;;  %v14255_v36 = vld [vmem:[#allocation217_spill] sm:$0xff]  ;;  %v14276_v16 = vld [vmem:[#allocation52_spill] sm:$0xff] }
 0x2ac   : > { %v6812_v35 = vpop.eup %6811  ;;  %6831 = vpow2.f32 %v3649_v56  ;;  %v4867_v15 = vadd.f32 %v4500_v59, %v4499_v0  ;;  %v11192_v43 = vmul.f32 1.442695, %v2910_v30  ;;  %v11195_v50 = vadd.f32 %v14253_v54, %v1170_v7  ;;  %v14256_v56 = vld [vmem:[#allocation45_spill] sm:$0xff]  ;;  %v11203_v0 = vpop.f32.mrb[130].mxu1 }
 0x2ad   : > { %14250 = vst [vmem:[#allocation119_spill] sm:$0xff] %v11182_v57  ;;  %v6814_v39 = vpop.eup %6813  ;;  %6833 = vrcp.f32 %v4023_v14  ;;  %v3864_v8 = vadd.f32 1.0, %v6812_v35  ;;  %v11199_v9 = vmul.f32 %v14256_v56, %v14255_v36  ;;  %v11201_v45 = vmul.f32 1.442695, %v3070_v34  ;;  %14258 = vst [vmem:[#allocation188_spill] sm:$0xff] %v11203_v0  ;;  %v14260_v14 = vld [vmem:[#allocation56_spill] sm:$0xff]  ;;  %v1175_v56 = vpop.permute.xlu1 %1174 }
 0x2ae   : > { %14254 = vst [vmem:[#allocation215_spill] sm:$0xff] %v11195_v50  ;;  %v6816_v20 = vpop.eup %6815  ;;  %v4024_v21 = vadd.f32 1.0, %v6814_v39  ;;  %6835 = vpow2.f32 %v3331_v49  ;;  %4868 = vadd.xlane.f32.xlu1 %v4867_v15  ;;  %v11209_v30 = vmul.f32 %v10804_v17, %v14260_v14  ;;  %v2911_v7 = vsub.f32 0.0, %v11179_v1  ;;  %v14262_v34 = vld [vmem:[#allocation35_spill] sm:$0xff]  ;;  %v14263_v15 = vld [vmem:[#allocation44_spill] sm:$0xff]  ;;  %v14265_v14 = vld [vmem:[#allocation173_spill] sm:$0xff] }
 0x2af   : > { %14257 = vst [vmem:[#allocation12_spill] sm:$0xff] %v11199_v9  ;;  %v11205_v59 = vpop.eup %6817  ;;  %6837 = vrcp.f32 %v3864_v8  ;;  %v3071_v35 = vsub.f32 0.0, %v11182_v57  ;;  %v4501_v22 = vmul.f32 %v6816_v20, %v10941_v5  ;;  %v2912_v49 = vsub.f32 0.0, %v11188_v44  ;;  %v14264_v8 = vld [vmem:[#allocation169_spill] sm:$0xff]  ;;  %v11225_v57 = vpop.f32.mrb[131].mxu0  ;;  %v14267_v20 = vld [vmem:[#allocation64_spill] sm:$0xff] }
 0x2b0   : > { %14259 = vst [vmem:[#allocation124_spill] sm:$0xff] %v11205_v59  ;;  %14261 = vst [vmem:[#allocation25_spill] sm:$0xff] %v11209_v30  ;;  %v6820_v36 = vpop.eup %6819  ;;  %6839 = vrcp.f32 %v4024_v21  ;;  %v11217_v39 = vadd.f32 %v14263_v15, %v14262_v34  ;;  %v3072_v17 = vsub.f32 0.0, %v11195_v50  ;;  %v11223_v30 = vadd.f32 %v14265_v14, %v14264_v8 }
 0x2b1   : > { %v6822_v54 = vpop.eup %6821  ;;  %v3865_v9 = vadd.f32 1.0, %v6820_v36  ;;  %6841 = vpow2.f32 %v11138_v2  ;;  %14266 = vst [vmem:[#allocation164_spill] sm:$0xff] %v11225_v57  ;;  %v11230_v15 = vadd.f32 %v14267_v20, %v1175_v56  ;;  %v14269_v36 = vld [vmem:[#allocation232_spill] sm:$0xff]  ;;  %v11237_v2 = vpop.f32.mrb[131].mxu1  ;;  %v3339_v50 = vmul.f32 1.442695, %v2911_v7 }
 0x2b2   : > { %v6824_v5 = vpop.eup %6823  ;;  %v4502_v21 = vmul.f32 %v6822_v54, %v10974_v62  ;;  %6843 = vpow2.f32 %v11140_v28  ;;  %v11234_v0 = vadd.f32 %v14269_v36, %v14262_v34  ;;  %4982 = vadd.xlane.f32.xlu1 %v10996_v24  ;;  %14270 = vst [vmem:[#allocation78_spill] sm:$0xff] %v11237_v2  ;;  %v11241_v57 = vmul.f32 1.442695, %v3071_v35  ;;  %v11247_v20 = vpop.f32.mrb[132].mxu0  ;;  %v14275_v35 = vld [vmem:[#allocation221_spill] sm:$0xff] }
 0x2b3   : > { %14268 = vst [vmem:[#allocation158_spill] sm:$0xff] %v11230_v15  ;;  %v11239_v8 = vpop.eup %6825  ;;  %6845 = vrcp.f32 %v3865_v9  ;;  %v4025_v14 = vadd.f32 1.0, %v6824_v5  ;;  %v11244_v28 = vmul.f32 1.442695, %v2912_v49  ;;  %v2913_v54 = vsub.f32 0.0, %v11217_v39  ;;  %14272 = vst [vmem:[#allocation138_spill] sm:$0xff] %v11247_v20 }
 0x2b4   : > { %14271 = vst [vmem:[#allocation131_spill] sm:$0xff] %v11239_v8  ;;  %v6828_v62 = vpop.eup %6827  ;;  %6847 = vpow2.f32 %v11153_v31  ;;  %v4870_v34 = vadd.f32 %v4502_v21, %v4501_v22  ;;  %v11249_v2 = vmul.f32 1.442695, %v3072_v17  ;;  %v14273_v9 = vld [vmem:[#allocation109_spill] sm:$0xff]  ;;  %v11256_v8 = vmul.f32 %v14276_v16, %v14275_v35  ;;  %v11261_v49 = vpop.f32.mrb[132].mxu1  ;;  %v14282_v16 = vld [vmem:[#allocation200_spill] sm:$0xff] }
 0x2b5   : > { %v6830_v24 = vpop.eup %6829  ;;  %6849 = vrcp.f32 %v4025_v14  ;;  %v3866_v36 = vadd.f32 1.0, %v6828_v62  ;;  %v11252_v5 = vadd.f32 %v14273_v9, %v1175_v56  ;;  %v3073_v31 = vsub.f32 0.0, %v11230_v15  ;;  %14278 = vst [vmem:[#allocation160_spill] sm:$0xff] %v11261_v49  ;;  %v1180_v17 = vpop.permute.xlu0 %1179  ;;  %v14280_v14 = vld [vmem:[#allocation38_spill] sm:$0xff]  ;;  %v14281_v62 = vld [vmem:[#allocation104_spill] sm:$0xff] }
 0x2b6   : > { %v6832_v7 = vpop.eup %6831  ;;  %14277 = vst [vmem:[#allocation193_spill] sm:$0xff] %v11256_v8  ;;  %6851 = vpow2.f32 %v11163_v51  ;;  %v2914_v22 = vsub.f32 0.0, %v11234_v0  ;;  %4871 = vadd.xlane.f32.xlu0 %v4870_v34  ;;  %v11267_v9 = vadd.f32 %v14281_v62, %v14280_v14  ;;  %v14283_v35 = vld [vmem:[#allocation114_spill] sm:$0xff]  ;;  %v4503_v15 = vmul.f32 %v6830_v24, %v10992_v27  ;;  %v14284_v49 = vld [vmem:[#allocation108_spill] sm:$0xff] }
 0x2b7   : > { %14274 = vst [vmem:[#allocation157_spill] sm:$0xff] %v11252_v5  ;;  %v11263_v21 = vpop.eup %6833  ;;  %6853 = vrcp.f32 %v3866_v36  ;;  %v4026_v56 = vadd.f32 1.0, %v6832_v7  ;;  %v11271_v8 = vadd.f32 %v14283_v35, %v14282_v16  ;;  %v11275_v34 = vmul.f32 1.442695, %v2913_v54  ;;  %v11280_v36 = vpop.f32.mrb[133].mxu0  ;;  %v14287_v62 = vld [vmem:[#allocation100_spill] sm:$0xff] }
 0x2b8   : > { %14279 = vst [vmem:[#allocation196_spill] sm:$0xff] %v11263_v21  ;;  %v6836_v51 = vpop.eup %6835  ;;  %6855 = vpow2.f32 %v11184_v42  ;;  %v11278_v20 = vadd.f32 %v14284_v49, %v1180_v17  ;;  %v14286_v21 = vld [vmem:[#allocation212_spill] sm:$0xff]  ;;  %v3074_v35 = vsub.f32 0.0, %v11252_v5  ;;  %v11291_v42 = vmul.f32 1.442695, %v3073_v31  ;;  %v11298_v49 = vpop.f32.mrb[133].mxu1 }
 0x2b9   : > { %v6838_v7 = vpop.eup %6837  ;;  %v11284_v59 = vmul.f32 %v14287_v62, %v14286_v21  ;;  %6857 = vrcp.f32 %v4026_v56  ;;  %v3867_v16 = vadd.f32 1.0, %v6836_v51  ;;  %v14289_v54 = vld [vmem:[#allocation20_spill] sm:$0xff]  ;;  %14290 = vst [vmem:[#allocation28_spill] sm:$0xff] %v11298_v49  ;;  %v11300_v56 = vmul.f32 1.442695, %v2914_v22  ;;  %v11314_v5 = vpop.f32.mrb[134].mxu0 }
 0x2ba   : > { %14285 = vst [vmem:[#allocation199_spill] sm:$0xff] %v11278_v20  ;;  %v11287_v58 = vpop.eup %6839  ;;  %v4504_v27 = vmul.f32 %v6838_v7, %v11013_v37  ;;  %6859 = vpow2.f32 %v11192_v43  ;;  %v11295_v24 = vadd.f32 %v14289_v54, %v14280_v14  ;;  %4985 = vadd.xlane.f32.xlu0 %v11038_v18  ;;  %v2915_v51 = vsub.f32 0.0, %v11267_v9  ;;  %v14291_v62 = vld [vmem:[#allocation76_spill] sm:$0xff]  ;;  %14295 = vst [vmem:[#allocation96_spill] sm:$0xff] %v11314_v5 }
 0x2bb   : > { %14288 = vst [vmem:[#allocation192_spill] sm:$0xff] %v11284_v59  ;;  %v6842_v21 = vpop.eup %6841  ;;  %6861 = vrcp.f32 %v3867_v16  ;;  %v11304_v37 = vadd.f32 %v14291_v62, %v1180_v17  ;;  %v3075_v14 = vsub.f32 0.0, %v11278_v20  ;;  %v14293_v18 = vld [vmem:[#allocation140_spill] sm:$0xff]  ;;  %v11312_v22 = vmul.f32 1.442695, %v3074_v35  ;;  %v1185_v62 = vpop.permute.xlu1 %1184 }
 0x2bc   : > { %v6844_v43 = vpop.eup %6843  ;;  %v4027_v31 = vadd.f32 1.0, %v6842_v21  ;;  %6863 = vpow2.f32 %v11201_v45  ;;  %v4873_v7 = vadd.f32 %v4504_v27, %v4503_v15  ;;  %v11310_v59 = vmul.f32 %v10877_v12, %v14293_v18  ;;  %v14296_v45 = vld [vmem:[#allocation37_spill] sm:$0xff]  ;;  %v14297_v49 = vld [vmem:[#allocation8_spill] sm:$0xff]  ;;  %v14298_v15 = vld [vmem:[#allocation170_spill] sm:$0xff] }
 0x2bd   : > { %14292 = vst [vmem:[#allocation147_spill] sm:$0xff] %v11304_v37  ;;  %v6846_v54 = vpop.eup %6845  ;;  %v3868_v16 = vadd.f32 1.0, %v6844_v43  ;;  %6865 = vpow2.f32 %v3339_v50  ;;  %v2916_v21 = vsub.f32 0.0, %v11295_v24  ;;  %v11319_v20 = vadd.f32 %v14297_v49, %v14296_v45  ;;  %v14299_v27 = vld [vmem:[#allocation172_spill] sm:$0xff]  ;;  %v11325_v43 = vpop.f32.mrb[134].mxu1 }
 0x2be   : > { %14294 = vst [vmem:[#allocation139_spill] sm:$0xff] %v11310_v59  ;;  %v6848_v17 = vpop.eup %6847  ;;  %6867 = vrcp.f32 %v4027_v31  ;;  %4874 = vadd.xlane.f32.xlu1 %v4873_v7  ;;  %v11323_v12 = vadd.f32 %v14299_v27, %v14298_v15  ;;  %14300 = vst [vmem:[#allocation151_spill] sm:$0xff] %v11325_v43  ;;  %v11329_v18 = vmul.f32 1.442695, %v2915_v51  ;;  %v14302_v31 = vld [vmem:[#allocation86_spill] sm:$0xff]  ;;  %v4505_v49 = vmul.f32 %v6846_v54, %v11034_v40  ;;  %v11339_v27 = vpop.f32.mrb[135].mxu0 }
 0x2bf   : > { %v11327_v50 = vpop.eup %6849  ;;  %6869 = vrcp.f32 %v3868_v16  ;;  %v4028_v35 = vadd.f32 1.0, %v6848_v17  ;;  %v11332_v59 = vadd.f32 %v14302_v31, %v1185_v62  ;;  %v11336_v7 = vmul.f32 1.442695, %v3075_v14  ;;  %14304 = vst [vmem:[#allocation203_spill] sm:$0xff] %v11339_v27  ;;  %v14307_v17 = vld [vmem:[#allocation90_spill] sm:$0xff] }
 0x2c0   : > { %14301 = vst [vmem:[#allocation67_spill] sm:$0xff] %v11327_v50  ;;  %v6852_v5 = vpop.eup %6851  ;;  %6871 = vpow2.f32 %v11241_v57  ;;  %v3076_v15 = vsub.f32 0.0, %v11304_v37  ;;  %v14305_v50 = vld [vmem:[#allocation228_spill] sm:$0xff]  ;;  %v11347_v31 = vadd.f32 %v14307_v17, %v14296_v45  ;;  %v11351_v14 = vmul.f32 1.442695, %v2916_v21  ;;  %v11355_v37 = vpop.f32.mrb[135].mxu1 }
 0x2c1   : > { %14303 = vst [vmem:[#allocation171_spill] sm:$0xff] %v11332_v59  ;;  %v6854_v43 = vpop.eup %6853  ;;  %v11343_v16 = vmul.f32 %v10901_v11, %v14305_v50  ;;  %6873 = vrcp.f32 %v4028_v35  ;;  %v3869_v51 = vadd.f32 1.0, %v6852_v5  ;;  %v2917_v54 = vsub.f32 0.0, %v11319_v20  ;;  %14308 = vst [vmem:[#allocation182_spill] sm:$0xff] %v11355_v37  ;;  %v14310_v50 = vld [vmem:[#allocation115_spill] sm:$0xff]  ;;  %v14315_v37 = vld [vmem:[#allocation118_spill] sm:$0xff] }
 0x2c2   : > { %v6856_v40 = vpop.eup %6855  ;;  %v4506_v57 = vmul.f32 %v6854_v43, %v11051_v33  ;;  %6875 = vpow2.f32 %v11244_v28  ;;  %4988 = vadd.xlane.f32.xlu1 %v11083_v46  ;;  %v3077_v45 = vsub.f32 0.0, %v11332_v59  ;;  %v11361_v35 = vadd.f32 %v14310_v50, %v1185_v62  ;;  %v14312_v43 = vld [vmem:[#allocation17_spill] sm:$0xff]  ;;  %v14314_v59 = vld [vmem:[#allocation40_spill] sm:$0xff]  ;;  %v11375_v50 = vpop.f32.mrb[136].mxu0 }
 0x2c3   : > { %14306 = vst [vmem:[#allocation2_spill] sm:$0xff] %v11343_v16  ;;  %v11357_v11 = vpop.eup %6857  ;;  %6877 = vrcp.f32 %v3869_v51  ;;  %v4029_v5 = vadd.f32 1.0, %v6856_v40  ;;  %v11365_v28 = vmul.f32 %v10926_v19, %v14312_v43  ;;  %v11368_v21 = vmul.f32 1.442695, %v3076_v15  ;;  %v1190_v16 = vpop.permute.xlu0 %1189  ;;  %14316 = vst [vmem:[#allocation101_spill] sm:$0xff] %v11375_v50 }
 0x2c4   : > { %14309 = vst [vmem:[#allocation27_spill] sm:$0xff] %v11357_v11  ;;  %14311 = vst [vmem:[#allocation162_spill] sm:$0xff] %v11361_v35  ;;  %v6860_v33 = vpop.eup %6859  ;;  %6879 = vpow2.f32 %v11249_v2  ;;  %v4876_v46 = vadd.f32 %v4506_v57, %v4505_v49  ;;  %v2918_v40 = vsub.f32 0.0, %v11347_v31  ;;  %v11373_v62 = vadd.f32 %v14315_v37, %v14314_v59  ;;  %v14317_v2 = vld [vmem:[#allocation57_spill] sm:$0xff]  ;;  %v14319_v49 = vld [vmem:[#allocation180_spill] sm:$0xff] }
 0x2c5   : > { %14313 = vst [vmem:[#allocation136_spill] sm:$0xff] %v11365_v28  ;;  %v6862_v17 = vpop.eup %6861  ;;  %6881 = vrcp.f32 %v4029_v5  ;;  %v3870_v51 = vadd.f32 1.0, %v6860_v33  ;;  %v11378_v19 = vmul.f32 1.442695, %v2917_v54  ;;  %v11381_v15 = vadd.f32 %v14317_v2, %v1190_v16  ;;  %v14320_v57 = vld [vmem:[#allocation179_spill] sm:$0xff]  ;;  %v11387_v33 = vpop.f32.mrb[136].mxu1 }
 0x2c6   : > { %v6864_v27 = vpop.eup %6863  ;;  %6883 = vpow2.f32 %v11275_v34  ;;  %4877 = vadd.xlane.f32.xlu0 %v4876_v46  ;;  %v11385_v5 = vadd.f32 %v14320_v57, %v14319_v49  ;;  %14321 = vst [vmem:[#allocation186_spill] sm:$0xff] %v11387_v33  ;;  %v11389_v28 = vmul.f32 1.442695, %v3077_v45  ;;  %v3078_v50 = vsub.f32 0.0, %v11361_v35  ;;  %v14323_v46 = vld [vmem:[#allocation61_spill] sm:$0xff]  ;;  %v11400_v57 = vpop.f32.mrb[137].mxu0 }
 0x2c7   : > { %14318 = vst [vmem:[#allocation197_spill] sm:$0xff] %v11381_v15  ;;  %v6866_v43 = vpop.eup %6865  ;;  %6885 = vrcp.f32 %v3870_v51  ;;  %v4030_v37 = vadd.f32 1.0, %v6864_v27  ;;  %v4507_v54 = vmul.f32 %v6862_v17, %v11076_v6  ;;  %v11398_v49 = vadd.f32 %v14323_v46, %v14314_v59  ;;  %14324 = vst [vmem:[#allocation218_spill] sm:$0xff] %v11400_v57  ;;  %v14325_v51 = vld [vmem:[#allocation233_spill] sm:$0xff] }
 0x2c8   : > { %v11392_v34 = vpop.eup %6867  ;;  %v3871_v2 = vadd.f32 1.0, %v6866_v43  ;;  %6887 = vpow2.f32 %v11291_v42  ;;  %v11404_v27 = vmul.f32 %v10943_v52, %v14325_v51  ;;  %v11406_v45 = vmul.f32 1.442695, %v2918_v40  ;;  %v14327_v59 = vld [vmem:[#allocation21_spill] sm:$0xff]  ;;  %v1195_v52 = vpop.permute.xlu1 %1194 }
 0x2c9   : > { %14322 = vst [vmem:[#allocation174_spill] sm:$0xff] %v11392_v34  ;;  %v6870_v33 = vpop.eup %6869  ;;  %6889 = vrcp.f32 %v4030_v37  ;;  %v2919_v35 = vsub.f32 0.0, %v11373_v62  ;;  %v3079_v42 = vsub.f32 0.0, %v11381_v15  ;;  %v11412_v43 = vadd.f32 %v14327_v59, %v1190_v16  ;;  %v14330_v37 = vld [vmem:[#allocation39_spill] sm:$0xff]  ;;  %v11437_v34 = vpop.f32.mrb[138].mxu0 }
 0x2ca   : > { %14326 = vst [vmem:[#allocation176_spill] sm:$0xff] %v11404_v27  ;;  %v6872_v6 = vpop.eup %6871  ;;  %v4508_v17 = vmul.f32 %v6870_v33, %v11094_v47  ;;  %6891 = vrcp.f32 %v3871_v2  ;;  %4991 = vadd.xlane.f32.xlu0 %v11131_v32  ;;  %v11418_v40 = vmul.f32 1.442695, %v3078_v50  ;;  %v14331_v27 = vld [vmem:[#allocation53_spill] sm:$0xff]  ;;  %v11424_v47 = vpop.f32.mrb[137].mxu1  ;;  %v2920_v16 = vsub.f32 0.0, %v11398_v49 }
 0x2cb   : > { %14328 = vst [vmem:[#allocation190_spill] sm:$0xff] %v11412_v43  ;;  %v11415_v46 = vpop.eup %6873  ;;  %v4031_v51 = vadd.f32 1.0, %v6872_v6  ;;  %6893 = vpow2.f32 %v11300_v56  ;;  %v11422_v57 = vadd.f32 %v14331_v27, %v14330_v37  ;;  %14332 = vst [vmem:[#allocation202_spill] sm:$0xff] %v11424_v47  ;;  %v14333_v32 = vld [vmem:[#allocation77_spill] sm:$0xff]  ;;  %v14335_v15 = vld [vmem:[#allocation235_spill] sm:$0xff] }
 0x2cc   : > { %14329 = vst [vmem:[#allocation30_spill] sm:$0xff] %v11415_v46  ;;  %v6876_v33 = vpop.eup %6875  ;;  %6895 = vpow2.f32 %v11312_v22  ;;  %v11429_v2 = vadd.f32 %v14333_v32, %v1195_v52  ;;  %v4879_v59 = vadd.f32 %v4508_v17, %v4507_v54  ;;  %v14336_v56 = vld [vmem:[#allocation154_spill] sm:$0xff]  ;;  %v11435_v27 = vmul.f32 1.442695, %v2919_v35  ;;  %14338 = vst [vmem:[#allocation175_spill] sm:$0xff] %v11437_v34  ;;  %v14340_v17 = vld [vmem:[#allocation208_spill] sm:$0xff] }
 0x2cd   : > { %v6878_v6 = vpop.eup %6877  ;;  %v11433_v50 = vmul.f32 %v14336_v56, %v14335_v15  ;;  %6897 = vrcp.f32 %v4031_v51  ;;  %v3872_v46 = vadd.f32 1.0, %v6876_v33  ;;  %v11440_v22 = vmul.f32 1.442695, %v3079_v42  ;;  %v14339_v54 = vld [vmem:[#allocation178_spill] sm:$0xff]  ;;  %v11447_v15 = vpop.f32.mrb[138].mxu1  ;;  %v14343_v56 = vld [vmem:[#allocation60_spill] sm:$0xff] }
 0x2ce   : > { %14334 = vst [vmem:[#allocation155_spill] sm:$0xff] %v11429_v2  ;;  %v6880_v47 = vpop.eup %6879  ;;  %6899 = vpow2.f32 %v11329_v18  ;;  %v3080_v32 = vsub.f32 0.0, %v11412_v43  ;;  %4880 = vadd.xlane.f32.xlu1 %v4879_v59  ;;  %v11445_v11 = vadd.f32 %v14340_v17, %v14339_v54  ;;  %14341 = vst [vmem:[#allocation205_spill] sm:$0xff] %v11447_v15  ;;  %v2921_v33 = vsub.f32 0.0, %v11422_v57  ;;  %v14344_v54 = vld [vmem:[#allocation132_spill] sm:$0xff]  ;;  %v11462_v43 = vpop.f32.mrb[139].mxu0 }
 0x2cf   : > { %14337 = vst [vmem:[#allocation153_spill] sm:$0xff] %v11433_v50  ;;  %v11449_v51 = vpop.eup %6881  ;;  %6901 = vrcp.f32 %v3872_v46  ;;  %v4032_v35 = vadd.f32 1.0, %v6880_v47  ;;  %v11454_v18 = vadd.f32 %v14343_v56, %v14330_v37  ;;  %v4509_v50 = vmul.f32 %v6878_v6, %v11115_v63  ;;  %14346 = vst [vmem:[#allocation209_spill] sm:$0xff] %v11462_v43  ;;  %v14347_v34 = vld [vmem:[#allocation43_spill] sm:$0xff]  ;;  %v14348_v37 = vld [vmem:[#allocation89_spill] sm:$0xff] }
 0x2d0   : > { %14342 = vst [vmem:[#allocation207_spill] sm:$0xff] %v11449_v51  ;;  %v6884_v42 = vpop.eup %6883  ;;  %6903 = vpow2.f32 %v11336_v7  ;;  %v3081_v59 = vsub.f32 0.0, %v11429_v2  ;;  %v11460_v17 = vadd.f32 %v14344_v54, %v1195_v52  ;;  %v11464_v15 = vmul.f32 1.442695, %v2920_v16  ;;  %v14349_v63 = vld [vmem:[#allocation83_spill] sm:$0xff]  ;;  %v11498_v2 = vpop.f32.mrb[140].mxu0 }
 0x2d1   : > { %v6886_v46 = vpop.eup %6885  ;;  %6905 = vrcp.f32 %v4032_v35  ;;  %v3873_v47 = vadd.f32 1.0, %v6884_v42  ;;  %v11468_v56 = vadd.f32 %v14348_v37, %v14347_v34  ;;  %v11472_v7 = vmul.f32 %v11000_v53, %v14349_v63  ;;  %v11479_v35 = vpop.f32.mrb[139].mxu1  ;;  %14355 = vst [vmem:[#allocation116_spill] sm:$0xff] %v11498_v2 }
 0x2d2   : > { %14345 = vst [vmem:[#allocation29_spill] sm:$0xff] %v11460_v17  ;;  %v6888_v51 = vpop.eup %6887  ;;  %v4510_v6 = vmul.f32 %v6886_v46, %v11136_v55  ;;  %6907 = vpow2.f32 %v11351_v14  ;;  %v11476_v52 = vmul.f32 1.442695, %v3080_v32  ;;  %4994 = vadd.xlane.f32.xlu1 %v11171_v61  ;;  %14351 = vst [vmem:[#allocation195_spill] sm:$0xff] %v11479_v35  ;;  %v11483_v54 = vmul.f32 1.442695, %v2921_v33  ;;  %v1200_v63 = vpop.permute.xlu0 %1199 }
 0x2d3   : > { %14350 = vst [vmem:[#allocation191_spill] sm:$0xff] %v11472_v7  ;;  %v11481_v16 = vpop.eup %6889  ;;  %6909 = vrcp.f32 %v3873_v47  ;;  %v4033_v42 = vadd.f32 1.0, %v6888_v51  ;;  %v2922_v37 = vsub.f32 0.0, %v11454_v18  ;;  %v11487_v55 = vmul.f32 1.442695, %v3081_v59  ;;  %v14352_v7 = vld [vmem:[#allocation133_spill] sm:$0xff] }
 0x2d4   : > { %v6892_v53 = vpop.eup %6891  ;;  %6911 = vpow2.f32 %v11368_v21  ;;  %v3082_v14 = vsub.f32 0.0, %v11460_v17  ;;  %v4882_v32 = vadd.f32 %v4510_v6, %v4509_v50  ;;  %v2923_v46 = vsub.f32 0.0, %v11468_v56  ;;  %v14354_v51 = vld [vmem:[#allocation80_spill] sm:$0xff]  ;;  %v14356_v59 = vld [vmem:[#allocation87_spill] sm:$0xff] }
 0x2d5   : > { %v6894_v61 = vpop.eup %6893  ;;  %6913 = vrcp.f32 %v4033_v42  ;;  %v11492_v47 = vadd.f32 %v14352_v7, %v1200_v63  ;;  %v11496_v33 = vadd.f32 %v14354_v51, %v14347_v34  ;;  %v11502_v17 = vadd.f32 %v14356_v59, %v1200_v63  ;;  %v14358_v50 = vld [vmem:[#allocation187_spill] sm:$0xff]  ;;  %v14359_v6 = vld [vmem:[#allocation4_spill] sm:$0xff]  ;;  %v11508_v7 = vpop.f32.mrb[140].mxu1  ;;  %v14361_v34 = vld [vmem:[#allocation85_spill] sm:$0xff] }
 0x2d6   : > { %v6896_v35 = vpop.eup %6895  ;;  %v3874_v21 = vadd.f32 1.0, %v6894_v61  ;;  %6915 = vpow2.f32 %v11378_v19  ;;  %4883 = vadd.xlane.f32.xlu0 %v4882_v32  ;;  %v11506_v42 = vadd.f32 %v14359_v6, %v14358_v50  ;;  %14360 = vst [vmem:[#allocation185_spill] sm:$0xff] %v11508_v7  ;;  %v11514_v51 = vmul.f32 %v11026_v26, %v14361_v34  ;;  %v11519_v63 = vpop.f32.mrb[141].mxu0  ;;  %v14364_v61 = vld [vmem:[#allocation92_spill] sm:$0xff] }
 0x2d7   : > { %14353 = vst [vmem:[#allocation149_spill] sm:$0xff] %v11492_v47  ;;  %14357 = vst [vmem:[#allocation117_spill] sm:$0xff] %v11502_v17  ;;  %v11510_v43 = vpop.eup %6897  ;;  %v4034_v2 = vadd.f32 1.0, %v6896_v35  ;;  %6917 = vpow2.f32 %v11389_v28  ;;  %v11517_v19 = vmul.f32 1.442695, %v2922_v37  ;;  %v11523_v59 = vmul.f32 %v11047_v25, %v14364_v61  ;;  %v1205_v34 = vpop.permute.xlu1 %1204 }
 0x2d8   : > { %14362 = vst [vmem:[#allocation210_spill] sm:$0xff] %v11514_v51  ;;  %14363 = vst [vmem:[#allocation234_spill] sm:$0xff] %v11519_v63  ;;  %v6900_v32 = vpop.eup %6899  ;;  %v4511_v50 = vmul.f32 %v6892_v53, %v11179_v1  ;;  %6919 = vrcp.f32 %v3874_v21  ;;  %v11526_v6 = vmul.f32 1.442695, %v3082_v14  ;;  %v3083_v35 = vsub.f32 0.0, %v11492_v47  ;;  %v11536_v53 = vpop.f32.mrb[141].mxu1 }
 0x2d9   : > { %14365 = vst [vmem:[#allocation32_spill] sm:$0xff] %v11523_v59  ;;  %v6902_v7 = vpop.eup %6901  ;;  %6921 = vrcp.f32 %v4034_v2  ;;  %v3875_v26 = vadd.f32 1.0, %v6900_v32  ;;  %v2924_v28 = vsub.f32 0.0, %v11496_v33  ;;  %v11532_v25 = vmul.f32 1.442695, %v2923_v46  ;;  %14366 = vst [vmem:[#allocation184_spill] sm:$0xff] %v11536_v53 }
 0x2da   : > { %v6904_v37 = vpop.eup %6903  ;;  %v4512_v51 = vmul.f32 %v6902_v7, %v11188_v44  ;;  %6923 = vpow2.f32 %v11406_v45  ;;  %v3084_v1 = vsub.f32 0.0, %v11502_v17  ;;  %4997 = vadd.xlane.f32.xlu0 %v11223_v30  ;;  %v14368_v21 = vld [vmem:[#allocation42_spill] sm:$0xff]  ;;  %v14372_v46 = vld [vmem:[#allocation23_spill] sm:$0xff]  ;;  %v11555_v53 = vmul.f32 1.442695, %v3083_v35  ;;  %v11572_v35 = vpop.f32.mrb[142].mxu1 }
 0x2db   : > { %v11538_v2 = vpop.eup %6905  ;;  %6925 = vrcp.f32 %v3875_v26  ;;  %v4035_v14 = vadd.f32 1.0, %v6904_v37  ;;  %v14369_v32 = vld [vmem:[#allocation194_spill] sm:$0xff]  ;;  %v11550_v7 = vadd.f32 %v14372_v46, %v14368_v21  ;;  %v14373_v30 = vld [vmem:[#allocation99_spill] sm:$0xff]  ;;  %14379 = vst [vmem:[#allocation189_spill] sm:$0xff] %v11572_v35  ;;  %v14380_v46 = vld [vmem:[#allocation48_spill] sm:$0xff] }
 0x2dc   : > { %14367 = vst [vmem:[#allocation122_spill] sm:$0xff] %v11538_v2  ;;  %v11542_v61 = vadd.f32 %v14369_v32, %v14368_v21  ;;  %v14370_v59 = vld [vmem:[#allocation98_spill] sm:$0xff]  ;;  %v6908_v45 = vpop.eup %6907  ;;  %6927 = vpow2.f32 %v11418_v40  ;;  %v11553_v17 = vadd.f32 %v14373_v30, %v1205_v34  ;;  %v4885_v47 = vadd.f32 %v4512_v51, %v4511_v50  ;;  %v14377_v51 = vld [vmem:[#allocation211_spill] sm:$0xff]  ;;  %v14378_v50 = vld [vmem:[#allocation224_spill] sm:$0xff] }
 0x2dd   : > { %v11545_v44 = vadd.f32 %v14370_v59, %v1205_v34  ;;  %v6910_v26 = vpop.eup %6909  ;;  %6929 = vrcp.f32 %v4035_v14  ;;  %v3876_v37 = vadd.f32 1.0, %v6908_v45  ;;  %v11557_v32 = vmul.f32 1.442695, %v2924_v28  ;;  %v11559_v59 = vpop.f32.mrb[142].mxu0  ;;  %v14375_v2 = vld [vmem:[#allocation126_spill] sm:$0xff] }
 0x2de   : > { %14374 = vst [vmem:[#allocation13_spill] sm:$0xff] %v11553_v17  ;;  %v6912_v63 = vpop.eup %6911  ;;  %v11563_v40 = vmul.f32 %v11071_v48, %v14375_v2  ;;  %6931 = vpow2.f32 %v11435_v27  ;;  %v11566_v21 = vmul.f32 1.442695, %v3084_v1  ;;  %4886 = vadd.xlane.f32.xlu1 %v4885_v47  ;;  %v11570_v34 = vadd.f32 %v14378_v50, %v14377_v51  ;;  %v11585_v30 = vpop.f32.mrb[143].mxu0 }
 0x2df   : > { %14371 = vst [vmem:[#allocation9_spill] sm:$0xff] %v11545_v44  ;;  %v11574_v28 = vpop.eup %6913  ;;  %6933 = vrcp.f32 %v3876_v37  ;;  %v4036_v14 = vadd.f32 1.0, %v6912_v63  ;;  %v2925_v45 = vsub.f32 0.0, %v11542_v61  ;;  %v3085_v48 = vsub.f32 0.0, %v11545_v44  ;;  %v1210_v37 = vpop.permute.xlu0 %1209  ;;  %v14383_v44 = vld [vmem:[#allocation165_spill] sm:$0xff] }
 0x2e0   : > { %14376 = vst [vmem:[#allocation219_spill] sm:$0xff] %v11563_v40  ;;  %v6916_v2 = vpop.eup %6915  ;;  %v11580_v27 = vmul.f32 %v11098_v10, %v14380_v46  ;;  %6935 = vpow2.f32 %v11440_v22  ;;  %v2926_v47 = vsub.f32 0.0, %v11550_v7  ;;  %v3086_v1 = vsub.f32 0.0, %v11553_v17  ;;  %v14382_v40 = vld [vmem:[#allocation47_spill] sm:$0xff] }
 0x2e1   : > { %v6918_v51 = vpop.eup %6917  ;;  %v4513_v63 = vmul.f32 %v6910_v26, %v11217_v39  ;;  %6937 = vrcp.f32 %v4036_v14  ;;  %v3877_v50 = vadd.f32 1.0, %v6916_v2  ;;  %v11590_v35 = vadd.f32 %v14383_v44, %v14382_v40  ;;  %v11601_v39 = vpop.f32.mrb[143].mxu1 }
 0x2e2   : > { %14381 = vst [vmem:[#allocation31_spill] sm:$0xff] %v11580_v27  ;;  %v6920_v10 = vpop.eup %6919  ;;  %v4037_v46 = vadd.f32 1.0, %v6918_v51  ;;  %6939 = vpow2.f32 %v11464_v15  ;;  %v11594_v22 = vadd.f32 %v11053_v38, %v1210_v37  ;;  %v14385_v27 = vld [vmem:[#allocation134_spill] sm:$0xff]  ;;  %5000 = vadd.xlane.f32.xlu1 %v11271_v8  ;;  %14386 = vst [vmem:[#allocation156_spill] sm:$0xff] %v11601_v39  ;;  %v11606_v14 = vmul.f32 1.442695, %v2925_v45 }
 0x2e3   : > { %v11598_v17 = vadd.f32 %v14385_v27, %v14382_v40  ;;  %v11603_v26 = vpop.eup %6921  ;;  %v4514_v44 = vmul.f32 %v6920_v10, %v11234_v0  ;;  %6941 = vrcp.f32 %v3877_v50  ;;  %v11608_v2 = vmul.f32 1.442695, %v3085_v48  ;;  %v14387_v40 = vld [vmem:[#allocation177_spill] sm:$0xff] }
 0x2e4   : > { %14384 = vst [vmem:[#allocation84_spill] sm:$0xff] %v11594_v22  ;;  %v6924_v15 = vpop.eup %6923  ;;  %6943 = vrcp.f32 %v4037_v46  ;;  %v11610_v38 = vmul.f32 1.442695, %v2926_v47  ;;  %v11612_v51 = vmul.f32 1.442695, %v3086_v1  ;;  %v11615_v27 = vadd.f32 %v14387_v40, %v1210_v37  ;;  %v14389_v10 = vld [vmem:[#allocation49_spill] sm:$0xff] }
 0x2e5   : > { %v6926_v8 = vpop.eup %6925  ;;  %v3878_v39 = vadd.f32 1.0, %v6924_v15  ;;  %6945 = vpow2.f32 %v11476_v52  ;;  %v2927_v0 = vsub.f32 0.0, %v11590_v35  ;;  %v4888_v50 = vadd.f32 %v4514_v44, %v4513_v63  ;;  %v11626_v37 = vpop.f32.mrb[144].mxu0  ;;  %v14394_v63 = vld [vmem:[#allocation46_spill] sm:$0xff]  ;;  %v14396_v40 = vld [vmem:[#allocation201_spill] sm:$0xff] }
 0x2e6   : > { %14388 = vst [vmem:[#allocation129_spill] sm:$0xff] %v11615_v27  ;;  %v6928_v45 = vpop.eup %6927  ;;  %v11621_v48 = vmul.f32 %v11121_v3, %v14389_v10  ;;  %6947 = vpow2.f32 %v11483_v54  ;;  %v3087_v47 = vsub.f32 0.0, %v11594_v22  ;;  %v2928_v1 = vsub.f32 0.0, %v11598_v17  ;;  %14391 = vst [vmem:[#allocation230_spill] sm:$0xff] %v11626_v37  ;;  %v11628_v46 = vpop.f32.mrb[144].mxu1  ;;  %v14395_v3 = vld [vmem:[#allocation216_spill] sm:$0xff] }
 0x2e7   : > { %14392 = vst [vmem:[#allocation198_spill] sm:$0xff] %v11628_v46  ;;  %v11630_v15 = vpop.eup %6929  ;;  %6949 = vrcp.f32 %v3878_v39  ;;  %v4038_v52 = vadd.f32 1.0, %v6928_v45  ;;  %v11634_v44 = vadd.f32 %v11085_v13, %v14394_v63  ;;  %4889 = vadd.xlane.f32.xlu0 %v4888_v50  ;;  %v11638_v54 = vadd.f32 %v14396_v40, %v14395_v3  ;;  %v14397_v22 = vld [vmem:[#allocation68_spill] sm:$0xff]  ;;  %v11647_v45 = vpop.f32.mrb[145].mxu0 }
 0x2e8   : > { %14390 = vst [vmem:[#allocation227_spill] sm:$0xff] %v11621_v48  ;;  %14393 = vst [vmem:[#allocation34_spill] sm:$0xff] %v11630_v15  ;;  %v6932_v10 = vpop.eup %6931  ;;  %v1215_v48 = vpop.permute.xlu1 %1214  ;;  %v11642_v37 = vmul.f32 %v11147_v29, %v14397_v22  ;;  %v4515_v46 = vmul.f32 %v6926_v8, %v11267_v9  ;;  %6951 = vpow2.f32 %v11487_v55  ;;  %v3088_v39 = vsub.f32 0.0, %v11615_v27 }
 0x2e9   : > { %v6934_v13 = vpop.eup %6933  ;;  %6953 = vrcp.f32 %v4038_v52  ;;  %v3879_v50 = vadd.f32 1.0, %v6932_v10  ;;  %v11649_v15 = vmul.f32 1.442695, %v2927_v0  ;;  %v11652_v3 = vadd.f32 %v11096_v23, %v1215_v48  ;;  %v11662_v22 = vpop.f32.mrb[145].mxu1  ;;  %v14400_v52 = vld [vmem:[#allocation110_spill] sm:$0xff] }
 0x2ea   : > { %14398 = vst [vmem:[#allocation16_spill] sm:$0xff] %v11642_v37  ;;  %v6936_v40 = vpop.eup %6935  ;;  %v4516_v29 = vmul.f32 %v6934_v13, %v11295_v24  ;;  %6955 = vpow2.f32 %v11517_v19  ;;  %v11656_v9 = vmul.f32 1.442695, %v3087_v47  ;;  %v11660_v55 = vadd.f32 %v11106_v41, %v14394_v63  ;;  %v14402_v13 = vld [vmem:[#allocation24_spill] sm:$0xff]  ;;  %v1220_v37 = vpop.permute.xlu0 %1219 }
 0x2eb   : > { %14399 = vst [vmem:[#allocation213_spill] sm:$0xff] %v11652_v3  ;;  %v11664_v8 = vpop.eup %6937  ;;  %6957 = vrcp.f32 %v3879_v50  ;;  %v4039_v0 = vadd.f32 1.0, %v6936_v40  ;;  %v2929_v23 = vsub.f32 0.0, %v11634_v44  ;;  %v11668_v10 = vadd.f32 %v14400_v52, %v1215_v48  ;;  %5003 = vadd.xlane.f32.xlu0 %v11323_v12  ;;  %v11681_v52 = vpop.f32.mrb[146].mxu0 }
 0x2ec   : > { %v6940_v24 = vpop.eup %6939  ;;  %6959 = vpow2.f32 %v11526_v6  ;;  %v11672_v19 = vmul.f32 1.442695, %v2928_v1  ;;  %v11674_v41 = vmul.f32 1.442695, %v3088_v39  ;;  %v4891_v47 = vadd.f32 %v4516_v29, %v4515_v46  ;;  %14404 = vst [vmem:[#allocation3_spill] sm:$0xff] %v11681_v52  ;;  %v14406_v1 = vld [vmem:[#allocation51_spill] sm:$0xff] }
 0x2ed   : > { %14401 = vst [vmem:[#allocation142_spill] sm:$0xff] %v11668_v10  ;;  %v6942_v63 = vpop.eup %6941  ;;  %v11678_v50 = vmul.f32 %v11175_v60, %v14402_v13  ;;  %6961 = vrcp.f32 %v4039_v0  ;;  %v3880_v40 = vadd.f32 1.0, %v6940_v24  ;;  %v3089_v48 = vsub.f32 0.0, %v11652_v3  ;;  %v14407_v60 = vld [vmem:[#allocation214_spill] sm:$0xff]  ;;  %v14408_v39 = vld [vmem:[#allocation79_spill] sm:$0xff]  ;;  %v11695_v0 = vpop.f32.mrb[146].mxu1 }
 0x2ee   : > { %v11683_v12 = vpop.eup %6943  ;;  %6963 = vpow2.f32 %v11532_v25  ;;  %v2930_v6 = vsub.f32 0.0, %v11660_v55  ;;  %v11689_v46 = vadd.f32 %v11124_v4, %v14406_v1  ;;  %4892 = vadd.xlane.f32.xlu1 %v4891_v47  ;;  %v11693_v29 = vadd.f32 %v14408_v39, %v14407_v60  ;;  %14409 = vst [vmem:[#allocation33_spill] sm:$0xff] %v11695_v0  ;;  %v14410_v25 = vld [vmem:[#allocation181_spill] sm:$0xff]  ;;  %v14412_v47 = vld [vmem:[#allocation163_spill] sm:$0xff]  ;;  %v11709_v39 = vpop.f32.mrb[147].mxu0  ;;  %v14415_v0 = vld [vmem:[#allocation124_spill] sm:$0xff] }
 0x2ef   : > { %14403 = vst [vmem:[#allocation143_spill] sm:$0xff] %v11678_v50  ;;  %14405 = vst [vmem:[#allocation236_spill] sm:$0xff] %v11683_v12  ;;  %v6946_v24 = vpop.eup %6945  ;;  %6965 = vrcp.f32 %v3880_v40  ;;  %v11697_v13 = vmul.f32 1.442695, %v2929_v23  ;;  %v3090_v50 = vsub.f32 0.0, %v11668_v10  ;;  %v11701_v3 = vadd.f32 %v14410_v25, %v1220_v37  ;;  %v14414_v23 = vld [vmem:[#allocation145_spill] sm:$0xff] }
 0x2f0   : > { %v6948_v27 = vpop.eup %6947  ;;  %v4517_v4 = vmul.f32 %v6942_v63, %v11319_v20  ;;  %v4040_v52 = vadd.f32 1.0, %v6946_v24  ;;  %6967 = vpow2.f32 %v11555_v53  ;;  %v11707_v60 = vadd.f32 %v14412_v47, %v14406_v1  ;;  %14413 = vst [vmem:[#allocation168_spill] sm:$0xff] %v11709_v39  ;;  %v11718_v20 = vpop.f32.mrb[147].mxu1  ;;  %v14418_v24 = vld [vmem:[#allocation183_spill] sm:$0xff] }
 0x2f1   : > { %14411 = vst [vmem:[#allocation135_spill] sm:$0xff] %v11701_v3  ;;  %v6950_v40 = vpop.eup %6949  ;;  %v11713_v12 = vmul.f32 %v14415_v0, %v14414_v23  ;;  %v3881_v10 = vadd.f32 1.0, %v6948_v27  ;;  %6969 = vpow2.f32 %v11557_v32  ;;  %v11716_v25 = vmul.f32 1.442695, %v3089_v48  ;;  %14417 = vst [vmem:[#allocation161_spill] sm:$0xff] %v11718_v20  ;;  %v14422_v20 = vld [vmem:[#allocation131_spill] sm:$0xff] }
 0x2f2   : > { %v6952_v63 = vpop.eup %6951  ;;  %v4518_v53 = vmul.f32 %v6950_v40, %v11347_v31  ;;  %6971 = vrcp.f32 %v4040_v52  ;;  %v2931_v1 = vsub.f32 0.0, %v11689_v46  ;;  %v11723_v47 = vadd.f32 %v14418_v24, %v1220_v37  ;;  %5006 = vadd.xlane.f32.xlu1 %v11385_v5  ;;  %v14421_v24 = vld [vmem:[#allocation91_spill] sm:$0xff] }
 0x2f3   : > { %14416 = vst [vmem:[#allocation159_spill] sm:$0xff] %v11713_v12  ;;  %v11726_v0 = vpop.eup %6953  ;;  %6973 = vrcp.f32 %v3881_v10  ;;  %v4041_v27 = vadd.f32 1.0, %v6952_v63  ;;  %v11728_v32 = vmul.f32 1.442695, %v2930_v6  ;;  %v3091_v48 = vsub.f32 0.0, %v11701_v3  ;;  %v14424_v63 = vld [vmem:[#allocation50_spill] sm:$0xff] }
 0x2f4   : > { %14419 = vst [vmem:[#allocation36_spill] sm:$0xff] %v11723_v47  ;;  %14420 = vst [vmem:[#allocation123_spill] sm:$0xff] %v11726_v0  ;;  %v6956_v23 = vpop.eup %6955  ;;  %6975 = vpow2.f32 %v11566_v21  ;;  %v11732_v31 = vmul.f32 1.442695, %v3090_v50  ;;  %v2932_v52 = vsub.f32 0.0, %v11707_v60  ;;  %v4894_v40 = vadd.f32 %v4518_v53, %v4517_v4  ;;  %v14425_v6 = vld [vmem:[#allocation166_spill] sm:$0xff]  ;;  %v1225_v21 = vpop.permute.xlu1 %1224 }
 0x2f5   : > { %v6958_v37 = vpop.eup %6957  ;;  %v11737_v5 = vmul.f32 %v14422_v20, %v14421_v24  ;;  %6977 = vrcp.f32 %v4041_v27  ;;  %v3882_v10 = vadd.f32 1.0, %v6956_v23  ;;  %v11741_v12 = vadd.f32 %v14425_v6, %v14424_v63  ;;  %v11743_v3 = vpop.f32.mrb[148].mxu0  ;;  %v14428_v53 = vld [vmem:[#allocation237_spill] sm:$0xff]  ;;  %v14429_v20 = vld [vmem:[#allocation95_spill] sm:$0xff] }
 0x2f6   : > { %14427 = vst [vmem:[#allocation226_spill] sm:$0xff] %v11743_v3  ;;  %v6960_v39 = vpop.eup %6959  ;;  %6979 = vpow2.f32 %v11606_v14  ;;  %v11746_v50 = vmul.f32 1.442695, %v2931_v1  ;;  %v3092_v4 = vsub.f32 0.0, %v11723_v47  ;;  %4895 = vadd.xlane.f32.xlu0 %v4894_v40  ;;  %v11751_v24 = vadd.f32 %v14429_v20, %v14428_v53  ;;  %v11753_v27 = vpop.f32.mrb[148].mxu1  ;;  %v14434_v53 = vld [vmem:[#allocation164_spill] sm:$0xff] }
 0x2f7   : > { %14423 = vst [vmem:[#allocation223_spill] sm:$0xff] %v11737_v5  ;;  %14426 = vst [vmem:[#allocation225_spill] sm:$0xff] %v11741_v12  ;;  %v11755_v23 = vpop.eup %6961  ;;  %6981 = vrcp.f32 %v3882_v10  ;;  %v4042_v6 = vadd.f32 1.0, %v6960_v39  ;;  %v11757_v3 = vmul.f32 1.442695, %v3091_v48  ;;  %v14432_v5 = vld [vmem:[#allocation188_spill] sm:$0xff]  ;;  %v4519_v1 = vmul.f32 %v6958_v37, %v11373_v62 }
 0x2f8   : > { %14430 = vst [vmem:[#allocation217_spill] sm:$0xff] %v11753_v27  ;;  %14431 = vst [vmem:[#allocation45_spill] sm:$0xff] %v11755_v23  ;;  %v11760_v0 = vadd.f32 %v14432_v5, %v1225_v21  ;;  %v6964_v14 = vpop.eup %6963  ;;  %6983 = vpow2.f32 %v11608_v2  ;;  %v11764_v40 = vmul.f32 1.442695, %v2932_v52  ;;  %v11768_v20 = vadd.f32 %v14434_v53, %v14424_v63  ;;  %v11770_v27 = vpop.f32.mrb[149].mxu0  ;;  %v14436_v5 = vld [vmem:[#allocation78_spill] sm:$0xff] }
 0x2f9   : > { %14435 = vst [vmem:[#allocation35_spill] sm:$0xff] %v11770_v27  ;;  %v6966_v10 = vpop.eup %6965  ;;  %6985 = vrcp.f32 %v4042_v6  ;;  %v3883_v39 = vadd.f32 1.0, %v6964_v14  ;;  %v2933_v48 = vsub.f32 0.0, %v11741_v12  ;;  %v11774_v47 = vadd.f32 %v14436_v5, %v1225_v21  ;;  %v14438_v62 = vld [vmem:[#allocation144_spill] sm:$0xff]  ;;  %v11785_v6 = vpop.f32.mrb[149].mxu1  ;;  %v14442_v5 = vld [vmem:[#allocation55_spill] sm:$0xff] }
 0x2fa   : > { %14433 = vst [vmem:[#allocation56_spill] sm:$0xff] %v11760_v0  ;;  %v6968_v23 = vpop.eup %6967  ;;  %v14439_v37 = vld [vmem:[#allocation196_spill] sm:$0xff]  ;;  %v4520_v52 = vmul.f32 %v6966_v10, %v11398_v49  ;;  %6987 = vpow2.f32 %v11610_v38  ;;  %v11782_v63 = vmul.f32 1.442695, %v3092_v4  ;;  %5009 = vadd.xlane.f32.xlu0 %v11445_v11  ;;  %14441 = vst [vmem:[#allocation173_spill] sm:$0xff] %v11785_v6  ;;  %v3093_v21 = vsub.f32 0.0, %v11760_v0  ;;  %v1230_v10 = vpop.permute.xlu0 %1229 }
 0x2fb   : > { %14437 = vst [vmem:[#allocation44_spill] sm:$0xff] %v11774_v47  ;;  %v11778_v2 = vmul.f32 %v14439_v37, %v14438_v62  ;;  %v6970_v14 = vpop.eup %6969  ;;  %6989 = vrcp.f32 %v3883_v39  ;;  %v4043_v53 = vadd.f32 1.0, %v6968_v23  ;;  %v14443_v27 = vld [vmem:[#allocation138_spill] sm:$0xff]  ;;  %v2934_v38 = vsub.f32 0.0, %v11768_v20  ;;  %v11803_v6 = vpop.f32.mrb[150].mxu0 }
 0x2fc   : > { %v11790_v12 = vadd.f32 %v14443_v27, %v14442_v5  ;;  %v11792_v62 = vpop.eup %6971  ;;  %v3884_v49 = vadd.f32 1.0, %v6970_v14  ;;  %6991 = vpow2.f32 %v11612_v51  ;;  %v4897_v4 = vadd.f32 %v4520_v52, %v4519_v1  ;;  %v14445_v37 = vld [vmem:[#allocation146_spill] sm:$0xff]  ;;  %14447 = vst [vmem:[#allocation109_spill] sm:$0xff] %v11803_v6  ;;  %v14448_v14 = vld [vmem:[#allocation160_spill] sm:$0xff]  ;;  %v14451_v52 = vld [vmem:[#allocation93_spill] sm:$0xff] }
 0x2fd   : > { %14440 = vst [vmem:[#allocation169_spill] sm:$0xff] %v11778_v2  ;;  %v6974_v11 = vpop.eup %6973  ;;  %v11798_v39 = vmul.f32 %v11287_v58, %v14445_v37  ;;  %6993 = vrcp.f32 %v4043_v53  ;;  %v11800_v23 = vmul.f32 1.442695, %v2933_v48  ;;  %v3094_v27 = vsub.f32 0.0, %v11774_v47  ;;  %v14452_v58 = vld [vmem:[#allocation88_spill] sm:$0xff] }
 0x2fe   : > { %14444 = vst [vmem:[#allocation64_spill] sm:$0xff] %v11790_v12  ;;  %v6976_v2 = vpop.eup %6975  ;;  %6995 = vrcp.f32 %v3884_v49  ;;  %v11806_v51 = vadd.f32 %v14448_v14, %v1230_v10  ;;  %v11810_v1 = vadd.f32 %v11280_v36, %v14442_v5  ;;  %4898 = vadd.xlane.f32.xlu1 %v4897_v4  ;;  %v11814_v37 = vadd.f32 %v14452_v58, %v14451_v52  ;;  %v11822_v14 = vpop.f32.mrb[150].mxu1  ;;  %v14454_v4 = vld [vmem:[#allocation28_spill] sm:$0xff] }
 0x2ff   : > { %14446 = vst [vmem:[#allocation232_spill] sm:$0xff] %v11798_v39  ;;  %v11816_v48 = vpop.eup %6977  ;;  %v4044_v53 = vadd.f32 1.0, %v6976_v2  ;;  %6997 = vpow2.f32 %v11649_v15  ;;  %v11819_v6 = vmul.f32 1.442695, %v3093_v21  ;;  %v2935_v49 = vsub.f32 0.0, %v11790_v12  ;;  %14453 = vst [vmem:[#allocation38_spill] sm:$0xff] %v11822_v14 }
 0x300   : > { %14449 = vst [vmem:[#allocation221_spill] sm:$0xff] %v11806_v51  ;;  %14450 = vst [vmem:[#allocation52_spill] sm:$0xff] %v11810_v1  ;;  %v6980_v47 = vpop.eup %6979  ;;  %v4521_v36 = vmul.f32 %v6974_v11, %v11422_v57  ;;  %6999 = vpow2.f32 %v11656_v9  ;;  %v11826_v5 = vmul.f32 1.442695, %v2934_v38  ;;  %v11829_v52 = vadd.f32 %v14454_v4, %v1230_v10  ;;  %v11831_v58 = vpop.f32.mrb[151].mxu0  ;;  %v14457_v15 = vld [vmem:[#allocation105_spill] sm:$0xff] }
 0x301   : > { %14456 = vst [vmem:[#allocation200_spill] sm:$0xff] %v11831_v58  ;;  %v6982_v2 = vpop.eup %6981  ;;  %v14458_v21 = vld [vmem:[#allocation67_spill] sm:$0xff]  ;;  %7001 = vrcp.f32 %v4044_v53  ;;  %v3885_v0 = vadd.f32 1.0, %v6980_v47  ;;  %v11837_v14 = vmul.f32 1.442695, %v3094_v27  ;;  %v3095_v9 = vsub.f32 0.0, %v11806_v51 }
 0x302   : > { %14455 = vst [vmem:[#allocation104_spill] sm:$0xff] %v11829_v52  ;;  %v11835_v39 = vmul.f32 %v14458_v21, %v14457_v15  ;;  %v6984_v12 = vpop.eup %6983  ;;  %v4522_v57 = vmul.f32 %v6982_v2, %v11454_v18  ;;  %7003 = vpow2.f32 %v11672_v19  ;;  %v2936_v38 = vsub.f32 0.0, %v11810_v1  ;;  %5012 = vadd.xlane.f32.xlu1 %v11506_v42  ;;  %v11844_v11 = vpop.f32.mrb[151].mxu1  ;;  %v14461_v4 = vld [vmem:[#allocation148_spill] sm:$0xff]  ;;  %v14462_v53 = vld [vmem:[#allocation27_spill] sm:$0xff]  ;;  %v14464_v21 = vld [vmem:[#allocation54_spill] sm:$0xff] }
 0x303   : > { %14460 = vst [vmem:[#allocation108_spill] sm:$0xff] %v11844_v11  ;;  %v11846_v10 = vpop.eup %6985  ;;  %v11850_v47 = vmul.f32 %v14462_v53, %v14461_v4  ;;  %7005 = vrcp.f32 %v3885_v0  ;;  %v4045_v27 = vadd.f32 1.0, %v6984_v12  ;;  %v11852_v15 = vmul.f32 1.442695, %v2935_v49  ;;  %v1235_v19 = vpop.permute.xlu1 %1234  ;;  %v14465_v42 = vld [vmem:[#allocation96_spill] sm:$0xff]  ;;  %v14467_v4 = vld [vmem:[#allocation151_spill] sm:$0xff] }
 0x304   : > { %14459 = vst [vmem:[#allocation114_spill] sm:$0xff] %v11835_v39  ;;  %v6988_v18 = vpop.eup %6987  ;;  %7007 = vpow2.f32 %v11674_v41  ;;  %v3096_v2 = vsub.f32 0.0, %v11829_v52  ;;  %v11858_v58 = vadd.f32 %v14465_v42, %v14464_v21  ;;  %v4900_v11 = vadd.f32 %v4522_v57, %v4521_v36  ;;  %v14469_v12 = vld [vmem:[#allocation203_spill] sm:$0xff]  ;;  %v11867_v49 = vpop.f32.mrb[152].mxu0  ;;  %v14473_v57 = vld [vmem:[#allocation220_spill] sm:$0xff] }
 0x305   : > { %14463 = vst [vmem:[#allocation212_spill] sm:$0xff] %v11850_v47  ;;  %v6990_v51 = vpop.eup %6989  ;;  %7009 = vrcp.f32 %v4045_v27  ;;  %v3886_v39 = vadd.f32 1.0, %v6988_v18  ;;  %v11861_v53 = vadd.f32 %v14467_v4, %v1235_v19  ;;  %v11865_v0 = vadd.f32 %v14469_v12, %v14464_v21  ;;  %14471 = vst [vmem:[#allocation140_spill] sm:$0xff] %v11867_v49  ;;  %v14472_v36 = vld [vmem:[#allocation15_spill] sm:$0xff]  ;;  %v11878_v18 = vpop.f32.mrb[152].mxu1  ;;  %v14475_v49 = vld [vmem:[#allocation182_spill] sm:$0xff] }
 0x306   : > { %14466 = vst [vmem:[#allocation100_spill] sm:$0xff] %v11858_v58  ;;  %v6992_v41 = vpop.eup %6991  ;;  %7011 = vpow2.f32 %v11697_v13  ;;  %v11870_v52 = vmul.f32 1.442695, %v3095_v9  ;;  %v11872_v42 = vmul.f32 1.442695, %v2936_v38  ;;  %4901 = vadd.xlane.f32.xlu0 %v4900_v11  ;;  %v11876_v27 = vadd.f32 %v14473_v57, %v14472_v36  ;;  %14474 = vst [vmem:[#allocation37_spill] sm:$0xff] %v11878_v18 }
 0x307   : > { %14468 = vst [vmem:[#allocation20_spill] sm:$0xff] %v11861_v53  ;;  %14470 = vst [vmem:[#allocation76_spill] sm:$0xff] %v11865_v0  ;;  %v11880_v4 = vpop.eup %6993  ;;  %v4523_v21 = vmul.f32 %v6990_v51, %v11468_v56  ;;  %7013 = vrcp.f32 %v3886_v39  ;;  %v4046_v12 = vadd.f32 1.0, %v6992_v41  ;;  %v11884_v47 = vadd.f32 %v14475_v49, %v1235_v19  ;;  %v14477_v9 = vld [vmem:[#allocation152_spill] sm:$0xff]  ;;  %v14478_v38 = vld [vmem:[#allocation174_spill] sm:$0xff]  ;;  %v11894_v57 = vpop.f32.mrb[153].mxu0 }
 0x308   : > { %v6996_v13 = vpop.eup %6995  ;;  %v11888_v1 = vmul.f32 %v14478_v38, %v14477_v9  ;;  %7015 = vpow2.f32 %v11716_v25  ;;  %v11891_v11 = vmul.f32 1.442695, %v3096_v2  ;;  %v2937_v36 = vsub.f32 0.0, %v11858_v58  ;;  %14480 = vst [vmem:[#allocation172_spill] sm:$0xff] %v11894_v57  ;;  %v14481_v49 = vld [vmem:[#allocation14_spill] sm:$0xff]  ;;  %v14484_v2 = vld [vmem:[#allocation59_spill] sm:$0xff] }
 0x309   : > { %14476 = vst [vmem:[#allocation8_spill] sm:$0xff] %v11884_v47  ;;  %v6998_v18 = vpop.eup %6997  ;;  %v4524_v56 = vmul.f32 %v6996_v13, %v11496_v33  ;;  %7017 = vrcp.f32 %v4046_v12  ;;  %v3097_v39 = vsub.f32 0.0, %v11861_v53  ;;  %v2938_v51 = vsub.f32 0.0, %v11865_v0  ;;  %v14482_v41 = vld [vmem:[#allocation30_spill] sm:$0xff]  ;;  %v14485_v38 = vld [vmem:[#allocation101_spill] sm:$0xff]  ;;  %v11909_v33 = vpop.f32.mrb[153].mxu1 }
 0x30a   : > { %14479 = vst [vmem:[#allocation170_spill] sm:$0xff] %v11888_v1  ;;  %v7000_v19 = vpop.eup %6999  ;;  %v11901_v9 = vmul.f32 %v14482_v41, %v14481_v49  ;;  %v3887_v25 = vadd.f32 1.0, %v6998_v18  ;;  %7019 = vpow2.f32 %v11728_v32  ;;  %v11906_v1 = vadd.f32 %v14485_v38, %v14484_v2  ;;  %5015 = vadd.xlane.f32.xlu0 %v11570_v34  ;;  %14487 = vst [vmem:[#allocation90_spill] sm:$0xff] %v11909_v33  ;;  %v1240_v13 = vpop.permute.xlu0 %1239  ;;  %v14490_v34 = vld [vmem:[#allocation218_spill] sm:$0xff]  ;;  %v14502_v58 = vld [vmem:[#allocation127_spill] sm:$0xff] }
 0x30b   : > { %v11911_v12 = vpop.eup %7001  ;;  %v4047_v57 = vadd.f32 1.0, %v7000_v19  ;;  %7021 = vpow2.f32 %v11732_v31  ;;  %v3098_v49 = vsub.f32 0.0, %v11884_v47  ;;  %v4903_v41 = vadd.f32 %v4524_v56, %v4523_v21  ;;  %v11924_v33 = vpop.f32.mrb[154].mxu0  ;;  %v14493_v56 = vld [vmem:[#allocation202_spill] sm:$0xff] }
 0x30c   : > { %14483 = vst [vmem:[#allocation86_spill] sm:$0xff] %v11901_v9  ;;  %14486 = vst [vmem:[#allocation228_spill] sm:$0xff] %v11906_v1  ;;  %v7004_v18 = vpop.eup %7003  ;;  %7023 = vrcp.f32 %v3887_v25  ;;  %v11915_v32 = vmul.f32 1.442695, %v2937_v36  ;;  %v14488_v9 = vld [vmem:[#allocation186_spill] sm:$0xff]  ;;  %v11922_v53 = vadd.f32 %v14490_v34, %v14484_v2  ;;  %v2939_v36 = vsub.f32 0.0, %v11906_v1 }
 0x30d   : > { %v11918_v38 = vadd.f32 %v14488_v9, %v1240_v13  ;;  %14492 = vst [vmem:[#allocation40_spill] sm:$0xff] %v11924_v33  ;;  %v7006_v0 = vpop.eup %7005  ;;  %7025 = vrcp.f32 %v4047_v57  ;;  %v3888_v19 = vadd.f32 1.0, %v7004_v18  ;;  %v11926_v31 = vmul.f32 1.442695, %v3097_v39  ;;  %4904 = vadd.xlane.f32.xlu1 %v4903_v41  ;;  %v14495_v25 = vld [vmem:[#allocation204_spill] sm:$0xff]  ;;  %v14496_v2 = vld [vmem:[#allocation6_spill] sm:$0xff] }
 0x30e   : > { %14491 = vst [vmem:[#allocation17_spill] sm:$0xff] %v11922_v53  ;;  %v11928_v47 = vmul.f32 1.442695, %v2938_v51  ;;  %v7008_v21 = vpop.eup %7007  ;;  %7027 = vpow2.f32 %v11746_v50  ;;  %v11933_v9 = vadd.f32 %v14493_v56, %v1240_v13  ;;  %v11937_v34 = vadd.f32 %v14496_v2, %v14495_v25  ;;  %v11939_v33 = vpop.f32.mrb[154].mxu1  ;;  %v14498_v39 = vld [vmem:[#allocation150_spill] sm:$0xff]  ;;  %v14499_v51 = vld [vmem:[#allocation207_spill] sm:$0xff] }
 0x30f   : > { %14489 = vst [vmem:[#allocation115_spill] sm:$0xff] %v11918_v38  ;;  %14497 = vst [vmem:[#allocation57_spill] sm:$0xff] %v11939_v33  ;;  %v11941_v57 = vpop.eup %7009  ;;  %v11945_v18 = vmul.f32 %v14499_v51, %v14498_v39  ;;  %7029 = vrcp.f32 %v3888_v19  ;;  %v4048_v41 = vadd.f32 1.0, %v7008_v21  ;;  %v11947_v50 = vmul.f32 1.442695, %v3098_v49  ;;  %v11953_v2 = vpop.f32.mrb[155].mxu0 }
 0x310   : > { %14494 = vst [vmem:[#allocation118_spill] sm:$0xff] %v11933_v9  ;;  %v7012_v1 = vpop.eup %7011  ;;  %v4525_v13 = vmul.f32 %v7006_v0, %v11542_v61  ;;  %7031 = vpow2.f32 %v11757_v3  ;;  %v3099_v56 = vsub.f32 0.0, %v11918_v38  ;;  %v2940_v25 = vsub.f32 0.0, %v11922_v53  ;;  %14501 = vst [vmem:[#allocation179_spill] sm:$0xff] %v11953_v2  ;;  %v14504_v49 = vld [vmem:[#allocation58_spill] sm:$0xff]  ;;  %v14505_v21 = vld [vmem:[#allocation175_spill] sm:$0xff]  ;;  %v1245_v3 = vpop.permute.xlu1 %1244 }
 0x311   : > { %14500 = vst [vmem:[#allocation180_spill] sm:$0xff] %v11945_v18  ;;  %v7014_v33 = vpop.eup %7013  ;;  %v11957_v39 = vmul.f32 %v11481_v16, %v14502_v58  ;;  %7033 = vrcp.f32 %v4048_v41  ;;  %v3889_v19 = vadd.f32 1.0, %v7012_v1  ;;  %v11961_v51 = vadd.f32 %v14505_v21, %v14504_v49  ;;  %5018 = vadd.xlane.f32.xlu1 %v11638_v54  ;;  %v11969_v16 = vpop.f32.mrb[155].mxu1  ;;  %v14508_v41 = vld [vmem:[#allocation205_spill] sm:$0xff] }
 0x312   : > { %v7016_v61 = vpop.eup %7015  ;;  %v4526_v0 = vmul.f32 %v7014_v33, %v11550_v7  ;;  %7035 = vpow2.f32 %v11764_v40  ;;  %v11966_v2 = vmul.f32 1.442695, %v2939_v36  ;;  %v3100_v53 = vsub.f32 0.0, %v11933_v9  ;;  %14507 = vst [vmem:[#allocation21_spill] sm:$0xff] %v11969_v16  ;;  %v14510_v54 = vld [vmem:[#allocation209_spill] sm:$0xff] }
 0x313   : > { %14503 = vst [vmem:[#allocation61_spill] sm:$0xff] %v11957_v39  ;;  %14506 = vst [vmem:[#allocation233_spill] sm:$0xff] %v11961_v51  ;;  %v11971_v58 = vpop.eup %7017  ;;  %7037 = vrcp.f32 %v3889_v19  ;;  %v4049_v1 = vadd.f32 1.0, %v7016_v61  ;;  %v11974_v21 = vadd.f32 %v14508_v41, %v1245_v3  ;;  %v11978_v38 = vadd.f32 %v14510_v54, %v14504_v49  ;;  %v14512_v61 = vld [vmem:[#allocation195_spill] sm:$0xff]  ;;  %v11989_v39 = vpop.f32.mrb[156].mxu0 }
 0x314   : > { %v7020_v7 = vpop.eup %7019  ;;  %7039 = vpow2.f32 %v11782_v63  ;;  %v11981_v40 = vmul.f32 1.442695, %v3099_v56  ;;  %v11983_v33 = vmul.f32 1.442695, %v2940_v25  ;;  %v4906_v36 = vadd.f32 %v4526_v0, %v4525_v13  ;;  %14514 = vst [vmem:[#allocation235_spill] sm:$0xff] %v11989_v39  ;;  %v14515_v54 = vld [vmem:[#allocation119_spill] sm:$0xff] }
 0x315   : > { %14509 = vst [vmem:[#allocation39_spill] sm:$0xff] %v11974_v21  ;;  %14511 = vst [vmem:[#allocation53_spill] sm:$0xff] %v11978_v38  ;;  %v7022_v16 = vpop.eup %7021  ;;  %7041 = vrcp.f32 %v4049_v1  ;;  %v3890_v9 = vadd.f32 1.0, %v7020_v7  ;;  %v2941_v19 = vsub.f32 0.0, %v11961_v51  ;;  %v11987_v41 = vadd.f32 %v14512_v61, %v1245_v3  ;;  %v14516_v13 = vld [vmem:[#allocation222_spill] sm:$0xff]  ;;  %v12000_v0 = vpop.f32.mrb[156].mxu1 }
 0x316   : > { %v7024_v49 = vpop.eup %7023  ;;  %v11993_v18 = vmul.f32 %v11510_v43, %v14515_v54  ;;  %v4050_v63 = vadd.f32 1.0, %v7022_v16  ;;  %7043 = vpow2.f32 %v11800_v23  ;;  %4907 = vadd.xlane.f32.xlu0 %v4906_v36  ;;  %v14517_v56 = vld [vmem:[#allocation206_spill] sm:$0xff]  ;;  %14518 = vst [vmem:[#allocation154_spill] sm:$0xff] %v12000_v0  ;;  %v12004_v3 = vmul.f32 1.442695, %v3100_v53  ;;  %v14519_v16 = vld [vmem:[#allocation215_spill] sm:$0xff] }
 0x317   : > { %14513 = vst [vmem:[#allocation77_spill] sm:$0xff] %v11987_v41  ;;  %v11998_v25 = vadd.f32 %v14517_v56, %v14516_v13  ;;  %v12002_v1 = vpop.eup %7025  ;;  %7045 = vrcp.f32 %v3890_v9  ;;  %v3101_v7 = vsub.f32 0.0, %v11974_v21  ;;  %v2942_v43 = vsub.f32 0.0, %v11978_v38  ;;  %v14520_v54 = vld [vmem:[#allocation122_spill] sm:$0xff]  ;;  %v14521_v13 = vld [vmem:[#allocation63_spill] sm:$0xff]  ;;  %v14522_v56 = vld [vmem:[#allocation116_spill] sm:$0xff]  ;;  %v1250_v9 = vpop.permute.xlu0 %1249 }
 0x318   : > { %v7028_v61 = vpop.eup %7027  ;;  %v12010_v23 = vmul.f32 %v14520_v54, %v14519_v16  ;;  %v4527_v36 = vmul.f32 %v7024_v49, %v11590_v35  ;;  %7047 = vrcp.f32 %v4050_v63  ;;  %v12015_v0 = vadd.f32 %v14522_v56, %v14521_v13  ;;  %v12021_v51 = vpop.f32.mrb[157].mxu0  ;;  %v14525_v35 = vld [vmem:[#allocation185_spill] sm:$0xff]  ;;  %v14527_v63 = vld [vmem:[#allocation234_spill] sm:$0xff] }
 0x319   : > { %v7030_v39 = vpop.eup %7029  ;;  %v3891_v53 = vadd.f32 1.0, %v7028_v61  ;;  %7049 = vpow2.f32 %v11819_v6  ;;  %v12018_v21 = vmul.f32 1.442695, %v2941_v19  ;;  %v3102_v38 = vsub.f32 0.0, %v11987_v41  ;;  %14524 = vst [vmem:[#allocation208_spill] sm:$0xff] %v12021_v51  ;;  %v12033_v6 = vpop.f32.mrb[157].mxu1 }
 0x31a   : > { %14523 = vst [vmem:[#allocation178_spill] sm:$0xff] %v12015_v0  ;;  %v7032_v16 = vpop.eup %7031  ;;  %v4528_v54 = vmul.f32 %v7030_v39, %v11598_v17  ;;  %7051 = vpow2.f32 %v11826_v5  ;;  %v12026_v49 = vadd.f32 %v14525_v35, %v1250_v9  ;;  %v12030_v56 = vadd.f32 %v14527_v63, %v14521_v13  ;;  %5021 = vadd.xlane.f32.xlu0 %v11693_v29  ;;  %v14530_v17 = vld [vmem:[#allocation184_spill] sm:$0xff]  ;;  %v14532_v41 = vld [vmem:[#allocation158_spill] sm:$0xff] }
 0x31b   : > { %14529 = vst [vmem:[#allocation43_spill] sm:$0xff] %v12033_v6  ;;  %v12035_v19 = vpop.eup %7033  ;;  %7053 = vrcp.f32 %v3891_v53  ;;  %v4051_v61 = vadd.f32 1.0, %v7032_v16  ;;  %v12037_v51 = vmul.f32 1.442695, %v3101_v7  ;;  %v12040_v39 = vadd.f32 %v14530_v17, %v1250_v9  ;;  %v12052_v16 = vpop.f32.mrb[158].mxu0 }
 0x31c   : > { %14526 = vst [vmem:[#allocation60_spill] sm:$0xff] %v12026_v49  ;;  %14528 = vst [vmem:[#allocation132_spill] sm:$0xff] %v12030_v56  ;;  %v7036_v5 = vpop.eup %7035  ;;  %7055 = vpow2.f32 %v11837_v14  ;;  %v12043_v35 = vmul.f32 1.442695, %v2942_v43  ;;  %v2943_v13 = vsub.f32 0.0, %v12015_v0  ;;  %v4909_v63 = vadd.f32 %v4528_v54, %v4527_v36  ;;  %v14534_v36 = vld [vmem:[#allocation102_spill] sm:$0xff] }
 0x31d   : > { %14531 = vst [vmem:[#allocation89_spill] sm:$0xff] %v12040_v39  ;;  %v7038_v29 = vpop.eup %7037  ;;  %v12048_v6 = vmul.f32 %v11574_v28, %v14532_v41  ;;  %7057 = vrcp.f32 %v4051_v61  ;;  %v3892_v53 = vadd.f32 1.0, %v7036_v5  ;;  %v12050_v7 = vmul.f32 1.442695, %v3102_v38  ;;  %14533 = vst [vmem:[#allocation83_spill] sm:$0xff] %v12052_v16  ;;  %v14535_v54 = vld [vmem:[#allocation97_spill] sm:$0xff] }
 0x31e   : > { %v7040_v9 = vpop.eup %7039  ;;  %7059 = vpow2.f32 %v11852_v15  ;;  %v3103_v14 = vsub.f32 0.0, %v12026_v49  ;;  %v2944_v43 = vsub.f32 0.0, %v12030_v56  ;;  %4910 = vadd.xlane.f32.xlu1 %v4909_v63  ;;  %v12059_v17 = vadd.f32 %v14535_v54, %v14534_v36  ;;  %v12061_v28 = vpop.f32.mrb[158].mxu1  ;;  %v14538_v5 = vld [vmem:[#allocation62_spill] sm:$0xff]  ;;  %v14540_v56 = vld [vmem:[#allocation157_spill] sm:$0xff] }
 0x31f   : > { %14537 = vst [vmem:[#allocation80_spill] sm:$0xff] %v12061_v28  ;;  %v12063_v41 = vpop.eup %7041  ;;  %7061 = vrcp.f32 %v3892_v53  ;;  %v4052_v38 = vadd.f32 1.0, %v7040_v9  ;;  %v3104_v61 = vsub.f32 0.0, %v12040_v39  ;;  %v12068_v15 = vadd.f32 %v11559_v59, %v14538_v5  ;;  %v1255_v49 = vpop.permute.xlu1 %1254  ;;  %v14542_v39 = vld [vmem:[#allocation189_spill] sm:$0xff] }
 0x320   : > { %14536 = vst [vmem:[#allocation133_spill] sm:$0xff] %v12059_v17  ;;  %v7044_v16 = vpop.eup %7043  ;;  %v12072_v63 = vmul.f32 %v11603_v26, %v14540_v56  ;;  %v4529_v36 = vmul.f32 %v7038_v29, %v11634_v44  ;;  %7063 = vpow2.f32 %v11870_v52  ;;  %v12076_v54 = vmul.f32 1.442695, %v2943_v13  ;;  %v12078_v53 = vpop.f32.mrb[159].mxu0  ;;  %v14546_v29 = vld [vmem:[#allocation199_spill] sm:$0xff] }
 0x321   : > { %14539 = vst [vmem:[#allocation87_spill] sm:$0xff] %v12068_v15  ;;  %14541 = vst [vmem:[#allocation187_spill] sm:$0xff] %v12078_v53  ;;  %v7046_v9 = vpop.eup %7045  ;;  %7065 = vrcp.f32 %v4052_v38  ;;  %v3893_v28 = vadd.f32 1.0, %v7044_v16  ;;  %v12081_v59 = vadd.f32 %v14542_v39, %v1255_v49  ;;  %v12085_v0 = vadd.f32 %v11585_v30, %v14538_v5  ;;  %v12096_v13 = vpop.f32.mrb[159].mxu1  ;;  %v14547_v16 = vld [vmem:[#allocation34_spill] sm:$0xff] }
 0x322   : > { %v12087_v26 = vpop.eup %7047  ;;  %v4530_v44 = vmul.f32 %v7046_v9, %v11660_v55  ;;  %7067 = vpow2.f32 %v11872_v42  ;;  %v12091_v52 = vmul.f32 1.442695, %v3103_v14  ;;  %v12093_v56 = vmul.f32 1.442695, %v2944_v43  ;;  %5024 = vadd.xlane.f32.xlu1 %v11751_v24  ;;  %14545 = vst [vmem:[#allocation92_spill] sm:$0xff] %v12096_v13  ;;  %v14548_v14 = vld [vmem:[#allocation156_spill] sm:$0xff]  ;;  %v1260_v13 = vpop.permute.xlu0 %1259 }
 0x323   : > { %14543 = vst [vmem:[#allocation4_spill] sm:$0xff] %v12081_v59  ;;  %14544 = vst [vmem:[#allocation85_spill] sm:$0xff] %v12085_v0  ;;  %v7050_v39 = vpop.eup %7049  ;;  %v12100_v38 = vmul.f32 %v14547_v16, %v14546_v29  ;;  %7069 = vrcp.f32 %v3893_v28  ;;  %v12102_v30 = vmul.f32 1.442695, %v3104_v61  ;;  %v2945_v55 = vsub.f32 0.0, %v12068_v15  ;;  %v14550_v16 = vld [vmem:[#allocation66_spill] sm:$0xff] }
 0x324   : > { %v7052_v5 = vpop.eup %7051  ;;  %v4053_v42 = vadd.f32 1.0, %v7050_v39  ;;  %7071 = vpow2.f32 %v11891_v11  ;;  %v12107_v43 = vadd.f32 %v14548_v14, %v1255_v49  ;;  %v4912_v24 = vadd.f32 %v4530_v44, %v4529_v36  ;;  %v14551_v15 = vld [vmem:[#allocation230_spill] sm:$0xff]  ;;  %v14556_v36 = vld [vmem:[#allocation231_spill] sm:$0xff] }
 0x325   : > { %v7054_v9 = vpop.eup %7053  ;;  %v3894_v53 = vadd.f32 1.0, %v7052_v5  ;;  %7073 = vpow2.f32 %v11915_v32  ;;  %v3105_v29 = vsub.f32 0.0, %v12081_v59  ;;  %v2946_v28 = vsub.f32 0.0, %v12085_v0  ;;  %v14553_v11 = vld [vmem:[#allocation198_spill] sm:$0xff]  ;;  %v14558_v32 = vld [vmem:[#allocation147_spill] sm:$0xff] }
 0x326   : > { %14549 = vst [vmem:[#allocation42_spill] sm:$0xff] %v12107_v43  ;;  %v7056_v61 = vpop.eup %7055  ;;  %7075 = vrcp.f32 %v4053_v42  ;;  %v12114_v39 = vadd.f32 %v14551_v15, %v14550_v16  ;;  %v12117_v17 = vadd.f32 %v14553_v11, %v1260_v13  ;;  %4913 = vadd.xlane.f32.xlu0 %v4912_v24  ;;  %v14555_v49 = vld [vmem:[#allocation18_spill] sm:$0xff]  ;;  %v12127_v14 = vmul.f32 %v11664_v8, %v14558_v32 }
 0x327   : > { %v12121_v44 = vadd.f32 %v14556_v36, %v14555_v49  ;;  %v12123_v5 = vpop.eup %7057  ;;  %7077 = vrcp.f32 %v3894_v53  ;;  %v4054_v42 = vadd.f32 1.0, %v7056_v61  ;;  %v12131_v15 = vadd.f32 %v11647_v45, %v14550_v16  ;;  %v14562_v16 = vld [vmem:[#allocation236_spill] sm:$0xff] }
 0x328   : > { %14552 = vst [vmem:[#allocation194_spill] sm:$0xff] %v12114_v39  ;;  %14554 = vst [vmem:[#allocation98_spill] sm:$0xff] %v12117_v17  ;;  %v7060_v59 = vpop.eup %7059  ;;  %v4531_v11 = vmul.f32 %v7054_v9, %v11689_v46  ;;  %7079 = vpow2.f32 %v11926_v31  ;;  %v12135_v24 = vmul.f32 1.442695, %v2945_v55  ;;  %v3106_v49 = vsub.f32 0.0, %v12107_v43 }
 0x329   : > { %14557 = vst [vmem:[#allocation23_spill] sm:$0xff] %v12121_v44  ;;  %14559 = vst [vmem:[#allocation99_spill] sm:$0xff] %v12131_v15  ;;  %v7062_v36 = vpop.eup %7061  ;;  %7081 = vrcp.f32 %v4054_v42  ;;  %v3895_v0 = vadd.f32 1.0, %v7060_v59  ;;  %v12138_v8 = vmul.f32 1.442695, %v3105_v29  ;;  %v12141_v53 = vadd.f32 %v11662_v22, %v1260_v13  ;;  %v14561_v29 = vld [vmem:[#allocation171_spill] sm:$0xff] }
 0x32a   : > { %v7064_v61 = vpop.eup %7063  ;;  %v4532_v45 = vmul.f32 %v7062_v36, %v11707_v60  ;;  %7083 = vpow2.f32 %v11928_v47  ;;  %v2947_v46 = vsub.f32 0.0, %v12114_v39  ;;  %v3107_v31 = vsub.f32 0.0, %v12117_v17  ;;  %5027 = vadd.xlane.f32.xlu0 %v11814_v37  ;;  %v14563_v37 = vld [vmem:[#allocation162_spill] sm:$0xff]  ;;  %v14564_v36 = vld [vmem:[#allocation123_spill] sm:$0xff] }
 0x32b   : > { %14560 = vst [vmem:[#allocation126_spill] sm:$0xff] %v12141_v53  ;;  %v12148_v55 = vpop.eup %7065  ;;  %7085 = vrcp.f32 %v3895_v0  ;;  %v4055_v59 = vadd.f32 1.0, %v7064_v61  ;;  %v12150_v9 = vmul.f32 1.442695, %v2946_v28  ;;  %v2948_v22 = vsub.f32 0.0, %v12131_v15 }
 0x32c   : > { %v7068_v13 = vpop.eup %7067  ;;  %v12155_v60 = vmul.f32 %v14562_v16, %v14561_v29  ;;  %7087 = vpow2.f32 %v11947_v50  ;;  %v12158_v47 = vmul.f32 1.442695, %v3106_v49  ;;  %v4915_v32 = vadd.f32 %v4532_v45, %v4531_v11  ;;  %v14565_v50 = vld [vmem:[#allocation5_spill] sm:$0xff]  ;;  %v14566_v49 = vld [vmem:[#allocation94_spill] sm:$0xff] }
 0x32d   : > { %v7070_v42 = vpop.eup %7069  ;;  %v12162_v17 = vmul.f32 %v14564_v36, %v14563_v37  ;;  %7089 = vrcp.f32 %v4055_v59  ;;  %v3896_v0 = vadd.f32 1.0, %v7068_v13  ;;  %v3108_v28 = vsub.f32 0.0, %v12141_v53  ;;  %v14568_v59 = vld [vmem:[#allocation65_spill] sm:$0xff]  ;;  %v14569_v13 = vld [vmem:[#allocation3_spill] sm:$0xff] }
 0x32e   : > { %v7072_v61 = vpop.eup %7071  ;;  %7091 = vpow2.f32 %v11966_v2  ;;  %v12166_v15 = vmul.f32 1.442695, %v2947_v46  ;;  %v12168_v29 = vmul.f32 1.442695, %v3107_v31  ;;  %4916 = vadd.xlane.f32.xlu1 %v4915_v32  ;;  %v12172_v11 = vadd.f32 %v14566_v49, %v14565_v50  ;;  %v12182_v2 = vpop.permute.xlu1 %1264  ;;  %v14570_v46 = vld [vmem:[#allocation225_spill] sm:$0xff]  ;;  %v14572_v49 = vld [vmem:[#allocation72_spill] sm:$0xff] }
 0x32f   : > { %v7074_v45 = vpop.eup %7073  ;;  %7093 = vrcp.f32 %v3896_v0  ;;  %v4056_v16 = vadd.f32 1.0, %v7072_v61  ;;  %v12174_v37 = vmul.f32 1.442695, %v2948_v22  ;;  %v12178_v36 = vadd.f32 %v14569_v13, %v14568_v59  ;;  %v14571_v50 = vld [vmem:[#allocation125_spill] sm:$0xff] }
 0x330   : > { %14567 = vst [vmem:[#allocation211_spill] sm:$0xff] %v12172_v11  ;;  %v12180_v53 = vpop.eup %7075  ;;  %v4533_v31 = vmul.f32 %v7070_v42, %v14570_v46  ;;  %v3897_v32 = vadd.f32 1.0, %v7074_v45  ;;  %7095 = vpow2.f32 %v11981_v40  ;;  %v12188_v39 = vadd.f32 %v14572_v49, %v14571_v50  ;;  %v14574_v22 = vld [vmem:[#allocation197_spill] sm:$0xff]  ;;  %v14578_v40 = vld [vmem:[#allocation168_spill] sm:$0xff]  ;;  %v14580_v49 = vld [vmem:[#allocation103_spill] sm:$0xff] }
 0x331   : > { %v7078_v0 = vpop.eup %7077  ;;  %v14575_v61 = vld [vmem:[#allocation45_spill] sm:$0xff]  ;;  %7097 = vrcp.f32 %v4056_v16  ;;  %v12194_v13 = vmul.f32 1.442695, %v3108_v28  ;;  %v12203_v46 = vadd.f32 %v14578_v40, %v14568_v59  ;;  %v12218_v59 = vpop.permute.xlu0 %1269  ;;  %v14585_v40 = vld [vmem:[#allocation190_spill] sm:$0xff] }
 0x332   : > { %14573 = vst [vmem:[#allocation224_spill] sm:$0xff] %v12188_v39  ;;  %v12192_v43 = vmul.f32 %v14575_v61, %v14574_v22  ;;  %v14577_v11 = vld [vmem:[#allocation33_spill] sm:$0xff]  ;;  %v7080_v42 = vpop.eup %7079  ;;  %v4534_v45 = vmul.f32 %v7078_v0, %v11768_v20  ;;  %7099 = vrcp.f32 %v3897_v32  ;;  %5030 = vadd.xlane.f32.xlu1 %v11876_v27  ;;  %v14582_v61 = vld [vmem:[#allocation106_spill] sm:$0xff]  ;;  %v12222_v27 = vmul.f32 %v11792_v62, %v14585_v40 }
 0x333   : > { %14576 = vst [vmem:[#allocation48_spill] sm:$0xff] %v12194_v13  ;;  %v12198_v44 = vadd.f32 %v14577_v11, %v12182_v2  ;;  %v14579_v50 = vld [vmem:[#allocation229_spill] sm:$0xff]  ;;  %v12210_v28 = vpop.eup %7081  ;;  %v4057_v16 = vadd.f32 1.0, %v7080_v42  ;;  %7101 = vpow2.f32 %v11983_v33 }
 0x334   : > { %v12208_v22 = vadd.f32 %v14580_v49, %v14579_v50  ;;  %v14583_v20 = vld [vmem:[#allocation73_spill] sm:$0xff]  ;;  %v7084_v0 = vpop.eup %7083  ;;  %v14586_v50 = vld [vmem:[#allocation155_spill] sm:$0xff]  ;;  %7103 = vpow2.f32 %v12004_v3  ;;  %v4918_v33 = vadd.f32 %v4534_v45, %v4533_v31 }
 0x335   : > { %v12216_v32 = vadd.f32 %v14583_v20, %v14582_v61  ;;  %v12226_v49 = vmul.f32 %v11816_v48, %v14586_v50  ;;  %v7086_v42 = vpop.eup %7085  ;;  %v14587_v11 = vld [vmem:[#allocation29_spill] sm:$0xff]  ;;  %7105 = vrcp.f32 %v4057_v16  ;;  %v3898_v61 = vadd.f32 1.0, %v7084_v0 }
 0x336   : > { %14581 = vst [vmem:[#allocation47_spill] sm:$0xff] %v12208_v22  ;;  %v12231_v22 = vmul.f32 %v11846_v10, %v14587_v11  ;;  %v14588_v20 = vld [vmem:[#allocation113_spill] sm:$0xff]  ;;  %v7088_v62 = vpop.eup %7087  ;;  %7107 = vpow2.f32 %v12018_v21  ;;  %4919 = vadd.xlane.f32.xlu0 %v4918_v33  ;;  %v14601_v21 = vld [vmem:[#allocation111_spill] sm:$0xff] }
 0x337   : > { %14584 = vst [vmem:[#allocation165_spill] sm:$0xff] %v12216_v32  ;;  %v14589_v32 = vld [vmem:[#allocation19_spill] sm:$0xff]  ;;  %v14591_v40 = vld [vmem:[#allocation149_spill] sm:$0xff]  ;;  %v12250_v10 = vpop.eup %7089  ;;  %7109 = vrcp.f32 %v3898_v61  ;;  %v4058_v16 = vadd.f32 1.0, %v7088_v62  ;;  %v14604_v61 = vld [vmem:[#allocation120_spill] sm:$0xff] }
 0x338   : > { %v12235_v39 = vadd.f32 %v14589_v32, %v14588_v20  ;;  %v12239_v13 = vmul.f32 %v11880_v4, %v14591_v40  ;;  %v14592_v48 = vld [vmem:[#allocation117_spill] sm:$0xff]  ;;  %v14595_v32 = vld [vmem:[#allocation22_spill] sm:$0xff]  ;;  %v12260_v40 = vpop.permute.xlu1 %1274  ;;  %7111 = vpow2.f32 %v12037_v51  ;;  %v14605_v62 = vld [vmem:[#allocation7_spill] sm:$0xff] }
 0x339   : > { %v12243_v3 = vmul.f32 %v11911_v12, %v14592_v48  ;;  %v14593_v31 = vld [vmem:[#allocation9_spill] sm:$0xff]  ;;  %v14597_v4 = vld [vmem:[#allocation130_spill] sm:$0xff]  ;;  %v7092_v12 = vpop.eup %7091  ;;  %7113 = vrcp.f32 %v4058_v16 }
 0x33a   : > { %14590 = vst [vmem:[#allocation134_spill] sm:$0xff] %v12235_v39  ;;  %v12247_v45 = vmul.f32 %v11941_v57, %v14593_v31  ;;  %v14594_v11 = vld [vmem:[#allocation121_spill] sm:$0xff]  ;;  %v14600_v57 = vld [vmem:[#allocation64_spill] sm:$0xff]  ;;  %v12270_v39 = vadd.f32 %v14605_v62, %v14604_v61  ;;  %7115 = vpow2.f32 %v12043_v35  ;;  %5033 = vadd.xlane.f32.xlu0 %v11937_v34  ;;  %v14611_v61 = vld [vmem:[#allocation167_spill] sm:$0xff] }
 0x33b   : > { %v12254_v0 = vadd.f32 %v14595_v32, %v14594_v11  ;;  %v14598_v50 = vld [vmem:[#allocation41_spill] sm:$0xff]  ;;  %v4535_v48 = vmul.f32 %v7086_v42, %v14600_v57  ;;  %v7094_v11 = vpop.eup %7093  ;;  %v3899_v42 = vadd.f32 1.0, %v7092_v12  ;;  %v12280_v57 = vpop.permute.xlu0 %1279  ;;  %v14616_v12 = vld [vmem:[#allocation107_spill] sm:$0xff] }
 0x33c   : > { %v12258_v20 = vadd.f32 %v14598_v50, %v14597_v4  ;;  %v14602_v33 = vld [vmem:[#allocation69_spill] sm:$0xff]  ;;  %14606 = vst [vmem:[#allocation216_spill] sm:$0xff] %v12270_v39  ;;  %v14608_v50 = vld [vmem:[#allocation84_spill] sm:$0xff]  ;;  %v7096_v51 = vpop.eup %7095  ;;  %14609 = vst [vmem:[#allocation201_spill] sm:$0xff] %v12280_v57 }
 0x33d   : > { %14596 = vst [vmem:[#allocation177_spill] sm:$0xff] %v12254_v0  ;;  %v12266_v31 = vadd.f32 %v14602_v33, %v14601_v21  ;;  %v14607_v32 = vld [vmem:[#allocation13_spill] sm:$0xff]  ;;  %v14610_v21 = vld [vmem:[#allocation52_spill] sm:$0xff]  ;;  %7117 = vrcp.f32 %v3899_v42  ;;  %v4059_v16 = vadd.f32 1.0, %v7096_v51 }
 0x33e   : > { %14599 = vst [vmem:[#allocation49_spill] sm:$0xff] %v12258_v20  ;;  %v12274_v4 = vmul.f32 %v11971_v58, %v14607_v32  ;;  %v12278_v20 = vmul.f32 %v12002_v1, %v14608_v50  ;;  %v4536_v33 = vmul.f32 %v7094_v11, %v14610_v21  ;;  %v14612_v62 = vld [vmem:[#allocation141_spill] sm:$0xff]  ;;  %v14613_v58 = vld [vmem:[#allocation11_spill] sm:$0xff]  ;;  %v14614_v32 = vld [vmem:[#allocation10_spill] sm:$0xff]  ;;  %v7098_v1 = vpop.eup %7097  ;;  %7119 = vpow2.f32 %v12050_v7 }
 0x33f   : > { %14603 = vst [vmem:[#allocation46_spill] sm:$0xff] %v12266_v31  ;;  %v12287_v39 = vadd.f32 %v14612_v62, %v14611_v61  ;;  %v12291_v31 = vadd.f32 %v14614_v32, %v14613_v58  ;;  %v14617_v50 = vld [vmem:[#allocation112_spill] sm:$0xff]  ;;  %v14619_v11 = vld [vmem:[#allocation26_spill] sm:$0xff]  ;;  %v14620_v21 = vld [vmem:[#allocation137_spill] sm:$0xff]  ;;  %v7100_v34 = vpop.eup %7099  ;;  %7121 = vrcp.f32 %v4059_v16 }
 0x340   : > { %v12295_v0 = vadd.f32 %v14617_v50, %v14616_v12  ;;  %v12299_v35 = vadd.f32 %v14620_v21, %v14619_v11  ;;  %v14622_v57 = vld [vmem:[#allocation129_spill] sm:$0xff]  ;;  %v4921_v62 = vadd.f32 %v4536_v33, %v4535_v48  ;;  %v14623_v58 = vld [vmem:[#allocation128_spill] sm:$0xff]  ;;  %v7102_v51 = vpop.eup %7101  ;;  %v14627_v50 = vld [vmem:[#allocation142_spill] sm:$0xff]  ;;  %v12322_v48 = vpop.permute.xlu1 %1284  ;;  %7123 = vpow2.f32 %v12076_v54 }
 0x341   : > { %14615 = vst [vmem:[#allocation68_spill] sm:$0xff] %v12291_v31  ;;  %v12303_v61 = vmul.f32 %v12035_v19, %v14622_v57  ;;  %v14624_v32 = vld [vmem:[#allocation12_spill] sm:$0xff]  ;;  %v14626_v31 = vld [vmem:[#allocation213_spill] sm:$0xff]  ;;  %v12316_v11 = vmul.f32 %v12087_v26, %v14627_v50  ;;  %v14628_v21 = vld [vmem:[#allocation135_spill] sm:$0xff]  ;;  %v7104_v7 = vpop.eup %7103  ;;  %v3900_v57 = vadd.f32 1.0, %v7102_v51  ;;  %7125 = vpow2.f32 %v12091_v52 }
 0x342   : > { %14618 = vst [vmem:[#allocation110_spill] sm:$0xff] %v12295_v0  ;;  %14621 = vst [vmem:[#allocation24_spill] sm:$0xff] %v12299_v35  ;;  %v12308_v42 = vadd.f32 %v14624_v32, %v14623_v58  ;;  %v12312_v12 = vmul.f32 %v12063_v41, %v14626_v31  ;;  %v12320_v19 = vmul.f32 %v12123_v5, %v14628_v21  ;;  %4922 = vadd.xlane.f32.xlu1 %v4921_v62  ;;  %v14629_v33 = vld [vmem:[#allocation25_spill] sm:$0xff]  ;;  %v14632_v31 = vld [vmem:[#allocation192_spill] sm:$0xff]  ;;  %v7106_v50 = vpop.eup %7105  ;;  %v12342_v0 = vpop.permute.xlu0 %1289 }
 0x343   : > { %v14630_v58 = vld [vmem:[#allocation193_spill] sm:$0xff]  ;;  %v14633_v32 = vld [vmem:[#allocation139_spill] sm:$0xff]  ;;  %v4060_v35 = vadd.f32 1.0, %v7104_v7  ;;  %v14635_v5 = vld [vmem:[#allocation2_spill] sm:$0xff]  ;;  %v7108_v62 = vpop.eup %7107  ;;  %7127 = vrcp.f32 %v3900_v57 }
 0x344   : > { %14625 = vst [vmem:[#allocation51_spill] sm:$0xff] %v12308_v42  ;;  %v12327_v41 = vadd.f32 %v14630_v58, %v14629_v33  ;;  %v12331_v26 = vadd.f32 %v14633_v32, %v14632_v31  ;;  %v14636_v16 = vld [vmem:[#allocation136_spill] sm:$0xff]  ;;  %v14639_v42 = vld [vmem:[#allocation153_spill] sm:$0xff]  ;;  %v14642_v31 = vld [vmem:[#allocation191_spill] sm:$0xff] }
 0x345   : > { %v12336_v21 = vadd.f32 %v14636_v16, %v14635_v5  ;;  %v14638_v51 = vld [vmem:[#allocation176_spill] sm:$0xff]  ;;  %v14643_v32 = vld [vmem:[#allocation210_spill] sm:$0xff]  ;;  %v14646_v52 = vld [vmem:[#allocation219_spill] sm:$0xff]  ;;  %v7110_v5 = vpop.eup %7109  ;;  %7129 = vrcp.f32 %v4060_v35 }
 0x346   : > { %14631 = vst [vmem:[#allocation214_spill] sm:$0xff] %v12327_v41  ;;  %14634 = vst [vmem:[#allocation79_spill] sm:$0xff] %v12331_v26  ;;  %v12340_v54 = vadd.f32 %v14639_v42, %v14638_v51  ;;  %v14641_v33 = vld [vmem:[#allocation100_spill] sm:$0xff]  ;;  %v12347_v41 = vadd.f32 %v14643_v32, %v14642_v31  ;;  %v7112_v57 = vpop.eup %7111  ;;  %7131 = vpow2.f32 %v12093_v56  ;;  %5036 = vadd.xlane.f32.xlu1 %v11998_v25  ;;  %v14651_v31 = vld [vmem:[#allocation31_spill] sm:$0xff] }
 0x347   : > { %14637 = vst [vmem:[#allocation181_spill] sm:$0xff] %v12336_v21  ;;  %v4537_v58 = vmul.f32 %v7100_v34, %v14641_v33  ;;  %v14645_v7 = vld [vmem:[#allocation32_spill] sm:$0xff]  ;;  %v3901_v34 = vadd.f32 1.0, %v7108_v62  ;;  %v14652_v32 = vld [vmem:[#allocation227_spill] sm:$0xff] }
 0x348   : > { %14640 = vst [vmem:[#allocation163_spill] sm:$0xff] %v12340_v54  ;;  %14644 = vst [vmem:[#allocation145_spill] sm:$0xff] %v12347_v41  ;;  %v12351_v26 = vadd.f32 %v14646_v52, %v14645_v7  ;;  %v14648_v16 = vld [vmem:[#allocation36_spill] sm:$0xff]  ;;  %v12366_v7 = vadd.f32 %v14652_v32, %v14651_v31  ;;  %v7114_v41 = vpop.eup %7113  ;;  %v14657_v35 = vld [vmem:[#allocation159_spill] sm:$0xff] }
 0x349   : > { %v12355_v21 = vmul.f32 %v12148_v55, %v14648_v16  ;;  %v14649_v42 = vld [vmem:[#allocation56_spill] sm:$0xff]  ;;  %v14655_v55 = vld [vmem:[#allocation143_spill] sm:$0xff]  ;;  %7133 = vrcp.f32 %v3901_v34  ;;  %v7116_v25 = vpop.eup %7115 }
 0x34a   : > { %14647 = vst [vmem:[#allocation124_spill] sm:$0xff] %v12351_v26  ;;  %v12359_v51 = vmul.f32 %v12180_v53, %v14649_v42  ;;  %v14650_v33 = vld [vmem:[#allocation76_spill] sm:$0xff]  ;;  %14653 = vst [vmem:[#allocation183_spill] sm:$0xff] %v12366_v7  ;;  %v4061_v53 = vadd.f32 1.0, %v7112_v57  ;;  %v14658_v62 = vld [vmem:[#allocation223_spill] sm:$0xff]  ;;  %v12380_v26 = vpop.permute.xlu1 %1294  ;;  %7135 = vpow2.f32 %v12102_v30  ;;  %v3902_v7 = vadd.f32 1.0, %v7116_v25 }
 0x34b   : > { %v4538_v54 = vmul.f32 %v7110_v5, %v14650_v33  ;;  %v14654_v52 = vld [vmem:[#allocation16_spill] sm:$0xff]  ;;  %v12374_v42 = vadd.f32 %v14658_v62, %v14657_v35  ;;  %v14660_v5 = vld [vmem:[#allocation169_spill] sm:$0xff]  ;;  %v14665_v57 = vld [vmem:[#allocation114_spill] sm:$0xff]  ;;  %v7118_v62 = vpop.eup %7117 }
 0x34c   : > { %v12370_v16 = vadd.f32 %v14655_v55, %v14654_v52  ;;  %v14661_v33 = vld [vmem:[#allocation232_spill] sm:$0xff]  ;;  %v12386_v52 = vpop.xlane.xlu0 %4724  ;;  %7137 = vrcp.f32 %v4061_v53  ;;  %v14671_v30 = vld [vmem:[#allocation170_spill] sm:$0xff] }
 0x34d   : > { %14659 = vst [vmem:[#allocation131_spill] sm:$0xff] %v12374_v42  ;;  %v12378_v56 = vadd.f32 %v14661_v33, %v14660_v5  ;;  %v14663_v31 = vld [vmem:[#allocation44_spill] sm:$0xff]  ;;  %14664 = vst [vmem:[#allocation166_spill] sm:$0xff] %v12386_v52  ;;  %v4924_v34 = vadd.f32 %v4538_v54, %v4537_v58  ;;  %v14668_v42 = vld [vmem:[#allocation221_spill] sm:$0xff]  ;;  %7139 = vpow2.f32 %v12135_v24 }
 0x34e   : > { %14656 = vst [vmem:[#allocation91_spill] sm:$0xff] %v12370_v16  ;;  %v12384_v32 = vmul.f32 %v12210_v28, %v14663_v31  ;;  %v14666_v55 = vld [vmem:[#allocation212_spill] sm:$0xff]  ;;  %v4695_v5 = vmul.f32 %v12250_v10, %v14668_v42  ;;  %v7120_v16 = vpop.eup %7119  ;;  %v14672_v54 = vld [vmem:[#allocation86_spill] sm:$0xff]  ;;  %7141 = vrcp.f32 %v3902_v7  ;;  %v12414_v53 = vpop.xlane.xlu1 %4727  ;;  %v12424_v7 = vadd.f32 %v12162_v17, %v12155_v60  ;;  %v14681_v60 = vld [vmem:[#allocation17_spill] sm:$0xff] }
 0x34f   : > { %14662 = vst [vmem:[#allocation50_spill] sm:$0xff] %v12378_v56  ;;  %v12391_v35 = vadd.f32 %v14666_v55, %v14665_v57  ;;  %v14669_v33 = vld [vmem:[#allocation104_spill] sm:$0xff]  ;;  %4925 = vadd.xlane.f32.xlu0 %v4924_v34  ;;  %v12400_v58 = vadd.f32 %v14672_v54, %v14671_v30  ;;  %v14674_v55 = vld [vmem:[#allocation61_spill] sm:$0xff]  ;;  %v4062_v10 = vadd.f32 1.0, %v7120_v16  ;;  %14675 = vst [vmem:[#allocation95_spill] sm:$0xff] %v12414_v53  ;;  %7143 = vpow2.f32 %v12138_v8 }
 0x350   : > { %v4696_v56 = vmul.f32 %v7098_v1, %v14669_v33  ;;  %v14670_v28 = vld [vmem:[#allocation20_spill] sm:$0xff]  ;;  %v12408_v1 = vadd.f32 %v12010_v23, %v11993_v18  ;;  %v12420_v34 = vadd.f32 %v12127_v14, %v12100_v38  ;;  %v12428_v30 = vpop.xlane.xlu0 %4730  ;;  %v14680_v8 = vld [vmem:[#allocation133_spill] sm:$0xff]  ;;  %v12434_v38 = vadd.f32 %v12222_v27, %v12192_v43 }
 0x351   : > { %14667 = vst [vmem:[#allocation237_spill] sm:$0xff] %v12391_v35  ;;  %v4697_v31 = vmul.f32 %v7106_v50, %v14670_v28  ;;  %v14673_v57 = vld [vmem:[#allocation180_spill] sm:$0xff]  ;;  %v7122_v35 = vpop.eup %7121  ;;  %v12412_v50 = vadd.f32 %v12072_v63, %v12048_v6  ;;  %v14678_v6 = vld [vmem:[#allocation115_spill] sm:$0xff]  ;;  %7145 = vrcp.f32 %v4062_v10  ;;  %14679 = vst [vmem:[#allocation188_spill] sm:$0xff] %v12428_v30  ;;  %v12438_v17 = vadd.f32 %v12231_v22, %v12226_v49 }
 0x352   : > { %v12404_v52 = vadd.f32 %v14674_v55, %v14673_v57  ;;  %v7124_v24 = vpop.eup %7123  ;;  %v14676_v42 = vld [vmem:[#allocation8_spill] sm:$0xff]  ;;  %v4699_v63 = vmul.f32 %v7122_v35, %v14678_v6  ;;  %7147 = vpow2.f32 %v12150_v9  ;;  %v12447_v9 = vadd.f32 %v12274_v4, %v12247_v45  ;;  %v14682_v57 = vld [vmem:[#allocation118_spill] sm:$0xff]  ;;  %v12463_v10 = vpop.xlane.xlu1 %4736  ;;  %v14731_v30 = vld [vmem:[#allocation99_spill] sm:$0xff] }
 0x353   : > { %v4698_v25 = vmul.f32 %v7114_v41, %v14676_v42  ;;  %v7126_v18 = vpop.eup %7125  ;;  %v14677_v23 = vld [vmem:[#allocation228_spill] sm:$0xff]  ;;  %v3903_v33 = vadd.f32 1.0, %v7124_v24  ;;  %5039 = vadd.xlane.f32.xlu0 %v14680_v8  ;;  %v12452_v22 = vadd.f32 %v12303_v61, %v12278_v20  ;;  %v12456_v27 = vadd.f32 %v12316_v11, %v12312_v12  ;;  %14684 = vst [vmem:[#allocation164_spill] sm:$0xff] %v12463_v10 }
 0x354   : > { %v4539_v16 = vmul.f32 %v7118_v62, %v14677_v23  ;;  %v7128_v28 = vpop.eup %7127  ;;  %v4063_v41 = vadd.f32 1.0, %v7126_v18  ;;  %v12443_v62 = vadd.f32 %v12243_v3, %v12239_v13  ;;  %v14683_v13 = vld [vmem:[#allocation161_spill] sm:$0xff]  ;;  %v3109_v20 = vsub.f32 0.0, %v12198_v44 }
 0x355   : > { %v7130_v14 = vpop.eup %7129  ;;  %v4540_v35 = vmul.f32 %v7128_v28, %v14681_v60  ;;  %7149 = vrcp.f32 %v3903_v33  ;;  %v12461_v3 = vadd.f32 %v14683_v13, %v12182_v2  ;;  %v2950_v61 = vsub.f32 0.0, %v12203_v46  ;;  %v14686_v18 = vld [vmem:[#allocation233_spill] sm:$0xff] }
 0x356   : > { %v7132_v54 = vpop.eup %7131  ;;  %v4700_v43 = vmul.f32 %v7130_v14, %v14682_v57  ;;  %7151 = vrcp.f32 %v4063_v41  ;;  %v12470_v12 = vadd.f32 %v12355_v21, %v12320_v19  ;;  %v12474_v2 = vadd.f32 %v12384_v32, %v12359_v51  ;;  %v14688_v32 = vld [vmem:[#allocation71_spill] sm:$0xff]  ;;  %v14691_v14 = vld [vmem:[#allocation53_spill] sm:$0xff] }
 0x357   : > { %v7134_v49 = vpop.eup %7133  ;;  %v3904_v55 = vadd.f32 1.0, %v7132_v54  ;;  %7153 = vpow2.f32 %v12158_v47  ;;  %v4927_v45 = vadd.f32 %v4540_v35, %v4539_v16  ;;  %v12476_v24 = vadd.f32 %v4696_v56, %v4695_v5  ;;  %v14689_v56 = vld [vmem:[#allocation226_spill] sm:$0xff]  ;;  %v14690_v41 = vld [vmem:[#allocation39_spill] sm:$0xff]  ;;  %v14692_v35 = vld [vmem:[#allocation217_spill] sm:$0xff] }
 0x358   : > { %v7136_v4 = vpop.eup %7135  ;;  %7155 = vpow2.f32 %v12166_v15  ;;  %v12478_v15 = vpop.xlane.xlu0 %4733  ;;  %v4541_v23 = vmul.f32 %v7134_v49, %v14686_v18  ;;  %v12482_v16 = vadd.f32 %v4698_v25, %v4697_v31  ;;  %v12484_v19 = vadd.f32 %v4700_v43, %v4699_v63  ;;  %v14693_v57 = vld [vmem:[#allocation23_spill] sm:$0xff] }
 0x359   : > { %v7138_v11 = vpop.eup %7137  ;;  %7157 = vrcp.f32 %v3904_v55  ;;  %v4064_v47 = vadd.f32 1.0, %v7136_v4  ;;  %4928 = vadd.xlane.f32.xlu1 %v4927_v45  ;;  %14685 = vst [vmem:[#allocation78_spill] sm:$0xff] %v12478_v15  ;;  %v14687_v33 = vsub.f32 0.0, %v12178_v36  ;;  %v12490_v5 = vadd.f32 %v14689_v56, %v14688_v32  ;;  %v12501_v49 = vpop.xlane.xlu1 %4742  ;;  %v14695_v55 = vld [vmem:[#allocation77_spill] sm:$0xff]  ;;  %v14696_v45 = vld [vmem:[#allocation48_spill] sm:$0xff] }
 0x35a   : > { %v7140_v42 = vpop.eup %7139  ;;  %7159 = vpow2.f32 %v12168_v29  ;;  %v4701_v8 = vmul.f32 %v7138_v11, %v14690_v41  ;;  %v3735_v29 = vmul.f32 1.442695, %v3109_v20  ;;  %v3110_v63 = vsub.f32 0.0, %v12461_v3  ;;  %14694 = vst [vmem:[#allocation144_spill] sm:$0xff] %v12501_v49 }
 0x35b   : > { %v7142_v21 = vpop.eup %7141  ;;  %7161 = vrcp.f32 %v4064_v47  ;;  %v3905_v6 = vadd.f32 1.0, %v7140_v42  ;;  %v3415_v51 = vmul.f32 1.442695, %v14687_v33  ;;  %v12498_v54 = vadd.f32 %v14692_v35, %v12218_v59 }
 0x35c   : > { %v7144_v28 = vpop.eup %7143  ;;  %v4542_v60 = vmul.f32 %v7142_v21, %v14691_v14  ;;  %7163 = vpow2.f32 %v12174_v37  ;;  %v14697_v37 = vld [vmem:[#allocation35_spill] sm:$0xff]  ;;  %v3417_v42 = vmul.f32 1.442695, %v2950_v61  ;;  %v2951_v18 = vsub.f32 0.0, %v12490_v5  ;;  %v14701_v61 = vld [vmem:[#allocation178_spill] sm:$0xff] }
 0x35d   : > { %v7146_v31 = vpop.eup %7145  ;;  %7165 = vrcp.f32 %v3905_v6  ;;  %v4065_v25 = vadd.f32 1.0, %v7144_v28  ;;  %5042 = vadd.xlane.f32.xlu1 %v14693_v57  ;;  %v12507_v4 = vadd.f32 %v14697_v37, %v14688_v32  ;;  %v12510_v6 = vpop.xlane.xlu0 %4739  ;;  %v3737_v28 = vmul.f32 1.442695, %v3110_v63  ;;  %v14702_v57 = vld [vmem:[#allocation70_spill] sm:$0xff]  ;;  %v14706_v37 = vld [vmem:[#allocation132_spill] sm:$0xff] }
 0x35e   : > { %v7148_v43 = vpop.eup %7147  ;;  %v4702_v13 = vmul.f32 %v7146_v31, %v14695_v55  ;;  %7167 = vpow2.f32 %v14696_v45  ;;  %v4930_v20 = vadd.f32 %v4542_v60, %v4541_v23  ;;  %14698 = vst [vmem:[#allocation196_spill] sm:$0xff] %v12510_v6  ;;  %v3111_v32 = vsub.f32 0.0, %v12498_v54  ;;  %v14700_v23 = vld [vmem:[#allocation173_spill] sm:$0xff] }
 0x35f   : > { %v7150_v11 = vpop.eup %7149  ;;  %7169 = vrcp.f32 %v4065_v25  ;;  %v3906_v47 = vadd.f32 1.0, %v7148_v43  ;;  %v12517_v41 = vadd.f32 %v14700_v23, %v12218_v59  ;;  %v2952_v25 = vsub.f32 0.0, %v12507_v4  ;;  %v14703_v43 = vld [vmem:[#allocation109_spill] sm:$0xff]  ;;  %v14705_v59 = vld [vmem:[#allocation60_spill] sm:$0xff] }
 0x360   : > { %v7152_v21 = vpop.eup %7151  ;;  %7171 = vpow2.f32 %v3415_v51  ;;  %4931 = vadd.xlane.f32.xlu0 %v4930_v20  ;;  %v12512_v33 = vadd.f32 %v4702_v13, %v4701_v8  ;;  %v4543_v60 = vmul.f32 %v7150_v11, %v14701_v61  ;;  %v3419_v8 = vmul.f32 1.442695, %v2951_v18  ;;  %v12525_v13 = vpop.xlane.xlu1 %4748  ;;  %v14710_v61 = vld [vmem:[#allocation89_spill] sm:$0xff] }
 0x361   : > { %v7154_v56 = vpop.eup %7153  ;;  %7173 = vrcp.f32 %v3906_v47  ;;  %v12523_v63 = vadd.f32 %v14703_v43, %v14702_v57  ;;  %14704 = vst [vmem:[#allocation138_spill] sm:$0xff] %v12525_v13  ;;  %v4703_v45 = vmul.f32 %v7152_v21, %v14705_v59  ;;  %v14708_v47 = vld [vmem:[#allocation211_spill] sm:$0xff]  ;;  %v3112_v21 = vsub.f32 0.0, %v12517_v41 }
 0x362   : > { %14699 = vst [vmem:[#allocation55_spill] sm:$0xff] %v12512_v33  ;;  %v7156_v14 = vpop.eup %7155  ;;  %v4066_v31 = vadd.f32 1.0, %v7154_v56  ;;  %7175 = vpow2.f32 %v3735_v29  ;;  %v14707_v29 = vld [vmem:[#allocation38_spill] sm:$0xff]  ;;  %v3739_v56 = vmul.f32 1.442695, %v3111_v32  ;;  %v14711_v32 = vld [vmem:[#allocation200_spill] sm:$0xff] }
 0x363   : > { %v7158_v51 = vpop.eup %7157  ;;  %v3907_v35 = vadd.f32 1.0, %v7156_v14  ;;  %7177 = vpow2.f32 %v3417_v42  ;;  %v12531_v11 = vadd.f32 %v14707_v29, %v12260_v40  ;;  %v12534_v14 = vpop.xlane.xlu0 %4745  ;;  %v2953_v29 = vsub.f32 0.0, %v12523_v63 }
 0x364   : > { %v7160_v55 = vpop.eup %7159  ;;  %v4544_v20 = vmul.f32 %v7158_v51, %v14706_v37  ;;  %7179 = vrcp.f32 %v4066_v31  ;;  %5045 = vadd.xlane.f32.xlu0 %v14708_v47  ;;  %14709 = vst [vmem:[#allocation146_spill] sm:$0xff] %v12534_v14  ;;  %v3421_v37 = vmul.f32 1.442695, %v2952_v25  ;;  %v14713_v25 = vld [vmem:[#allocation87_spill] sm:$0xff] }
 0x365   : > { %v7162_v42 = vpop.eup %7161  ;;  %7181 = vrcp.f32 %v3907_v35  ;;  %v4067_v18 = vadd.f32 1.0, %v7160_v55  ;;  %v3113_v35 = vsub.f32 0.0, %v12531_v11  ;;  %v12542_v55 = vadd.f32 %v14711_v32, %v14702_v57 }
 0x366   : > { %v7164_v23 = vpop.eup %7163  ;;  %v4704_v43 = vmul.f32 %v7162_v42, %v14710_v61  ;;  %7183 = vpow2.f32 %v3737_v28  ;;  %v4933_v51 = vadd.f32 %v4544_v20, %v4543_v60  ;;  %v3741_v61 = vmul.f32 1.442695, %v3112_v21 }
 0x367   : > { %v7166_v31 = vpop.eup %7165  ;;  %7185 = vrcp.f32 %v4067_v18  ;;  %v3908_v59 = vadd.f32 1.0, %v7164_v23  ;;  %v12546_v18 = vpop.xlane.xlu1 %4754  ;;  %v2954_v21 = vsub.f32 0.0, %v12542_v55 }
 0x368   : > { %v7168_v47 = vpop.eup %7167  ;;  %7187 = vpow2.f32 %v3419_v8  ;;  %4934 = vadd.xlane.f32.xlu1 %v4933_v51  ;;  %v12544_v42 = vadd.f32 %v4704_v43, %v4703_v45  ;;  %14712 = vst [vmem:[#allocation160_spill] sm:$0xff] %v12546_v18  ;;  %v4545_v23 = vmul.f32 %v7166_v31, %v14713_v25  ;;  %v14714_v8 = vld [vmem:[#allocation108_spill] sm:$0xff]  ;;  %v3423_v51 = vmul.f32 1.442695, %v2953_v29  ;;  %v14715_v45 = vld [vmem:[#allocation75_spill] sm:$0xff]  ;;  %v14718_v18 = vld [vmem:[#allocation85_spill] sm:$0xff] }
 0x369   : > { %v7170_v28 = vpop.eup %7169  ;;  %7189 = vrcp.f32 %v3908_v59  ;;  %v4068_v60 = vadd.f32 1.0, %v7168_v47  ;;  %v12551_v13 = vadd.f32 %v14714_v8, %v12260_v40  ;;  %v14716_v43 = vld [vmem:[#allocation140_spill] sm:$0xff]  ;;  %v12557_v47 = vpop.xlane.xlu0 %4751  ;;  %v14722_v8 = vld [vmem:[#allocation37_spill] sm:$0xff] }
 0x36a   : > { %v7172_v20 = vpop.eup %7171  ;;  %7191 = vpow2.f32 %v3739_v56  ;;  %v12555_v32 = vadd.f32 %v14716_v43, %v14715_v45  ;;  %14717 = vst [vmem:[#allocation93_spill] sm:$0xff] %v12557_v47  ;;  %v3743_v56 = vmul.f32 1.442695, %v3113_v35  ;;  %v14719_v31 = vld [vmem:[#allocation224_spill] sm:$0xff] }
 0x36b   : > { %v7174_v14 = vpop.eup %7173  ;;  %7193 = vrcp.f32 %v4068_v60  ;;  %v3909_v57 = vadd.f32 1.0, %v7172_v20  ;;  %v14720_v25 = vld [vmem:[#allocation4_spill] sm:$0xff]  ;;  %v14721_v20 = vld [vmem:[#allocation201_spill] sm:$0xff] }
 0x36c   : > { %v7176_v59 = vpop.eup %7175  ;;  %v4546_v49 = vmul.f32 %v7174_v14, %v14718_v18  ;;  %7195 = vpow2.f32 %v3421_v37  ;;  %5048 = vadd.xlane.f32.xlu1 %v14719_v31  ;;  %v4705_v60 = vmul.f32 %v7170_v28, %v14720_v25  ;;  %v12565_v43 = vadd.f32 %v14722_v8, %v14721_v20  ;;  %v14723_v18 = vld [vmem:[#allocation42_spill] sm:$0xff]  ;;  %v14724_v28 = vld [vmem:[#allocation172_spill] sm:$0xff]  ;;  %v12574_v25 = vpop.xlane.xlu1 %4760 }
 0x36d   : > { %v7178_v40 = vpop.eup %7177  ;;  %7197 = vrcp.f32 %v3909_v57  ;;  %v4069_v29 = vadd.f32 1.0, %v7176_v59  ;;  %v3114_v14 = vsub.f32 0.0, %v12551_v13  ;;  %v2955_v31 = vsub.f32 0.0, %v12555_v32  ;;  %14725 = vst [vmem:[#allocation88_spill] sm:$0xff] %v12574_v25 }
 0x36e   : > { %v7180_v6 = vpop.eup %7179  ;;  %v3910_v10 = vadd.f32 1.0, %v7178_v40  ;;  %7199 = vpow2.f32 %v3741_v61  ;;  %v4936_v37 = vadd.f32 %v4546_v49, %v4545_v23  ;;  %v12572_v57 = vadd.f32 %v14724_v28, %v14715_v45  ;;  %v14726_v61 = vld [vmem:[#allocation90_spill] sm:$0xff]  ;;  %v12583_v45 = vpop.xlane.xlu0 %4757 }
 0x36f   : > { %v7182_v35 = vpop.eup %7181  ;;  %v4706_v47 = vmul.f32 %v7180_v6, %v14723_v18  ;;  %7201 = vrcp.f32 %v4069_v29  ;;  %v3425_v8 = vmul.f32 1.442695, %v2954_v21  ;;  %v12578_v40 = vadd.f32 %v14726_v61, %v14721_v20  ;;  %14728 = vst [vmem:[#allocation105_spill] sm:$0xff] %v12583_v45  ;;  %v14729_v28 = vld [vmem:[#allocation194_spill] sm:$0xff]  ;;  %v14734_v45 = vld [vmem:[#allocation47_spill] sm:$0xff] }
 0x370   : > { %v7184_v59 = vpop.eup %7183  ;;  %7203 = vrcp.f32 %v3910_v10  ;;  %4937 = vadd.xlane.f32.xlu0 %v4936_v37  ;;  %v3115_v6 = vsub.f32 0.0, %v12565_v43  ;;  %v4547_v15 = vmul.f32 %v7182_v35, %v14729_v28  ;;  %v3745_v10 = vmul.f32 1.442695, %v3114_v14  ;;  %v12596_v33 = vpop.xlane.xlu1 %4766 }
 0x371   : > { %v7186_v49 = vpop.eup %7185  ;;  %v4070_v23 = vadd.f32 1.0, %v7184_v59  ;;  %7205 = vpow2.f32 %v3423_v51  ;;  %v12581_v29 = vadd.f32 %v4706_v47, %v4705_v60  ;;  %v3427_v20 = vmul.f32 1.442695, %v2955_v31  ;;  %v14730_v59 = vld [vmem:[#allocation98_spill] sm:$0xff]  ;;  %v14733_v60 = vld [vmem:[#allocation40_spill] sm:$0xff]  ;;  %14736 = vst [vmem:[#allocation67_spill] sm:$0xff] %v12596_v33 }
 0x372   : > { %v7188_v18 = vpop.eup %7187  ;;  %7207 = vpow2.f32 %v3743_v56  ;;  %v2956_v37 = vsub.f32 0.0, %v12572_v57  ;;  %v4707_v51 = vmul.f32 %v7186_v49, %v14730_v59  ;;  %v14732_v47 = vld [vmem:[#allocation74_spill] sm:$0xff]  ;;  %v3747_v35 = vmul.f32 1.442695, %v3115_v6  ;;  %v12606_v59 = vpop.xlane.xlu0 %4763 }
 0x373   : > { %14727 = vst [vmem:[#allocation28_spill] sm:$0xff] %v12581_v29  ;;  %v7190_v21 = vpop.eup %7189  ;;  %7209 = vrcp.f32 %v4070_v23  ;;  %v3911_v25 = vadd.f32 1.0, %v7188_v18  ;;  %v12591_v29 = vadd.f32 %v14733_v60, %v14732_v47  ;;  %v3116_v31 = vsub.f32 0.0, %v12578_v40  ;;  %v14735_v18 = vld [vmem:[#allocation126_spill] sm:$0xff]  ;;  %14739 = vst [vmem:[#allocation148_spill] sm:$0xff] %v12606_v59 }
 0x374   : > { %v7192_v61 = vpop.eup %7191  ;;  %v4548_v53 = vmul.f32 %v7190_v21, %v14731_v30  ;;  %7211 = vpow2.f32 %v3425_v8  ;;  %5051 = vadd.xlane.f32.xlu0 %v14734_v45  ;;  %v14737_v30 = vld [vmem:[#allocation57_spill] sm:$0xff]  ;;  %v3429_v60 = vmul.f32 1.442695, %v2956_v37 }
 0x375   : > { %v7194_v56 = vpop.eup %7193  ;;  %7213 = vrcp.f32 %v3911_v25  ;;  %v4071_v14 = vadd.f32 1.0, %v7192_v61  ;;  %v12600_v8 = vadd.f32 %v14737_v30, %v12322_v48  ;;  %v14738_v25 = vld [vmem:[#allocation179_spill] sm:$0xff]  ;;  %v14741_v30 = vld [vmem:[#allocation21_spill] sm:$0xff] }
 0x376   : > { %v7196_v23 = vpop.eup %7195  ;;  %v4708_v28 = vmul.f32 %v7194_v56, %v14735_v18  ;;  %7215 = vpow2.f32 %v3745_v10  ;;  %v4939_v49 = vadd.f32 %v4548_v53, %v4547_v15  ;;  %v12604_v61 = vadd.f32 %v14738_v25, %v14732_v47 }
 0x377   : > { %v7198_v21 = vpop.eup %7197  ;;  %7217 = vrcp.f32 %v4071_v14  ;;  %v3912_v45 = vadd.f32 1.0, %v7196_v23  ;;  %v2957_v56 = vsub.f32 0.0, %v12591_v29  ;;  %v3749_v14 = vmul.f32 1.442695, %v3116_v31 }
 0x378   : > { %v7200_v6 = vpop.eup %7199  ;;  %7219 = vpow2.f32 %v3427_v20  ;;  %4940 = vadd.xlane.f32.xlu1 %v4939_v49  ;;  %v12609_v10 = vadd.f32 %v4708_v28, %v4707_v51  ;;  %v4549_v53 = vmul.f32 %v7198_v21, %v12178_v36  ;;  %v3117_v47 = vsub.f32 0.0, %v12600_v8  ;;  %v14742_v28 = vld [vmem:[#allocation82_spill] sm:$0xff]  ;;  %v14743_v49 = vld [vmem:[#allocation235_spill] sm:$0xff] }
 0x379   : > { %v7202_v18 = vpop.eup %7201  ;;  %7221 = vrcp.f32 %v3912_v45  ;;  %v4072_v15 = vadd.f32 1.0, %v7200_v6  ;;  %v12615_v25 = vadd.f32 %v14741_v30, %v12322_v48  ;;  %v2958_v51 = vsub.f32 0.0, %v12604_v61  ;;  %v14744_v48 = vld [vmem:[#allocation165_spill] sm:$0xff] }
 0x37a   : > { %14740 = vst [vmem:[#allocation27_spill] sm:$0xff] %v12609_v10  ;;  %v7204_v23 = vpop.eup %7203  ;;  %7223 = vpow2.f32 %v3747_v35  ;;  %v12621_v36 = vadd.f32 %v14743_v49, %v14742_v28  ;;  %v4709_v31 = vmul.f32 %v7202_v18, %v12198_v44  ;;  %v12624_v35 = vpop.xlane.xlu1 %4772  ;;  %v3431_v6 = vmul.f32 1.442695, %v2957_v56 }
 0x37b   : > { %v7206_v20 = vpop.eup %7205  ;;  %v4550_v37 = vmul.f32 %v7204_v23, %v12203_v46  ;;  %7225 = vrcp.f32 %v4072_v15  ;;  %v14745_v46 = vld [vmem:[#allocation154_spill] sm:$0xff]  ;;  %v12632_v10 = vpop.xlane.xlu0 %4769  ;;  %v3751_v44 = vmul.f32 1.442695, %v3117_v47 }
 0x37c   : > { %v7208_v21 = vpop.eup %7207  ;;  %v3913_v45 = vadd.f32 1.0, %v7206_v20  ;;  %7227 = vpow2.f32 %v3429_v60  ;;  %5054 = vadd.xlane.f32.xlu1 %v14744_v48  ;;  %v12629_v15 = vadd.f32 %v14745_v46, %v12342_v0  ;;  %14746 = vst [vmem:[#allocation54_spill] sm:$0xff] %v12632_v10  ;;  %v3118_v60 = vsub.f32 0.0, %v12615_v25 }
 0x37d   : > { %v7210_v30 = vpop.eup %7209  ;;  %v4073_v33 = vadd.f32 1.0, %v7208_v21  ;;  %7229 = vpow2.f32 %v3749_v14  ;;  %v4942_v23 = vadd.f32 %v4550_v37, %v4549_v53  ;;  %v2959_v20 = vsub.f32 0.0, %v12621_v36  ;;  %v14747_v14 = vld [vmem:[#allocation208_spill] sm:$0xff] }
 0x37e   : > { %v7212_v49 = vpop.eup %7211  ;;  %v4710_v59 = vmul.f32 %v7210_v30, %v12461_v3  ;;  %7231 = vrcp.f32 %v3913_v45  ;;  %v12638_v21 = vadd.f32 %v14747_v14, %v14742_v28  ;;  %v3433_v37 = vmul.f32 1.442695, %v2958_v51  ;;  %v12644_v46 = vpop.xlane.xlu1 %4778  ;;  %v14749_v28 = vld [vmem:[#allocation43_spill] sm:$0xff] }
 0x37f   : > { %v7214_v56 = vpop.eup %7213  ;;  %7233 = vrcp.f32 %v4073_v33  ;;  %v3914_v18 = vadd.f32 1.0, %v7212_v49  ;;  %4943 = vadd.xlane.f32.xlu0 %v4942_v23  ;;  %v3119_v45 = vsub.f32 0.0, %v12629_v15  ;;  %14748 = vst [vmem:[#allocation96_spill] sm:$0xff] %v12644_v46  ;;  %v3753_v49 = vmul.f32 1.442695, %v3118_v60  ;;  %v14753_v60 = vld [vmem:[#allocation83_spill] sm:$0xff] }
 0x380   : > { %v7216_v53 = vpop.eup %7215  ;;  %7235 = vpow2.f32 %v3431_v6  ;;  %v12640_v3 = vadd.f32 %v4710_v59, %v4709_v31  ;;  %v4551_v33 = vmul.f32 %v7214_v56, %v12490_v5  ;;  %v12648_v23 = vadd.f32 %v14749_v28, %v12342_v0  ;;  %v12654_v56 = vpop.xlane.xlu0 %4775  ;;  %v14755_v46 = vld [vmem:[#allocation187_spill] sm:$0xff] }
 0x381   : > { %v7218_v48 = vpop.eup %7217  ;;  %7237 = vrcp.f32 %v3914_v18  ;;  %v4074_v47 = vadd.f32 1.0, %v7216_v53  ;;  %v3435_v51 = vmul.f32 1.442695, %v2959_v20  ;;  %v2960_v31 = vsub.f32 0.0, %v12638_v21  ;;  %v14750_v18 = vld [vmem:[#allocation134_spill] sm:$0xff]  ;;  %14751 = vst [vmem:[#allocation151_spill] sm:$0xff] %v12654_v56 }
 0x382   : > { %v7220_v30 = vpop.eup %7219  ;;  %7239 = vpow2.f32 %v3751_v44  ;;  %v4711_v53 = vmul.f32 %v7218_v48, %v12498_v54  ;;  %v14752_v44 = vld [vmem:[#allocation81_spill] sm:$0xff]  ;;  %v3755_v20 = vmul.f32 1.442695, %v3119_v45 }
 0x383   : > { %v7222_v6 = vpop.eup %7221  ;;  %7241 = vrcp.f32 %v4074_v47  ;;  %v3915_v59 = vadd.f32 1.0, %v7220_v30  ;;  %5057 = vadd.xlane.f32.xlu0 %v14750_v18  ;;  %v12658_v0 = vadd.f32 %v14753_v60, %v14752_v44  ;;  %v14754_v30 = vld [vmem:[#allocation80_spill] sm:$0xff]  ;;  %v3437_v60 = vmul.f32 1.442695, %v2960_v31 }
 0x384   : > { %v7224_v14 = vpop.eup %7223  ;;  %v4552_v5 = vmul.f32 %v7222_v6, %v12507_v4  ;;  %7243 = vpow2.f32 %v3433_v37  ;;  %v12662_v10 = vadd.f32 %v14754_v30, %v12380_v26  ;;  %v3120_v4 = vsub.f32 0.0, %v12648_v23 }
 0x385   : > { %v7226_v28 = vpop.eup %7225  ;;  %7245 = vrcp.f32 %v3915_v59  ;;  %v4075_v47 = vadd.f32 1.0, %v7224_v14  ;;  %v12668_v59 = vadd.f32 %v14755_v46, %v14752_v44  ;;  %v12670_v14 = vpop.xlane.xlu1 %4784  ;;  %v2961_v56 = vsub.f32 0.0, %v12658_v0  ;;  %v14757_v44 = vld [vmem:[#allocation92_spill] sm:$0xff] }
 0x386   : > { %v7228_v18 = vpop.eup %7227  ;;  %v4712_v54 = vmul.f32 %v7226_v28, %v12517_v41  ;;  %7247 = vpow2.f32 %v3753_v49  ;;  %v4945_v48 = vadd.f32 %v4552_v5, %v4551_v33  ;;  %14756 = vst [vmem:[#allocation203_spill] sm:$0xff] %v12670_v14  ;;  %v3121_v33 = vsub.f32 0.0, %v12662_v10  ;;  %v12677_v28 = vpop.xlane.xlu0 %4781 }
 0x387   : > { %v7230_v37 = vpop.eup %7229  ;;  %7249 = vrcp.f32 %v4075_v47  ;;  %v3916_v6 = vadd.f32 1.0, %v7228_v18  ;;  %v3757_v46 = vmul.f32 1.442695, %v3120_v4  ;;  %v12681_v47 = vadd.f32 %v14757_v44, %v12380_v26 }
 0x388   : > { %v7232_v45 = vpop.eup %7231  ;;  %v4076_v30 = vadd.f32 1.0, %v7230_v37  ;;  %7251 = vpow2.f32 %v3435_v51  ;;  %4946 = vadd.xlane.f32.xlu1 %v4945_v48  ;;  %v12673_v41 = vadd.f32 %v4712_v54, %v4711_v53  ;;  %v2962_v53 = vsub.f32 0.0, %v12668_v59 }
 0x389   : > { %v7234_v49 = vpop.eup %7233  ;;  %7253 = vrcp.f32 %v3916_v6  ;;  %v4553_v31 = vmul.f32 %v7232_v45, %v12523_v63  ;;  %v3439_v63 = vmul.f32 1.442695, %v2961_v56  ;;  %v14758_v6 = vld [vmem:[#allocation177_spill] sm:$0xff] }
 0x38a   : > { %v7236_v5 = vpop.eup %7235  ;;  %7255 = vrcp.f32 %v4076_v30  ;;  %v4713_v48 = vmul.f32 %v7234_v49, %v12531_v11  ;;  %v3759_v30 = vmul.f32 1.442695, %v3121_v33  ;;  %v12691_v56 = vpop.xlane.xlu0 %4787  ;;  %v3441_v49 = vmul.f32 1.442695, %v2962_v53 }
 0x38b   : > { %v7238_v51 = vpop.eup %7237  ;;  %v3917_v18 = vadd.f32 1.0, %v7236_v5  ;;  %7257 = vpow2.f32 %v3755_v20  ;;  %v12688_v5 = vpop.xlane.xlu1 %4790  ;;  %v3122_v20 = vsub.f32 0.0, %v12681_v47 }
 0x38c   : > { %v7240_v54 = vpop.eup %7239  ;;  %v4554_v37 = vmul.f32 %v7238_v51, %v12542_v55  ;;  %7259 = vpow2.f32 %v3437_v60  ;;  %5060 = vadd.xlane.f32.xlu1 %v14758_v6 }
 0x38d   : > { %v7242_v45 = vpop.eup %7241  ;;  %7261 = vrcp.f32 %v3917_v18  ;;  %v4077_v4 = vadd.f32 1.0, %v7240_v54  ;;  %v3761_v54 = vmul.f32 1.442695, %v3122_v20 }
 0x38e   : > { %v7244_v26 = vpop.eup %7243  ;;  %v4714_v44 = vmul.f32 %v7242_v45, %v12551_v13  ;;  %7263 = vpow2.f32 %v3757_v46  ;;  %v4948_v14 = vadd.f32 %v4554_v37, %v4553_v31 }
 0x38f   : > { %v7246_v11 = vpop.eup %7245  ;;  %7265 = vrcp.f32 %v4077_v4  ;;  %v3918_v55 = vadd.f32 1.0, %v7244_v26  ;;  %v12698_v53 = vpop.xlane.xlu1 %4796 }
 0x390   : > { %v7248_v60 = vpop.eup %7247  ;;  %7267 = vpow2.f32 %v3439_v63  ;;  %4949 = vadd.xlane.f32.xlu0 %v4948_v14  ;;  %v12693_v51 = vadd.f32 %v4714_v44, %v4713_v48  ;;  %v4555_v46 = vmul.f32 %v7246_v11, %v12555_v32  ;;  %v14759_v14 = vld [vmem:[#allocation49_spill] sm:$0xff] }
 0x391   : > { %v7250_v33 = vpop.eup %7249  ;;  %7269 = vrcp.f32 %v3918_v55  ;;  %v4078_v13 = vadd.f32 1.0, %v7248_v60 }
 0x392   : > { %v7252_v18 = vpop.eup %7251  ;;  %7271 = vpow2.f32 %v3759_v30  ;;  %v4715_v37 = vmul.f32 %v7250_v33, %v12565_v43  ;;  %v12702_v30 = vpop.xlane.xlu0 %4793 }
 0x393   : > { %v7254_v31 = vpop.eup %7253  ;;  %7273 = vrcp.f32 %v4078_v13  ;;  %v3919_v6 = vadd.f32 1.0, %v7252_v18  ;;  %v12707_v33 = vpop.xlane.xlu1 %4802 }
 0x394   : > { %v7256_v45 = vpop.eup %7255  ;;  %v4556_v63 = vmul.f32 %v7254_v31, %v12572_v57  ;;  %7275 = vpow2.f32 %v3441_v49  ;;  %5063 = vadd.xlane.f32.xlu0 %v14759_v14 }
 0x395   : > { %v7258_v48 = vpop.eup %7257  ;;  %v4716_v4 = vmul.f32 %v7256_v45, %v12578_v40  ;;  %7277 = vrcp.f32 %v3919_v6  ;;  %v14760_v6 = vld [vmem:[#allocation46_spill] sm:$0xff] }
 0x396   : > { %v7260_v32 = vpop.eup %7259  ;;  %v4079_v26 = vadd.f32 1.0, %v7258_v48  ;;  %7279 = vpow2.f32 %v3761_v54  ;;  %v4951_v43 = vadd.f32 %v4556_v63, %v4555_v46 }
 0x397   : > { %v7262_v44 = vpop.eup %7261  ;;  %v3920_v20 = vadd.f32 1.0, %v7260_v32  ;;  %v12704_v11 = vadd.f32 %v4716_v4, %v4715_v37  ;;  %v12711_v37 = vpop.xlane.xlu0 %4799 }
 0x398   : > { %v7264_v57 = vpop.eup %7263  ;;  %7281 = vrcp.f32 %v4079_v26  ;;  %4952 = vadd.xlane.f32.xlu1 %v4951_v43  ;;  %v4557_v40 = vmul.f32 %v7262_v44, %v12591_v29  ;;  %v12715_v43 = vpop.xlane.xlu1 %4808 }
 0x399   : > { %v7266_v55 = vpop.eup %7265  ;;  %7283 = vrcp.f32 %v3920_v20  ;;  %v4080_v60 = vadd.f32 1.0, %v7264_v57 }
 0x39a   : > { %v7268_v49 = vpop.eup %7267  ;;  %v4717_v46 = vmul.f32 %v7266_v55, %v12600_v8 }
 0x39b   : > { %v7270_v13 = vpop.eup %7269  ;;  %7285 = vrcp.f32 %v4080_v60  ;;  %v3921_v18 = vadd.f32 1.0, %v7268_v49  ;;  %v12720_v57 = vpop.xlane.xlu0 %4805  ;;  %v14761_v49 = vld [vmem:[#allocation216_spill] sm:$0xff] }
 0x39c   : > { %v7272_v54 = vpop.eup %7271  ;;  %v4558_v31 = vmul.f32 %v7270_v13, %v12604_v61  ;;  %5066 = vadd.xlane.f32.xlu1 %v14760_v6 }
 0x39d   : > { %v7274_v45 = vpop.eup %7273  ;;  %7287 = vrcp.f32 %v3921_v18  ;;  %v4081_v63 = vadd.f32 1.0, %v7272_v54  ;;  %v12726_v18 = vpop.xlane.xlu1 %4814 }
 0x39e   : > { %v7276_v14 = vpop.eup %7275  ;;  %v4718_v29 = vmul.f32 %v7274_v45, %v12615_v25  ;;  %v4954_v48 = vadd.f32 %v4558_v31, %v4557_v40 }
 0x39f   : > { %v7278_v4 = vpop.eup %7277  ;;  %7289 = vrcp.f32 %v4081_v63  ;;  %v3922_v32 = vadd.f32 1.0, %v7276_v14  ;;  %v12728_v31 = vpop.xlane.xlu0 %4811 }
 0x3a0   : > { %v7280_v26 = vpop.eup %7279  ;;  %4955 = vadd.xlane.f32.xlu0 %v4954_v48  ;;  %v12717_v8 = vadd.f32 %v4718_v29, %v4717_v46  ;;  %v4559_v20 = vmul.f32 %v7278_v4, %v12621_v36 }
 0x3a1   : > { %7291 = vrcp.f32 %v3922_v32  ;;  %v4082_v61 = vadd.f32 1.0, %v7280_v26  ;;  %v12735_v14 = vpop.xlane.xlu1 %4820  ;;  %v14762_v32 = vld [vmem:[#allocation110_spill] sm:$0xff] }
 0x3a2   : > { %v7282_v44 = vpop.eup %7281 }
 0x3a3   : > { %v7284_v55 = vpop.eup %7283  ;;  %7293 = vrcp.f32 %v4082_v61  ;;  %v4719_v25 = vmul.f32 %v7282_v44, %v12629_v15  ;;  %v12739_v48 = vpop.xlane.xlu0 %4817  ;;  %v14764_v61 = vld [vmem:[#allocation51_spill] sm:$0xff]  ;;  %v14765_v44 = vld [vmem:[#allocation24_spill] sm:$0xff] }
 0x3a4   : > { %v4560_v60 = vmul.f32 %v7284_v55, %v12638_v21  ;;  %5069 = vadd.xlane.f32.xlu0 %v14761_v49  ;;  %v14767_v55 = vld [vmem:[#allocation214_spill] sm:$0xff] }
 0x3a5   : > { %v7286_v40 = vpop.eup %7285 }
 0x3a6   : > { %v4720_v13 = vmul.f32 %v7286_v40, %v12648_v23  ;;  %v4957_v54 = vadd.f32 %v4560_v60, %v4559_v20  ;;  %v14769_v40 = vld [vmem:[#allocation181_spill] sm:$0xff] }
 0x3a7   : > { %v7288_v46 = vpop.eup %7287 }
 0x3a8   : > { %4958 = vadd.xlane.f32.xlu1 %v4957_v54  ;;  %v12730_v36 = vadd.f32 %v4720_v13, %v4719_v25  ;;  %v4561_v45 = vmul.f32 %v7288_v46, %v12658_v0  ;;  %v12744_v0 = vpop.xlane.xlu1 %4826  ;;  %v14768_v25 = vld [vmem:[#allocation163_spill] sm:$0xff]  ;;  %v14770_v13 = vld [vmem:[#allocation124_spill] sm:$0xff]  ;;  %v14771_v46 = vld [vmem:[#allocation145_spill] sm:$0xff] }
 0x3a9   : > { %v7290_v6 = vpop.eup %7289 }
 0x3aa   : > { %v4721_v21 = vmul.f32 %v7290_v6, %v12662_v10  ;;  %v12746_v10 = vpop.xlane.xlu0 %4823  ;;  %v14772_v6 = vld [vmem:[#allocation91_spill] sm:$0xff] }
 0x3ab   : > { %v7292_v15 = vpop.eup %7291 }
 0x3ac   : > { %v4562_v63 = vmul.f32 %v7292_v15, %v12668_v59  ;;  %5072 = vadd.xlane.f32.xlu1 %v12287_v39  ;;  %v14763_v59 = vld [vmem:[#allocation68_spill] sm:$0xff]  ;;  %v12750_v39 = vpop.xlane.xlu1 %4832  ;;  %v14773_v15 = vld [vmem:[#allocation183_spill] sm:$0xff] }
 0x3ad   : > { %v7294_v23 = vpop.eup %7293 }
 0x3ae   : > { %v4722_v29 = vmul.f32 %v7294_v23, %v12681_v47  ;;  %v4960_v4 = vadd.f32 %v4562_v63, %v4561_v45  ;;  %v14766_v47 = vld [vmem:[#allocation79_spill] sm:$0xff]  ;;  %v12754_v20 = vpop.xlane.xlu0 %4829 }
 0x3b0   : > { %4961 = vadd.xlane.f32.xlu0 %v4960_v4  ;;  %5078 = vadd.xlane.f32.xlu1 %v14762_v32  ;;  %v12742_v26 = vadd.f32 %v4722_v29, %v4721_v21  ;;  %v12758_v60 = vpop.xlane.xlu1 %4838  ;;  %v14774_v21 = vld [vmem:[#allocation50_spill] sm:$0xff]  ;;  %v14775_v29 = vld [vmem:[#allocation131_spill] sm:$0xff]  ;;  %v14776_v32 = vld [vmem:[#allocation237_spill] sm:$0xff] }
 0x3b2   : > { %v12760_v49 = vpop.xlane.xlu0 %4835 }
 0x3b4   : > { %5075 = vadd.xlane.f32.xlu0 %v14763_v59  ;;  %5084 = vadd.xlane.f32.xlu1 %v14764_v61  ;;  %v12764_v54 = vpop.xlane.xlu1 %4844 }
 0x3b6   : > { %v12768_v45 = vpop.xlane.xlu0 %4841 }
 0x3b8   : > { %5081 = vadd.xlane.f32.xlu0 %v14765_v44  ;;  %5090 = vadd.xlane.f32.xlu1 %v14766_v47  ;;  %v12772_v63 = vpop.xlane.xlu1 %4850 }
 0x3ba   : > { %v12774_v23 = vpop.xlane.xlu0 %4847 }
 0x3bc   : > { %5087 = vadd.xlane.f32.xlu0 %v14767_v55  ;;  %5096 = vadd.xlane.f32.xlu1 %v14768_v25  ;;  %v12778_v4 = vpop.xlane.xlu1 %4964 }
 0x3be   : > { %v12782_v59 = vpop.xlane.xlu0 %4853 }
 0x3c0   : > { %5093 = vadd.xlane.f32.xlu0 %v14769_v40  ;;  %5102 = vadd.xlane.f32.xlu1 %v14770_v13  ;;  %v12786_v61 = vpop.xlane.xlu1 %4856 }
 0x3c2   : > { %v12788_v44 = vpop.xlane.xlu0 %4967 }
 0x3c4   : > { %5099 = vadd.xlane.f32.xlu0 %v14771_v46  ;;  %5108 = vadd.xlane.f32.xlu1 %v14772_v6  ;;  %v14784_v46 = vld [vmem:[#allocation96_spill] sm:$0xff]  ;;  %v14785_v6 = vld [vmem:[#allocation78_spill] sm:$0xff] }
 0x3c8   : > { %5105 = vadd.xlane.f32.xlu0 %v14773_v15  ;;  %5114 = vadd.xlane.f32.xlu1 %v14774_v21  ;;  %v5207_v15 = vmul.f32 0.00390625, %v14785_v6  ;;  %v5223_v21 = vmul.f32 0.00390625, %v12677_v28  ;;  %v14789_v28 = vld [vmem:[#allocation144_spill] sm:$0xff]  ;;  %v5227_v6 = vmul.f32 0.00390625, %v12702_v30 }
 0x3c9   : > { %v14793_v30 = vld [vmem:[#allocation160_spill] sm:$0xff] }
 0x3cc   : > { %5111 = vadd.xlane.f32.xlu0 %v14775_v29  ;;  %5120 = vadd.xlane.f32.xlu1 %v12400_v58  ;;  %v12792_v58 = vpop.xlane.xlu1 %4970  ;;  %v14786_v29 = vld [vmem:[#allocation164_spill] sm:$0xff] }
 0x3d0   : > { %5117 = vadd.xlane.f32.xlu0 %v14776_v32  ;;  %5126 = vadd.xlane.f32.xlu1 %v12408_v1  ;;  %v12796_v1 = vpop.xlane.xlu0 %4859  ;;  %v5208_v32 = vmul.f32 0.00390625, %v14786_v29  ;;  %v5228_v29 = vmul.f32 0.00390625, %v12698_v53 }
 0x3d4   : > { %5123 = vadd.xlane.f32.xlu0 %v12404_v52  ;;  %5132 = vadd.xlane.f32.xlu1 %v12420_v34  ;;  %v12800_v52 = vpop.xlane.xlu1 %4862  ;;  %v12802_v34 = vpop.xlane.xlu0 %4973 }
 0x3d8   : > { %5129 = vadd.xlane.f32.xlu0 %v12412_v50  ;;  %5138 = vadd.xlane.f32.xlu1 %v12434_v38  ;;  %v12806_v50 = vpop.xlane.xlu1 %4976 }
 0x3dc   : > { %5135 = vadd.xlane.f32.xlu0 %v12424_v7  ;;  %5144 = vadd.xlane.f32.xlu1 %v12443_v62  ;;  %v12810_v7 = vpop.xlane.xlu0 %4865  ;;  %v12814_v38 = vpop.xlane.xlu1 %4868 }
 0x3e0   : > { %5141 = vadd.xlane.f32.xlu0 %v12438_v17  ;;  %5150 = vadd.xlane.f32.xlu1 %v12452_v22  ;;  %v12816_v17 = vpop.xlane.xlu0 %4979  ;;  %v12820_v62 = vpop.xlane.xlu1 %4982  ;;  %v14778_v22 = vld [vmem:[#allocation27_spill] sm:$0xff] }
 0x3e4   : > { %5147 = vadd.xlane.f32.xlu0 %v12447_v9  ;;  %5156 = vadd.xlane.f32.xlu1 %v12470_v12  ;;  %v14777_v9 = vld [vmem:[#allocation55_spill] sm:$0xff]  ;;  %v14779_v12 = vld [vmem:[#allocation28_spill] sm:$0xff] }
 0x3e8   : > { %5153 = vadd.xlane.f32.xlu0 %v12456_v27  ;;  %5162 = vadd.xlane.f32.xlu1 %v12476_v24  ;;  %v12824_v27 = vpop.xlane.xlu0 %4871 }
 0x3ec   : > { %5159 = vadd.xlane.f32.xlu0 %v12474_v2  ;;  %5168 = vadd.xlane.f32.xlu1 %v12484_v19  ;;  %v12828_v2 = vpop.xlane.xlu1 %4874  ;;  %v12830_v24 = vpop.xlane.xlu0 %4985 }
 0x3f0   : > { %5165 = vadd.xlane.f32.xlu0 %v12482_v16  ;;  %5174 = vadd.xlane.f32.xlu1 %v12544_v42  ;;  %v12834_v16 = vpop.xlane.xlu1 %4988  ;;  %v12838_v19 = vpop.xlane.xlu0 %4877 }
 0x3f4   : > { %5171 = vadd.xlane.f32.xlu0 %v14777_v9  ;;  %5180 = vadd.xlane.f32.xlu1 %v14778_v22  ;;  %v12841_v42 = vpop.xlane.xlu0 %4991  ;;  %v12846_v55 = vpop.xlane.xlu1 %4880  ;;  %v14787_v22 = vld [vmem:[#allocation203_spill] sm:$0xff] }
 0x3f8   : > { %5177 = vadd.xlane.f32.xlu0 %v14779_v12  ;;  %5186 = vadd.xlane.f32.xlu1 %v12673_v41  ;;  %v14780_v41 = vld [vmem:[#allocation166_spill] sm:$0xff]  ;;  %v5224_v12 = vmul.f32 0.00390625, %v14787_v22 }
 0x3f9   : > { %v5204_v47 = vmul.f32 0.00390625, %v14780_v41 }
 0x3fc   : > { %5183 = vadd.xlane.f32.xlu0 %v12640_v3  ;;  %5192 = vadd.xlane.f32.xlu1 %v12704_v11  ;;  %v5220_v3 = vmul.f32 0.00390625, %v12624_v35  ;;  %v14781_v11 = vld [vmem:[#allocation95_spill] sm:$0xff]  ;;  %v12855_v35 = vpop.xlane.xlu1 %4994 }
 0x3fd   : > { %v5205_v25 = vmul.f32 0.00390625, %v14781_v11  ;;  %v5225_v11 = vmul.f32 0.00390625, %v12691_v56 }
 0x400   : > { %5189 = vadd.xlane.f32.xlu0 %v12693_v51  ;;  %5198 = vadd.xlane.f32.xlu1 %v12730_v36  ;;  %v12849_v51 = vpop.xlane.xlu0 %4883  ;;  %v14782_v36 = vld [vmem:[#allocation151_spill] sm:$0xff]  ;;  %v12862_v41 = vpop.xlane.xlu1 %4886 }
 0x401   : > { %v5221_v40 = vmul.f32 0.00390625, %v14782_v36  ;;  %v5210_v36 = vmul.f32 0.00390625, %v14789_v28  ;;  %v5230_v28 = vmul.f32 0.00390625, %v12707_v33  ;;  %v14796_v33 = vld [vmem:[#allocation148_spill] sm:$0xff] }
 0x404   : > { %5195 = vadd.xlane.f32.xlu0 %v12717_v8  ;;  %v14783_v8 = vld [vmem:[#allocation188_spill] sm:$0xff]  ;;  %v12859_v9 = vpop.xlane.xlu0 %4997 }
 0x405   : > { %v5206_v13 = vmul.f32 0.00390625, %v14783_v8  ;;  %v5226_v8 = vmul.f32 0.00390625, %v12688_v5  ;;  %v14792_v5 = vld [vmem:[#allocation93_spill] sm:$0xff] }
 0x406   : > { %v5213_v22 = vmul.f32 0.00390625, %v14792_v5 }
 0x408   : > { %5201 = vadd.xlane.f32.xlu0 %v12742_v26  ;;  %v5222_v26 = vmul.f32 0.00390625, %v14784_v46 }
 0x433   : > { %5364 = vxpose.xlu1.b32.start [1/16] (narrow) %v5204_v47, 8  ;;  %v14788_v47 = vld [vmem:[#allocation196_spill] sm:$0xff] }
 0x435   : > { %5396 = vxpose.xlu0.b32.start [1/16] (narrow) %v5220_v3, 8  ;;  %v5209_v3 = vmul.f32 0.00390625, %v14788_v47  ;;  %v5229_v47 = vmul.f32 0.00390625, %v12711_v37  ;;  %v14795_v37 = vld [vmem:[#allocation88_spill] sm:$0xff] }
 0x437   : > { %5365 = vxpose.xlu1.b32.cont [2/16] (narrow) %v5205_v25, 8  ;;  %v12866_v25 = vpop.xlane.xlu0 %4889 }
 0x439   : > { %5397 = vxpose.xlu0.b32.cont [2/16] (narrow) %v5221_v40, 8  ;;  %v12869_v40 = vpop.xlane.xlu1 %5000 }
 0x43b   : > { %5366 = vxpose.xlu1.b32.cont [3/16] (narrow) %v5206_v13, 8  ;;  %v14790_v13 = vld [vmem:[#allocation146_spill] sm:$0xff] }
 0x43c   : > { %v5211_v46 = vmul.f32 0.00390625, %v14790_v13  ;;  %v5231_v13 = vmul.f32 0.00390625, %v12720_v57 }
 0x43d   : > { %5398 = vxpose.xlu0.b32.cont [3/16] (narrow) %v5222_v26, 8  ;;  %v12873_v26 = vpop.xlane.xlu0 %5003  ;;  %v12876_v56 = vpop.xlane.xlu1 %4892 }
 0x43f   : > { %5367 = vxpose.xlu1.b32.cont [4/16] (narrow) %v5207_v15, 8  ;;  %v14791_v15 = vld [vmem:[#allocation138_spill] sm:$0xff] }
 0x441   : > { %5399 = vxpose.xlu0.b32.cont [4/16] (narrow) %v5223_v21, 8  ;;  %v5212_v21 = vmul.f32 0.00390625, %v14791_v15 }
 0x443   : > { %5368 = vxpose.xlu1.b32.cont [5/16] (narrow) %v5208_v32, 8  ;;  %v12880_v32 = vpop.xlane.xlu0 %4895 }
 0x445   : > { %5400 = vxpose.xlu0.b32.cont [5/16] (narrow) %v5224_v12, 8  ;;  %v12883_v12 = vpop.xlane.xlu1 %5006 }
 0x447   : > { %5369 = vxpose.xlu1.b32.cont [6/16] (narrow) %v5209_v3, 8  ;;  %v5214_v3 = vmul.f32 0.00390625, %v14793_v30 }
 0x449   : > { %5401 = vxpose.xlu0.b32.cont [6/16] (narrow) %v5225_v11, 8  ;;  %v12887_v11 = vpop.xlane.xlu0 %5009  ;;  %v12890_v53 = vpop.xlane.xlu1 %4898 }
 0x44b   : > { %5370 = vxpose.xlu1.b32.cont [7/16] (narrow) %v5210_v36, 8  ;;  %v14794_v36 = vld [vmem:[#allocation105_spill] sm:$0xff] }
 0x44d   : > { %5402 = vxpose.xlu0.b32.cont [7/16] (narrow) %v5226_v8, 8  ;;  %v5215_v8 = vmul.f32 0.00390625, %v14794_v36  ;;  %v12897_v15 = vpop.xlane.xlu1 %5012 }
 0x44f   : > { %5371 = vxpose.xlu1.b32.cont [8/16] (narrow) %v5211_v46, 8  ;;  %v12894_v46 = vpop.xlane.xlu0 %4901 }
 0x451   : > { %5403 = vxpose.xlu0.b32.cont [8/16] (narrow) %v5227_v6, 8  ;;  %v5216_v6 = vmul.f32 0.00390625, %v14795_v37  ;;  %v12904_v57 = vpop.xlane.xlu1 %4904 }
 0x453   : > { %5372 = vxpose.xlu1.b32.cont [9/16] (narrow) %v5212_v21, 8  ;;  %v5232_v21 = vmul.f32 0.00390625, %v12715_v43  ;;  %v12901_v5 = vpop.xlane.xlu0 %5015  ;;  %v14798_v43 = vld [vmem:[#allocation54_spill] sm:$0xff] }
 0x454   : > { %v5219_v36 = vmul.f32 0.00390625, %v14798_v43  ;;  %v5241_v43 = vmul.f32 0.00390625, %v12760_v49 }
 0x455   : > { %5404 = vxpose.xlu0.b32.cont [9/16] (narrow) %v5228_v29, 8  ;;  %v5217_v29 = vmul.f32 0.00390625, %v14796_v33  ;;  %v5237_v33 = vmul.f32 0.00390625, %v12746_v10 }
 0x457   : > { %5373 = vxpose.xlu1.b32.cont [10/16] (narrow) %v5213_v22, 8  ;;  %v5233_v22 = vmul.f32 0.00390625, %v12728_v31  ;;  %v5252_v31 = vmul.f32 0.00390625, %v12814_v38 }
 0x459   : > { %5405 = vxpose.xlu0.b32.cont [10/16] (narrow) %v5229_v47, 8  ;;  %v14797_v47 = vld [vmem:[#allocation67_spill] sm:$0xff] }
 0x45a   : > { %v5218_v30 = vmul.f32 0.00390625, %v14797_v47 }
 0x45b   : > { %5374 = vxpose.xlu1.b32.cont [11/16] (narrow) %v5214_v3, 8  ;;  %v5234_v3 = vmul.f32 0.00390625, %v12726_v18 }
 0x45d   : > { %5406 = vxpose.xlu0.b32.cont [11/16] (narrow) %v5230_v28, 8  ;;  %v12908_v28 = vpop.xlane.xlu0 %4907 }
 0x45f   : > { %5375 = vxpose.xlu1.b32.cont [12/16] (narrow) %v5215_v8, 8  ;;  %v12911_v8 = vpop.xlane.xlu1 %5018 }
 0x461   : > { %5407 = vxpose.xlu0.b32.cont [12/16] (narrow) %v5231_v13, 8  ;;  %v5235_v13 = vmul.f32 0.00390625, %v12739_v48  ;;  %v12915_v37 = vpop.xlane.xlu0 %5021  ;;  %v5254_v48 = vmul.f32 0.00390625, %v12828_v2  ;;  %v5240_v2 = vmul.f32 0.00390625, %v12750_v39 }
 0x463   : > { %5376 = vxpose.xlu1.b32.cont [13/16] (narrow) %v5216_v6, 8  ;;  %v5236_v6 = vmul.f32 0.00390625, %v12735_v14  ;;  %v12918_v18 = vpop.xlane.xlu1 %4910  ;;  %v5255_v14 = vmul.f32 0.00390625, %v12838_v19 }
 0x465   : > { %5408 = vxpose.xlu0.b32.cont [13/16] (narrow) %v5232_v21, 8  ;;  %v5253_v21 = vmul.f32 0.00390625, %v12824_v27  ;;  %v5239_v27 = vmul.f32 0.00390625, %v12754_v20  ;;  %v5258_v20 = vmul.f32 0.00390625, %v12862_v41  ;;  %v5244_v41 = vmul.f32 0.00390625, %v12764_v54 }
 0x467   : > { %5377 = vxpose.xlu1.b32.cont [14/16] (narrow) %v5217_v29, 8  ;;  %v12922_v29 = vpop.xlane.xlu0 %4913  ;;  %v12925_v38 = vpop.xlane.xlu1 %5024 }
 0x469   : > { %5409 = vxpose.xlu0.b32.cont [14/16] (narrow) %v5233_v22, 8  ;;  %v5238_v22 = vmul.f32 0.00390625, %v12744_v0  ;;  %v5257_v0 = vmul.f32 0.00390625, %v12849_v51  ;;  %v5243_v51 = vmul.f32 0.00390625, %v12768_v45  ;;  %v5262_v45 = vmul.f32 0.00390625, %v12890_v53 }
 0x46a   : > { %v5248_v53 = vmul.f32 0.00390625, %v12786_v61 }
 0x46b   : > { %5378 = vxpose.xlu1.b32.cont [15/16] (narrow) %v5218_v30, 8  ;;  %v12929_v47 = vpop.xlane.xlu0 %5027  ;;  %v12932_v10 = vpop.xlane.xlu1 %4916  ;;  %v5256_v30 = vmul.f32 0.00390625, %v12846_v55  ;;  %v5242_v55 = vmul.f32 0.00390625, %v12758_v60 }
 0x46d   : > { %5410 = vxpose.xlu0.b32.cont [15/16] (narrow) %v5234_v3, 8 }
 0x46f   : > { %5379 = vxpose.xlu1.b32.end [16/16] (narrow) %v5219_v36, 8  ;;  %v12936_v3 = vpop.xlane.xlu0 %4919  ;;  %v12939_v19 = vpop.xlane.xlu1 %5030 }
 0x471   : > { %5411 = vxpose.xlu0.b32.end [16/16] (narrow) %v5235_v13, 8  ;;  %v5259_v13 = vmul.f32 0.00390625, %v12866_v25  ;;  %v5245_v25 = vmul.f32 0.00390625, %v12774_v23 }
 0x473   : > { %5460 = vxpose.xlu1.b32.start [1/16] (narrow) %v5252_v31, 8  ;;  %v12943_v36 = vpop.xlane.xlu0 %5033  ;;  %v4923_v39 = vpop.xlane.xlu1 %4922 }
 0x475   : > { %5428 = vxpose.xlu0.b32.start [1/16] (narrow) %v5236_v6, 8  ;;  %v5260_v6 = vmul.f32 0.00390625, %v12876_v56  ;;  %v5246_v56 = vmul.f32 0.00390625, %v12772_v63  ;;  %v5265_v63 = vmul.f32 0.00390625, %v12908_v28  ;;  %v5251_v28 = vmul.f32 0.00390625, %v12810_v7 }
 0x477   : > { %5461 = vxpose.xlu1.b32.cont [2/16] (narrow) %v5253_v21, 8  ;;  %v4926_v31 = vpop.xlane.xlu0 %4925  ;;  %v12949_v49 = vpop.xlane.xlu1 %5036  ;;  %v5261_v21 = vmul.f32 0.00390625, %v12880_v32  ;;  %v5247_v32 = vmul.f32 0.00390625, %v12782_v59 }
 0x479   : > { %5429 = vxpose.xlu0.b32.cont [2/16] (narrow) %v5237_v33, 8 }
 0x47b   : > { %5462 = vxpose.xlu1.b32.cont [3/16] (narrow) %v5254_v48, 8  ;;  %v12953_v60 = vpop.xlane.xlu0 %5039  ;;  %v4929_v33 = vpop.xlane.xlu1 %4928 }
 0x47d   : > { %5430 = vxpose.xlu0.b32.cont [3/16] (narrow) %v5238_v22, 8  ;;  %v5263_v22 = vmul.f32 0.00390625, %v12894_v46  ;;  %v5249_v46 = vmul.f32 0.00390625, %v12796_v1  ;;  %v5284_v1 = vmul.f32 0.00390625, %v12778_v4 }
 0x47f   : > { %5463 = vxpose.xlu1.b32.cont [4/16] (narrow) %v5255_v14, 8  ;;  %v4932_v48 = vpop.xlane.xlu0 %4931  ;;  %v12959_v54 = vpop.xlane.xlu1 %5042  ;;  %v5264_v14 = vmul.f32 0.00390625, %v12904_v57  ;;  %v5250_v57 = vmul.f32 0.00390625, %v12800_v52 }
 0x481   : > { %5431 = vxpose.xlu0.b32.cont [4/16] (narrow) %v5239_v27, 8 }
 0x483   : > { %5464 = vxpose.xlu1.b32.cont [5/16] (narrow) %v5256_v30, 8  ;;  %v12963_v23 = vpop.xlane.xlu0 %5045  ;;  %v4935_v27 = vpop.xlane.xlu1 %4934 }
 0x485   : > { %5432 = vxpose.xlu0.b32.cont [5/16] (narrow) %v5240_v2, 8  ;;  %v5266_v2 = vmul.f32 0.00390625, %v12918_v18  ;;  %v5268_v18 = vmul.f32 0.00390625, %v12932_v10  ;;  %v5287_v10 = vmul.f32 0.00390625, %v12802_v34  ;;  %v5274_v34 = vmul.f32 0.00390625, %v4935_v27 }
 0x487   : > { %5465 = vxpose.xlu1.b32.cont [6/16] (narrow) %v5257_v0, 8  ;;  %v4938_v30 = vpop.xlane.xlu0 %4937  ;;  %v12969_v59 = vpop.xlane.xlu1 %5048  ;;  %v5267_v0 = vmul.f32 0.00390625, %v12922_v29  ;;  %v5269_v29 = vmul.f32 0.00390625, %v12936_v3  ;;  %v5272_v3 = vmul.f32 0.00390625, %v4929_v33  ;;  %v5292_v33 = vmul.f32 0.00390625, %v12834_v16 }
 0x489   : > { %5433 = vxpose.xlu0.b32.cont [6/16] (narrow) %v5241_v43, 8 }
 0x48b   : > { %5466 = vxpose.xlu1.b32.cont [7/16] (narrow) %v5258_v20, 8  ;;  %v12973_v61 = vpop.xlane.xlu0 %5051  ;;  %v4941_v43 = vpop.xlane.xlu1 %4940 }
 0x48d   : > { %5434 = vxpose.xlu0.b32.cont [7/16] (narrow) %v5242_v55, 8  ;;  %v5285_v55 = vmul.f32 0.00390625, %v12788_v44 }
 0x48f   : > { %5467 = vxpose.xlu1.b32.cont [8/16] (narrow) %v5259_v13, 8  ;;  %v4944_v20 = vpop.xlane.xlu0 %4943  ;;  %v12979_v52 = vpop.xlane.xlu1 %5054  ;;  %v5286_v13 = vmul.f32 0.00390625, %v12792_v58  ;;  %v5289_v58 = vmul.f32 0.00390625, %v12816_v17 }
 0x491   : > { %5435 = vxpose.xlu0.b32.cont [8/16] (narrow) %v5243_v51, 8  ;;  %v5270_v51 = vmul.f32 0.00390625, %v4923_v39 }
 0x493   : > { %5468 = vxpose.xlu1.b32.cont [9/16] (narrow) %v5260_v6, 8  ;;  %v12983_v7 = vpop.xlane.xlu0 %5057  ;;  %v4947_v4 = vpop.xlane.xlu1 %4946  ;;  %v5271_v6 = vmul.f32 0.00390625, %v4926_v31 }
 0x495   : > { %5436 = vxpose.xlu0.b32.cont [9/16] (narrow) %v5244_v41, 8  ;;  %v5288_v41 = vmul.f32 0.00390625, %v12806_v50 }
 0x497   : > { %5469 = vxpose.xlu1.b32.cont [10/16] (narrow) %v5261_v21, 8  ;;  %v4950_v44 = vpop.xlane.xlu0 %4949  ;;  %v5061_v21 = vpop.xlane.xlu1 %5060 }
 0x499   : > { %5437 = vxpose.xlu0.b32.cont [10/16] (narrow) %v5245_v25, 8 }
 0x49b   : > { %5470 = vxpose.xlu1.b32.cont [11/16] (narrow) %v5262_v45, 8  ;;  %v5064_v25 = vpop.xlane.xlu0 %5063  ;;  %v5273_v45 = vmul.f32 0.00390625, %v4932_v48  ;;  %v4953_v39 = vpop.xlane.xlu1 %4952 }
 0x49d   : > { %5438 = vxpose.xlu0.b32.cont [11/16] (narrow) %v5246_v56, 8  ;;  %v5290_v56 = vmul.f32 0.00390625, %v12820_v62  ;;  %v5277_v62 = vmul.f32 0.00390625, %v4944_v20 }
 0x49f   : > { %5471 = vxpose.xlu1.b32.cont [12/16] (narrow) %v5263_v22, 8  ;;  %v4956_v31 = vpop.xlane.xlu0 %4955  ;;  %v5291_v22 = vmul.f32 0.00390625, %v12830_v24  ;;  %v5067_v50 = vpop.xlane.xlu1 %5066 }
 0x4a1   : > { %5439 = vxpose.xlu0.b32.cont [12/16] (narrow) %v5247_v32, 8  ;;  %v5275_v32 = vmul.f32 0.00390625, %v4938_v30  ;;  %v5295_v30 = vmul.f32 0.00390625, %v12859_v9 }
 0x4a3   : > { %5472 = vxpose.xlu1.b32.cont [13/16] (narrow) %v5264_v14, 8  ;;  %v5070_v17 = vpop.xlane.xlu0 %5069  ;;  %v5276_v14 = vmul.f32 0.00390625, %v4941_v43  ;;  %v4959_v48 = vpop.xlane.xlu1 %4958  ;;  %v5297_v43 = vmul.f32 0.00390625, %v12873_v26 }
 0x4a4   : > { %v5282_v20 = vmul.f32 0.00390625, %v4959_v48 }
 0x4a5   : > { %5440 = vxpose.xlu0.b32.cont [13/16] (narrow) %v5248_v53, 8  ;;  %v5293_v53 = vmul.f32 0.00390625, %v12841_v42  ;;  %v5280_v42 = vmul.f32 0.00390625, %v4953_v39 }
 0x4a7   : > { %5473 = vxpose.xlu1.b32.cont [14/16] (narrow) %v5265_v63, 8  ;;  %v4962_v27 = vpop.xlane.xlu0 %4961  ;;  %v5294_v63 = vmul.f32 0.00390625, %v12855_v35  ;;  %v5073_v24 = vpop.xlane.xlu1 %5072 }
 0x4a9   : > { %5441 = vxpose.xlu0.b32.cont [14/16] (narrow) %v5249_v46, 8  ;;  %v5278_v46 = vmul.f32 0.00390625, %v4947_v4  ;;  %v5300_v4 = vmul.f32 0.00390625, %v12897_v15  ;;  %v5303_v15 = vmul.f32 0.00390625, %v12915_v37 }
 0x4ab   : > { %5474 = vxpose.xlu1.b32.cont [15/16] (narrow) %v5266_v2, 8  ;;  %v5076_v16 = vpop.xlane.xlu0 %5075  ;;  %v5279_v2 = vmul.f32 0.00390625, %v4950_v44 }
 0x4ad   : > { %5442 = vxpose.xlu0.b32.cont [15/16] (narrow) %v5250_v57, 8  ;;  %v5079_v57 = vpop.xlane.xlu1 %5078 }
 0x4af   : > { %5475 = vxpose.xlu1.b32.end [16/16] (narrow) %v5267_v0, 8  ;;  %v5296_v0 = vmul.f32 0.00390625, %v12869_v40  ;;  %v5283_v40 = vmul.f32 0.00390625, %v4962_v27  ;;  %v5310_v27 = vmul.f32 0.00390625, %v12959_v54 }
 0x4b1   : > { %5443 = vxpose.xlu0.b32.end [16/16] (narrow) %v5251_v28, 8  ;;  %v5082_v28 = vpop.xlane.xlu0 %5081  ;;  %v5085_v35 = vpop.xlane.xlu1 %5084 }
 0x4b3   : > { %5524 = vxpose.xlu1.b32.start [1/16] (narrow) %v5284_v1, 8  ;;  %v5281_v1 = vmul.f32 0.00390625, %v4956_v31  ;;  %v5322_v31 = vmul.f32 0.00390625, %v5079_v57  ;;  %v5313_v57 = vmul.f32 0.00390625, %v12973_v61 }
 0x4b5   : > { %5492 = vxpose.xlu0.b32.start [1/16] (narrow) %v5268_v18, 8  ;;  %v5298_v18 = vmul.f32 0.00390625, %v12883_v12  ;;  %v5088_v9 = vpop.xlane.xlu0 %5087 }
 0x4b6   : > { %v5325_v48 = vmul.f32 0.00390625, %v5088_v9 }
 0x4b7   : > { %5525 = vxpose.xlu1.b32.cont [2/16] (narrow) %v5285_v55, 8  ;;  %v5091_v55 = vpop.xlane.xlu1 %5090 }
 0x4b9   : > { %5493 = vxpose.xlu0.b32.cont [2/16] (narrow) %v5269_v29, 8  ;;  %v5299_v29 = vmul.f32 0.00390625, %v12887_v11  ;;  %v5302_v11 = vmul.f32 0.00390625, %v12911_v8  ;;  %v5321_v8 = vmul.f32 0.00390625, %v5076_v16  ;;  %v5312_v16 = vmul.f32 0.00390625, %v12969_v59 }
 0x4bb   : > { %5526 = vxpose.xlu1.b32.cont [3/16] (narrow) %v5286_v13, 8  ;;  %v5094_v13 = vpop.xlane.xlu0 %5093  ;;  %v5097_v26 = vpop.xlane.xlu1 %5096 }
 0x4bd   : > { %5494 = vxpose.xlu0.b32.cont [3/16] (narrow) %v5270_v51, 8  ;;  %v5316_v51 = vmul.f32 0.00390625, %v5061_v21  ;;  %v5319_v21 = vmul.f32 0.00390625, %v5070_v17  ;;  %v5308_v17 = vmul.f32 0.00390625, %v12949_v49  ;;  %v5327_v49 = vmul.f32 0.00390625, %v5094_v13 }
 0x4bf   : > { %5527 = vxpose.xlu1.b32.cont [4/16] (narrow) %v5287_v10, 8  ;;  %v5317_v10 = vmul.f32 0.00390625, %v5064_v25  ;;  %v5100_v12 = vpop.xlane.xlu0 %5099  ;;  %v13000_v44 = vpop.xlane.xlu1 %5102  ;;  %v5320_v25 = vmul.f32 0.00390625, %v5073_v24  ;;  %v5311_v24 = vmul.f32 0.00390625, %v12963_v23 }
 0x4c0   : > { %v5330_v23 = vmul.f32 0.00390625, %v13000_v44 }
 0x4c1   : > { %5495 = vxpose.xlu0.b32.cont [4/16] (narrow) %v5271_v6, 8  ;;  %v5301_v6 = vmul.f32 0.00390625, %v12901_v5 }
 0x4c3   : > { %5528 = vxpose.xlu1.b32.cont [5/16] (narrow) %v5288_v41, 8  ;;  %v5318_v41 = vmul.f32 0.00390625, %v5067_v50  ;;  %v5323_v50 = vmul.f32 0.00390625, %v5082_v28 }
 0x4c5   : > { %5496 = vxpose.xlu0.b32.cont [5/16] (narrow) %v5272_v3, 8  ;;  %v13003_v3 = vpop.xlane.xlu0 %5105 }
 0x4c6   : > { %v5331_v59 = vmul.f32 0.00390625, %v13003_v3 }
 0x4c7   : > { %5529 = vxpose.xlu1.b32.cont [6/16] (narrow) %v5289_v58, 8  ;;  %v13005_v58 = vpop.xlane.xlu1 %5108 }
 0x4c9   : > { %5497 = vxpose.xlu0.b32.cont [6/16] (narrow) %v5273_v45, 8  ;;  %v13008_v5 = vpop.xlane.xlu0 %5111  ;;  %v5304_v45 = vmul.f32 0.00390625, %v12925_v38 }
 0x4cb   : > { %5530 = vxpose.xlu1.b32.cont [7/16] (narrow) %v5290_v56, 8  ;;  %v13011_v39 = vpop.xlane.xlu1 %5114  ;;  %v5305_v56 = vmul.f32 0.00390625, %v12929_v47  ;;  %v5324_v47 = vmul.f32 0.00390625, %v5085_v35  ;;  %v5315_v35 = vmul.f32 0.00390625, %v12983_v7 }
 0x4cd   : > { %5498 = vxpose.xlu0.b32.cont [7/16] (narrow) %v5274_v34, 8  ;;  %v13014_v34 = vpop.xlane.xlu0 %5117 }
 0x4cf   : > { %5531 = vxpose.xlu1.b32.cont [8/16] (narrow) %v5291_v22, 8  ;;  %v13016_v37 = vpop.xlane.xlu1 %5120  ;;  %v5306_v22 = vmul.f32 0.00390625, %v12939_v19 }
 0x4d1   : > { %5499 = vxpose.xlu0.b32.cont [8/16] (narrow) %v5275_v32, 8  ;;  %v13019_v38 = vpop.xlane.xlu0 %5123  ;;  %v5307_v32 = vmul.f32 0.00390625, %v12943_v36 }
 0x4d2   : > { %v5337_v44 = vmul.f32 0.00390625, %v13019_v38 }
 0x4d3   : > { %5532 = vxpose.xlu1.b32.cont [9/16] (narrow) %v5292_v33, 8  ;;  %v13022_v33 = vpop.xlane.xlu1 %5126 }
 0x4d4   : > { %v5338_v3 = vmul.f32 0.00390625, %v13022_v33 }
 0x4d5   : > { %5500 = vxpose.xlu0.b32.cont [9/16] (narrow) %v5276_v14, 8  ;;  %v13025_v14 = vpop.xlane.xlu0 %5129 }
 0x4d7   : > { %5533 = vxpose.xlu1.b32.cont [10/16] (narrow) %v5293_v53, 8  ;;  %v13027_v19 = vpop.xlane.xlu1 %5132  ;;  %v5309_v53 = vmul.f32 0.00390625, %v12953_v60 }
 0x4d9   : > { %5501 = vxpose.xlu0.b32.cont [10/16] (narrow) %v5277_v62, 8  ;;  %v5326_v62 = vmul.f32 0.00390625, %v5091_v55  ;;  %v13030_v36 = vpop.xlane.xlu0 %5135 }
 0x4db   : > { %5534 = vxpose.xlu1.b32.cont [11/16] (narrow) %v5294_v63, 8  ;;  %v13033_v63 = vpop.xlane.xlu1 %5138 }
 0x4dd   : > { %5502 = vxpose.xlu0.b32.cont [11/16] (narrow) %v5278_v46, 8  ;;  %v13036_v46 = vpop.xlane.xlu0 %5141 }
 0x4de   : > { %v5343_v33 = vmul.f32 0.00390625, %v13036_v46 }
 0x4df   : > { %5535 = vxpose.xlu1.b32.cont [12/16] (narrow) %v5295_v30, 8  ;;  %v5328_v30 = vmul.f32 0.00390625, %v5097_v26  ;;  %v13038_v60 = vpop.xlane.xlu1 %5144 }
 0x4e1   : > { %5503 = vxpose.xlu0.b32.cont [12/16] (narrow) %v5279_v2, 8  ;;  %v5329_v2 = vmul.f32 0.00390625, %v5100_v12  ;;  %v13041_v54 = vpop.xlane.xlu0 %5147 }
 0x4e3   : > { %5536 = vxpose.xlu1.b32.cont [13/16] (narrow) %v5296_v0, 8  ;;  %v13044_v0 = vpop.xlane.xlu1 %5150 }
 0x4e5   : > { %5504 = vxpose.xlu0.b32.cont [13/16] (narrow) %v5280_v42, 8  ;;  %v5314_v42 = vmul.f32 0.00390625, %v12979_v52  ;;  %v13048_v28 = vpop.xlane.xlu0 %5153  ;;  %v5333_v52 = vmul.f32 0.00390625, %v13008_v5 }
 0x4e7   : > { %5537 = vxpose.xlu1.b32.cont [14/16] (narrow) %v5297_v43, 8  ;;  %v5157_v43 = vpop.xlane.xlu1 %5156 }
 0x4e9   : > { %5505 = vxpose.xlu0.b32.cont [14/16] (narrow) %v5281_v1, 8  ;;  %v5348_v1 = vmul.f32 0.00390625, %v5157_v43  ;;  %v5160_v61 = vpop.xlane.xlu0 %5159  ;;  %v5347_v43 = vmul.f32 0.00390625, %v13048_v28 }
 0x4ea   : > { %v5349_v9 = vmul.f32 0.00390625, %v5160_v61 }
 0x4eb   : > { %5538 = vxpose.xlu1.b32.cont [15/16] (narrow) %v5298_v18, 8  ;;  %v5332_v18 = vmul.f32 0.00390625, %v13005_v58 }
 0x4ed   : > { %5506 = vxpose.xlu0.b32.cont [15/16] (narrow) %v5282_v20, 8  ;;  %v5163_v20 = vpop.xlane.xlu1 %5162 }
 0x4ee   : > { %v5350_v55 = vmul.f32 0.00390625, %v5163_v20 }
 0x4ef   : > { %5539 = vxpose.xlu1.b32.end [16/16] (narrow) %v5299_v29, 8  ;;  %v5166_v29 = vpop.xlane.xlu0 %5165 }
 0x4f0   : > { %v5351_v7 = vmul.f32 0.00390625, %v5166_v29 }
 0x4f1   : > { %5507 = vxpose.xlu0.b32.end [16/16] (narrow) %v5283_v40, 8  ;;  %v5334_v40 = vmul.f32 0.00390625, %v13011_v39  ;;  %v5169_v13 = vpop.xlane.xlu1 %5168  ;;  %v5340_v39 = vmul.f32 0.00390625, %v13027_v19 }
 0x4f2   : > { %v5352_v26 = vmul.f32 0.00390625, %v5169_v13 }
 0x4f3   : > { %5588 = vxpose.xlu1.b32.start [1/16] (narrow) %v5316_v51, 8  ;;  %v5335_v51 = vmul.f32 0.00390625, %v13014_v34  ;;  %v5341_v34 = vmul.f32 0.00390625, %v13030_v36 }
 0x4f5   : > { %5556 = vxpose.xlu0.b32.start [1/16] (narrow) %v5300_v4, 8  ;;  %v5172_v4 = vpop.xlane.xlu0 %5171 }
 0x4f6   : > { %v5353_v12 = vmul.f32 0.00390625, %v5172_v4 }
 0x4f7   : > { %5589 = vxpose.xlu1.b32.cont [2/16] (narrow) %v5317_v10, 8  ;;  %v5336_v10 = vmul.f32 0.00390625, %v13016_v37 }
 0x4f9   : > { %5557 = vxpose.xlu0.b32.cont [2/16] (narrow) %v5301_v6, 8  ;;  %v5175_v6 = vpop.xlane.xlu1 %5174 }
 0x4fb   : > { %5590 = vxpose.xlu1.b32.cont [3/16] (narrow) %v5318_v41, 8  ;;  %v5178_v41 = vpop.xlane.xlu0 %5177 }
 0x4fc   : > { %v5355_v58 = vmul.f32 0.00390625, %v5178_v41 }
 0x4fd   : > { %5558 = vxpose.xlu0.b32.cont [3/16] (narrow) %v5302_v11, 8  ;;  %v5354_v11 = vmul.f32 0.00390625, %v5175_v6 }
 0x4ff   : > { %5591 = vxpose.xlu1.b32.cont [4/16] (narrow) %v5319_v21, 8  ;;  %v5181_v21 = vpop.xlane.xlu1 %5180 }
 0x500   : > { %v5356_v5 = vmul.f32 0.00390625, %v5181_v21 }
 0x501   : > { %5559 = vxpose.xlu0.b32.cont [4/16] (narrow) %v5303_v15, 8  ;;  %v5184_v15 = vpop.xlane.xlu0 %5183 }
 0x503   : > { %5592 = vxpose.xlu1.b32.cont [5/16] (narrow) %v5320_v25, 8  ;;  %v5339_v25 = vmul.f32 0.00390625, %v13025_v14 }
 0x505   : > { %5560 = vxpose.xlu0.b32.cont [5/16] (narrow) %v5304_v45, 8  ;;  %v5187_v45 = vpop.xlane.xlu1 %5186 }
 0x506   : > { %v5358_v37 = vmul.f32 0.00390625, %v5187_v45 }
 0x507   : > { %5593 = vxpose.xlu1.b32.cont [6/16] (narrow) %v5321_v8, 8  ;;  %v5190_v8 = vpop.xlane.xlu0 %5189 }
 0x508   : > { %v5359_v38 = vmul.f32 0.00390625, %v5190_v8 }
 0x509   : > { %5561 = vxpose.xlu0.b32.cont [6/16] (narrow) %v5305_v56, 8  ;;  %v5357_v56 = vmul.f32 0.00390625, %v5184_v15 }
 0x50b   : > { %5594 = vxpose.xlu1.b32.cont [7/16] (narrow) %v5322_v31, 8  ;;  %v5193_v31 = vpop.xlane.xlu1 %5192 }
 0x50d   : > { %5562 = vxpose.xlu0.b32.cont [7/16] (narrow) %v5306_v22, 8  ;;  %v5196_v22 = vpop.xlane.xlu0 %5195 }
 0x50f   : > { %5595 = vxpose.xlu1.b32.cont [8/16] (narrow) %v5323_v50, 8  ;;  %v5342_v50 = vmul.f32 0.00390625, %v13033_v63  ;;  %v5345_v63 = vmul.f32 0.00390625, %v13041_v54 }
 0x511   : > { %5563 = vxpose.xlu0.b32.cont [8/16] (narrow) %v5307_v32, 8  ;;  %v5199_v32 = vpop.xlane.xlu1 %5198 }
 0x513   : > { %5596 = vxpose.xlu1.b32.cont [9/16] (narrow) %v5324_v47, 8  ;;  %v5202_v47 = vpop.xlane.xlu0 %5201 }
 0x515   : > { %5564 = vxpose.xlu0.b32.cont [9/16] (narrow) %v5308_v17, 8  ;;  %v5360_v17 = vmul.f32 0.00390625, %v5193_v31  ;;  %v5380_v14 = vpop.trf.xlu1 }
 0x517   : > { %5597 = vxpose.xlu1.b32.cont [10/16] (narrow) %v5325_v48, 8  ;;  %v5344_v48 = vmul.f32 0.00390625, %v13038_v60  ;;  %v5412_v19 = vpop.trf.xlu0  ;;  %v5363_v60 = vmul.f32 0.00390625, %v5202_v47 }
 0x519   : > { %5565 = vxpose.xlu0.b32.cont [10/16] (narrow) %v5309_v53, 8  ;;  %v5361_v53 = vmul.f32 0.00390625, %v5196_v22 }
 0x51b   : > { %5598 = vxpose.xlu1.b32.cont [11/16] (narrow) %v5326_v62, 8  ;;  %v7305_v62 = vmov 1966171168   ;;  %v5444_v46 = vpop.trf.xlu0 }
 0x51c   : > { %v5699_v36 = vunpack.c.l.s4 %v7305_v62 }
 0x51d   : > { %5566 = vxpose.xlu0.b32.cont [11/16] (narrow) %v5310_v27, 8  ;;  %v5701_v27 = vlaneseq }
 0x51f   : > { %5599 = vxpose.xlu1.b32.cont [12/16] (narrow) %v5327_v49, 8  ;;  %v5476_v49 = vpop.trf.xlu1  ;;  %vm5763_vm1 = vcmp.lt.s32.totalorder %v5701_v27, 256 }
 0x521   : > { %5567 = vxpose.xlu0.b32.cont [12/16] (narrow) %v5311_v24, 8  ;;  %v5362_v24 = vmul.f32 0.00390625, %v5199_v32 }
 0x523   : > { %5600 = vxpose.xlu1.b32.cont [13/16] (narrow) %v5328_v30, 8  ;;  %v5700_v30 = vunpack.c.0.s8 %v5699_v36 }
 0x525   : > { %5568 = vxpose.xlu0.b32.cont [13/16] (narrow) %v5312_v16, 8  ;;  %v5702_v16 = vshrl.u32 %v5701_v27, 7 }
 0x527   : > { %5601 = vxpose.xlu1.b32.cont [14/16] (narrow) %v5329_v2, 8  ;;  %v5346_v2 = vmul.f32 0.00390625, %v13044_v0 }
 0x529   : > { %5569 = vxpose.xlu0.b32.cont [14/16] (narrow) %v5313_v57, 8 }
 0x52b   : > { %5602 = vxpose.xlu1.b32.cont [15/16] (narrow) %v5330_v23, 8  ;;  %v5703_v23 = vsub.s32 %v5700_v30, %v5702_v16 }
 0x52d   : > { %5570 = vxpose.xlu0.b32.cont [15/16] (narrow) %v5314_v42, 8  ;;  %v5694_v42 = vcombine.low %v5380_v14, %v5412_v19 }
 0x52f   : > { %5603 = vxpose.xlu1.b32.end [16/16] (narrow) %v5331_v59, 8  ;;  %v5695_v59 = vcombine.low %v5444_v46, %v5476_v49 }
 0x531   : > { %5571 = vxpose.xlu0.b32.end [16/16] (narrow) %v5315_v35, 8  ;;  %v5704_v35 = vrot.slane %v5694_v42, %v5703_v23 }
 0x533   : > { %5652 = vxpose.xlu1.b32.start [1/16] (narrow) %v5348_v1, 8  ;;  %v5540_v57 = vpop.trf.xlu1  ;;  %v5711_v1 = vrot.slane %v5695_v59, %v5703_v23 }
 0x535   : > { %5620 = vxpose.xlu0.b32.start [1/16] (narrow) %v5332_v18, 8  ;;  %v5508_v54 = vpop.trf.xlu0  ;;  %v5726_v20 = vcombine.low %v5704_v35, %v5711_v1 }
 0x536   : > { %v5696_v61 = vcombine.low %v5508_v54, %v5540_v57 }
 0x537   : > { %5653 = vxpose.xlu1.b32.cont [2/16] (narrow) %v5349_v9, 8  ;;  %v5734_v29 = vrot.slane %v5726_v20, %v5703_v23 }
 0x538   : > { %v5718_v0 = vrot.slane %v5696_v61, %v5703_v23 }
 0x539   : > { %5621 = vxpose.xlu0.b32.cont [2/16] (narrow) %v5333_v52, 8 }
 0x53b   : > { %5654 = vxpose.xlu1.b32.cont [3/16] (narrow) %v5350_v55, 8 }
 0x53d   : > { %5622 = vxpose.xlu0.b32.cont [3/16] (narrow) %v5334_v40, 8 }
 0x53f   : > { %5655 = vxpose.xlu1.b32.cont [4/16] (narrow) %v5351_v7, 8 }
 0x541   : > { %5623 = vxpose.xlu0.b32.cont [4/16] (narrow) %v5335_v51, 8 }
 0x543   : > { %5656 = vxpose.xlu1.b32.cont [5/16] (narrow) %v5352_v26, 8 }
 0x545   : > { %5624 = vxpose.xlu0.b32.cont [5/16] (narrow) %v5336_v10, 8 }
 0x547   : > { %5657 = vxpose.xlu1.b32.cont [6/16] (narrow) %v5353_v12, 8 }
 0x549   : > { %5625 = vxpose.xlu0.b32.cont [6/16] (narrow) %v5337_v44, 8 }
 0x54b   : > { %5658 = vxpose.xlu1.b32.cont [7/16] (narrow) %v5354_v11, 8 }
 0x54d   : > { %5626 = vxpose.xlu0.b32.cont [7/16] (narrow) %v5338_v3, 8 }
 0x54f   : > { %5659 = vxpose.xlu1.b32.cont [8/16] (narrow) %v5355_v58, 8 }
 0x551   : > { %5627 = vxpose.xlu0.b32.cont [8/16] (narrow) %v5339_v25, 8 }
 0x553   : > { %5660 = vxpose.xlu1.b32.cont [9/16] (narrow) %v5356_v5, 8 }
 0x555   : > { %5628 = vxpose.xlu0.b32.cont [9/16] (narrow) %v5340_v39, 8 }
 0x557   : > { %5661 = vxpose.xlu1.b32.cont [10/16] (narrow) %v5357_v56, 8 }
 0x559   : > { %5629 = vxpose.xlu0.b32.cont [10/16] (narrow) %v5341_v34, 8 }
 0x55b   : > { %5662 = vxpose.xlu1.b32.cont [11/16] (narrow) %v5358_v37, 8 }
 0x55d   : > { %5630 = vxpose.xlu0.b32.cont [11/16] (narrow) %v5342_v50, 8 }
 0x55f   : > { %5663 = vxpose.xlu1.b32.cont [12/16] (narrow) %v5359_v38, 8 }
 0x561   : > { %5631 = vxpose.xlu0.b32.cont [12/16] (narrow) %v5343_v33, 8 }
 0x563   : > { %5664 = vxpose.xlu1.b32.cont [13/16] (narrow) %v5360_v17, 8 }
 0x565   : > { %5632 = vxpose.xlu0.b32.cont [13/16] (narrow) %v5344_v48, 8 }
 0x567   : > { %5665 = vxpose.xlu1.b32.cont [14/16] (narrow) %v5361_v53, 8 }
 0x569   : > { %5633 = vxpose.xlu0.b32.cont [14/16] (narrow) %v5345_v63, 8 }
 0x56b   : > { %5666 = vxpose.xlu1.b32.cont [15/16] (narrow) %v5362_v24, 8 }
 0x56d   : > { %5634 = vxpose.xlu0.b32.cont [15/16] (narrow) %v5346_v2, 8 }
 0x56f   : > { %5667 = vxpose.xlu1.b32.end [16/16] (narrow) %v5363_v60, 8 }
 0x571   : > { %5635 = vxpose.xlu0.b32.end [16/16] (narrow) %v5347_v43, 8 }
 0x573   : > { %v5604_v18 = vpop.trf.xlu1 }
 0x575   : > { %v5572_v9 = vpop.trf.xlu0 }
 0x576   : > { %v5697_v52 = vcombine.low %v5572_v9, %v5604_v18 }
 0x578   : > { %v5725_v55 = vrot.slane %v5697_v52, %v5703_v23 }
 0x57a   : > { %v5727_v40 = vcombine.low %v5718_v0, %v5725_v55 }
 0x57c   : > { %v5741_v7 = vrot.slane %v5727_v40, %v5703_v23 }
 0x57e   : > { %v5742_v28 = vcombine.low %v5734_v29, %v5741_v7 }
 0x580   : > { %5760 = vst [vmem:[%s168_s9] sm:$0xff] %v5742_v28 }
 0x5b3   : > { %v5668_v13 = vpop.trf.xlu1 }
 0x5b5   : > { %v5636_v51 = vpop.trf.xlu0 }
 0x5b6   : > { %v5743_v26 = vcombine.low %v5636_v51, %v5668_v13 }
 0x5b8   : > { %v5750_v4 = vrot.slane %v5743_v26, %v5703_v23 }
 0x5ba   : > { %v5757_v10 = vrot.slane %v5750_v4, %v5703_v23 }
 0x5bc   : > { %5765 = vst.msk [vmem:[%s168_s9 + $0x8] sm:$0x3] %vm5763_vm1, %v5757_v10 }
 0x5bd PF: > { %s13_s12 = sadd.s32 1, %s7301_s12  }
 0x5be   : > { %p10_p4 = scmp.ge.s32.totalorder %s13_s12, 4  }
 0x5c0   :  { %12 = sbr.rel (!%p10_p4) target bundleno = 1 (0x1), region = 62 }

</bundles_post_ra>
